<compile_context>
chip_gen: v7x
topology: tpu7x:2x2x1
jax: 0.10.0
libtpu: 0.0.40
codegen_flags: <defaults>
</compile_context>

<pallas_src>
import numpy as np
import jax
import jax.numpy as jnp
from jax import lax
from jax.experimental import pallas as pl
from jax.experimental.pallas import tpu as pltpu

KH, KW = 10, 4  # conv kernel size, fixed by the module


# ---------------------------------------------------------------------------
# Kernel: whole network on one batch tile (batch in the lane dimension).
# ---------------------------------------------------------------------------
def _deepcat_kernel(x_ref, a1_ref, b1_ref, a2_ref, b2_ref,
                    fc1w_ref, fc1b_ref, fc2w_ref, fc2b_ref,
                    fc3w_ref, fc3b_ref, out_ref):
    f32 = jnp.float32
    nt_dims = (((1,), (1,)), ((), ()))     # contract last dims: A @ x^T

    # conv1 + ReLU + maxpool(1,2)/s1.  x tile is (TN, F0); the NT contraction
    # reorients on-chip so the result is batch-in-lane (2*F1p, TN).
    c1 = lax.dot_general(a1_ref[...], x_ref[...], nt_dims,
                         preferred_element_type=f32)
    h1 = c1.shape[0] // 2                  # F1p, multiple of 8
    p1 = jnp.maximum(jnp.maximum(c1[:h1], c1[h1:]) + b1_ref[...], 0.0)

    # conv2 + ReLU + maxpool(1,2)/s1 (single concatenated Toeplitz matmul).
    c2 = jnp.dot(a2_ref[...], p1, preferred_element_type=f32)   # (2*F2, TN)
    h2 = c2.shape[0] // 2                  # F2, multiple of 8
    p2 = jnp.maximum(jnp.maximum(c2[:h2], c2[h2:]) + b2_ref[...], 0.0)

    # fc1 + ReLU (dropout = identity in eval mode).
    h_fc1 = jnp.maximum(
        jnp.dot(fc1w_ref[...], p2, preferred_element_type=f32) + fc1b_ref[...],
        0.0)                                                     # (50, TN)
    # fc2 + ReLU (BatchNorm1d(50) folded into fc2 on the host).
    h_fc2 = jnp.maximum(
        jnp.dot(fc2w_ref[...], h_fc1, preferred_element_type=f32)
        + fc2b_ref[...], 0.0)                                    # (10, TN)
    # fc3 + ReLU (BatchNorm1d(10) folded into fc3 on the host).
    z = jnp.maximum(
        jnp.dot(fc3w_ref[...], h_fc2, preferred_element_type=f32)
        + fc3b_ref[...], 0.0)                                    # (2, TN)

    # Softmax over the 2 classes (exact divide; EUP exp, trivial size).
    z0, z1 = z[0:1, :], z[1:2, :]
    m = jnp.maximum(z0, z1)
    e0 = jnp.exp(z0 - m)
    e1 = jnp.exp(z1 - m)
    denom = e0 + e1
    p_cls0 = e0 / denom
    p_cls1 = e1 / denom
    pred = jnp.where(z1 > z0, 1.0, 0.0)    # argmax (ties -> class 0)

    # Packed lane-dense output assembled in one value -> one full-block store.
    tn = z.shape[1]
    rows = lax.broadcasted_iota(jnp.int32, (8, tn), 0)

    def _b(v):
        return jnp.broadcast_to(v, (8, tn))

    packed = jnp.where(rows == 0, _b(z0),
             jnp.where(rows == 1, _b(z1),
             jnp.where(rows == 2, _b(p_cls0),
             jnp.where(rows == 3, _b(p_cls1),
             jnp.where(rows == 4, _b(pred), 0.0)))))
    out_ref[...] = packed


# ---------------------------------------------------------------------------
# Wrapper: batch tiling, lane-dense layout plumbing, unpacking of the output.
# ---------------------------------------------------------------------------
def _pallas_forward(x2, weights, F0, tile_n, nt, Np, single_buffer_weights):
    def w_spec(shape):
        if single_buffer_weights:
            # Grid-invariant weights: constant index map + single VMEM buffer.
            return pl.BlockSpec(shape, lambda i: (0, 0),
                                pipeline_mode=pl.Buffered(buffer_count=1))
        return pl.BlockSpec(shape, lambda i: (0, 0))

    in_specs = [pl.BlockSpec((tile_n, F0), lambda i: (i, 0))]
    in_specs += [w_spec(w.shape) for w in weights]

    return pl.pallas_call(
        _deepcat_kernel,
        grid=(nt,),
        in_specs=in_specs,
        out_specs=pl.BlockSpec((8, tile_n), lambda i: (0, i)),
        out_shape=jax.ShapeDtypeStruct((8, Np), jnp.float32),
        compiler_params=pltpu.CompilerParams(
            dimension_semantics=("parallel",),       # megacore on v7x
            vmem_limit_bytes=48 * 1024 * 1024),      # fits v5e/v6e/v7x budgets
    )(x2, *weights)


def var_merged_v4_forward(x_nchw, kp, tile_n=512):
    """x_nchw: (N, 1, 20, seq_len) float32 - PyTorch NCHW convention."""
    N, C, H, W0 = x_nchw.shape
    F0 = C * H * W0
    nt = pl.cdiv(N, tile_n)
    Np = nt * tile_n

    # Contiguous (N, F0) view - NO host-side transpose; the in-kernel NT
    # contraction does the reorientation on the VMEM tile.
    x2 = x_nchw.reshape(N, F0)
    if Np != N:
        x2 = jnp.pad(x2, ((0, Np - N), (0, 0)))

    weights = (kp["a1"], kp["b1"], kp["a2"], kp["b2"],
               kp["fc1w"], kp["fc1b"], kp["fc2w"], kp["fc2b"],
               kp["fc3w"], kp["fc3b"])

    try:
        out = _pallas_forward(x2, weights, F0, tile_n, nt, Np, True)
    except Exception:
        # pipeline_mode=pl.Buffered(1) unsupported on this jax build; fall back
        # to default double-buffered weight blocks (correctness unaffected).
        out = _pallas_forward(x2, weights, F0, tile_n, nt, Np, False)

    logits = out[0:2, :N].T                               # (N, 2)
    probs = out[2:4, :N].T                                # (N, 2)
    pred = out[4, :N].astype(jnp.int32)                   # (N,)  (torch: int64)
    return logits, pred, probs


# ---------------------------------------------------------------------------
# Parameter setup (host-side glue): conv+pool -> ONE concatenated Toeplitz
# matmul per conv stage, BN folded into the following fc layer.
# ---------------------------------------------------------------------------
def _conv_pool_matrices(w_oihw, b, H_in, W_in):
    """Build (A_cat, bias_col) so that
    relu(max(top_half(A_cat @ x), bottom_half(A_cat @ x)) + bias) equals
    maxpool(1,2)/s1(relu(conv2d_valid(x, w) + b)) on channel-major flattened
    features, output already in NCHW flatten order."""
    w = np.asarray(w_oihw, np.float32)
    b = np.asarray(b, np.float32)
    Cout, Cin, KH_, KW_ = w.shape
    H_out, W_out = H_in - KH_ + 1, W_in - KW_ + 1
    A = np.zeros((Cout, H_out, W_out, Cin, H_in, W_in), np.float32)
    for dh in range(KH_):
        for dw in range(KW_):
            for ho in range(H_out):
                for wo in range(W_out):
                    A[:, ho, wo, :, ho + dh, wo + dw] = w[:, :, dh, dw]
    A = A.reshape(Cout, H_out, W_out, Cin * H_in * W_in)
    A_left = A[:, :, :-1, :].reshape(-1, Cin * H_in * W_in)
    A_right = A[:, :, 1:, :].reshape(-1, Cin * H_in * W_in)
    A_cat = np.concatenate([A_left, A_right], axis=0)      # (2*F_out, F_in)
    bias = np.repeat(b, H_out * (W_out - 1)).reshape(-1, 1)
    return A_cat, bias


def make_params(seq_len, key):
    """Deterministic synthetic init (PyTorch-style uniform(-1/sqrt(fan_in)))."""
    W3 = seq_len - 8
    flat = 16 * 2 * W3
    ks = jax.random.split(key, 14)

    def uni(k, shape, fan_in):
        bnd = 1.0 / np.sqrt(fan_in)
        return jax.random.uniform(k, shape, jnp.float32, -bnd, bnd)

    w1_oihw = uni(ks[0], (8, 1, KH, KW), 1 * KH * KW)
    b1 = uni(ks[1], (8,), 1 * KH * KW)
    w2_oihw = uni(ks[2], (16, 8, KH, KW), 8 * KH * KW)
    b2 = uni(ks[3], (16,), 8 * KH * KW)
    fc1_w = uni(ks[4], (50, flat), flat)
    fc1_b = uni(ks[5], (50,), flat)
    fc2_w = uni(ks[6], (10, 50), 50)
    fc2_b = uni(ks[7], (10,), 50)
    fc3_w = uni(ks[8], (2, 10), 10)
    fc3_b = uni(ks[9], (2,), 10)

    bn1_g = 1.0 + 0.1 * jax.random.normal(ks[10], (50,), jnp.float32)
    bn1_b = 0.1 * jax.random.normal(ks[11], (50,), jnp.float32)
    bn2_g = 1.0 + 0.1 * jax.random.normal(ks[12], (10,), jnp.float32)
    bn2_b = 0.1 * jax.random.normal(ks[13], (10,), jnp.float32)
    eps = 1e-5
    bn1_mean, bn1_var = jnp.zeros((50,)), jnp.ones((50,))   # fresh running stats
    bn2_mean, bn2_var = jnp.zeros((10,)), jnp.ones((10,))
    bn1_scale = bn1_g / jnp.sqrt(bn1_var + eps)
    bn1_shift = bn1_b - bn1_mean * bn1_scale
    bn2_scale = bn2_g / jnp.sqrt(bn2_var + eps)
    bn2_shift = bn2_b - bn2_mean * bn2_scale

    torch_p = dict(w1=w1_oihw, b1=b1, w2=w2_oihw, b2=b2,
                   fc1_w=fc1_w, fc1_b=fc1_b, fc2_w=fc2_w, fc2_b=fc2_b,
                   fc3_w=fc3_w, fc3_b=fc3_b,
                   bn1_scale=bn1_scale, bn1_shift=bn1_shift,
                   bn2_scale=bn2_scale, bn2_shift=bn2_shift)

    # conv+pool as a single concatenated Toeplitz matmul per stage.
    H1, W1p = 20 - KH + 1, (seq_len - KW + 1) - 1   # conv1 out H / pooled width
    a1, b1col = _conv_pool_matrices(w1_oihw, b1, 20, seq_len)
    a2, b2col = _conv_pool_matrices(w2_oihw, b2, H1, W1p)

    # Fold BN1 into fc2 and BN2 into fc3 (inference-mode affine).
    fc2w_f = fc2_w * bn1_scale[None, :]
    fc2b_f = fc2_b + fc2_w @ bn1_shift
    fc3w_f = fc3_w * bn2_scale[None, :]
    fc3b_f = fc3_b + fc3_w @ bn2_shift

    kernel_p = dict(
        a1=jnp.asarray(a1), b1=jnp.asarray(b1col),
        a2=jnp.asarray(a2), b2=jnp.asarray(b2col),
        fc1w=fc1_w, fc1b=fc1_b.reshape(-1, 1),
        fc2w=fc2w_f, fc2b=fc2b_f.reshape(-1, 1),
        fc3w=fc3w_f, fc3b=fc3b_f.reshape(-1, 1),
    )
    return torch_p, kernel_p


# ---------------------------------------------------------------------------
# Pure-JAX reference mirroring the PyTorch forward (eval mode, BN explicit).
# ---------------------------------------------------------------------------
def reference_forward(x_nchw, p):
    dn = ('NCHW', 'OIHW', 'NCHW')
    hp = lax.Precision.HIGHEST
    r1 = jax.nn.relu(lax.conv_general_dilated(x_nchw, p["w1"], (1, 1), 'VALID',
                                              dimension_numbers=dn, precision=hp)
                     + p["b1"][None, :, None, None])
    p1 = jnp.maximum(r1[..., :-1], r1[..., 1:])
    r2 = jax.nn.relu(lax.conv_general_dilated(p1, p["w2"], (1, 1), 'VALID',
                                              dimension_numbers=dn, precision=hp)
                     + p["b2"][None, :, None, None])
    p2 = jnp.maximum(r2[..., :-1], r2[..., 1:])
    flat = p2.reshape(p2.shape[0], -1)
    a1 = jax.nn.relu(jnp.dot(flat, p["fc1_w"].T, precision=hp) + p["fc1_b"])
    y1 = a1 * p["bn1_scale"] + p["bn1_shift"]
    a2 = jax.nn.relu(jnp.dot(y1, p["fc2_w"].T, precision=hp) + p["fc2_b"])
    y2 = a2 * p["bn2_scale"] + p["bn2_shift"]
    logits = jax.nn.relu(jnp.dot(y2, p["fc3_w"].T, precision=hp) + p["fc3_b"])
    pred = jnp.argmax(logits, axis=1)
    probs = jax.nn.softmax(logits, axis=1)
    return logits, pred, probs


if __name__ == "__main__":
    seq_len = 12          # L in {12, ..., 16}
    N = 300               # not a tile multiple -> exercises padding; nt = 2
    key = jax.random.PRNGKey(0)
    kx, kparam = jax.random.split(key)
    x = jax.random.normal(kx, (N, 1, 20, seq_len), jnp.float32)

    torch_p, kern_p = make_params(seq_len, kparam)

    logits, pred, probs = var_merged_v4_forward(x, kern_p, tile_n=256)
    jax.block_until_ready((logits, pred, probs))

    ref_logits, ref_pred, ref_probs = reference_forward(x, torch_p)
    np.testing.assert_allclose(np.asarray(logits), np.asarray(ref_logits),
                               rtol=1e-3, atol=1e-4)
    np.testing.assert_allclose(np.asarray(probs), np.asarray(ref_probs),
                               rtol=1e-3, atol=1e-4)
    margin = np.abs(np.asarray(ref_logits)[:, 1] - np.asarray(ref_logits)[:, 0])
    sel = margin > 1e-4
    assert np.array_equal(np.asarray(pred)[sel], np.asarray(ref_pred)[sel])

    print("KERNEL_OK")
</pallas_src>

<mosaic_0001>
module attributes {stable_mosaic.version = 11 : i64} {
  func.func @_deepcat_kernel(%arg0: i32, %arg1: memref<256x240xf32, #tpu.memory_space<vmem>>, %arg2: memref<1408x240xf32, #tpu.memory_space<vmem>>, %arg3: memref<704x1xf32, #tpu.memory_space<vmem>>, %arg4: memref<256x704xf32, #tpu.memory_space<vmem>>, %arg5: memref<128x1xf32, #tpu.memory_space<vmem>>, %arg6: memref<50x128xf32, #tpu.memory_space<vmem>>, %arg7: memref<50x1xf32, #tpu.memory_space<vmem>>, %arg8: memref<10x50xf32, #tpu.memory_space<vmem>>, %arg9: memref<10x1xf32, #tpu.memory_space<vmem>>, %arg10: memref<2x10xf32, #tpu.memory_space<vmem>>, %arg11: memref<2x1xf32, #tpu.memory_space<vmem>>, %arg12: memref<8x256xf32, #tpu.memory_space<vmem>>) attributes {dimension_semantics = [#tpu.dimension_semantics<parallel>], iteration_bounds = array<i64: 2>, scalar_prefetch = 0 : i64, scratch_operands = 0 : i64, tpu.core_type = #tpu.core_type<tc>, window_params = [{transform_indices = @transform_0, window_bounds = array<i64: 256, 240>}, {pipeline_mode = #tpu.pipeline_mode<synchronous>, transform_indices = @transform_1, window_bounds = array<i64: 1408, 240>}, {pipeline_mode = #tpu.pipeline_mode<synchronous>, transform_indices = @transform_2, window_bounds = array<i64: 704, 1>}, {pipeline_mode = #tpu.pipeline_mode<synchronous>, transform_indices = @transform_3, window_bounds = array<i64: 256, 704>}, {pipeline_mode = #tpu.pipeline_mode<synchronous>, transform_indices = @transform_4, window_bounds = array<i64: 128, 1>}, {pipeline_mode = #tpu.pipeline_mode<synchronous>, transform_indices = @transform_5, window_bounds = array<i64: 50, 128>}, {pipeline_mode = #tpu.pipeline_mode<synchronous>, transform_indices = @transform_6, window_bounds = array<i64: 50, 1>}, {pipeline_mode = #tpu.pipeline_mode<synchronous>, transform_indices = @transform_7, window_bounds = array<i64: 10, 50>}, {pipeline_mode = #tpu.pipeline_mode<synchronous>, transform_indices = @transform_8, window_bounds = array<i64: 10, 1>}, {pipeline_mode = #tpu.pipeline_mode<synchronous>, transform_indices = @transform_9, window_bounds = array<i64: 2, 10>}, {pipeline_mode = #tpu.pipeline_mode<synchronous>, transform_indices = @transform_10, window_bounds = array<i64: 2, 1>}, {transform_indices = @transform_11, window_bounds = array<i64: 8, 256>}]} {
    %c0 = arith.constant 0 : index
    %c0_0 = arith.constant 0 : index
    %0 = vector.load %arg2[%c0, %c0_0] : memref<1408x240xf32, #tpu.memory_space<vmem>>, vector<1408x240xf32>
    %c0_1 = arith.constant 0 : index
    %c0_2 = arith.constant 0 : index
    %1 = vector.load %arg1[%c0_1, %c0_2] : memref<256x240xf32, #tpu.memory_space<vmem>>, vector<256x240xf32>
    %cst = arith.constant dense<0.000000e+00> : vector<1408x256xf32>
    %2 = tpu.matmul %0, %1, %cst {dimension_numbers = #tpu.dot_dimension_numbers<[1], [1], [0], [0], [0, 0, 1, 0], [], []>} : vector<1408x240xf32>, vector<256x240xf32>, vector<1408x256xf32> -> vector<1408x256xf32>
    %3 = vector.extract_strided_slice %2 {offsets = [0, 0], sizes = [704, 256], strides = [1, 1]} : vector<1408x256xf32> to vector<704x256xf32>
    %4 = vector.extract_strided_slice %2 {offsets = [704, 0], sizes = [704, 256], strides = [1, 1]} : vector<1408x256xf32> to vector<704x256xf32>
    %5 = arith.maximumf %3, %4 : vector<704x256xf32>
    %c0_3 = arith.constant 0 : index
    %c0_4 = arith.constant 0 : index
    %6 = vector.load %arg3[%c0_3, %c0_4] : memref<704x1xf32, #tpu.memory_space<vmem>>, vector<704x1xf32>
    %7 = vector.broadcast %6 : vector<704x1xf32> to vector<704x256xf32>
    %8 = arith.addf %5, %7 : vector<704x256xf32>
    %cst_5 = arith.constant 0.000000e+00 : f32
    %9 = vector.broadcast %cst_5 : f32 to vector<704x256xf32>
    %10 = arith.maximumf %8, %9 : vector<704x256xf32>
    %c0_6 = arith.constant 0 : index
    %c0_7 = arith.constant 0 : index
    %11 = vector.load %arg4[%c0_6, %c0_7] : memref<256x704xf32, #tpu.memory_space<vmem>>, vector<256x704xf32>
    %cst_8 = arith.constant dense<0.000000e+00> : vector<256x256xf32>
    %12 = tpu.matmul %11, %10, %cst_8 {dimension_numbers = #tpu.dot_dimension_numbers<[1], [0], [0], [1], [0, 0, 1, 1], [], []>} : vector<256x704xf32>, vector<704x256xf32>, vector<256x256xf32> -> vector<256x256xf32>
    %13 = vector.extract_strided_slice %12 {offsets = [0, 0], sizes = [128, 256], strides = [1, 1]} : vector<256x256xf32> to vector<128x256xf32>
    %14 = vector.extract_strided_slice %12 {offsets = [128, 0], sizes = [128, 256], strides = [1, 1]} : vector<256x256xf32> to vector<128x256xf32>
    %15 = arith.maximumf %13, %14 : vector<128x256xf32>
    %c0_9 = arith.constant 0 : index
    %c0_10 = arith.constant 0 : index
    %16 = vector.load %arg5[%c0_9, %c0_10] : memref<128x1xf32, #tpu.memory_space<vmem>>, vector<128x1xf32>
    %17 = vector.broadcast %16 : vector<128x1xf32> to vector<128x256xf32>
    %18 = arith.addf %15, %17 : vector<128x256xf32>
    %cst_11 = arith.constant 0.000000e+00 : f32
    %19 = vector.broadcast %cst_11 : f32 to vector<128x256xf32>
    %20 = arith.maximumf %18, %19 : vector<128x256xf32>
    %c0_12 = arith.constant 0 : index
    %c0_13 = arith.constant 0 : index
    %21 = vector.load %arg6[%c0_12, %c0_13] : memref<50x128xf32, #tpu.memory_space<vmem>>, vector<50x128xf32>
    %cst_14 = arith.constant dense<0.000000e+00> : vector<50x256xf32>
    %22 = tpu.matmul %21, %20, %cst_14 {dimension_numbers = #tpu.dot_dimension_numbers<[1], [0], [0], [1], [0, 0, 1, 1], [], []>} : vector<50x128xf32>, vector<128x256xf32>, vector<50x256xf32> -> vector<50x256xf32>
    %c0_15 = arith.constant 0 : index
    %c0_16 = arith.constant 0 : index
    %23 = vector.load %arg7[%c0_15, %c0_16] : memref<50x1xf32, #tpu.memory_space<vmem>>, vector<50x1xf32>
    %24 = vector.broadcast %23 : vector<50x1xf32> to vector<50x256xf32>
    %25 = arith.addf %22, %24 : vector<50x256xf32>
    %cst_17 = arith.constant 0.000000e+00 : f32
    %26 = vector.broadcast %cst_17 : f32 to vector<50x256xf32>
    %27 = arith.maximumf %25, %26 : vector<50x256xf32>
    %c0_18 = arith.constant 0 : index
    %c0_19 = arith.constant 0 : index
    %28 = vector.load %arg8[%c0_18, %c0_19] : memref<10x50xf32, #tpu.memory_space<vmem>>, vector<10x50xf32>
    %cst_20 = arith.constant dense<0.000000e+00> : vector<10x256xf32>
    %29 = tpu.matmul %28, %27, %cst_20 {dimension_numbers = #tpu.dot_dimension_numbers<[1], [0], [0], [1], [0, 0, 1, 1], [], []>} : vector<10x50xf32>, vector<50x256xf32>, vector<10x256xf32> -> vector<10x256xf32>
    %c0_21 = arith.constant 0 : index
    %c0_22 = arith.constant 0 : index
    %30 = vector.load %arg9[%c0_21, %c0_22] : memref<10x1xf32, #tpu.memory_space<vmem>>, vector<10x1xf32>
    %31 = vector.broadcast %30 : vector<10x1xf32> to vector<10x256xf32>
    %32 = arith.addf %29, %31 : vector<10x256xf32>
    %cst_23 = arith.constant 0.000000e+00 : f32
    %33 = vector.broadcast %cst_23 : f32 to vector<10x256xf32>
    %34 = arith.maximumf %32, %33 : vector<10x256xf32>
    %c0_24 = arith.constant 0 : index
    %c0_25 = arith.constant 0 : index
    %35 = vector.load %arg10[%c0_24, %c0_25] : memref<2x10xf32, #tpu.memory_space<vmem>>, vector<2x10xf32>
    %cst_26 = arith.constant dense<0.000000e+00> : vector<2x256xf32>
    %36 = tpu.matmul %35, %34, %cst_26 {dimension_numbers = #tpu.dot_dimension_numbers<[1], [0], [0], [1], [0, 0, 1, 1], [], []>} : vector<2x10xf32>, vector<10x256xf32>, vector<2x256xf32> -> vector<2x256xf32>
    %c0_27 = arith.constant 0 : index
    %c0_28 = arith.constant 0 : index
    %37 = vector.load %arg11[%c0_27, %c0_28] : memref<2x1xf32, #tpu.memory_space<vmem>>, vector<2x1xf32>
    %38 = vector.broadcast %37 : vector<2x1xf32> to vector<2x256xf32>
    %39 = arith.addf %36, %38 : vector<2x256xf32>
    %cst_29 = arith.constant 0.000000e+00 : f32
    %40 = vector.broadcast %cst_29 : f32 to vector<2x256xf32>
    %41 = arith.maximumf %39, %40 : vector<2x256xf32>
    %42 = vector.extract_strided_slice %41 {offsets = [0, 0], sizes = [1, 256], strides = [1, 1]} : vector<2x256xf32> to vector<1x256xf32>
    %43 = vector.extract_strided_slice %41 {offsets = [1, 0], sizes = [1, 256], strides = [1, 1]} : vector<2x256xf32> to vector<1x256xf32>
    %44 = arith.maximumf %42, %43 : vector<1x256xf32>
    %45 = arith.subf %42, %44 : vector<1x256xf32>
    %46 = math.exp %45 : vector<1x256xf32>
    %47 = arith.subf %43, %44 : vector<1x256xf32>
    %48 = math.exp %47 : vector<1x256xf32>
    %49 = arith.addf %46, %48 : vector<1x256xf32>
    %50 = arith.divf %46, %49 : vector<1x256xf32>
    %51 = arith.divf %48, %49 : vector<1x256xf32>
    %52 = arith.cmpf ogt, %43, %42 : vector<1x256xf32>
    %cst_30 = arith.constant 1.000000e+00 : f32
    %cst_31 = arith.constant 0.000000e+00 : f32
    %53 = vector.broadcast %cst_30 : f32 to vector<1x256xf32>
    %54 = vector.broadcast %cst_31 : f32 to vector<1x256xf32>
    %55 = arith.select %52, %53, %54 : vector<1x256xi1>, vector<1x256xf32>
    %56 = tpu.iota {dimensions = array<i32: 0>} : vector<8x256xi32>
    %c0_i32 = arith.constant 0 : i32
    %57 = vector.broadcast %c0_i32 : i32 to vector<8x256xi32>
    %58 = arith.cmpi eq, %56, %57 : vector<8x256xi32>
    %59 = vector.shape_cast %42 : vector<1x256xf32> to vector<1x256xf32>
    %60 = vector.broadcast %59 : vector<1x256xf32> to vector<8x256xf32>
    %c1_i32 = arith.constant 1 : i32
    %61 = vector.broadcast %c1_i32 : i32 to vector<8x256xi32>
    %62 = arith.cmpi eq, %56, %61 : vector<8x256xi32>
    %63 = vector.shape_cast %43 : vector<1x256xf32> to vector<1x256xf32>
    %64 = vector.broadcast %63 : vector<1x256xf32> to vector<8x256xf32>
    %c2_i32 = arith.constant 2 : i32
    %65 = vector.broadcast %c2_i32 : i32 to vector<8x256xi32>
    %66 = arith.cmpi eq, %56, %65 : vector<8x256xi32>
    %67 = vector.shape_cast %50 : vector<1x256xf32> to vector<1x256xf32>
    %68 = vector.broadcast %67 : vector<1x256xf32> to vector<8x256xf32>
    %c3_i32 = arith.constant 3 : i32
    %69 = vector.broadcast %c3_i32 : i32 to vector<8x256xi32>
    %70 = arith.cmpi eq, %56, %69 : vector<8x256xi32>
    %71 = vector.shape_cast %51 : vector<1x256xf32> to vector<1x256xf32>
    %72 = vector.broadcast %71 : vector<1x256xf32> to vector<8x256xf32>
    %c4_i32 = arith.constant 4 : i32
    %73 = vector.broadcast %c4_i32 : i32 to vector<8x256xi32>
    %74 = arith.cmpi eq, %56, %73 : vector<8x256xi32>
    %75 = vector.shape_cast %55 : vector<1x256xf32> to vector<1x256xf32>
    %76 = vector.broadcast %75 : vector<1x256xf32> to vector<8x256xf32>
    %cst_32 = arith.constant 0.000000e+00 : f32
    %77 = vector.broadcast %cst_32 : f32 to vector<8x256xf32>
    %78 = arith.select %74, %76, %77 : vector<8x256xi1>, vector<8x256xf32>
    %79 = arith.select %70, %72, %78 : vector<8x256xi1>, vector<8x256xf32>
    %80 = arith.select %66, %68, %79 : vector<8x256xi1>, vector<8x256xf32>
    %81 = arith.select %62, %64, %80 : vector<8x256xi1>, vector<8x256xf32>
    %82 = arith.select %58, %60, %81 : vector<8x256xi1>, vector<8x256xf32>
    %c0_33 = arith.constant 0 : index
    %c0_34 = arith.constant 0 : index
    %83 = vector.load %arg12[%c0_33, %c0_34] : memref<8x256xf32, #tpu.memory_space<vmem>>, vector<8x256xf32>
    tpu.vector_store %arg12[%c0_33, %c0_34], %82 {strides = array<i32>} : memref<8x256xf32, #tpu.memory_space<vmem>>, vector<8x256xf32>,
    return
  }
  func.func @transform_0(%arg0: i32) -> (i32, i32) {
    %c0_i32 = arith.constant 0 : i32
    %c0_i32_0 = arith.constant 0 : i32
    return %arg0, %c0_i32 : i32, i32
  }
  func.func @transform_1(%arg0: i32) -> (i32, i32) {
    %c0_i32 = arith.constant 0 : i32
    %c0_i32_0 = arith.constant 0 : i32
    %c0_i32_1 = arith.constant 0 : i32
    return %c0_i32, %c0_i32_0 : i32, i32
  }
  func.func @transform_2(%arg0: i32) -> (i32, i32) {
    %c0_i32 = arith.constant 0 : i32
    %c0_i32_0 = arith.constant 0 : i32
    %c0_i32_1 = arith.constant 0 : i32
    return %c0_i32, %c0_i32_0 : i32, i32
  }
  func.func @transform_3(%arg0: i32) -> (i32, i32) {
    %c0_i32 = arith.constant 0 : i32
    %c0_i32_0 = arith.constant 0 : i32
    %c0_i32_1 = arith.constant 0 : i32
    return %c0_i32, %c0_i32_0 : i32, i32
  }
  func.func @transform_4(%arg0: i32) -> (i32, i32) {
    %c0_i32 = arith.constant 0 : i32
    %c0_i32_0 = arith.constant 0 : i32
    %c0_i32_1 = arith.constant 0 : i32
    return %c0_i32, %c0_i32_0 : i32, i32
  }
  func.func @transform_5(%arg0: i32) -> (i32, i32) {
    %c0_i32 = arith.constant 0 : i32
    %c0_i32_0 = arith.constant 0 : i32
    %c0_i32_1 = arith.constant 0 : i32
    return %c0_i32, %c0_i32_0 : i32, i32
  }
  func.func @transform_6(%arg0: i32) -> (i32, i32) {
    %c0_i32 = arith.constant 0 : i32
    %c0_i32_0 = arith.constant 0 : i32
    %c0_i32_1 = arith.constant 0 : i32
    return %c0_i32, %c0_i32_0 : i32, i32
  }
  func.func @transform_7(%arg0: i32) -> (i32, i32) {
    %c0_i32 = arith.constant 0 : i32
    %c0_i32_0 = arith.constant 0 : i32
    %c0_i32_1 = arith.constant 0 : i32
    return %c0_i32, %c0_i32_0 : i32, i32
  }
  func.func @transform_8(%arg0: i32) -> (i32, i32) {
    %c0_i32 = arith.constant 0 : i32
    %c0_i32_0 = arith.constant 0 : i32
    %c0_i32_1 = arith.constant 0 : i32
    return %c0_i32, %c0_i32_0 : i32, i32
  }
  func.func @transform_9(%arg0: i32) -> (i32, i32) {
    %c0_i32 = arith.constant 0 : i32
    %c0_i32_0 = arith.constant 0 : i32
    %c0_i32_1 = arith.constant 0 : i32
    return %c0_i32, %c0_i32_0 : i32, i32
  }
  func.func @transform_10(%arg0: i32) -> (i32, i32) {
    %c0_i32 = arith.constant 0 : i32
    %c0_i32_0 = arith.constant 0 : i32
    %c0_i32_1 = arith.constant 0 : i32
    return %c0_i32, %c0_i32_0 : i32, i32
  }
  func.func @transform_11(%arg0: i32) -> (i32, i32) {
    %c0_i32 = arith.constant 0 : i32
    %c0_i32_0 = arith.constant 0 : i32
    return %c0_i32, %arg0 : i32, i32
  }
}

module attributes {stable_mosaic.version = 11 : i64} {
  func.func @_deepcat_kernel(%arg0: i32, %arg1: memref<256x240xf32, #tpu.memory_space<vmem>>, %arg2: memref<1408x240xf32, #tpu.memory_space<vmem>>, %arg3: memref<704x1xf32, #tpu.memory_space<vmem>>, %arg4: memref<256x704xf32, #tpu.memory_space<vmem>>, %arg5: memref<128x1xf32, #tpu.memory_space<vmem>>, %arg6: memref<50x128xf32, #tpu.memory_space<vmem>>, %arg7: memref<50x1xf32, #tpu.memory_space<vmem>>, %arg8: memref<10x50xf32, #tpu.memory_space<vmem>>, %arg9: memref<10x1xf32, #tpu.memory_space<vmem>>, %arg10: memref<2x10xf32, #tpu.memory_space<vmem>>, %arg11: memref<2x1xf32, #tpu.memory_space<vmem>>, %arg12: memref<8x256xf32, #tpu.memory_space<vmem>>) attributes {dimension_semantics = [#tpu.dimension_semantics<parallel>], iteration_bounds = array<i64: 2>, scalar_prefetch = 0 : i64, scratch_operands = 0 : i64, tpu.core_type = #tpu.core_type<tc>, window_params = [{transform_indices = @transform_0, window_bounds = array<i64: 256, 240>}, {pipeline_mode = #tpu.pipeline_mode<synchronous>, transform_indices = @transform_1, window_bounds = array<i64: 1408, 240>}, {pipeline_mode = #tpu.pipeline_mode<synchronous>, transform_indices = @transform_2, window_bounds = array<i64: 704, 1>}, {pipeline_mode = #tpu.pipeline_mode<synchronous>, transform_indices = @transform_3, window_bounds = array<i64: 256, 704>}, {pipeline_mode = #tpu.pipeline_mode<synchronous>, transform_indices = @transform_4, window_bounds = array<i64: 128, 1>}, {pipeline_mode = #tpu.pipeline_mode<synchronous>, transform_indices = @transform_5, window_bounds = array<i64: 50, 128>}, {pipeline_mode = #tpu.pipeline_mode<synchronous>, transform_indices = @transform_6, window_bounds = array<i64: 50, 1>}, {pipeline_mode = #tpu.pipeline_mode<synchronous>, transform_indices = @transform_7, window_bounds = array<i64: 10, 50>}, {pipeline_mode = #tpu.pipeline_mode<synchronous>, transform_indices = @transform_8, window_bounds = array<i64: 10, 1>}, {pipeline_mode = #tpu.pipeline_mode<synchronous>, transform_indices = @transform_9, window_bounds = array<i64: 2, 10>}, {pipeline_mode = #tpu.pipeline_mode<synchronous>, transform_indices = @transform_10, window_bounds = array<i64: 2, 1>}, {transform_indices = @transform_11, window_bounds = array<i64: 8, 256>}]} {
    %c0 = arith.constant 0 : index
    %c0_0 = arith.constant 0 : index
    %0 = vector.load %arg2[%c0, %c0_0] : memref<1408x240xf32, #tpu.memory_space<vmem>>, vector<1408x240xf32>
    %c0_1 = arith.constant 0 : index
    %c0_2 = arith.constant 0 : index
    %1 = vector.load %arg1[%c0_1, %c0_2] : memref<256x240xf32, #tpu.memory_space<vmem>>, vector<256x240xf32>
    %cst = arith.constant dense<0.000000e+00> : vector<1408x256xf32>
    %2 = tpu.matmul %0, %1, %cst {dimension_numbers = #tpu.dot_dimension_numbers<[1], [1], [0], [0], [0, 0, 1, 0], [], []>} : vector<1408x240xf32>, vector<256x240xf32>, vector<1408x256xf32> -> vector<1408x256xf32>
    %3 = vector.extract_strided_slice %2 {offsets = [0, 0], sizes = [704, 256], strides = [1, 1]} : vector<1408x256xf32> to vector<704x256xf32>
    %4 = vector.extract_strided_slice %2 {offsets = [704, 0], sizes = [704, 256], strides = [1, 1]} : vector<1408x256xf32> to vector<704x256xf32>
    %5 = arith.maximumf %3, %4 : vector<704x256xf32>
    %c0_3 = arith.constant 0 : index
    %c0_4 = arith.constant 0 : index
    %6 = vector.load %arg3[%c0_3, %c0_4] : memref<704x1xf32, #tpu.memory_space<vmem>>, vector<704x1xf32>
    %7 = vector.broadcast %6 : vector<704x1xf32> to vector<704x256xf32>
    %8 = arith.addf %5, %7 : vector<704x256xf32>
    %cst_5 = arith.constant 0.000000e+00 : f32
    %9 = vector.broadcast %cst_5 : f32 to vector<704x256xf32>
    %10 = arith.maximumf %8, %9 : vector<704x256xf32>
    %c0_6 = arith.constant 0 : index
    %c0_7 = arith.constant 0 : index
    %11 = vector.load %arg4[%c0_6, %c0_7] : memref<256x704xf32, #tpu.memory_space<vmem>>, vector<256x704xf32>
    %cst_8 = arith.constant dense<0.000000e+00> : vector<256x256xf32>
    %12 = tpu.matmul %11, %10, %cst_8 {dimension_numbers = #tpu.dot_dimension_numbers<[1], [0], [0], [1], [0, 0, 1, 1], [], []>} : vector<256x704xf32>, vector<704x256xf32>, vector<256x256xf32> -> vector<256x256xf32>
    %13 = vector.extract_strided_slice %12 {offsets = [0, 0], sizes = [128, 256], strides = [1, 1]} : vector<256x256xf32> to vector<128x256xf32>
    %14 = vector.extract_strided_slice %12 {offsets = [128, 0], sizes = [128, 256], strides = [1, 1]} : vector<256x256xf32> to vector<128x256xf32>
    %15 = arith.maximumf %13, %14 : vector<128x256xf32>
    %c0_9 = arith.constant 0 : index
    %c0_10 = arith.constant 0 : index
    %16 = vector.load %arg5[%c0_9, %c0_10] : memref<128x1xf32, #tpu.memory_space<vmem>>, vector<128x1xf32>
    %17 = vector.broadcast %16 : vector<128x1xf32> to vector<128x256xf32>
    %18 = arith.addf %15, %17 : vector<128x256xf32>
    %cst_11 = arith.constant 0.000000e+00 : f32
    %19 = vector.broadcast %cst_11 : f32 to vector<128x256xf32>
    %20 = arith.maximumf %18, %19 : vector<128x256xf32>
    %c0_12 = arith.constant 0 : index
    %c0_13 = arith.constant 0 : index
    %21 = vector.load %arg6[%c0_12, %c0_13] : memref<50x128xf32, #tpu.memory_space<vmem>>, vector<50x128xf32>
    %cst_14 = arith.constant dense<0.000000e+00> : vector<50x256xf32>
    %22 = tpu.matmul %21, %20, %cst_14 {dimension_numbers = #tpu.dot_dimension_numbers<[1], [0], [0], [1], [0, 0, 1, 1], [], []>} : vector<50x128xf32>, vector<128x256xf32>, vector<50x256xf32> -> vector<50x256xf32>
    %c0_15 = arith.constant 0 : index
    %c0_16 = arith.constant 0 : index
    %23 = vector.load %arg7[%c0_15, %c0_16] : memref<50x1xf32, #tpu.memory_space<vmem>>, vector<50x1xf32>
    %24 = vector.broadcast %23 : vector<50x1xf32> to vector<50x256xf32>
    %25 = arith.addf %22, %24 : vector<50x256xf32>
    %cst_17 = arith.constant 0.000000e+00 : f32
    %26 = vector.broadcast %cst_17 : f32 to vector<50x256xf32>
    %27 = arith.maximumf %25, %26 : vector<50x256xf32>
    %c0_18 = arith.constant 0 : index
    %c0_19 = arith.constant 0 : index
    %28 = vector.load %arg8[%c0_18, %c0_19] : memref<10x50xf32, #tpu.memory_space<vmem>>, vector<10x50xf32>
    %cst_20 = arith.constant dense<0.000000e+00> : vector<10x256xf32>
    %29 = tpu.matmul %28, %27, %cst_20 {dimension_numbers = #tpu.dot_dimension_numbers<[1], [0], [0], [1], [0, 0, 1, 1], [], []>} : vector<10x50xf32>, vector<50x256xf32>, vector<10x256xf32> -> vector<10x256xf32>
    %c0_21 = arith.constant 0 : index
    %c0_22 = arith.constant 0 : index
    %30 = vector.load %arg9[%c0_21, %c0_22] : memref<10x1xf32, #tpu.memory_space<vmem>>, vector<10x1xf32>
    %31 = vector.broadcast %30 : vector<10x1xf32> to vector<10x256xf32>
    %32 = arith.addf %29, %31 : vector<10x256xf32>
    %cst_23 = arith.constant 0.000000e+00 : f32
    %33 = vector.broadcast %cst_23 : f32 to vector<10x256xf32>
    %34 = arith.maximumf %32, %33 : vector<10x256xf32>
    %c0_24 = arith.constant 0 : index
    %c0_25 = arith.constant 0 : index
    %35 = vector.load %arg10[%c0_24, %c0_25] : memref<2x10xf32, #tpu.memory_space<vmem>>, vector<2x10xf32>
    %cst_26 = arith.constant dense<0.000000e+00> : vector<2x256xf32>
    %36 = tpu.matmul %35, %34, %cst_26 {dimension_numbers = #tpu.dot_dimension_numbers<[1], [0], [0], [1], [0, 0, 1, 1], [], []>} : vector<2x10xf32>, vector<10x256xf32>, vector<2x256xf32> -> vector<2x256xf32>
    %c0_27 = arith.constant 0 : index
    %c0_28 = arith.constant 0 : index
    %37 = vector.load %arg11[%c0_27, %c0_28] : memref<2x1xf32, #tpu.memory_space<vmem>>, vector<2x1xf32>
    %38 = vector.broadcast %37 : vector<2x1xf32> to vector<2x256xf32>
    %39 = arith.addf %36, %38 : vector<2x256xf32>
    %cst_29 = arith.constant 0.000000e+00 : f32
    %40 = vector.broadcast %cst_29 : f32 to vector<2x256xf32>
    %41 = arith.maximumf %39, %40 : vector<2x256xf32>
    %42 = vector.extract_strided_slice %41 {offsets = [0, 0], sizes = [1, 256], strides = [1, 1]} : vector<2x256xf32> to vector<1x256xf32>
    %43 = vector.extract_strided_slice %41 {offsets = [1, 0], sizes = [1, 256], strides = [1, 1]} : vector<2x256xf32> to vector<1x256xf32>
    %44 = arith.maximumf %42, %43 : vector<1x256xf32>
    %45 = arith.subf %42, %44 : vector<1x256xf32>
    %46 = math.exp %45 : vector<1x256xf32>
    %47 = arith.subf %43, %44 : vector<1x256xf32>
    %48 = math.exp %47 : vector<1x256xf32>
    %49 = arith.addf %46, %48 : vector<1x256xf32>
    %50 = arith.divf %46, %49 : vector<1x256xf32>
    %51 = arith.divf %48, %49 : vector<1x256xf32>
    %52 = arith.cmpf ogt, %43, %42 : vector<1x256xf32>
    %cst_30 = arith.constant 1.000000e+00 : f32
    %cst_31 = arith.constant 0.000000e+00 : f32
    %53 = vector.broadcast %cst_30 : f32 to vector<1x256xf32>
    %54 = vector.broadcast %cst_31 : f32 to vector<1x256xf32>
    %55 = arith.select %52, %53, %54 : vector<1x256xi1>, vector<1x256xf32>
    %56 = tpu.iota {dimensions = array<i32: 0>} : vector<8x256xi32>
    %c0_i32 = arith.constant 0 : i32
    %57 = vector.broadcast %c0_i32 : i32 to vector<8x256xi32>
    %58 = arith.cmpi eq, %56, %57 : vector<8x256xi32>
    %59 = vector.shape_cast %42 : vector<1x256xf32> to vector<1x256xf32>
    %60 = vector.broadcast %59 : vector<1x256xf32> to vector<8x256xf32>
    %c1_i32 = arith.constant 1 : i32
    %61 = vector.broadcast %c1_i32 : i32 to vector<8x256xi32>
    %62 = arith.cmpi eq, %56, %61 : vector<8x256xi32>
    %63 = vector.shape_cast %43 : vector<1x256xf32> to vector<1x256xf32>
    %64 = vector.broadcast %63 : vector<1x256xf32> to vector<8x256xf32>
    %c2_i32 = arith.constant 2 : i32
    %65 = vector.broadcast %c2_i32 : i32 to vector<8x256xi32>
    %66 = arith.cmpi eq, %56, %65 : vector<8x256xi32>
    %67 = vector.shape_cast %50 : vector<1x256xf32> to vector<1x256xf32>
    %68 = vector.broadcast %67 : vector<1x256xf32> to vector<8x256xf32>
    %c3_i32 = arith.constant 3 : i32
    %69 = vector.broadcast %c3_i32 : i32 to vector<8x256xi32>
    %70 = arith.cmpi eq, %56, %69 : vector<8x256xi32>
    %71 = vector.shape_cast %51 : vector<1x256xf32> to vector<1x256xf32>
    %72 = vector.broadcast %71 : vector<1x256xf32> to vector<8x256xf32>
    %c4_i32 = arith.constant 4 : i32
    %73 = vector.broadcast %c4_i32 : i32 to vector<8x256xi32>
    %74 = arith.cmpi eq, %56, %73 : vector<8x256xi32>
    %75 = vector.shape_cast %55 : vector<1x256xf32> to vector<1x256xf32>
    %76 = vector.broadcast %75 : vector<1x256xf32> to vector<8x256xf32>
    %cst_32 = arith.constant 0.000000e+00 : f32
    %77 = vector.broadcast %cst_32 : f32 to vector<8x256xf32>
    %78 = arith.select %74, %76, %77 : vector<8x256xi1>, vector<8x256xf32>
    %79 = arith.select %70, %72, %78 : vector<8x256xi1>, vector<8x256xf32>
    %80 = arith.select %66, %68, %79 : vector<8x256xi1>, vector<8x256xf32>
    %81 = arith.select %62, %64, %80 : vector<8x256xi1>, vector<8x256xf32>
    %82 = arith.select %58, %60, %81 : vector<8x256xi1>, vector<8x256xf32>
    %c0_33 = arith.constant 0 : index
    %c0_34 = arith.constant 0 : index
    %83 = vector.load %arg12[%c0_33, %c0_34] : memref<8x256xf32, #tpu.memory_space<vmem>>, vector<8x256xf32>
    tpu.vector_store %arg12[%c0_33, %c0_34], %82 {strides = array<i32>} : memref<8x256xf32, #tpu.memory_space<vmem>>, vector<8x256xf32>,
    return
  }
  func.func @transform_0(%arg0: i32) -> (i32, i32) {
    %c0_i32 = arith.constant 0 : i32
    %c0_i32_0 = arith.constant 0 : i32
    return %arg0, %c0_i32 : i32, i32
  }
  func.func @transform_1(%arg0: i32) -> (i32, i32) {
    %c0_i32 = arith.constant 0 : i32
    %c0_i32_0 = arith.constant 0 : i32
    %c0_i32_1 = arith.constant 0 : i32
    return %c0_i32, %c0_i32_0 : i32, i32
  }
  func.func @transform_2(%arg0: i32) -> (i32, i32) {
    %c0_i32 = arith.constant 0 : i32
    %c0_i32_0 = arith.constant 0 : i32
    %c0_i32_1 = arith.constant 0 : i32
    return %c0_i32, %c0_i32_0 : i32, i32
  }
  func.func @transform_3(%arg0: i32) -> (i32, i32) {
    %c0_i32 = arith.constant 0 : i32
    %c0_i32_0 = arith.constant 0 : i32
    %c0_i32_1 = arith.constant 0 : i32
    return %c0_i32, %c0_i32_0 : i32, i32
  }
  func.func @transform_4(%arg0: i32) -> (i32, i32) {
    %c0_i32 = arith.constant 0 : i32
    %c0_i32_0 = arith.constant 0 : i32
    %c0_i32_1 = arith.constant 0 : i32
    return %c0_i32, %c0_i32_0 : i32, i32
  }
  func.func @transform_5(%arg0: i32) -> (i32, i32) {
    %c0_i32 = arith.constant 0 : i32
    %c0_i32_0 = arith.constant 0 : i32
    %c0_i32_1 = arith.constant 0 : i32
    return %c0_i32, %c0_i32_0 : i32, i32
  }
  func.func @transform_6(%arg0: i32) -> (i32, i32) {
    %c0_i32 = arith.constant 0 : i32
    %c0_i32_0 = arith.constant 0 : i32
    %c0_i32_1 = arith.constant 0 : i32
    return %c0_i32, %c0_i32_0 : i32, i32
  }
  func.func @transform_7(%arg0: i32) -> (i32, i32) {
    %c0_i32 = arith.constant 0 : i32
    %c0_i32_0 = arith.constant 0 : i32
    %c0_i32_1 = arith.constant 0 : i32
    return %c0_i32, %c0_i32_0 : i32, i32
  }
  func.func @transform_8(%arg0: i32) -> (i32, i32) {
    %c0_i32 = arith.constant 0 : i32
    %c0_i32_0 = arith.constant 0 : i32
    %c0_i32_1 = arith.constant 0 : i32
    return %c0_i32, %c0_i32_0 : i32, i32
  }
  func.func @transform_9(%arg0: i32) -> (i32, i32) {
    %c0_i32 = arith.constant 0 : i32
    %c0_i32_0 = arith.constant 0 : i32
    %c0_i32_1 = arith.constant 0 : i32
    return %c0_i32, %c0_i32_0 : i32, i32
  }
  func.func @transform_10(%arg0: i32) -> (i32, i32) {
    %c0_i32 = arith.constant 0 : i32
    %c0_i32_0 = arith.constant 0 : i32
    %c0_i32_1 = arith.constant 0 : i32
    return %c0_i32, %c0_i32_0 : i32, i32
  }
  func.func @transform_11(%arg0: i32) -> (i32, i32) {
    %c0_i32 = arith.constant 0 : i32
    %c0_i32_0 = arith.constant 0 : i32
    return %c0_i32, %arg0 : i32, i32
  }
}

</mosaic_0001>

<bundles_post_ra>
// kernel: tpu_custom_call.1
= control target key start
LH: loop header
LB: loop body
LE: loop exit
PB: predicated region body
PF: predicated region fallthrough
CT: control target
= control target key end

     0   :  { %16 = vsyncpa [#allocation3], 0  ;;  %s9759_s0 = inlined_call_operand.vmem [shape: f32[512,240], index: 0, kind: input, shape index: {}]   ;;  %s9760_s1 = inlined_call_operand.vmem [shape: f32[1408,240], index: 1, kind: input, shape index: {}]   ;;  %s9761_s2 = inlined_call_operand.vmem [shape: f32[704,1], index: 2, kind: input, shape index: {}]   ;;  %s9762_s3 = inlined_call_operand.vmem [shape: f32[256,704], index: 3, kind: input, shape index: {}]   ;;  %s9763_s4 = inlined_call_operand.vmem [shape: f32[128,1], index: 4, kind: input, shape index: {}]   ;;  %s9764_s5 = inlined_call_operand.vmem [shape: f32[50,128], index: 5, kind: input, shape index: {}]   ;;  %s9765_s6 = inlined_call_operand.vmem [shape: f32[50,1], index: 6, kind: input, shape index: {}]   ;;  %s9766_s7 = inlined_call_operand.vmem [shape: f32[10,50], index: 7, kind: input, shape index: {}]   ;;  %s9767_s8 = inlined_call_operand.vmem [shape: f32[10,1], index: 8, kind: input, shape index: {}]   ;;  %s9768_s9 = inlined_call_operand.vmem [shape: f32[2,10], index: 9, kind: input, shape index: {}]   ;;  %s9769_s10 = inlined_call_operand.vmem [shape: f32[2,1], index: 10, kind: input, shape index: {}]   ;;  %s9770_s11 = inlined_call_operand.hbm [shape: f32[8,512], index: 11, kind: output, shape index: {}]  }
   0x1   :  { %18 = vsyncpa [#allocation3 + $0x1], 0  ;;  %s6335_s17 = smov 0   ;;  %s6337_s18 = smov 0  }
   0x2   :  { %s6339_s19 = smov 0   ;;  %s6341_s20 = smov 0  }
   0x3 LB: > { %s6356_s21 = sadd.s32 4294967295, %s6269_s20   ;;  %s5419_s22 = sadd.s32 4294967294, %s6269_s20   ;;  %s6269_s20 = sphi %s6341_s20, %s10204_s20   ;;  %s6265_s19 = sphi %s6339_s19, %s10203_s19   ;;  %s6261_s18 = sphi %s6337_s18, %s10202_s18   ;;  %s6257_s17 = sphi %s6335_s17, %s10201_s17  }
   0x4   : > { %s6360_s23 = sadd.s32 1, %s6269_s20   ;;  %s267_s24 = sadd.s32 1, %s6265_s19 }
   0x5   : > { %s264_s25 = ssub.s32 %s6269_s20, %s6360_s23  ;;  %p277_p0 = scmp.ne.s32.totalorder %s6265_s19, %s6261_s18 }
   0x6   : > { %p265_p1 = scmp.eq.s32.totalorder %s264_s25, 0  ;;  %p278_p2 = scmp.eq.s32.totalorder %s6356_s21, 1 }
   0x7   : > { %p283_p3 = scmp.ne.s32.totalorder %s6261_s18, %s6257_s17  ;;  %p284_p4 = scmp.eq.s32.totalorder %s5419_s22, 1 }
   0x8   : > { %s6371_s26 = scalar_select %p265_p1, %s6265_s19, %s267_s24  }
   0x9   : > { %p6373_p5 = por %p278_p2, %p277_p0  ;;  %p6377_p6 = por %p284_p4, %p283_p3 }
   0xa   : > { %p5422_p7 = scmp.ge.s32.totalorder %s6269_s20, 1  ;;  %p342_p8 = scmp.lt.s32.totalorder %s6269_s20, 3 }
   0xc   : > { %p343_p9 = pnand %p5422_p7, %p342_p8 }
   0xe   : > { %346 = sbr.rel (%p343_p9) target bundleno = 2213 (0x8a5), region = 64 }
  0x15   : > { %s5424_s29 = sshll.u32 %s6356_s21, 5  ;;  %vm807_vm0 = vcmask 916480   ;;  %v392_v0 = vld [vmem:[%s9760_s1 + $0x8] sm:$0xff]  ;;  %vm3801_vm2 = vcmask 523264   ;;  %vm5052_vm3 = vcmask 1041408   ;;  %vm5045_vm4 = vcmask 408576  }
  0x16   : > { %p384_p10 = scmp.lt.s32.totalorder %s5424_s29, 63  ;;  %5459 = vmatprep.mubr.msk.f32.mxu0 %vm807_vm0, %v392_v0  ;;  %vm6395_vm1 = vmpackc.low %vm807_vm0, %vm807_vm0  ;;  %v396_v1 = vld [vmem:[%s9760_s1 + $0x28] sm:$0xff]  ;;  %vm6273_vm5 = vmmov 1   ;;  %vm5147_vm7 = vcmask 80896   ;;  %s380_s30 = sand.u32 1, %s6261_s18  }
  0x17   : > { %vm5982_vm6 = vmpackc.low %vm5052_vm3, %vm6273_vm5  ;;  %s5423_s12 = sshll.u32 %s380_s30, 4  ;;  %s5346_s24 = scalar_lea.sflag [#allocation3], %s380_s30 }
  0x18   : > { %s10206_s29 = smov (!%p384_p10, %s5424_s29), 63  ;;  %s382_s14 = scalar_lea.vmem [#allocation2], %s5423_s12 }
  0x19   : > { %s5679_s13 = sshll.u32 %s10206_s29, 4  ;;  %s5360_s15 = sshll.u32 %s382_s14, 4  ;;  %s9716_s15 = int_to_ptr.vmem [resolvable:$true] %s5360_s15 }
  0x1a   : > { %s6391_s16 = scalar_lea.vmem %s9759_s0, %s5679_s13  ;;  %s5680_s13 = sshll.u32 %s6356_s21, 8 }
  0x1b   : > { %v744_v2 = vld [vmem:[%s6391_s16 + $0x8] sm:$0xff]  ;;  %v746_v3 = vld [vmem:[%s6391_s16 + $0x18] sm:$0xff]  ;;  %v743_v4 = vld [vmem:[%s6391_s16] sm:$0xff]  ;;  %s9714_s22 = scalar_lea.hbm %s9770_s11, %s5680_s13  ;;  %s6207_s25 = scalar_lea.vmem %s9716_s15, 256 }
  0x1c   : > { %v5681_v5 = vpack.c.bf16 %v746_v3, %v744_v2  ;;  %v745_v6 = vld [vmem:[%s6391_s16 + $0x10] sm:$0xff]  ;;  %v748_v7 = vld [vmem:[%s6391_s16 + $0x28] sm:$0xff]  ;;  %v750_v8 = vld [vmem:[%s6391_s16 + $0x38] sm:$0xff]  ;;  %p6208_p11 = scmp.ne.s32.totalorder %s9716_s15, %s6207_s25  ;;  %s6274_s29 = smov [#allocation2]  }
  0x1d   : > { %v5684_v9 = vpack.c.bf16 %v745_v6, %v743_v4  ;;  %v5686_v10 = vpack.c.bf16 %v750_v8, %v748_v7  ;;  %v747_v11 = vld [vmem:[%s6391_s16 + $0x20] sm:$0xff]  ;;  %v749_v12 = vld [vmem:[%s6391_s16 + $0x30] sm:$0xff]  ;;  %v752_v13 = vld [vmem:[%s6391_s16 + $0x48] sm:$0xff]  ;;  %s6211_s12 = sshll.u32 %s6274_s29, 4  ;;  %s6212_s12 = int_to_ptr.vmem [resolvable:$false] %s6211_s12 }
  0x1e   : > { %5683 = vmatprep.subr.msk.bf16.mxu0 %vm6395_vm1, %v5681_v5  ;;  %5987 = vmatprep.subr.msk.bf16.mxu1 %vm6395_vm1, %v5681_v5  ;;  %v754_v14 = vld [vmem:[%s6391_s16 + $0x58] sm:$0xff]  ;;  %v5689_v15 = vpack.c.bf16 %v749_v12, %v747_v11  ;;  %v751_v17 = vld [vmem:[%s6391_s16 + $0x40] sm:$0xff]  ;;  %v753_v18 = vld [vmem:[%s6391_s16 + $0x50] sm:$0xff]  ;;  %p6209_p12 = pnand %p6208_p11, %p6373_p5  ;;  %s6213_s13 = scalar_lea.vmem %s6212_s12, 512 }
  0x1f   : > { %5685 = vmatpush1.bf16.xpose.msra.mxu0 %v5684_v9  ;;  %6003 = vmatpush1.bf16.xpose.msra.mxu1 %v5684_v9  ;;  %v5691_v16 = vpack.c.bf16 %v754_v14, %v752_v13  ;;  %v756_v19 = vld [vmem:[%s6391_s16 + $0x68] sm:$0xff]  ;;  %v758_v20 = vld [vmem:[%s6391_s16 + $0x78] sm:$0xff]  ;;  %v5694_v21 = vpack.c.bf16 %v753_v18, %v751_v17  ;;  %v755_v23 = vld [vmem:[%s6391_s16 + $0x60] sm:$0xff]  ;;  %p6214_p0 = scmp.lt.s32.totalorder %s9716_s15, %s6212_s12  ;;  %p6215_p1 = scmp.lt.s32.totalorder %s6213_s13, %s6207_s25 }
  0x20   : > { %5688 = vmatprep.subr.msk.bf16.mxu0 %vm6395_vm1, %v5686_v10  ;;  %5988 = vmatprep.subr.msk.bf16.mxu1 %vm6395_vm1, %v5686_v10  ;;  %v5696_v22 = vpack.c.bf16 %v758_v20, %v756_v19  ;;  %v757_v24 = vld [vmem:[%s6391_s16 + $0x70] sm:$0xff]  ;;  %v760_v25 = vld [vmem:[%s6391_s16 + $0x88] sm:$0xff]  ;;  %v762_v26 = vld [vmem:[%s6391_s16 + $0x98] sm:$0xff]  ;;  %p6210_p13 = pneg %p6209_p12 }
  0x21   : > { %v5699_v27 = vpack.c.bf16 %v757_v24, %v755_v23  ;;  %v5701_v28 = vpack.c.bf16 %v762_v26, %v760_v25  ;;  %v759_v29 = vld [vmem:[%s6391_s16 + $0x80] sm:$0xff]  ;;  %v761_v30 = vld [vmem:[%s6391_s16 + $0x90] sm:$0xff]  ;;  %v764_v31 = vld [vmem:[%s6391_s16 + $0xa8] sm:$0xff]  ;;  %p6216_p2 = por %p6215_p1, %p6214_p0 }
  0x22   : > { %v766_v32 = vld [vmem:[%s6391_s16 + $0xb8] sm:$0xff]  ;;  %v5704_v33 = vpack.c.bf16 %v761_v30, %v759_v29  ;;  %v763_v35 = vld [vmem:[%s6391_s16 + $0xa0] sm:$0xff]  ;;  %v765_v36 = vld [vmem:[%s6391_s16 + $0xb0] sm:$0xff] }
  0x23   : > { %v5706_v34 = vpack.c.bf16 %v766_v32, %v764_v31  ;;  %v768_v37 = vld [vmem:[%s6391_s16 + $0xc8] sm:$0xff]  ;;  %v770_v38 = vld [vmem:[%s6391_s16 + $0xd8] sm:$0xff]  ;;  %v5709_v39 = vpack.c.bf16 %v765_v36, %v763_v35  ;;  %v767_v41 = vld [vmem:[%s6391_s16 + $0xc0] sm:$0xff]  ;;  %p6217_p3 = pnand %p6216_p2, %p6210_p13 }
  0x24   : > { %v5711_v40 = vpack.c.bf16 %v770_v38, %v768_v37  ;;  %v769_v42 = vld [vmem:[%s6391_s16 + $0xd0] sm:$0xff]  ;;  %v772_v43 = vld [vmem:[%s6391_s16 + $0xe8] sm:$0xff]  ;;  %v774_v44 = vld [vmem:[%s6391_s16 + $0xf8] sm:$0xff] }
  0x25   : > { %v5714_v45 = vpack.c.bf16 %v769_v42, %v767_v41  ;;  %v5716_v46 = vpack.c.bf16 %v774_v44, %v772_v43  ;;  %v771_v47 = vld [vmem:[%s6391_s16 + $0xe0] sm:$0xff]  ;;  %v773_v48 = vld [vmem:[%s6391_s16 + $0xf0] sm:$0xff]  ;;  %v776_v49 = vld [vmem:[%s6391_s16 + $0x108] sm:$0xff] }
  0x26   : > { %v778_v50 = vld [vmem:[%s6391_s16 + $0x118] sm:$0xff]  ;;  %v5719_v51 = vpack.c.bf16 %v773_v48, %v771_v47  ;;  %v775_v53 = vld [vmem:[%s6391_s16 + $0x100] sm:$0xff]  ;;  %v777_v54 = vld [vmem:[%s6391_s16 + $0x110] sm:$0xff] }
  0x27   : > { %5690 = vmatpush1.bf16.xpose.msra.mxu0 %v5689_v15  ;;  %6004 = vmatpush1.bf16.xpose.msra.mxu1 %v5689_v15  ;;  %v5721_v52 = vpack.c.bf16 %v778_v50, %v776_v49  ;;  %v780_v55 = vld [vmem:[%s6391_s16 + $0x128] sm:$0xff]  ;;  %v782_v56 = vld [vmem:[%s6391_s16 + $0x138] sm:$0xff]  ;;  %v5724_v57 = vpack.c.bf16 %v777_v54, %v775_v53  ;;  %v779_v59 = vld [vmem:[%s6391_s16 + $0x120] sm:$0xff] }
  0x28   : > { %5693 = vmatprep.subr.msk.bf16.mxu0 %vm6395_vm1, %v5691_v16  ;;  %5989 = vmatprep.subr.msk.bf16.mxu1 %vm6395_vm1, %v5691_v16  ;;  %v5726_v58 = vpack.c.bf16 %v782_v56, %v780_v55  ;;  %v781_v60 = vld [vmem:[%s6391_s16 + $0x130] sm:$0xff]  ;;  %v784_v61 = vld [vmem:[%s6391_s16 + $0x148] sm:$0xff]  ;;  %v786_v62 = vld [vmem:[%s6391_s16 + $0x158] sm:$0xff] }
  0x29   : > { %v5729_v63 = vpack.c.bf16 %v781_v60, %v779_v59  ;;  %v5731_v0 = vpack.c.bf16 %v786_v62, %v784_v61  ;;  %v783_v2 = vld [vmem:[%s6391_s16 + $0x140] sm:$0xff]  ;;  %v785_v3 = vld [vmem:[%s6391_s16 + $0x150] sm:$0xff]  ;;  %v788_v4 = vld [vmem:[%s6391_s16 + $0x168] sm:$0xff] }
  0x2a   : > { %v790_v5 = vld [vmem:[%s6391_s16 + $0x178] sm:$0xff]  ;;  %v5734_v6 = vpack.c.bf16 %v785_v3, %v783_v2  ;;  %v787_v8 = vld [vmem:[%s6391_s16 + $0x160] sm:$0xff]  ;;  %v789_v9 = vld [vmem:[%s6391_s16 + $0x170] sm:$0xff] }
  0x2b   : > { %v5736_v7 = vpack.c.bf16 %v790_v5, %v788_v4  ;;  %v792_v10 = vld [vmem:[%s6391_s16 + $0x188] sm:$0xff]  ;;  %v794_v11 = vld [vmem:[%s6391_s16 + $0x198] sm:$0xff]  ;;  %v5739_v12 = vpack.c.bf16 %v789_v9, %v787_v8  ;;  %v791_v14 = vld [vmem:[%s6391_s16 + $0x180] sm:$0xff]  ;;  %v6271_v8 = vmov 0  }
  0x2c   : > { %v5741_v13 = vpack.c.bf16 %v794_v11, %v792_v10  ;;  %v793_v15 = vld [vmem:[%s6391_s16 + $0x190] sm:$0xff]  ;;  %v796_v16 = vld [vmem:[%s6391_s16 + $0x1a8] sm:$0xff]  ;;  %v798_v17 = vld [vmem:[%s6391_s16 + $0x1b8] sm:$0xff]  ;;  %6190 = vset.pattern.permute.xlu1 %v6271_v8  ;;  %6189 = vset.pattern.permute.xlu0 %v6271_v8 }
  0x2d   : > { %v5744_v18 = vpack.c.bf16 %v793_v15, %v791_v14  ;;  %v5746_v19 = vpack.c.bf16 %v798_v17, %v796_v16  ;;  %v795_v20 = vld [vmem:[%s6391_s16 + $0x1a0] sm:$0xff]  ;;  %v802_v23 = vld [vmem:[%s6391_s16 + $0x1d8] sm:$0xff]  ;;  %v393_v37 = vld [vmem:[%s9760_s1 + $0x10] sm:$0xff] }
  0x2e   : > { %v799_v26 = vld [vmem:[%s6391_s16 + $0x1c0] sm:$0xff]  ;;  %v806_v29 = vld [vmem:[%s6391_s16 + $0x1f8] sm:$0xff]  ;;  %v400_v41 = vld [vmem:[%s9760_s1 + $0x48] sm:$0xff] }
  0x2f   : > { %5695 = vmatpush1.bf16.xpose.msra.mxu0 %v5694_v21  ;;  %6005 = vmatpush1.bf16.xpose.msra.mxu1 %v5694_v21  ;;  %v797_v21 = vld [vmem:[%s6391_s16 + $0x1b0] sm:$0xff]  ;;  %v803_v32 = vld [vmem:[%s6391_s16 + $0x1e0] sm:$0xff]  ;;  %v394_v36 = vld [vmem:[%s9760_s1 + $0x18] sm:$0xff] }
  0x30   : > { %5698 = vmatprep.subr.msk.bf16.mxu0 %vm6395_vm1, %v5696_v22  ;;  %5990 = vmatprep.subr.msk.bf16.mxu1 %vm6395_vm1, %v5696_v22  ;;  %v800_v22 = vld [vmem:[%s6391_s16 + $0x1c8] sm:$0xff]  ;;  %v5749_v24 = vpack.c.bf16 %v797_v21, %v795_v20  ;;  %v391_v35 = vld [vmem:[%s9760_s1] sm:$0xff]  ;;  %v402_v43 = vld [vmem:[%s9760_s1 + $0x58] sm:$0xff] }
  0x31   : > { %v5751_v25 = vpack.c.bf16 %v802_v23, %v800_v22  ;;  %v395_v38 = vld [vmem:[%s9760_s1 + $0x20] sm:$0xff]  ;;  %v401_v44 = vld [vmem:[%s9760_s1 + $0x50] sm:$0xff]  ;;  %v406_v47 = vld [vmem:[%s9760_s1 + $0x78] sm:$0xff] }
  0x32   : > { %v399_v42 = vld [vmem:[%s9760_s1 + $0x40] sm:$0xff]  ;;  %v405_v48 = vld [vmem:[%s9760_s1 + $0x70] sm:$0xff]  ;;  %v408_v49 = vld [vmem:[%s9760_s1 + $0x88] sm:$0xff] }
  0x33   : > { %v407_v50 = vld [vmem:[%s9760_s1 + $0x80] sm:$0xff]  ;;  %v412_v53 = vld [vmem:[%s9760_s1 + $0xa8] sm:$0xff]  ;;  %v414_v55 = vld [vmem:[%s9760_s1 + $0xb8] sm:$0xff] }
  0x34   : > { %v411_v54 = vld [vmem:[%s9760_s1 + $0xa0] sm:$0xff]  ;;  %v413_v56 = vld [vmem:[%s9760_s1 + $0xb0] sm:$0xff]  ;;  %v418_v59 = vld [vmem:[%s9760_s1 + $0xd8] sm:$0xff] }
  0x35   : > { %v417_v60 = vld [vmem:[%s9760_s1 + $0xd0] sm:$0xff]  ;;  %v420_v61 = vld [vmem:[%s9760_s1 + $0xe8] sm:$0xff]  ;;  %v419_v62 = vld [vmem:[%s9760_s1 + $0xe0] sm:$0xff] }
  0x36   : > { %v424_v2 = vld [vmem:[%s9760_s1 + $0x108] sm:$0xff]  ;;  %v423_v3 = vld [vmem:[%s9760_s1 + $0x100] sm:$0xff]  ;;  %v426_v4 = vld [vmem:[%s9760_s1 + $0x118] sm:$0xff] }
  0x37   : > { %5700 = vmatpush1.bf16.xpose.msra.mxu0 %v5699_v27  ;;  %6006 = vmatpush1.bf16.xpose.msra.mxu1 %v5699_v27  ;;  %v801_v27 = vld [vmem:[%s6391_s16 + $0x1d0] sm:$0xff]  ;;  %v428_v9 = vld [vmem:[%s9760_s1 + $0x128] sm:$0xff]  ;;  %v2732_v10 = vld [vmem:[%s9761_s2 + $0x18] sm:$0xff] }
  0x38   : > { %5703 = vmatprep.subr.msk.bf16.mxu0 %vm6395_vm1, %v5701_v28  ;;  %5991 = vmatprep.subr.msk.bf16.mxu1 %vm6395_vm1, %v5701_v28  ;;  %v804_v28 = vld [vmem:[%s6391_s16 + $0x1e8] sm:$0xff]  ;;  %v5754_v30 = vpack.c.bf16 %v801_v27, %v799_v26  ;;  %v2731_v5 = vld [vmem:[%s9761_s2 + $0x10] sm:$0xff]  ;;  %v2733_v15 = vld [vmem:[%s9761_s2 + $0x20] sm:$0xff] }
  0x39   : > { %v5756_v31 = vpack.c.bf16 %v806_v29, %v804_v28  ;;  %2829 = vperm.xlu1 %6190, %v2731_v5   ;;  %v2730_v11 = vld [vmem:[%s9761_s2 + $0x8] sm:$0xff]  ;;  %v429_v16 = vld [vmem:[%s9760_s1 + $0x130] sm:$0xff]  ;;  %v431_v20 = vld [vmem:[%s9760_s1 + $0x140] sm:$0xff] }
  0x3a   : > { %v2734_v14 = vld [vmem:[%s9761_s2 + $0x28] sm:$0xff]  ;;  %v434_v21 = vld [vmem:[%s9760_s1 + $0x158] sm:$0xff]  ;;  %v2737_v23 = vld [vmem:[%s9761_s2 + $0x40] sm:$0xff] }
  0x3b   : > { %v432_v17 = vld [vmem:[%s9760_s1 + $0x148] sm:$0xff]  ;;  %v674_v26 = vld [vmem:[%s9760_s1 + $0x8d8] sm:$0xff]  ;;  %v673_v27 = vld [vmem:[%s9760_s1 + $0x8d0] sm:$0xff] }
  0x3c   : > { %v2738_v22 = vld [vmem:[%s9761_s2 + $0x48] sm:$0xff]  ;;  %5600 = vmatprep.mubr.msk.f32.mxu1 %vm807_vm0, %v674_v26  ;;  %v2740_v28 = vld [vmem:[%s9761_s2 + $0x58] sm:$0xff]  ;;  %v2739_v29 = vld [vmem:[%s9761_s2 + $0x50] sm:$0xff] }
  0x3d   : > { %2834 = vperm.xlu1 %6190, %v2732_v10   ;;  %v687_v5 = vld [vmem:[%s9760_s1 + $0x940] sm:$0xff]  ;;  %v449_v8 = vld [vmem:[%s9760_s1 + $0x1d0] sm:$0xff]  ;;  %v690_v10 = vld [vmem:[%s9760_s1 + $0x958] sm:$0xff] }
  0x3e   : > { %v455_v26 = vld [vmem:[%s9760_s1 + $0x200] sm:$0xff] }
  0x3f   : > { %5705 = vmatpush1.bf16.xpose.msra.mxu0 %v5704_v33  ;;  %6007 = vmatpush1.bf16.xpose.msra.mxu1 %v5704_v33  ;;  %v805_v33 = vld [vmem:[%s6391_s16 + $0x1f0] sm:$0xff] }
  0x40   : > { %5708 = vmatprep.subr.msk.bf16.mxu0 %vm6395_vm1, %v5706_v34  ;;  %5992 = vmatprep.subr.msk.bf16.mxu1 %vm6395_vm1, %v5706_v34  ;;  %v5759_v34 = vpack.c.bf16 %v805_v33, %v803_v32  ;;  %v676_v32 = vld [vmem:[%s9760_s1 + $0x8e8] sm:$0xff]  ;;  %v675_v33 = vld [vmem:[%s9760_s1 + $0x8e0] sm:$0xff] }
  0x41   : > { %2844 = vperm.xlu1 %6190, %v2734_v14   ;;  %v451_v14 = vld [vmem:[%s9760_s1 + $0x1e0] sm:$0xff] }
  0x47   : > { %5710 = vmatpush1.bf16.xpose.msra.mxu0 %v5709_v39  ;;  %6008 = vmatpush1.bf16.xpose.msra.mxu1 %v5709_v39  ;;  %v398_v39 = vld [vmem:[%s9760_s1 + $0x38] sm:$0xff] }
  0x48   : > { %5713 = vmatprep.subr.msk.bf16.mxu0 %vm6395_vm1, %v5711_v40  ;;  %5993 = vmatprep.subr.msk.bf16.mxu1 %vm6395_vm1, %v5711_v40  ;;  %v397_v40 = vld [vmem:[%s9760_s1 + $0x30] sm:$0xff] }
  0x4f   : > { %5715 = vmatpush1.bf16.xpose.msra.mxu0 %v5714_v45  ;;  %6009 = vmatpush1.bf16.xpose.msra.mxu1 %v5714_v45  ;;  %v404_v45 = vld [vmem:[%s9760_s1 + $0x68] sm:$0xff] }
  0x50   : > { %5718 = vmatprep.subr.msk.bf16.mxu0 %vm6395_vm1, %v5716_v46  ;;  %5994 = vmatprep.subr.msk.bf16.mxu1 %vm6395_vm1, %v5716_v46  ;;  %v403_v46 = vld [vmem:[%s9760_s1 + $0x60] sm:$0xff] }
  0x57   : > { %5720 = vmatpush1.bf16.xpose.msra.mxu0 %v5719_v51  ;;  %6010 = vmatpush1.bf16.xpose.msra.mxu1 %v5719_v51  ;;  %v410_v51 = vld [vmem:[%s9760_s1 + $0x98] sm:$0xff] }
  0x58   : > { %5723 = vmatprep.subr.msk.bf16.mxu0 %vm6395_vm1, %v5721_v52  ;;  %5995 = vmatprep.subr.msk.bf16.mxu1 %vm6395_vm1, %v5721_v52  ;;  %v409_v52 = vld [vmem:[%s9760_s1 + $0x90] sm:$0xff] }
  0x5f   : > { %5725 = vmatpush1.bf16.xpose.msra.mxu0 %v5724_v57  ;;  %6011 = vmatpush1.bf16.xpose.msra.mxu1 %v5724_v57  ;;  %v416_v57 = vld [vmem:[%s9760_s1 + $0xc8] sm:$0xff] }
  0x60   : > { %5728 = vmatprep.subr.msk.bf16.mxu0 %vm6395_vm1, %v5726_v58  ;;  %5996 = vmatprep.subr.msk.bf16.mxu1 %vm6395_vm1, %v5726_v58  ;;  %v415_v58 = vld [vmem:[%s9760_s1 + $0xc0] sm:$0xff] }
  0x67   : > { %5730 = vmatpush1.bf16.xpose.msra.mxu0 %v5729_v63  ;;  %6012 = vmatpush1.bf16.xpose.msra.mxu1 %v5729_v63  ;;  %v422_v63 = vld [vmem:[%s9760_s1 + $0xf8] sm:$0xff] }
  0x68   : > { %5733 = vmatprep.subr.msk.bf16.mxu0 %vm6395_vm1, %v5731_v0  ;;  %5997 = vmatprep.subr.msk.bf16.mxu1 %vm6395_vm1, %v5731_v0  ;;  %v421_v0 = vld [vmem:[%s9760_s1 + $0xf0] sm:$0xff] }
  0x6f   : > { %5735 = vmatpush1.bf16.xpose.msra.mxu0 %v5734_v6  ;;  %6013 = vmatpush1.bf16.xpose.msra.mxu1 %v5734_v6  ;;  %v2729_v6 = vld [vmem:[%s9761_s2] sm:$0xff] }
  0x70   : > { %5738 = vmatprep.subr.msk.bf16.mxu0 %vm6395_vm1, %v5736_v7  ;;  %5998 = vmatprep.subr.msk.bf16.mxu1 %vm6395_vm1, %v5736_v7  ;;  %v425_v7 = vld [vmem:[%s9760_s1 + $0x110] sm:$0xff] }
  0x71   : > { %2819 = vperm.xlu0 %6189, %v2729_v6   ;;  %v2754_v6 = vld [vmem:[%s9761_s2 + $0xc8] sm:$0xff] }
  0x75   : > { %2824 = vperm.xlu0 %6189, %v2730_v11   ;;  %v689_v11 = vld [vmem:[%s9760_s1 + $0x950] sm:$0xff] }
  0x77   : > { %5740 = vmatpush1.bf16.xpose.msra.mxu0 %v5739_v12  ;;  %6014 = vmatpush1.bf16.xpose.msra.mxu1 %v5739_v12  ;;  %v427_v12 = vld [vmem:[%s9760_s1 + $0x120] sm:$0xff] }
  0x78   : > { %5743 = vmatprep.subr.msk.bf16.mxu0 %vm6395_vm1, %v5741_v13  ;;  %5999 = vmatprep.subr.msk.bf16.mxu1 %vm6395_vm1, %v5741_v13  ;;  %v430_v13 = vld [vmem:[%s9760_s1 + $0x138] sm:$0xff] }
  0x79   : > { %2839 = vperm.xlu0 %6189, %v2733_v15   ;;  %v454_v15 = vld [vmem:[%s9760_s1 + $0x1f8] sm:$0xff] }
  0x7f   : > { %5745 = vmatpush1.bf16.xpose.msra.mxu0 %v5744_v18  ;;  %6015 = vmatpush1.bf16.xpose.msra.mxu1 %v5744_v18  ;;  %v2736_v18 = vld [vmem:[%s9761_s2 + $0x38] sm:$0xff] }
  0x80   : > { %5748 = vmatprep.subr.msk.bf16.mxu0 %vm6395_vm1, %v5746_v19  ;;  %6000 = vmatprep.subr.msk.bf16.mxu1 %vm6395_vm1, %v5746_v19  ;;  %v2735_v19 = vld [vmem:[%s9761_s2 + $0x30] sm:$0xff] }
  0x81   : > { %2854 = vperm.xlu1 %6190, %v2736_v18   ;;  %2849 = vperm.xlu0 %6189, %v2735_v19   ;;  %v2758_v18 = vld [vmem:[%s9761_s2 + $0xe8] sm:$0xff]  ;;  %v2757_v19 = vld [vmem:[%s9761_s2 + $0xe0] sm:$0xff] }
  0x85   : > { %2864 = vperm.xlu1 %6190, %v2738_v22   ;;  %2859 = vperm.xlu0 %6189, %v2737_v23   ;;  %v694_v22 = vld [vmem:[%s9760_s1 + $0x978] sm:$0xff]  ;;  %v693_v23 = vld [vmem:[%s9760_s1 + $0x970] sm:$0xff] }
  0x87   : > { %5750 = vmatpush1.bf16.xpose.msra.mxu0 %v5749_v24  ;;  %6016 = vmatpush1.bf16.xpose.msra.mxu1 %v5749_v24  ;;  %v433_v24 = vld [vmem:[%s9760_s1 + $0x150] sm:$0xff] }
  0x88   : > { %5753 = vmatprep.subr.msk.bf16.mxu0 %vm6395_vm1, %v5751_v25  ;;  %6001 = vmatprep.subr.msk.bf16.mxu1 %vm6395_vm1, %v5751_v25  ;;  %v436_v25 = vld [vmem:[%s9760_s1 + $0x168] sm:$0xff] }
  0x89   : > { %2874 = vperm.xlu1 %6190, %v2740_v28   ;;  %2869 = vperm.xlu0 %6189, %v2739_v29   ;;  %v696_v28 = vld [vmem:[%s9760_s1 + $0x988] sm:$0xff]  ;;  %v695_v29 = vld [vmem:[%s9760_s1 + $0x980] sm:$0xff] }
  0x8f   : > { %5755 = vmatpush1.bf16.xpose.msra.mxu0 %v5754_v30  ;;  %6017 = vmatpush1.bf16.xpose.msra.mxu1 %v5754_v30  ;;  %v435_v30 = vld [vmem:[%s9760_s1 + $0x160] sm:$0xff] }
  0x90   : > { %5758 = vmatprep.subr.msk.bf16.mxu0 %vm6395_vm1, %v5756_v31  ;;  %6002 = vmatprep.subr.msk.bf16.mxu1 %vm6395_vm1, %v5756_v31  ;;  %v438_v31 = vld [vmem:[%s9760_s1 + $0x178] sm:$0xff] }
  0x97   : > { %5760 = vmatpush1.bf16.xpose.msra.mxu0 %v5759_v34  ;;  %6018 = vmatpush1.bf16.xpose.msra.mxu1 %v5759_v34  ;;  %v2742_v34 = vld [vmem:[%s9761_s2 + $0x68] sm:$0xff] }
  0x98   : > { %2884 = vperm.xlu1 %6190, %v2742_v34   ;;  %v698_v34 = vld [vmem:[%s9760_s1 + $0x998] sm:$0xff] }
  0x9e   : > { %1497 = vmatmul.mubr.f32.vlgmr.msra.gmra.mrb[0].mxu0 %v391_v35  ;;  %2343 = vmatmul.mubr.f32.vlgmr.msra.gmra.mrb[0].mxu1 %v673_v27  ;;  %v2741_v35 = vld [vmem:[%s9761_s2 + $0x60] sm:$0xff]  ;;  %v458_v27 = vld [vmem:[%s9760_s1 + $0x218] sm:$0xff] }
  0x9f   : > { %5460 = vmatprep.mubr.msk.f32.mxu0 %vm807_vm0, %v394_v36  ;;  %5601 = vmatprep.mubr.msk.f32.mxu1 %vm807_vm0, %v676_v32  ;;  %v437_v36 = vld [vmem:[%s9760_s1 + $0x170] sm:$0xff] }
  0xa0   : > { %2879 = vperm.xlu0 %6189, %v2741_v35   ;;  %v457_v32 = vld [vmem:[%s9760_s1 + $0x210] sm:$0xff] }
  0xa1   : > { %v697_v35 = vld [vmem:[%s9760_s1 + $0x990] sm:$0xff] }
  0xa2   : > { %1503 = vmatmul.mubr.f32.gmra.mrb[2].mxu0 %v393_v37  ;;  %2349 = vmatmul.mubr.f32.gmra.mrb[2].mxu1 %v675_v33  ;;  %v440_v37 = vld [vmem:[%s9760_s1 + $0x188] sm:$0xff] }
  0xa3   : > { %5461 = vmatprep.mubr.msk.f32.mxu0 %vm807_vm0, %v396_v1  ;;  %v678_v1 = vld [vmem:[%s9760_s1 + $0x8f8] sm:$0xff]  ;;  %v460_v33 = vld [vmem:[%s9760_s1 + $0x228] sm:$0xff] }
  0xa4   : > { %5602 = vmatprep.mubr.msk.f32.mxu1 %vm807_vm0, %v678_v1  ;;  %v459_v1 = vld [vmem:[%s9760_s1 + $0x220] sm:$0xff] }
  0xa6   : > { %1509 = vmatmul.mubr.f32.gmra.mrb[4].mxu0 %v395_v38  ;;  %v677_v38 = vld [vmem:[%s9760_s1 + $0x8f0] sm:$0xff] }
  0xa7   : > { %5462 = vmatprep.mubr.msk.f32.mxu0 %vm807_vm0, %v398_v39  ;;  %2355 = vmatmul.mubr.f32.gmra.mrb[4].mxu1 %v677_v38  ;;  %v2744_v39 = vld [vmem:[%s9761_s2 + $0x78] sm:$0xff] }
  0xa8   : > { %2894 = vperm.xlu1 %6190, %v2744_v39   ;;  %v462_v38 = vld [vmem:[%s9760_s1 + $0x238] sm:$0xff]  ;;  %v700_v39 = vld [vmem:[%s9760_s1 + $0x9a8] sm:$0xff] }
  0xaa   : > { %1515 = vmatmul.mubr.f32.gmra.mrb[6].mxu0 %v397_v40  ;;  %v2743_v40 = vld [vmem:[%s9761_s2 + $0x70] sm:$0xff] }
  0xab   : > { %5463 = vmatprep.mubr.msk.f32.mxu0 %vm807_vm0, %v400_v41  ;;  %v439_v41 = vld [vmem:[%s9760_s1 + $0x180] sm:$0xff]  ;;  %2889 = vperm.xlu0 %6189, %v2743_v40  }
  0xac   : > { %v699_v40 = vld [vmem:[%s9760_s1 + $0x9a0] sm:$0xff] }
  0xae   : > { %1521 = vmatmul.mubr.f32.gmra.mrb[8].mxu0 %v399_v42  ;;  %v442_v42 = vld [vmem:[%s9760_s1 + $0x198] sm:$0xff] }
  0xaf   : > { %5464 = vmatprep.mubr.msk.f32.mxu0 %vm807_vm0, %v402_v43  ;;  %v680_v43 = vld [vmem:[%s9760_s1 + $0x908] sm:$0xff] }
  0xb0   : > { %5603 = vmatprep.mubr.msk.f32.mxu1 %vm807_vm0, %v680_v43  ;;  %v461_v43 = vld [vmem:[%s9760_s1 + $0x230] sm:$0xff] }
  0xb2   : > { %1527 = vmatmul.mubr.f32.gmra.mrb[10].mxu0 %v401_v44  ;;  %v679_v44 = vld [vmem:[%s9760_s1 + $0x900] sm:$0xff] }
  0xb3   : > { %5465 = vmatprep.mubr.msk.f32.mxu0 %vm807_vm0, %v404_v45  ;;  %2361 = vmatmul.mubr.f32.gmra.mrb[6].mxu1 %v679_v44  ;;  %v2746_v45 = vld [vmem:[%s9761_s2 + $0x88] sm:$0xff] }
  0xb4   : > { %2904 = vperm.xlu1 %6190, %v2746_v45   ;;  %v464_v44 = vld [vmem:[%s9760_s1 + $0x248] sm:$0xff]  ;;  %v702_v45 = vld [vmem:[%s9760_s1 + $0x9b8] sm:$0xff] }
  0xb6   : > { %1533 = vmatmul.mubr.f32.gmra.mrb[12].mxu0 %v403_v46  ;;  %v2745_v46 = vld [vmem:[%s9761_s2 + $0x80] sm:$0xff] }
  0xb7   : > { %5466 = vmatprep.mubr.msk.f32.mxu0 %vm807_vm0, %v406_v47  ;;  %v441_v47 = vld [vmem:[%s9760_s1 + $0x190] sm:$0xff]  ;;  %2899 = vperm.xlu0 %6189, %v2745_v46  }
  0xb8   : > { %v701_v46 = vld [vmem:[%s9760_s1 + $0x9b0] sm:$0xff] }
  0xba   : > { %1539 = vmatmul.mubr.f32.gmra.mrb[14].mxu0 %v405_v48  ;;  %v444_v48 = vld [vmem:[%s9760_s1 + $0x1a8] sm:$0xff] }
  0xbb   : > { %5467 = vmatprep.mubr.msk.f32.mxu0 %vm807_vm0, %v408_v49  ;;  %v682_v49 = vld [vmem:[%s9760_s1 + $0x918] sm:$0xff] }
  0xbc   : > { %5604 = vmatprep.mubr.msk.f32.mxu1 %vm807_vm0, %v682_v49  ;;  %v463_v49 = vld [vmem:[%s9760_s1 + $0x240] sm:$0xff] }
  0xbe   : > { %1545 = vmatmul.mubr.f32.gmra.mrb[16].mxu0 %v407_v50  ;;  %v681_v50 = vld [vmem:[%s9760_s1 + $0x910] sm:$0xff] }
  0xbf   : > { %5468 = vmatprep.mubr.msk.f32.mxu0 %vm807_vm0, %v410_v51  ;;  %2367 = vmatmul.mubr.f32.gmra.mrb[8].mxu1 %v681_v50  ;;  %v2748_v51 = vld [vmem:[%s9761_s2 + $0x98] sm:$0xff] }
  0xc0   : > { %2914 = vperm.xlu1 %6190, %v2748_v51   ;;  %v466_v50 = vld [vmem:[%s9760_s1 + $0x258] sm:$0xff]  ;;  %v704_v51 = vld [vmem:[%s9760_s1 + $0x9c8] sm:$0xff] }
  0xc2   : > { %1551 = vmatmul.mubr.f32.gmra.mrb[18].mxu0 %v409_v52  ;;  %v2747_v52 = vld [vmem:[%s9761_s2 + $0x90] sm:$0xff] }
  0xc3   : > { %5469 = vmatprep.mubr.msk.f32.mxu0 %vm807_vm0, %v412_v53  ;;  %v443_v53 = vld [vmem:[%s9760_s1 + $0x1a0] sm:$0xff]  ;;  %2909 = vperm.xlu0 %6189, %v2747_v52  }
  0xc4   : > { %v703_v52 = vld [vmem:[%s9760_s1 + $0x9c0] sm:$0xff] }
  0xc6   : > { %1557 = vmatmul.mubr.f32.gmra.mrb[20].mxu0 %v411_v54  ;;  %v446_v54 = vld [vmem:[%s9760_s1 + $0x1b8] sm:$0xff] }
  0xc7   : > { %5470 = vmatprep.mubr.msk.f32.mxu0 %vm807_vm0, %v414_v55  ;;  %v684_v55 = vld [vmem:[%s9760_s1 + $0x928] sm:$0xff] }
  0xc8   : > { %5605 = vmatprep.mubr.msk.f32.mxu1 %vm807_vm0, %v684_v55  ;;  %v465_v55 = vld [vmem:[%s9760_s1 + $0x250] sm:$0xff] }
  0xca   : > { %1563 = vmatmul.mubr.f32.gmra.mrb[22].mxu0 %v413_v56  ;;  %v683_v56 = vld [vmem:[%s9760_s1 + $0x920] sm:$0xff] }
  0xcb   : > { %5471 = vmatprep.mubr.msk.f32.mxu0 %vm807_vm0, %v416_v57  ;;  %2373 = vmatmul.mubr.f32.gmra.mrb[10].mxu1 %v683_v56  ;;  %v2750_v57 = vld [vmem:[%s9761_s2 + $0xa8] sm:$0xff] }
  0xcc   : > { %2924 = vperm.xlu1 %6190, %v2750_v57   ;;  %v468_v56 = vld [vmem:[%s9760_s1 + $0x268] sm:$0xff]  ;;  %v706_v57 = vld [vmem:[%s9760_s1 + $0x9d8] sm:$0xff] }
  0xce   : > { %1569 = vmatmul.mubr.f32.gmra.mrb[24].mxu0 %v415_v58  ;;  %v2749_v58 = vld [vmem:[%s9761_s2 + $0xa0] sm:$0xff] }
  0xcf   : > { %5472 = vmatprep.mubr.msk.f32.mxu0 %vm807_vm0, %v418_v59  ;;  %v445_v59 = vld [vmem:[%s9760_s1 + $0x1b0] sm:$0xff]  ;;  %2919 = vperm.xlu0 %6189, %v2749_v58  }
  0xd0   : > { %v705_v58 = vld [vmem:[%s9760_s1 + $0x9d0] sm:$0xff] }
  0xd2   : > { %1575 = vmatmul.mubr.f32.gmra.mrb[26].mxu0 %v417_v60  ;;  %v448_v60 = vld [vmem:[%s9760_s1 + $0x1c8] sm:$0xff] }
  0xd3   : > { %5473 = vmatprep.mubr.msk.f32.mxu0 %vm807_vm0, %v420_v61  ;;  %v686_v61 = vld [vmem:[%s9760_s1 + $0x938] sm:$0xff] }
  0xd4   : > { %5606 = vmatprep.mubr.msk.f32.mxu1 %vm807_vm0, %v686_v61  ;;  %v467_v61 = vld [vmem:[%s9760_s1 + $0x260] sm:$0xff] }
  0xd6   : > { %1581 = vmatmul.mubr.f32.gmra.mrb[28].mxu0 %v419_v62  ;;  %v685_v62 = vld [vmem:[%s9760_s1 + $0x930] sm:$0xff] }
  0xd7   : > { %5474 = vmatprep.mubr.msk.f32.mxu0 %vm807_vm0, %v422_v63  ;;  %2379 = vmatmul.mubr.f32.gmra.mrb[12].mxu1 %v685_v62  ;;  %v2752_v63 = vld [vmem:[%s9761_s2 + $0xb8] sm:$0xff] }
  0xd8   : > { %2934 = vperm.xlu1 %6190, %v2752_v63   ;;  %v470_v62 = vld [vmem:[%s9760_s1 + $0x278] sm:$0xff]  ;;  %v708_v63 = vld [vmem:[%s9760_s1 + $0x9e8] sm:$0xff] }
  0xda   : > { %1587 = vmatmul.mubr.f32.gmra.mrb[30].mxu0 %v421_v0  ;;  %v2751_v0 = vld [vmem:[%s9761_s2 + $0xb0] sm:$0xff] }
  0xdb   : > { %5475 = vmatprep.mubr.msk.f32.mxu0 %vm807_vm0, %v424_v2  ;;  %v447_v2 = vld [vmem:[%s9760_s1 + $0x1c0] sm:$0xff]  ;;  %2929 = vperm.xlu0 %6189, %v2751_v0  }
  0xdc   : > { %2944 = vperm.xlu1 %6190, %v2754_v6   ;;  %v707_v0 = vld [vmem:[%s9760_s1 + $0x9e0] sm:$0xff]  ;;  %v710_v6 = vld [vmem:[%s9760_s1 + $0x9f8] sm:$0xff] }
  0xde   : > { %1593 = vmatmul.mubr.f32.gmra.mrb[32].mxu0 %v423_v3  ;;  %v450_v3 = vld [vmem:[%s9760_s1 + $0x1d8] sm:$0xff] }
  0xdf   : > { %5476 = vmatprep.mubr.msk.f32.mxu0 %vm807_vm0, %v426_v4  ;;  %v688_v4 = vld [vmem:[%s9760_s1 + $0x948] sm:$0xff] }
  0xe0   : > { %5607 = vmatprep.mubr.msk.f32.mxu1 %vm807_vm0, %v688_v4  ;;  %v469_v4 = vld [vmem:[%s9760_s1 + $0x270] sm:$0xff] }
  0xe1   : > { %2385 = vmatmul.mubr.f32.gmra.mrb[14].mxu1 %v687_v5  ;;  %v472_v5 = vld [vmem:[%s9760_s1 + $0x288] sm:$0xff] }
  0xe2   : > { %1599 = vmatmul.mubr.f32.gmra.mrb[34].mxu0 %v425_v7  ;;  %v2753_v7 = vld [vmem:[%s9761_s2 + $0xc0] sm:$0xff]  ;;  %5608 = vmatprep.mubr.msk.f32.mxu1 %vm807_vm0, %v690_v10 }
  0xe3   : > { %5477 = vmatprep.mubr.msk.f32.mxu0 %vm807_vm0, %v428_v9  ;;  %v452_v9 = vld [vmem:[%s9760_s1 + $0x1e8] sm:$0xff]  ;;  %2939 = vperm.xlu0 %6189, %v2753_v7   ;;  %v709_v7 = vld [vmem:[%s9760_s1 + $0x9f0] sm:$0xff]  ;;  %v471_v10 = vld [vmem:[%s9760_s1 + $0x280] sm:$0xff] }
  0xe5   : > { %2391 = vmatmul.mubr.f32.gmra.mrb[16].mxu1 %v689_v11  ;;  %v474_v11 = vld [vmem:[%s9760_s1 + $0x298] sm:$0xff] }
  0xe6   : > { %1605 = vmatmul.mubr.f32.gmra.mrb[36].mxu0 %v427_v12  ;;  %v2756_v12 = vld [vmem:[%s9761_s2 + $0xd8] sm:$0xff] }
  0xe7   : > { %5478 = vmatprep.mubr.msk.f32.mxu0 %vm807_vm0, %v430_v13  ;;  %v2755_v13 = vld [vmem:[%s9761_s2 + $0xd0] sm:$0xff]  ;;  %2954 = vperm.xlu1 %6190, %v2756_v12   ;;  %v712_v12 = vld [vmem:[%s9760_s1 + $0xa08] sm:$0xff] }
  0xe8   : > { %2949 = vperm.xlu0 %6189, %v2755_v13   ;;  %v711_v13 = vld [vmem:[%s9760_s1 + $0xa00] sm:$0xff] }
  0xea   : > { %1611 = vmatmul.mubr.f32.gmra.mrb[38].mxu0 %v429_v16  ;;  %v692_v16 = vld [vmem:[%s9760_s1 + $0x968] sm:$0xff] }
  0xeb   : > { %5479 = vmatprep.mubr.msk.f32.mxu0 %vm807_vm0, %v432_v17  ;;  %5609 = vmatprep.mubr.msk.f32.mxu1 %vm807_vm0, %v692_v16  ;;  %v691_v17 = vld [vmem:[%s9760_s1 + $0x960] sm:$0xff]  ;;  %v473_v16 = vld [vmem:[%s9760_s1 + $0x290] sm:$0xff] }
  0xec   : > { %2397 = vmatmul.mubr.f32.gmra.mrb[18].mxu1 %v691_v17  ;;  %2964 = vperm.xlu1 %6190, %v2758_v18   ;;  %v476_v17 = vld [vmem:[%s9760_s1 + $0x2a8] sm:$0xff]  ;;  %v714_v18 = vld [vmem:[%s9760_s1 + $0xa18] sm:$0xff] }
  0xed   : > { %2959 = vperm.xlu0 %6189, %v2757_v19   ;;  %5610 = vmatprep.mubr.msk.f32.mxu1 %vm807_vm0, %v694_v22  ;;  %v713_v19 = vld [vmem:[%s9760_s1 + $0xa10] sm:$0xff]  ;;  %v475_v22 = vld [vmem:[%s9760_s1 + $0x2a0] sm:$0xff] }
  0xee   : > { %1617 = vmatmul.mubr.f32.gmra.mrb[40].mxu0 %v431_v20  ;;  %v453_v20 = vld [vmem:[%s9760_s1 + $0x1f0] sm:$0xff] }
  0xef   : > { %5480 = vmatprep.mubr.msk.f32.mxu0 %vm807_vm0, %v434_v21  ;;  %v456_v21 = vld [vmem:[%s9760_s1 + $0x208] sm:$0xff] }
  0xf0   : > { %2403 = vmatmul.mubr.f32.gmra.mrb[20].mxu1 %v693_v23  ;;  %v478_v23 = vld [vmem:[%s9760_s1 + $0x2b8] sm:$0xff] }
  0xf1   : > { %5611 = vmatprep.mubr.msk.f32.mxu1 %vm807_vm0, %v696_v28  ;;  %v477_v28 = vld [vmem:[%s9760_s1 + $0x2b0] sm:$0xff] }
  0xf2   : > { %1623 = vmatmul.mubr.f32.gmra.mrb[42].mxu0 %v433_v24  ;;  %v2760_v24 = vld [vmem:[%s9761_s2 + $0xf8] sm:$0xff] }
  0xf3   : > { %5481 = vmatprep.mubr.msk.f32.mxu0 %vm807_vm0, %v436_v25  ;;  %v2759_v25 = vld [vmem:[%s9761_s2 + $0xf0] sm:$0xff]  ;;  %2974 = vperm.xlu1 %6190, %v2760_v24   ;;  %v716_v24 = vld [vmem:[%s9760_s1 + $0xa28] sm:$0xff] }
  0xf4   : > { %2969 = vperm.xlu0 %6189, %v2759_v25   ;;  %2409 = vmatmul.mubr.f32.gmra.mrb[22].mxu1 %v695_v29  ;;  %v715_v25 = vld [vmem:[%s9760_s1 + $0xa20] sm:$0xff]  ;;  %v480_v29 = vld [vmem:[%s9760_s1 + $0x2c8] sm:$0xff] }
  0xf5   : > { %5612 = vmatprep.mubr.msk.f32.mxu1 %vm807_vm0, %v698_v34  ;;  %v482_v34 = vld [vmem:[%s9760_s1 + $0x2d8] sm:$0xff] }
  0xf6   : > { %1629 = vmatmul.mubr.f32.gmra.mrb[44].mxu0 %v435_v30  ;;  %v2762_v30 = vld [vmem:[%s9761_s2 + $0x108] sm:$0xff] }
  0xf7   : > { %5482 = vmatprep.mubr.msk.f32.mxu0 %vm807_vm0, %v438_v31  ;;  %v2761_v31 = vld [vmem:[%s9761_s2 + $0x100] sm:$0xff]  ;;  %2984 = vperm.xlu1 %6190, %v2762_v30   ;;  %v718_v30 = vld [vmem:[%s9760_s1 + $0xa38] sm:$0xff] }
  0xf8   : > { %2979 = vperm.xlu0 %6189, %v2761_v31   ;;  %2415 = vmatmul.mubr.f32.gmra.mrb[24].mxu1 %v697_v35  ;;  %v717_v31 = vld [vmem:[%s9760_s1 + $0xa30] sm:$0xff]  ;;  %v720_v35 = vld [vmem:[%s9760_s1 + $0xa48] sm:$0xff] }
  0xf9   : > { %5613 = vmatprep.mubr.msk.f32.mxu1 %vm807_vm0, %v700_v39  ;;  %v722_v39 = vld [vmem:[%s9760_s1 + $0xa58] sm:$0xff] }
  0xfa   : > { %1635 = vmatmul.mubr.f32.gmra.mrb[46].mxu0 %v437_v36  ;;  %v2764_v36 = vld [vmem:[%s9761_s2 + $0x118] sm:$0xff] }
  0xfb   : > { %5483 = vmatprep.mubr.msk.f32.mxu0 %vm807_vm0, %v440_v37  ;;  %v2763_v37 = vld [vmem:[%s9761_s2 + $0x110] sm:$0xff]  ;;  %2994 = vperm.xlu1 %6190, %v2764_v36   ;;  %v719_v36 = vld [vmem:[%s9760_s1 + $0xa40] sm:$0xff] }
  0xfc   : > { %2989 = vperm.xlu0 %6189, %v2763_v37   ;;  %2421 = vmatmul.mubr.f32.gmra.mrb[26].mxu1 %v699_v40  ;;  %v2784_v37 = vld [vmem:[%s9761_s2 + $0x1b8] sm:$0xff]  ;;  %v721_v40 = vld [vmem:[%s9760_s1 + $0xa50] sm:$0xff] }
  0xfd   : > { %5614 = vmatprep.mubr.msk.f32.mxu1 %vm807_vm0, %v702_v45  ;;  %v723_v45 = vld [vmem:[%s9760_s1 + $0xa60] sm:$0xff] }
  0xfe   : > { %1641 = vmatmul.mubr.f32.gmra.mrb[48].mxu0 %v439_v41  ;;  %v2766_v41 = vld [vmem:[%s9761_s2 + $0x128] sm:$0xff] }
  0xff   : > { %5484 = vmatprep.mubr.msk.f32.mxu0 %vm807_vm0, %v442_v42  ;;  %v2765_v42 = vld [vmem:[%s9761_s2 + $0x120] sm:$0xff]  ;;  %3004 = vperm.xlu1 %6190, %v2766_v41  }
 0x100   : > { %2999 = vperm.xlu0 %6189, %v2765_v42   ;;  %2427 = vmatmul.mubr.f32.gmra.mrb[28].mxu1 %v701_v46  ;;  %v2785_v41 = vld [vmem:[%s9761_s2 + $0x1c0] sm:$0xff]  ;;  %v2786_v46 = vld [vmem:[%s9761_s2 + $0x1c8] sm:$0xff] }
 0x101   : > { %5615 = vmatprep.mubr.msk.f32.mxu1 %vm807_vm0, %v704_v51  ;;  %v483_v42 = vld [vmem:[%s9760_s1 + $0x2e0] sm:$0xff]  ;;  %v2787_v51 = vld [vmem:[%s9761_s2 + $0x1d0] sm:$0xff] }
 0x102   : > { %1647 = vmatmul.mubr.f32.gmra.mrb[50].mxu0 %v441_v47  ;;  %v2768_v47 = vld [vmem:[%s9761_s2 + $0x138] sm:$0xff] }
 0x103   : > { %5485 = vmatprep.mubr.msk.f32.mxu0 %vm807_vm0, %v444_v48  ;;  %v2767_v48 = vld [vmem:[%s9761_s2 + $0x130] sm:$0xff]  ;;  %3014 = vperm.xlu1 %6190, %v2768_v47  }
 0x104   : > { %3009 = vperm.xlu0 %6189, %v2767_v48   ;;  %2433 = vmatmul.mubr.f32.gmra.mrb[30].mxu1 %v703_v52  ;;  %v485_v47 = vld [vmem:[%s9760_s1 + $0x2f0] sm:$0xff]  ;;  %v488_v48 = vld [vmem:[%s9760_s1 + $0x308] sm:$0xff]  ;;  %v487_v52 = vld [vmem:[%s9760_s1 + $0x300] sm:$0xff] }
 0x105   : > { %5616 = vmatprep.mubr.msk.f32.mxu1 %vm807_vm0, %v706_v57  ;;  %v489_v57 = vld [vmem:[%s9760_s1 + $0x310] sm:$0xff] }
 0x106   : > { %1653 = vmatmul.mubr.f32.gmra.mrb[52].mxu0 %v443_v53  ;;  %v2770_v53 = vld [vmem:[%s9761_s2 + $0x148] sm:$0xff] }
 0x107   : > { %5486 = vmatprep.mubr.msk.f32.mxu0 %vm807_vm0, %v446_v54  ;;  %v2769_v54 = vld [vmem:[%s9761_s2 + $0x140] sm:$0xff]  ;;  %3024 = vperm.xlu1 %6190, %v2770_v53   ;;  %v490_v53 = vld [vmem:[%s9760_s1 + $0x318] sm:$0xff] }
 0x108   : > { %3019 = vperm.xlu0 %6189, %v2769_v54   ;;  %2439 = vmatmul.mubr.f32.gmra.mrb[32].mxu1 %v705_v58  ;;  %v728_v54 = vld [vmem:[%s9760_s1 + $0xa88] sm:$0xff] }
 0x109   : > { %5617 = vmatprep.mubr.msk.f32.mxu1 %vm807_vm0, %v708_v63  ;;  %v492_v58 = vld [vmem:[%s9760_s1 + $0x328] sm:$0xff]  ;;  %v494_v63 = vld [vmem:[%s9760_s1 + $0x338] sm:$0xff] }
 0x10a   : > { %1659 = vmatmul.mubr.f32.gmra.mrb[54].mxu0 %v445_v59  ;;  %v2772_v59 = vld [vmem:[%s9761_s2 + $0x158] sm:$0xff] }
 0x10b   : > { %5487 = vmatprep.mubr.msk.f32.mxu0 %vm807_vm0, %v448_v60  ;;  %v2771_v60 = vld [vmem:[%s9761_s2 + $0x150] sm:$0xff]  ;;  %3034 = vperm.xlu1 %6190, %v2772_v59   ;;  %v730_v59 = vld [vmem:[%s9760_s1 + $0xa98] sm:$0xff] }
 0x10c   : > { %3029 = vperm.xlu0 %6189, %v2771_v60   ;;  %2445 = vmatmul.mubr.f32.gmra.mrb[34].mxu1 %v707_v0  ;;  %v729_v60 = vld [vmem:[%s9760_s1 + $0xa90] sm:$0xff]  ;;  %v732_v0 = vld [vmem:[%s9760_s1 + $0xaa8] sm:$0xff] }
 0x10d   : > { %5618 = vmatprep.mubr.msk.f32.mxu1 %vm807_vm0, %v710_v6  ;;  %v734_v6 = vld [vmem:[%s9760_s1 + $0xab8] sm:$0xff] }
 0x10e   : > { %1665 = vmatmul.mubr.f32.gmra.mrb[56].mxu0 %v447_v2  ;;  %v2774_v2 = vld [vmem:[%s9761_s2 + $0x168] sm:$0xff] }
 0x10f   : > { %5488 = vmatprep.mubr.msk.f32.mxu0 %vm807_vm0, %v450_v3  ;;  %v2773_v3 = vld [vmem:[%s9761_s2 + $0x160] sm:$0xff]  ;;  %3044 = vperm.xlu1 %6190, %v2774_v2  }
 0x110   : > { %3039 = vperm.xlu0 %6189, %v2773_v3   ;;  %2451 = vmatmul.mubr.f32.gmra.mrb[36].mxu1 %v709_v7  ;;  %v731_v2 = vld [vmem:[%s9760_s1 + $0xaa0] sm:$0xff]  ;;  %v2790_v3 = vld [vmem:[%s9761_s2 + $0x1e8] sm:$0xff]  ;;  %v733_v7 = vld [vmem:[%s9760_s1 + $0xab0] sm:$0xff] }
 0x111   : > { %5619 = vmatprep.mubr.msk.f32.mxu1 %vm807_vm0, %v712_v12  ;;  %v735_v12 = vld [vmem:[%s9760_s1 + $0xac0] sm:$0xff] }
 0x112   : > { %1671 = vmatmul.mubr.f32.gmra.mrb[58].mxu0 %v449_v8  ;;  %v2776_v8 = vld [vmem:[%s9761_s2 + $0x178] sm:$0xff] }
 0x113   : > { %5489 = vmatprep.mubr.msk.f32.mxu0 %vm807_vm0, %v452_v9  ;;  %v2775_v9 = vld [vmem:[%s9761_s2 + $0x170] sm:$0xff]  ;;  %3054 = vperm.xlu1 %6190, %v2776_v8  }
 0x114   : > { %3049 = vperm.xlu0 %6189, %v2775_v9   ;;  %2457 = vmatmul.mubr.f32.gmra.mrb[38].mxu1 %v711_v13  ;;  %v2791_v8 = vld [vmem:[%s9761_s2 + $0x1f0] sm:$0xff]  ;;  %v495_v9 = vld [vmem:[%s9760_s1 + $0x340] sm:$0xff]  ;;  %v2792_v13 = vld [vmem:[%s9761_s2 + $0x1f8] sm:$0xff] }
 0x115   : > { %5620 = vmatprep.mubr.msk.f32.mxu1 %vm807_vm0, %v714_v18  ;;  %v737_v18 = vld [vmem:[%s9760_s1 + $0xad0] sm:$0xff] }
 0x116   : > { %1677 = vmatmul.mubr.f32.gmra.mrb[60].mxu0 %v451_v14  ;;  %v2778_v14 = vld [vmem:[%s9761_s2 + $0x188] sm:$0xff] }
 0x117   : > { %5490 = vmatprep.mubr.msk.f32.mxu0 %vm807_vm0, %v454_v15  ;;  %v2777_v15 = vld [vmem:[%s9761_s2 + $0x180] sm:$0xff]  ;;  %3064 = vperm.xlu1 %6190, %v2778_v14   ;;  %v497_v14 = vld [vmem:[%s9760_s1 + $0x350] sm:$0xff] }
 0x118   : > { %3059 = vperm.xlu0 %6189, %v2777_v15   ;;  %2463 = vmatmul.mubr.f32.gmra.mrb[40].mxu1 %v713_v19  ;;  %v500_v15 = vld [vmem:[%s9760_s1 + $0x368] sm:$0xff] }
 0x119   : > { %5621 = vmatprep.mubr.msk.f32.mxu1 %vm807_vm0, %v716_v24 }
 0x11a   : > { %1683 = vmatmul.mubr.f32.gmra.mrb[62].mxu0 %v453_v20  ;;  %v2780_v20 = vld [vmem:[%s9761_s2 + $0x198] sm:$0xff] }
 0x11b   : > { %5491 = vmatprep.mubr.msk.f32.mxu0 %vm807_vm0, %v456_v21  ;;  %v2779_v21 = vld [vmem:[%s9761_s2 + $0x190] sm:$0xff]  ;;  %3074 = vperm.xlu1 %6190, %v2780_v20   ;;  %v2793_v20 = vld [vmem:[%s9761_s2 + $0x200] sm:$0xff] }
 0x11c   : > { %3069 = vperm.xlu0 %6189, %v2779_v21   ;;  %2469 = vmatmul.mubr.f32.gmra.mrb[42].mxu1 %v715_v25  ;;  %v499_v21 = vld [vmem:[%s9760_s1 + $0x360] sm:$0xff] }
 0x11d   : > { %5622 = vmatprep.mubr.msk.f32.mxu1 %vm807_vm0, %v718_v30  ;;  %v739_v25 = vld [vmem:[%s9760_s1 + $0xae0] sm:$0xff]  ;;  %v742_v30 = vld [vmem:[%s9760_s1 + $0xaf8] sm:$0xff] }
 0x11e   : > { %1689 = vmatmul.mubr.f32.gmra.mrb[64].mxu0 %v455_v26  ;;  %v2782_v26 = vld [vmem:[%s9761_s2 + $0x1a8] sm:$0xff] }
 0x11f   : > { %5492 = vmatprep.mubr.msk.f32.mxu0 %vm807_vm0, %v458_v27  ;;  %v2781_v27 = vld [vmem:[%s9761_s2 + $0x1a0] sm:$0xff]  ;;  %3084 = vperm.xlu1 %6190, %v2782_v26  }
 0x120   : > { %3079 = vperm.xlu0 %6189, %v2781_v27   ;;  %2475 = vmatmul.mubr.f32.gmra.mrb[44].mxu1 %v717_v31  ;;  %v2794_v27 = vld [vmem:[%s9761_s2 + $0x208] sm:$0xff] }
 0x121   : > { %5623 = vmatprep.mubr.msk.f32.mxu1 %vm807_vm0, %v720_v35  ;;  %v503_v35 = vld [vmem:[%s9760_s1 + $0x380] sm:$0xff] }
 0x122   : > { %1695 = vmatmul.mubr.f32.gmra.mrb[66].mxu0 %v457_v32  ;;  %v2783_v32 = vld [vmem:[%s9761_s2 + $0x1b0] sm:$0xff] }
 0x123   : > { %5493 = vmatprep.mubr.msk.f32.mxu0 %vm807_vm0, %v460_v33  ;;  %v479_v33 = vld [vmem:[%s9760_s1 + $0x2c0] sm:$0xff]  ;;  %3094 = vperm.xlu1 %6190, %v2784_v37  }
 0x124   : > { %3089 = vperm.xlu0 %6189, %v2783_v32   ;;  %2481 = vmatmul.mubr.f32.gmra.mrb[46].mxu1 %v719_v36  ;;  %v741_v32 = vld [vmem:[%s9760_s1 + $0xaf0] sm:$0xff]  ;;  %v506_v36 = vld [vmem:[%s9760_s1 + $0x398] sm:$0xff] }
 0x125   : > { %5624 = vmatprep.mubr.msk.f32.mxu1 %vm807_vm0, %v722_v39  ;;  %v505_v39 = vld [vmem:[%s9760_s1 + $0x390] sm:$0xff] }
 0x126   : > { %1701 = vmatmul.mubr.f32.gmra.mrb[68].mxu0 %v459_v1  ;;  %v481_v1 = vld [vmem:[%s9760_s1 + $0x2d0] sm:$0xff] }
 0x127   : > { %5494 = vmatprep.mubr.msk.f32.mxu0 %vm807_vm0, %v462_v38  ;;  %v484_v38 = vld [vmem:[%s9760_s1 + $0x2e8] sm:$0xff]  ;;  %3104 = vperm.xlu1 %6190, %v2786_v46  }
 0x128   : > { %2487 = vmatmul.mubr.f32.gmra.mrb[48].mxu1 %v721_v40  ;;  %3099 = vperm.xlu0 %6189, %v2785_v41   ;;  %v508_v40 = vld [vmem:[%s9760_s1 + $0x3a8] sm:$0xff] }
 0x12a   : > { %1707 = vmatmul.mubr.f32.gmra.mrb[70].mxu0 %v461_v43  ;;  %v486_v43 = vld [vmem:[%s9760_s1 + $0x2f8] sm:$0xff] }
 0x12b   : > { %5495 = vmatprep.mubr.msk.f32.mxu0 %vm807_vm0, %v464_v44  ;;  %v724_v44 = vld [vmem:[%s9760_s1 + $0xa68] sm:$0xff] }
 0x12c   : > { %5625 = vmatprep.mubr.msk.f32.mxu1 %vm807_vm0, %v724_v44  ;;  %3109 = vperm.xlu0 %6189, %v2787_v51   ;;  %v507_v44 = vld [vmem:[%s9760_s1 + $0x3a0] sm:$0xff]  ;;  %v7425_v51 = vpop.permute.xlu0 %2819 }
 0x12d   : > { %2493 = vmatmul.mubr.f32.gmra.mrb[50].mxu1 %v723_v45  ;;  %v510_v45 = vld [vmem:[%s9760_s1 + $0x3b8] sm:$0xff]  ;;  %9845 = vst [vmem:[#allocation17_spill] sm:$0xff] %v7425_v51 }
 0x12e   : > { %1713 = vmatmul.mubr.f32.gmra.mrb[72].mxu0 %v463_v49  ;;  %v726_v49 = vld [vmem:[%s9760_s1 + $0xa78] sm:$0xff] }
 0x12f   : > { %5496 = vmatprep.mubr.msk.f32.mxu0 %vm807_vm0, %v466_v50  ;;  %5626 = vmatprep.mubr.msk.f32.mxu1 %vm807_vm0, %v726_v49  ;;  %v725_v50 = vld [vmem:[%s9760_s1 + $0xa70] sm:$0xff] }
 0x130   : > { %v509_v49 = vld [vmem:[%s9760_s1 + $0x3b0] sm:$0xff] }
 0x131   : > { %2499 = vmatmul.mubr.f32.gmra.mrb[52].mxu1 %v725_v50  ;;  %v512_v50 = vld [vmem:[%s9760_s1 + $0x3c8] sm:$0xff] }
 0x132   : > { %1719 = vmatmul.mubr.f32.gmra.mrb[74].mxu0 %v465_v55  ;;  %5627 = vmatprep.mubr.msk.f32.mxu1 %vm807_vm0, %v728_v54  ;;  %v727_v55 = vld [vmem:[%s9760_s1 + $0xa80] sm:$0xff]  ;;  %v2799_v54 = vld [vmem:[%s9761_s2 + $0x230] sm:$0xff] }
 0x133   : > { %5497 = vmatprep.mubr.msk.f32.mxu0 %vm807_vm0, %v468_v56  ;;  %v2788_v56 = vld [vmem:[%s9761_s2 + $0x1d8] sm:$0xff] }
 0x134   : > { %3114 = vperm.xlu1 %6190, %v2788_v56   ;;  %v514_v56 = vld [vmem:[%s9760_s1 + $0x3d8] sm:$0xff] }
 0x135   : > { %2505 = vmatmul.mubr.f32.gmra.mrb[54].mxu1 %v727_v55  ;;  %v511_v55 = vld [vmem:[%s9760_s1 + $0x3c0] sm:$0xff] }
 0x136   : > { %1725 = vmatmul.mubr.f32.gmra.mrb[76].mxu0 %v467_v61  ;;  %5628 = vmatprep.mubr.msk.f32.mxu1 %vm807_vm0, %v730_v59  ;;  %v2789_v61 = vld [vmem:[%s9761_s2 + $0x1e0] sm:$0xff] }
 0x137   : > { %5498 = vmatprep.mubr.msk.f32.mxu0 %vm807_vm0, %v470_v62  ;;  %v491_v62 = vld [vmem:[%s9760_s1 + $0x320] sm:$0xff]  ;;  %3119 = vperm.xlu0 %6189, %v2789_v61   ;;  %v2800_v61 = vld [vmem:[%s9761_s2 + $0x238] sm:$0xff] }
 0x138   : > { %3124 = vperm.xlu1 %6190, %v2790_v3  }
 0x139   : > { %2511 = vmatmul.mubr.f32.gmra.mrb[56].mxu1 %v729_v60  ;;  %v7447_v60 = vpop.permute.xlu0 %2824 }
 0x13a   : > { %1731 = vmatmul.mubr.f32.gmra.mrb[78].mxu0 %v469_v4  ;;  %5629 = vmatprep.mubr.msk.f32.mxu1 %vm807_vm0, %v732_v0  ;;  %v493_v4 = vld [vmem:[%s9760_s1 + $0x330] sm:$0xff]  ;;  %9851 = vst [vmem:[#allocation23_spill] sm:$0xff] %v7447_v60  ;;  %v594_v60 = vld [vmem:[%s9760_s1 + $0x658] sm:$0xff] }
 0x13b   : > { %5499 = vmatprep.mubr.msk.f32.mxu0 %vm807_vm0, %v472_v5  ;;  %v496_v5 = vld [vmem:[%s9760_s1 + $0x348] sm:$0xff]  ;;  %3129 = vperm.xlu0 %6189, %v2791_v8  }
 0x13c   : > { %3134 = vperm.xlu1 %6190, %v2792_v13  }
 0x13d   : > { %2517 = vmatmul.mubr.f32.gmra.mrb[58].mxu1 %v731_v2 }
 0x13e   : > { %1737 = vmatmul.mubr.f32.gmra.mrb[80].mxu0 %v471_v10  ;;  %5630 = vmatprep.mubr.msk.f32.mxu1 %vm807_vm0, %v734_v6  ;;  %v498_v10 = vld [vmem:[%s9760_s1 + $0x358] sm:$0xff] }
 0x13f   : > { %5500 = vmatprep.mubr.msk.f32.mxu0 %vm807_vm0, %v474_v11  ;;  %v736_v11 = vld [vmem:[%s9760_s1 + $0xac8] sm:$0xff]  ;;  %3139 = vperm.xlu0 %6189, %v2793_v20   ;;  %v518_v6 = vld [vmem:[%s9760_s1 + $0x3f8] sm:$0xff]  ;;  %v519_v20 = vld [vmem:[%s9760_s1 + $0x400] sm:$0xff] }
 0x140   : > { %3144 = vperm.xlu1 %6190, %v2794_v27   ;;  %v2804_v27 = vld [vmem:[%s9761_s2 + $0x258] sm:$0xff] }
 0x141   : > { %2523 = vmatmul.mubr.f32.gmra.mrb[60].mxu1 %v733_v7  ;;  %v7475_v7 = vpop.permute.xlu0 %2839 }
 0x142   : > { %1743 = vmatmul.mubr.f32.gmra.mrb[82].mxu0 %v473_v16  ;;  %5631 = vmatprep.mubr.msk.f32.mxu1 %vm807_vm0, %v736_v11  ;;  %v738_v16 = vld [vmem:[%s9760_s1 + $0xad8] sm:$0xff]  ;;  %9855 = vst [vmem:[#allocation27_spill] sm:$0xff] %v7475_v7  ;;  %v517_v11 = vld [vmem:[%s9760_s1 + $0x3f0] sm:$0xff] }
 0x143   : > { %5501 = vmatprep.mubr.msk.f32.mxu0 %vm807_vm0, %v476_v17 }
 0x145   : > { %2529 = vmatmul.mubr.f32.gmra.mrb[62].mxu1 %v735_v12  ;;  %v520_v12 = vld [vmem:[%s9760_s1 + $0x408] sm:$0xff] }
 0x146   : > { %1749 = vmatmul.mubr.f32.gmra.mrb[84].mxu0 %v475_v22  ;;  %5632 = vmatprep.mubr.msk.f32.mxu1 %vm807_vm0, %v738_v16  ;;  %v502_v22 = vld [vmem:[%s9760_s1 + $0x378] sm:$0xff]  ;;  %v7497_v16 = vpop.permute.xlu0 %2849 }
 0x147   : > { %5502 = vmatprep.mubr.msk.f32.mxu0 %vm807_vm0, %v478_v23  ;;  %v740_v23 = vld [vmem:[%s9760_s1 + $0xae8] sm:$0xff]  ;;  %9861 = vst [vmem:[#allocation33_spill] sm:$0xff] %v7497_v16  ;;  %v575_v16 = vld [vmem:[%s9760_s1 + $0x5c0] sm:$0xff] }
 0x149   : > { %2535 = vmatmul.mubr.f32.gmra.mrb[64].mxu1 %v737_v18  ;;  %v2803_v18 = vld [vmem:[%s9761_s2 + $0x250] sm:$0xff] }
 0x14a   : > { %1755 = vmatmul.mubr.f32.gmra.mrb[86].mxu0 %v477_v28  ;;  %5633 = vmatprep.mubr.msk.f32.mxu1 %vm807_vm0, %v740_v23  ;;  %v501_v28 = vld [vmem:[%s9760_s1 + $0x370] sm:$0xff] }
 0x14b   : > { %5503 = vmatprep.mubr.msk.f32.mxu0 %vm807_vm0, %v480_v29  ;;  %v504_v29 = vld [vmem:[%s9760_s1 + $0x388] sm:$0xff] }
 0x14d   : > { %2541 = vmatmul.mubr.f32.gmra.mrb[66].mxu1 %v739_v25 }
 0x14e   : > { %1761 = vmatmul.mubr.f32.gmra.mrb[88].mxu0 %v479_v33  ;;  %5634 = vmatprep.mubr.msk.f32.mxu1 %vm807_vm0, %v742_v30  ;;  %v7525_v30 = vpop.permute.xlu0 %2859 }
 0x14f   : > { %5504 = vmatprep.mubr.msk.f32.mxu0 %vm807_vm0, %v482_v34  ;;  %v2795_v34 = vld [vmem:[%s9761_s2 + $0x210] sm:$0xff]  ;;  %9865 = vst [vmem:[#allocation37_spill] sm:$0xff] %v7525_v30 }
 0x150   : > { %3149 = vperm.xlu0 %6189, %v2795_v34   ;;  %v4870_v30 = vld [vmem:[%s9765_s6 + $0x10] sm:$0xff] }
 0x151   : > { %2547 = vmatmul.mubr.f32.gmra.mrb[68].mxu1 %v741_v32 }
 0x152   : > { %1767 = vmatmul.mubr.f32.gmra.mrb[90].mxu0 %v481_v1 }
 0x153   : > { %5505 = vmatprep.mubr.msk.f32.mxu0 %vm807_vm0, %v484_v38  ;;  %v2796_v38 = vld [vmem:[%s9761_s2 + $0x218] sm:$0xff] }
 0x154   : > { %3154 = vperm.xlu1 %6190, %v2796_v38   ;;  %v526_v38 = vld [vmem:[%s9760_s1 + $0x438] sm:$0xff] }
 0x156   : > { %1773 = vmatmul.mubr.f32.gmra.mrb[92].mxu0 %v483_v42 }
 0x157   : > { %5506 = vmatprep.mubr.msk.f32.mxu0 %vm807_vm0, %v486_v43  ;;  %v2797_v43 = vld [vmem:[%s9761_s2 + $0x220] sm:$0xff] }
 0x158   : > { %3159 = vperm.xlu0 %6189, %v2797_v43  }
 0x15a   : > { %1779 = vmatmul.mubr.f32.gmra.mrb[94].mxu0 %v485_v47 }
 0x15b   : > { %5507 = vmatprep.mubr.msk.f32.mxu0 %vm807_vm0, %v488_v48  ;;  %v2798_v48 = vld [vmem:[%s9761_s2 + $0x228] sm:$0xff] }
 0x15c   : > { %3164 = vperm.xlu1 %6190, %v2798_v48   ;;  %3169 = vperm.xlu0 %6189, %v2799_v54   ;;  %v525_v48 = vld [vmem:[%s9760_s1 + $0x430] sm:$0xff] }
 0x15e   : > { %1785 = vmatmul.mubr.f32.gmra.mrb[96].mxu0 %v487_v52 }
 0x15f   : > { %5508 = vmatprep.mubr.msk.f32.mxu0 %vm807_vm0, %v490_v53 }
 0x160   : > { %3174 = vperm.xlu1 %6190, %v2800_v61   ;;  %v527_v61 = vld [vmem:[%s9760_s1 + $0x440] sm:$0xff] }
 0x162   : > { %1791 = vmatmul.mubr.f32.gmra.mrb[98].mxu0 %v489_v57  ;;  %v7441_v57 = vpop.permute.xlu1 %2829 }
 0x163   : > { %5509 = vmatprep.mubr.msk.f32.mxu0 %vm807_vm0, %v492_v58  ;;  %9848 = vst [vmem:[#allocation20_spill] sm:$0xff] %v7441_v57 }
 0x166   : > { %1797 = vmatmul.mubr.f32.gmra.mrb[100].mxu0 %v491_v62  ;;  %v513_v62 = vld [vmem:[%s9760_s1 + $0x3d0] sm:$0xff]  ;;  %v7463_v3 = vpop.permute.xlu1 %2834 }
 0x167   : > { %5510 = vmatprep.mubr.msk.f32.mxu0 %vm807_vm0, %v494_v63  ;;  %v516_v63 = vld [vmem:[%s9760_s1 + $0x3e8] sm:$0xff]  ;;  %9854 = vst [vmem:[#allocation26_spill] sm:$0xff] %v7463_v3 }
 0x168   : > { %v588_v3 = vld [vmem:[%s9760_s1 + $0x628] sm:$0xff] }
 0x16a   : > { %1803 = vmatmul.mubr.f32.gmra.mrb[102].mxu0 %v493_v4  ;;  %v2801_v4 = vld [vmem:[%s9761_s2 + $0x240] sm:$0xff]  ;;  %v7491_v13 = vpop.permute.xlu1 %2844 }
 0x16b   : > { %5511 = vmatprep.mubr.msk.f32.mxu0 %vm807_vm0, %v496_v5  ;;  %v515_v5 = vld [vmem:[%s9760_s1 + $0x3e0] sm:$0xff]  ;;  %3179 = vperm.xlu0 %6189, %v2801_v4   ;;  %9858 = vst [vmem:[#allocation30_spill] sm:$0xff] %v7491_v13 }
 0x16c   : > { %v579_v13 = vld [vmem:[%s9760_s1 + $0x5e0] sm:$0xff] }
 0x16e   : > { %1809 = vmatmul.mubr.f32.gmra.mrb[104].mxu0 %v495_v9  ;;  %v7513_v25 = vpop.permute.xlu1 %2854 }
 0x16f   : > { %5512 = vmatprep.mubr.msk.f32.mxu0 %vm807_vm0, %v498_v10  ;;  %v2802_v10 = vld [vmem:[%s9761_s2 + $0x248] sm:$0xff]  ;;  %3189 = vperm.xlu0 %6189, %v2803_v18   ;;  %9864 = vst [vmem:[#allocation36_spill] sm:$0xff] %v7513_v25 }
 0x170   : > { %3184 = vperm.xlu1 %6190, %v2802_v10   ;;  %v529_v10 = vld [vmem:[%s9760_s1 + $0x450] sm:$0xff] }
 0x171   : > { %v7323_v17 = vpop.f32.mrb[0].mxu0 }
 0x172   : > { %9833 = vst [vmem:[#allocation5_spill] sm:$0xff] %v7323_v17  ;;  %v7329_v19 = vpop.f32.mrb[1].mxu0  ;;  %1815 = vmatmul.mubr.f32.gmra.mrb[106].mxu0 %v497_v14 }
 0x173   : > { %9834 = vst [vmem:[#allocation6_spill] sm:$0xff] %v7329_v19  ;;  %5513 = vmatprep.mubr.msk.f32.mxu0 %vm807_vm0, %v500_v15  ;;  %v598_v19 = vld [vmem:[%s9760_s1 + $0x678] sm:$0xff] }
 0x174   : > { %3194 = vperm.xlu1 %6190, %v2804_v27   ;;  %v2809_v27 = vld [vmem:[%s9761_s2 + $0x280] sm:$0xff] }
 0x175   : > { %v7344_v24 = vpop.f32.mrb[2].mxu0 }
 0x176   : > { %9835 = vst [vmem:[#allocation7_spill] sm:$0xff] %v7344_v24  ;;  %v7350_v26 = vpop.f32.mrb[3].mxu0  ;;  %1821 = vmatmul.mubr.f32.gmra.mrb[108].mxu0 %v499_v21  ;;  %v522_v21 = vld [vmem:[%s9760_s1 + $0x418] sm:$0xff]  ;;  %v596_v24 = vld [vmem:[%s9760_s1 + $0x668] sm:$0xff] }
 0x177   : > { %9836 = vst [vmem:[#allocation8_spill] sm:$0xff] %v7350_v26  ;;  %5514 = vmatprep.mubr.msk.f32.mxu0 %vm807_vm0, %v502_v22 }
 0x179   : > { %v7365_v31 = vpop.f32.mrb[4].mxu0 }
 0x17a   : > { %9837 = vst [vmem:[#allocation9_spill] sm:$0xff] %v7365_v31  ;;  %v7371_v33 = vpop.f32.mrb[5].mxu0  ;;  %1827 = vmatmul.mubr.f32.gmra.mrb[110].mxu0 %v501_v28  ;;  %v521_v28 = vld [vmem:[%s9760_s1 + $0x410] sm:$0xff] }
 0x17b   : > { %9838 = vst [vmem:[#allocation10_spill] sm:$0xff] %v7371_v33  ;;  %5515 = vmatprep.mubr.msk.f32.mxu0 %vm807_vm0, %v504_v29  ;;  %v524_v29 = vld [vmem:[%s9760_s1 + $0x428] sm:$0xff] }
 0x17c   : > { %v592_v33 = vld [vmem:[%s9760_s1 + $0x648] sm:$0xff] }
 0x17d   : > { %v7383_v37 = vpop.f32.mrb[6].mxu0 }
 0x17e   : > { %9839 = vst [vmem:[#allocation11_spill] sm:$0xff] %v7383_v37  ;;  %v7385_v1 = vpop.f32.mrb[7].mxu0  ;;  %1833 = vmatmul.mubr.f32.gmra.mrb[112].mxu0 %v503_v35  ;;  %v2805_v35 = vld [vmem:[%s9761_s2 + $0x260] sm:$0xff]  ;;  %v590_v37 = vld [vmem:[%s9760_s1 + $0x638] sm:$0xff] }
 0x17f   : > { %9840 = vst [vmem:[#allocation12_spill] sm:$0xff] %v7385_v1  ;;  %5516 = vmatprep.mubr.msk.f32.mxu0 %vm807_vm0, %v506_v36  ;;  %v523_v36 = vld [vmem:[%s9760_s1 + $0x420] sm:$0xff]  ;;  %3199 = vperm.xlu0 %6189, %v2805_v35  }
 0x181   : > { %v7397_v41 = vpop.f32.mrb[8].mxu0 }
 0x182   : > { %9841 = vst [vmem:[#allocation13_spill] sm:$0xff] %v7397_v41  ;;  %v7399_v42 = vpop.f32.mrb[9].mxu0  ;;  %1839 = vmatmul.mubr.f32.gmra.mrb[114].mxu0 %v505_v39  ;;  %v7541_v39 = vpop.permute.xlu1 %2864 }
 0x183   : > { %9842 = vst [vmem:[#allocation14_spill] sm:$0xff] %v7399_v42  ;;  %5517 = vmatprep.mubr.msk.f32.mxu0 %vm807_vm0, %v508_v40  ;;  %9868 = vst [vmem:[#allocation40_spill] sm:$0xff] %v7541_v39  ;;  %v586_v42 = vld [vmem:[%s9760_s1 + $0x618] sm:$0xff] }
 0x185   : > { %v7411_v46 = vpop.f32.mrb[10].mxu0 }
 0x186   : > { %9843 = vst [vmem:[#allocation15_spill] sm:$0xff] %v7411_v46  ;;  %v7413_v47 = vpop.f32.mrb[11].mxu0  ;;  %1845 = vmatmul.mubr.f32.gmra.mrb[116].mxu0 %v507_v44  ;;  %v7547_v44 = vpop.permute.xlu0 %2869  ;;  %v584_v46 = vld [vmem:[%s9760_s1 + $0x608] sm:$0xff] }
 0x187   : > { %9844 = vst [vmem:[#allocation16_spill] sm:$0xff] %v7413_v47  ;;  %5518 = vmatprep.mubr.msk.f32.mxu0 %vm807_vm0, %v510_v45  ;;  %9871 = vst [vmem:[#allocation43_spill] sm:$0xff] %v7547_v44  ;;  %v2806_v45 = vld [vmem:[%s9761_s2 + $0x268] sm:$0xff]  ;;  %v563_v44 = vld [vmem:[%s9760_s1 + $0x560] sm:$0xff] }
 0x188   : > { %3204 = vperm.xlu1 %6190, %v2806_v45   ;;  %v2810_v45 = vld [vmem:[%s9761_s2 + $0x288] sm:$0xff] }
 0x189   : > { %v7427_v52 = vpop.f32.mrb[12].mxu0 }
 0x18a   : > { %9846 = vst [vmem:[#allocation18_spill] sm:$0xff] %v7427_v52  ;;  %v7429_v53 = vpop.f32.mrb[13].mxu0  ;;  %1851 = vmatmul.mubr.f32.gmra.mrb[118].mxu0 %v509_v49  ;;  %v528_v49 = vld [vmem:[%s9760_s1 + $0x448] sm:$0xff]  ;;  %v5033_v52 = vld [vmem:[%s9767_s8] sm:$0xff] }
 0x18b   : > { %9847 = vst [vmem:[#allocation19_spill] sm:$0xff] %v7429_v53  ;;  %5519 = vmatprep.mubr.msk.f32.mxu0 %vm807_vm0, %v512_v50 }
 0x18d   : > { %v7443_v58 = vpop.f32.mrb[14].mxu0 }
 0x18e   : > { %9849 = vst [vmem:[#allocation21_spill] sm:$0xff] %v7443_v58  ;;  %v7445_v59 = vpop.f32.mrb[15].mxu0  ;;  %1857 = vmatmul.mubr.f32.gmra.mrb[120].mxu0 %v511_v55  ;;  %v7563_v55 = vpop.permute.xlu1 %2874 }
 0x18f   : > { %9850 = vst [vmem:[#allocation22_spill] sm:$0xff] %v7445_v59  ;;  %5520 = vmatprep.mubr.msk.f32.mxu0 %vm807_vm0, %v514_v56  ;;  %9874 = vst [vmem:[#allocation46_spill] sm:$0xff] %v7563_v55  ;;  %v2807_v56 = vld [vmem:[%s9761_s2 + $0x270] sm:$0xff] }
 0x190   : > { %3209 = vperm.xlu0 %6189, %v2807_v56   ;;  %v4874_v59 = vld [vmem:[%s9765_s6 + $0x30] sm:$0x3] }
 0x191   : > { %v7459_v0 = vpop.f32.mrb[16].mxu0 }
 0x192   : > { %9852 = vst [vmem:[#allocation24_spill] sm:$0xff] %v7459_v0  ;;  %v7461_v2 = vpop.f32.mrb[17].mxu0  ;;  %1863 = vmatmul.mubr.f32.gmra.mrb[122].mxu0 %v513_v62  ;;  %v530_v62 = vld [vmem:[%s9760_s1 + $0x458] sm:$0xff]  ;;  %v571_v0 = vld [vmem:[%s9760_s1 + $0x5a0] sm:$0xff] }
 0x193   : > { %9853 = vst [vmem:[#allocation25_spill] sm:$0xff] %v7461_v2  ;;  %5521 = vmatprep.mubr.msk.f32.mxu0 %vm807_vm0, %v516_v63  ;;  %v7575_v63 = vpop.permute.xlu0 %2879 }
 0x194   : > { %9875 = vst [vmem:[#allocation47_spill] sm:$0xff] %v7575_v63  ;;  %3219 = vperm.xlu0 %6189, %v2809_v27   ;;  %v4707_v63 = vld [vmem:[%s9763_s4 + $0x30] sm:$0xff] }
 0x195   : > { %v7477_v8 = vpop.f32.mrb[18].mxu0 }
 0x196   : > { %9856 = vst [vmem:[#allocation28_spill] sm:$0xff] %v7477_v8  ;;  %v7479_v9 = vpop.f32.mrb[19].mxu0  ;;  %1869 = vmatmul.mubr.f32.gmra.mrb[124].mxu0 %v515_v5 }
 0x197   : > { %9857 = vst [vmem:[#allocation29_spill] sm:$0xff] %v7479_v9  ;;  %5522 = vmatprep.mubr.msk.f32.mxu0 %vm807_vm0, %v518_v6  ;;  %v2808_v6 = vld [vmem:[%s9761_s2 + $0x278] sm:$0xff]  ;;  %v567_v9 = vld [vmem:[%s9760_s1 + $0x580] sm:$0xff] }
 0x198   : > { %3214 = vperm.xlu1 %6190, %v2808_v6   ;;  %v2811_v6 = vld [vmem:[%s9761_s2 + $0x290] sm:$0xff] }
 0x199   : > { %v7493_v14 = vpop.f32.mrb[20].mxu0  ;;  %3229 = vperm.xlu0 %6189, %v2811_v6   ;;  %v540_v6 = vld [vmem:[%s9760_s1 + $0x4a8] sm:$0xff] }
 0x19a   : > { %9859 = vst [vmem:[#allocation31_spill] sm:$0xff] %v7493_v14  ;;  %v7495_v15 = vpop.f32.mrb[21].mxu0  ;;  %1875 = vmatmul.mubr.f32.gmra.mrb[126].mxu0 %v517_v11  ;;  %v532_v11 = vld [vmem:[%s9760_s1 + $0x468] sm:$0xff]  ;;  %v4715_v14 = vld [vmem:[%s9763_s4 + $0x70] sm:$0xff] }
 0x19b   : > { %9860 = vst [vmem:[#allocation32_spill] sm:$0xff] %v7495_v15  ;;  %5523 = vmatprep.mubr.msk.f32.mxu0 %vm807_vm0, %v520_v12  ;;  %v7591_v12 = vpop.permute.xlu1 %2884 }
 0x19c   : > { %9878 = vst [vmem:[#allocation50_spill] sm:$0xff] %v7591_v12  ;;  %3224 = vperm.xlu1 %6190, %v2810_v45   ;;  %v555_v12 = vld [vmem:[%s9760_s1 + $0x520] sm:$0xff] }
 0x19d   : > { %v7509_v22 = vpop.f32.mrb[22].mxu0 }
 0x19e   : > { %9862 = vst [vmem:[#allocation34_spill] sm:$0xff] %v7509_v22  ;;  %v7511_v23 = vpop.f32.mrb[23].mxu0  ;;  %1881 = vmatmul.mubr.f32.gmra.mrb[128].mxu0 %v519_v20 }
 0x19f   : > { %9863 = vst [vmem:[#allocation35_spill] sm:$0xff] %v7511_v23  ;;  %5524 = vmatprep.mubr.msk.f32.mxu0 %vm807_vm0, %v522_v21  ;;  %v7597_v21 = vpop.permute.xlu0 %2889  ;;  %v4711_v23 = vld [vmem:[%s9763_s4 + $0x50] sm:$0xff] }
 0x1a0   : > { %9881 = vst [vmem:[#allocation53_spill] sm:$0xff] %v7597_v21 }
 0x1a1   : > { %v7527_v32 = vpop.f32.mrb[24].mxu0 }
 0x1a2   : > { %9866 = vst [vmem:[#allocation38_spill] sm:$0xff] %v7527_v32  ;;  %v7529_v34 = vpop.f32.mrb[25].mxu0  ;;  %1887 = vmatmul.mubr.f32.gmra.mrb[130].mxu0 %v521_v28  ;;  %v531_v28 = vld [vmem:[%s9760_s1 + $0x460] sm:$0xff] }
 0x1a3   : > { %9867 = vst [vmem:[#allocation39_spill] sm:$0xff] %v7529_v34  ;;  %5525 = vmatprep.mubr.msk.f32.mxu0 %vm807_vm0, %v524_v29  ;;  %v534_v29 = vld [vmem:[%s9760_s1 + $0x478] sm:$0xff]  ;;  %v7625_v56 = vpop.permute.xlu0 %2899  ;;  %v559_v32 = vld [vmem:[%s9760_s1 + $0x540] sm:$0xff] }
 0x1a4   : > { %9885 = vst [vmem:[#allocation57_spill] sm:$0xff] %v7625_v56 }
 0x1a5   : > { %v7543_v40 = vpop.f32.mrb[26].mxu0 }
 0x1a6   : > { %9869 = vst [vmem:[#allocation41_spill] sm:$0xff] %v7543_v40  ;;  %v7545_v43 = vpop.f32.mrb[27].mxu0  ;;  %1893 = vmatmul.mubr.f32.gmra.mrb[132].mxu0 %v523_v36 }
 0x1a7   : > { %9870 = vst [vmem:[#allocation42_spill] sm:$0xff] %v7545_v43  ;;  %5526 = vmatprep.mubr.msk.f32.mxu0 %vm807_vm0, %v526_v38  ;;  %v7613_v38 = vpop.permute.xlu1 %2894  ;;  %v7647_v45 = vpop.permute.xlu0 %2909 }
 0x1a8   : > { %9884 = vst [vmem:[#allocation56_spill] sm:$0xff] %v7613_v38  ;;  %9891 = vst [vmem:[#allocation63_spill] sm:$0xff] %v7647_v45  ;;  %v552_v38 = vld [vmem:[%s9760_s1 + $0x508] sm:$0xff] }
 0x1a9   : > { %v7559_v50 = vpop.f32.mrb[28].mxu0 }
 0x1aa   : > { %9872 = vst [vmem:[#allocation44_spill] sm:$0xff] %v7559_v50  ;;  %v7561_v54 = vpop.f32.mrb[29].mxu0  ;;  %1899 = vmatmul.mubr.f32.gmra.mrb[134].mxu0 %v525_v48  ;;  %v533_v48 = vld [vmem:[%s9760_s1 + $0x470] sm:$0xff] }
 0x1ab   : > { %9873 = vst [vmem:[#allocation45_spill] sm:$0xff] %v7561_v54  ;;  %5527 = vmatprep.mubr.msk.f32.mxu0 %vm807_vm0, %v528_v49  ;;  %v536_v49 = vld [vmem:[%s9760_s1 + $0x488] sm:$0xff]  ;;  %v7641_v27 = vpop.permute.xlu1 %2904  ;;  %v7675_v45 = vpop.permute.xlu0 %2919  ;;  %v4703_v54 = vld [vmem:[%s9763_s4 + $0x10] sm:$0xff] }
 0x1ac   : > { %9888 = vst [vmem:[#allocation60_spill] sm:$0xff] %v7641_v27  ;;  %9895 = vst [vmem:[#allocation67_spill] sm:$0xff] %v7675_v45  ;;  %v543_v27 = vld [vmem:[%s9760_s1 + $0x4c0] sm:$0xff] }
 0x1ad   : > { %v7577_v4 = vpop.f32.mrb[30].mxu0 }
 0x1ae   : > { %9876 = vst [vmem:[#allocation48_spill] sm:$0xff] %v7577_v4  ;;  %v7579_v5 = vpop.f32.mrb[31].mxu0  ;;  %1905 = vmatmul.mubr.f32.gmra.mrb[136].mxu0 %v527_v61  ;;  %v554_v4 = vld [vmem:[%s9760_s1 + $0x518] sm:$0xff] }
 0x1af   : > { %9877 = vst [vmem:[#allocation49_spill] sm:$0xff] %v7579_v5  ;;  %5528 = vmatprep.mubr.msk.f32.mxu0 %vm807_vm0, %v530_v62 }
 0x1b1   : > { %v7593_v18 = vpop.f32.mrb[32].mxu0 }
 0x1b2   : > { %9879 = vst [vmem:[#allocation51_spill] sm:$0xff] %v7593_v18  ;;  %v7595_v20 = vpop.f32.mrb[33].mxu0  ;;  %1911 = vmatmul.mubr.f32.gmra.mrb[138].mxu0 %v529_v10  ;;  %v535_v10 = vld [vmem:[%s9760_s1 + $0x480] sm:$0xff] }
 0x1b3   : > { %9880 = vst [vmem:[#allocation52_spill] sm:$0xff] %v7595_v20  ;;  %5529 = vmatprep.mubr.msk.f32.mxu0 %vm807_vm0, %v532_v11  ;;  %v538_v11 = vld [vmem:[%s9760_s1 + $0x498] sm:$0xff]  ;;  %v547_v20 = vld [vmem:[%s9760_s1 + $0x4e0] sm:$0xff] }
 0x1b5   : > { %v7609_v35 = vpop.f32.mrb[34].mxu0 }
 0x1b6   : > { %9882 = vst [vmem:[#allocation54_spill] sm:$0xff] %v7609_v35  ;;  %v7611_v36 = vpop.f32.mrb[35].mxu0  ;;  %1917 = vmatmul.mubr.f32.gmra.mrb[140].mxu0 %v531_v28  ;;  %v545_v35 = vld [vmem:[%s9760_s1 + $0x4d0] sm:$0xff] }
 0x1b7   : > { %9883 = vst [vmem:[#allocation55_spill] sm:$0xff] %v7611_v36  ;;  %5530 = vmatprep.mubr.msk.f32.mxu0 %vm807_vm0, %v534_v29 }
 0x1b9   : > { %v7627_v61 = vpop.f32.mrb[36].mxu0 }
 0x1ba   : > { %9886 = vst [vmem:[#allocation58_spill] sm:$0xff] %v7627_v61  ;;  %v7629_v62 = vpop.f32.mrb[37].mxu0  ;;  %1923 = vmatmul.mubr.f32.gmra.mrb[142].mxu0 %v533_v48  ;;  %v2812_v48 = vld [vmem:[%s9761_s2 + $0x298] sm:$0xff] }
 0x1bb   : > { %9887 = vst [vmem:[#allocation59_spill] sm:$0xff] %v7629_v62  ;;  %5531 = vmatprep.mubr.msk.f32.mxu0 %vm807_vm0, %v536_v49  ;;  %v537_v49 = vld [vmem:[%s9760_s1 + $0x490] sm:$0xff]  ;;  %3234 = vperm.xlu1 %6190, %v2812_v48   ;;  %v539_v48 = vld [vmem:[%s9760_s1 + $0x4a0] sm:$0xff] }
 0x1bd   : > { %v7643_v28 = vpop.f32.mrb[38].mxu0 }
 0x1be   : > { %9889 = vst [vmem:[#allocation61_spill] sm:$0xff] %v7643_v28  ;;  %v7645_v29 = vpop.f32.mrb[39].mxu0  ;;  %1929 = vmatmul.mubr.f32.gmra.mrb[144].mxu0 %v535_v10 }
 0x1bf   : > { %9890 = vst [vmem:[#allocation62_spill] sm:$0xff] %v7645_v29  ;;  %5532 = vmatprep.mubr.msk.f32.mxu0 %vm807_vm0, %v538_v11  ;;  %v7663_v29 = vpop.permute.xlu1 %2914  ;;  %v2813_v11 = vld [vmem:[%s9761_s2 + $0x2a0] sm:$0xff] }
 0x1c0   : > { %9894 = vst [vmem:[#allocation66_spill] sm:$0xff] %v7663_v29  ;;  %3239 = vperm.xlu0 %6189, %v2813_v11   ;;  %v2814_v11 = vld [vmem:[%s9761_s2 + $0x2a8] sm:$0xff] }
 0x1c1   : > { %v7659_v28 = vpop.f32.mrb[40].mxu0  ;;  %3244 = vperm.xlu1 %6190, %v2814_v11   ;;  %v546_v11 = vld [vmem:[%s9760_s1 + $0x4d8] sm:$0xff] }
 0x1c2   : > { %9892 = vst [vmem:[#allocation64_spill] sm:$0xff] %v7659_v28  ;;  %v7661_v10 = vpop.f32.mrb[41].mxu0  ;;  %1935 = vmatmul.mubr.f32.gmra.mrb[146].mxu0 %v537_v49  ;;  %v542_v28 = vld [vmem:[%s9760_s1 + $0x4b8] sm:$0xff] }
 0x1c3   : > { %9893 = vst [vmem:[#allocation65_spill] sm:$0xff] %v7661_v10  ;;  %5533 = vmatprep.mubr.msk.f32.mxu0 %vm807_vm0, %v540_v6  ;;  %v7679_v10 = vpop.f32.mrb[0].mxu1  ;;  %v541_v6 = vld [vmem:[%s9760_s1 + $0x4b0] sm:$0xff]  ;;  %v7695_v45 = vpop.permute.xlu1 %2924 }
 0x1c4   : > { %9897 = vst [vmem:[#allocation69_spill] sm:$0xff] %v7679_v10  ;;  %v7683_v62 = vpop.f32.mrb[1].mxu1  ;;  %9900 = vst [vmem:[#allocation72_spill] sm:$0xff] %v7695_v45  ;;  %v2815_v45 = vld [vmem:[%s9761_s2 + $0x2b0] sm:$0xff] }
 0x1c5   : > { %v7677_v49 = vpop.f32.mrb[42].mxu0  ;;  %9899 = vst [vmem:[#allocation71_spill] sm:$0xff] %v7683_v62  ;;  %3249 = vperm.xlu0 %6189, %v2815_v45   ;;  %v548_v45 = vld [vmem:[%s9760_s1 + $0x4e8] sm:$0xff] }
 0x1c6   : > { %9896 = vst [vmem:[#allocation68_spill] sm:$0xff] %v7677_v49  ;;  %v7681_v29 = vpop.f32.mrb[43].mxu0  ;;  %1941 = vmatmul.mubr.f32.gmra.mrb[148].mxu0 %v539_v48  ;;  %v544_v49 = vld [vmem:[%s9760_s1 + $0x4c8] sm:$0xff] }
 0x1c7   : > { %9898 = vst [vmem:[#allocation70_spill] sm:$0xff] %v7681_v29  ;;  %5534 = vmatprep.mubr.msk.f32.mxu0 %vm807_vm0, %v542_v28  ;;  %v7699_v29 = vpop.f32.mrb[2].mxu1 }
 0x1c8   : > { %v7703_v61 = vpop.f32.mrb[3].mxu1 }
 0x1c9   : > { %v7697_v48 = vpop.f32.mrb[44].mxu0 }
 0x1ca   : > { %9901 = vst [vmem:[#allocation73_spill] sm:$0xff] %v7697_v48  ;;  %v7701_v28 = vpop.f32.mrb[45].mxu0  ;;  %1947 = vmatmul.mubr.f32.gmra.mrb[150].mxu0 %v541_v6  ;;  %v7715_v48 = vpop.permute.xlu0 %2929 }
 0x1cb   : > { %9902 = vst [vmem:[#allocation74_spill] sm:$0xff] %v7701_v28  ;;  %5535 = vmatprep.mubr.msk.f32.mxu0 %vm807_vm0, %v544_v49  ;;  %9903 = vst [vmem:[#allocation75_spill] sm:$0xff] %v7715_v48  ;;  %v7719_v28 = vpop.f32.mrb[4].mxu1  ;;  %v2816_v48 = vld [vmem:[%s9761_s2 + $0x2b8] sm:$0xff] }
 0x1cc   : > { %v7723_v36 = vpop.f32.mrb[5].mxu1  ;;  %3254 = vperm.xlu1 %6190, %v2816_v48  }
 0x1cd   : > { %v7717_v6 = vpop.f32.mrb[46].mxu0 }
 0x1ce   : > { %9904 = vst [vmem:[#allocation76_spill] sm:$0xff] %v7717_v6  ;;  %v7721_v49 = vpop.f32.mrb[47].mxu0  ;;  %1953 = vmatmul.mubr.f32.gmra.mrb[152].mxu0 %v543_v27  ;;  %v7735_v6 = vpop.permute.xlu1 %2934 }
 0x1cf   : > { %9905 = vst [vmem:[#allocation77_spill] sm:$0xff] %v7721_v49  ;;  %5536 = vmatprep.mubr.msk.f32.mxu0 %vm807_vm0, %v546_v11  ;;  %9906 = vst [vmem:[#allocation78_spill] sm:$0xff] %v7735_v6  ;;  %v7739_v49 = vpop.f32.mrb[6].mxu1  ;;  %v550_v6 = vld [vmem:[%s9760_s1 + $0x4f8] sm:$0xff]  ;;  %v7752_v48 = vpop.permute.xlu0 %2939 }
 0x1d0   : > { %v7743_v56 = vpop.f32.mrb[7].mxu1  ;;  %9909 = vst [vmem:[#allocation81_spill] sm:$0xff] %v7752_v48 }
 0x1d1   : > { %v7737_v27 = vpop.f32.mrb[48].mxu0  ;;  %v7756_v18 = vpop.f32.mrb[8].mxu1 }
 0x1d2   : > { %9907 = vst [vmem:[#allocation79_spill] sm:$0xff] %v7737_v27  ;;  %v7741_v11 = vpop.f32.mrb[49].mxu0  ;;  %1959 = vmatmul.mubr.f32.gmra.mrb[154].mxu0 %v545_v35  ;;  %v7760_v35 = vpop.f32.mrb[9].mxu1 }
 0x1d3   : > { %9908 = vst [vmem:[#allocation80_spill] sm:$0xff] %v7741_v11  ;;  %5537 = vmatprep.mubr.msk.f32.mxu0 %vm807_vm0, %v548_v45  ;;  %v549_v45 = vld [vmem:[%s9760_s1 + $0x4f0] sm:$0xff]  ;;  %v7769_v48 = vpop.permute.xlu1 %2944  ;;  %v7773_v5 = vpop.f32.mrb[10].mxu1 }
 0x1d4   : > { %9912 = vst [vmem:[#allocation84_spill] sm:$0xff] %v7769_v48  ;;  %v7786_v48 = vpop.permute.xlu0 %2949 }
 0x1d5   : > { %v7754_v27 = vpop.f32.mrb[50].mxu0  ;;  %9915 = vst [vmem:[#allocation87_spill] sm:$0xff] %v7786_v48  ;;  %v553_v48 = vld [vmem:[%s9760_s1 + $0x510] sm:$0xff] }
 0x1d6   : > { %9910 = vst [vmem:[#allocation82_spill] sm:$0xff] %v7754_v27  ;;  %v7758_v11 = vpop.f32.mrb[51].mxu0  ;;  %1965 = vmatmul.mubr.f32.gmra.mrb[156].mxu0 %v547_v20  ;;  %v7777_v20 = vpop.f32.mrb[11].mxu1 }
 0x1d7   : > { %9911 = vst [vmem:[#allocation83_spill] sm:$0xff] %v7758_v11  ;;  %5538 = vmatprep.mubr.msk.f32.mxu0 %vm807_vm0, %v550_v6  ;;  %v551_v6 = vld [vmem:[%s9760_s1 + $0x500] sm:$0xff] }
 0x1d8   : > { %v7826_v43 = vpop.permute.xlu0 %2959 }
 0x1d9   : > { %v7771_v27 = vpop.f32.mrb[52].mxu0  ;;  %9921 = vst [vmem:[#allocation93_spill] sm:$0xff] %v7826_v43  ;;  %v557_v43 = vld [vmem:[%s9760_s1 + $0x530] sm:$0xff] }
 0x1da   : > { %9913 = vst [vmem:[#allocation85_spill] sm:$0xff] %v7771_v27  ;;  %v7775_v11 = vpop.f32.mrb[53].mxu0  ;;  %1971 = vmatmul.mubr.f32.gmra.mrb[158].mxu0 %v549_v45  ;;  %v4701_v27 = vld [vmem:[%s9763_s4] sm:$0xff]  ;;  %v7793_v45 = vpop.f32.mrb[12].mxu1 }
 0x1db   : > { %9914 = vst [vmem:[#allocation86_spill] sm:$0xff] %v7775_v11  ;;  %5539 = vmatprep.mubr.msk.f32.mxu0 %vm807_vm0, %v552_v38  ;;  %4719 = vperm.xlu0 %6189, %v4701_v27   ;;  %v7797_v21 = vpop.f32.mrb[13].mxu1  ;;  %v556_v27 = vld [vmem:[%s9760_s1 + $0x528] sm:$0xff] }
 0x1dd   : > { %v7791_v11 = vpop.f32.mrb[54].mxu0 }
 0x1de   : > { %9916 = vst [vmem:[#allocation88_spill] sm:$0xff] %v7791_v11  ;;  %v7795_v38 = vpop.f32.mrb[55].mxu0  ;;  %1977 = vmatmul.mubr.f32.gmra.mrb[160].mxu0 %v551_v6  ;;  %v7809_v11 = vpop.permute.xlu1 %2954 }
 0x1df   : > { %9917 = vst [vmem:[#allocation89_spill] sm:$0xff] %v7795_v38  ;;  %5540 = vmatprep.mubr.msk.f32.mxu0 %vm807_vm0, %v554_v4  ;;  %9918 = vst [vmem:[#allocation90_spill] sm:$0xff] %v7809_v11  ;;  %4729 = vperm.xlu0 %6189, %v4703_v54   ;;  %v7813_v6 = vpop.f32.mrb[14].mxu1  ;;  %v558_v11 = vld [vmem:[%s9760_s1 + $0x538] sm:$0xff]  ;;  %v4705_v54 = vld [vmem:[%s9763_s4 + $0x20] sm:$0xff] }
 0x1e0   : > { %v7817_v50 = vpop.f32.mrb[15].mxu1 }
 0x1e1   : > { %v7811_v38 = vpop.f32.mrb[56].mxu0 }
 0x1e2   : > { %9919 = vst [vmem:[#allocation91_spill] sm:$0xff] %v7811_v38  ;;  %v7815_v4 = vpop.f32.mrb[57].mxu0  ;;  %1983 = vmatmul.mubr.f32.gmra.mrb[162].mxu0 %v553_v48  ;;  %v4702_v48 = vld [vmem:[%s9763_s4 + $0x8] sm:$0xff] }
 0x1e3   : > { %9920 = vst [vmem:[#allocation92_spill] sm:$0xff] %v7815_v4  ;;  %5541 = vmatprep.mubr.msk.f32.mxu0 %vm807_vm0, %v556_v27  ;;  %4739 = vperm.xlu0 %6189, %v4705_v54   ;;  %v7836_v27 = vpop.f32.mrb[16].mxu1  ;;  %v4704_v54 = vld [vmem:[%s9763_s4 + $0x18] sm:$0xff] }
 0x1e4   : > { %4724 = vperm.xlu1 %6190, %v4702_v48   ;;  %v7840_v40 = vpop.f32.mrb[17].mxu1  ;;  %v7855_v48 = vpop.permute.xlu1 %2964 }
 0x1e5   : > { %v7834_v4 = vpop.f32.mrb[58].mxu0  ;;  %9924 = vst [vmem:[#allocation96_spill] sm:$0xff] %v7855_v48  ;;  %v562_v48 = vld [vmem:[%s9760_s1 + $0x558] sm:$0xff] }
 0x1e6   : > { %9922 = vst [vmem:[#allocation94_spill] sm:$0xff] %v7834_v4  ;;  %v7838_v38 = vpop.f32.mrb[59].mxu0  ;;  %1989 = vmatmul.mubr.f32.gmra.mrb[164].mxu0 %v555_v12  ;;  %v560_v12 = vld [vmem:[%s9760_s1 + $0x548] sm:$0xff] }
 0x1e7   : > { %9923 = vst [vmem:[#allocation95_spill] sm:$0xff] %v7838_v38  ;;  %5542 = vmatprep.mubr.msk.f32.mxu0 %vm807_vm0, %v558_v11  ;;  %4749 = vperm.xlu0 %6189, %v4707_v63   ;;  %v7859_v11 = vpop.f32.mrb[18].mxu1  ;;  %v4709_v63 = vld [vmem:[%s9763_s4 + $0x40] sm:$0xff] }
 0x1e8   : > { %4734 = vperm.xlu1 %6190, %v4704_v54   ;;  %v7863_v34 = vpop.f32.mrb[19].mxu1 }
 0x1e9   : > { %v7857_v38 = vpop.f32.mrb[60].mxu0 }
 0x1ea   : > { %9925 = vst [vmem:[#allocation97_spill] sm:$0xff] %v7857_v38  ;;  %v7861_v4 = vpop.f32.mrb[61].mxu0  ;;  %1995 = vmatmul.mubr.f32.gmra.mrb[166].mxu0 %v557_v43  ;;  %v7872_v38 = vpop.permute.xlu0 %2969  ;;  %v4706_v43 = vld [vmem:[%s9763_s4 + $0x28] sm:$0xff] }
 0x1eb   : > { %9926 = vst [vmem:[#allocation98_spill] sm:$0xff] %v7861_v4  ;;  %5543 = vmatprep.mubr.msk.f32.mxu0 %vm807_vm0, %v560_v12  ;;  %9927 = vst [vmem:[#allocation99_spill] sm:$0xff] %v7872_v38  ;;  %4759 = vperm.xlu0 %6189, %v4709_v63   ;;  %v7882_v12 = vpop.f32.mrb[20].mxu1  ;;  %v561_v38 = vld [vmem:[%s9760_s1 + $0x550] sm:$0xff]  ;;  %v4708_v63 = vld [vmem:[%s9763_s4 + $0x38] sm:$0xff] }
 0x1ec   : > { %4744 = vperm.xlu1 %6190, %v4706_v43   ;;  %v7886_v55 = vpop.f32.mrb[21].mxu1  ;;  %v7901_v43 = vpop.permute.xlu1 %2974 }
 0x1ed   : > { %v7880_v54 = vpop.f32.mrb[62].mxu0  ;;  %9930 = vst [vmem:[#allocation102_spill] sm:$0xff] %v7901_v43  ;;  %v566_v43 = vld [vmem:[%s9760_s1 + $0x578] sm:$0xff] }
 0x1ee   : > { %9928 = vst [vmem:[#allocation100_spill] sm:$0xff] %v7880_v54  ;;  %v7884_v4 = vpop.f32.mrb[63].mxu0  ;;  %2001 = vmatmul.mubr.f32.gmra.mrb[168].mxu0 %v559_v32  ;;  %v564_v32 = vld [vmem:[%s9760_s1 + $0x568] sm:$0xff] }
 0x1ef   : > { %9929 = vst [vmem:[#allocation101_spill] sm:$0xff] %v7884_v4  ;;  %5544 = vmatprep.mubr.msk.f32.mxu0 %vm807_vm0, %v562_v48  ;;  %4769 = vperm.xlu0 %6189, %v4711_v23   ;;  %v7905_v48 = vpop.f32.mrb[22].mxu1  ;;  %v4713_v23 = vld [vmem:[%s9763_s4 + $0x60] sm:$0xff] }
 0x1f0   : > { %4754 = vperm.xlu1 %6190, %v4708_v63   ;;  %v7909_v22 = vpop.f32.mrb[23].mxu1 }
 0x1f1   : > { %v7903_v4 = vpop.f32.mrb[64].mxu0 }
 0x1f2   : > { %9931 = vst [vmem:[#allocation103_spill] sm:$0xff] %v7903_v4  ;;  %v7907_v54 = vpop.f32.mrb[65].mxu0  ;;  %2007 = vmatmul.mubr.f32.gmra.mrb[170].mxu0 %v561_v38  ;;  %v7918_v4 = vpop.permute.xlu0 %2979  ;;  %v4710_v38 = vld [vmem:[%s9763_s4 + $0x48] sm:$0xff] }
 0x1f3   : > { %9932 = vst [vmem:[#allocation104_spill] sm:$0xff] %v7907_v54  ;;  %5545 = vmatprep.mubr.msk.f32.mxu0 %vm807_vm0, %v564_v32  ;;  %9933 = vst [vmem:[#allocation105_spill] sm:$0xff] %v7918_v4  ;;  %4779 = vperm.xlu0 %6189, %v4713_v23   ;;  %v7928_v32 = vpop.f32.mrb[24].mxu1  ;;  %v565_v4 = vld [vmem:[%s9760_s1 + $0x570] sm:$0xff]  ;;  %v4712_v23 = vld [vmem:[%s9763_s4 + $0x58] sm:$0xff] }
 0x1f4   : > { %4764 = vperm.xlu1 %6190, %v4710_v38   ;;  %v7932_v15 = vpop.f32.mrb[25].mxu1  ;;  %v7947_v38 = vpop.permute.xlu1 %2984 }
 0x1f5   : > { %v7926_v63 = vpop.f32.mrb[66].mxu0  ;;  %9936 = vst [vmem:[#allocation108_spill] sm:$0xff] %v7947_v38  ;;  %v570_v38 = vld [vmem:[%s9760_s1 + $0x598] sm:$0xff] }
 0x1f6   : > { %9934 = vst [vmem:[#allocation106_spill] sm:$0xff] %v7926_v63  ;;  %v7930_v54 = vpop.f32.mrb[67].mxu0  ;;  %2013 = vmatmul.mubr.f32.gmra.mrb[172].mxu0 %v563_v44  ;;  %v568_v44 = vld [vmem:[%s9760_s1 + $0x588] sm:$0xff] }
 0x1f7   : > { %9935 = vst [vmem:[#allocation107_spill] sm:$0xff] %v7930_v54  ;;  %5546 = vmatprep.mubr.msk.f32.mxu0 %vm807_vm0, %v566_v43  ;;  %4789 = vperm.xlu0 %6189, %v4715_v14   ;;  %v7951_v43 = vpop.f32.mrb[26].mxu1  ;;  %v4868_v14 = vld [vmem:[%s9765_s6] sm:$0xff] }
 0x1f8   : > { %4774 = vperm.xlu1 %6190, %v4712_v23   ;;  %v7955_v39 = vpop.f32.mrb[27].mxu1 }
 0x1f9   : > { %v7949_v54 = vpop.f32.mrb[68].mxu0 }
 0x1fa   : > { %9937 = vst [vmem:[#allocation109_spill] sm:$0xff] %v7949_v54  ;;  %v7953_v63 = vpop.f32.mrb[69].mxu0  ;;  %2019 = vmatmul.mubr.f32.gmra.mrb[174].mxu0 %v565_v4  ;;  %v7964_v54 = vpop.permute.xlu0 %2989  ;;  %v4714_v4 = vld [vmem:[%s9763_s4 + $0x68] sm:$0xff] }
 0x1fb   : > { %9938 = vst [vmem:[#allocation110_spill] sm:$0xff] %v7953_v63  ;;  %5547 = vmatprep.mubr.msk.f32.mxu0 %vm807_vm0, %v568_v44  ;;  %9939 = vst [vmem:[#allocation111_spill] sm:$0xff] %v7964_v54  ;;  %4877 = vperm.xlu0 %6189, %v4868_v14   ;;  %v7974_v44 = vpop.f32.mrb[28].mxu1  ;;  %v569_v54 = vld [vmem:[%s9760_s1 + $0x590] sm:$0xff]  ;;  %v4716_v14 = vld [vmem:[%s9763_s4 + $0x78] sm:$0xff] }
 0x1fc   : > { %4784 = vperm.xlu1 %6190, %v4714_v4   ;;  %v7978_v8 = vpop.f32.mrb[29].mxu1  ;;  %v7993_v4 = vpop.permute.xlu1 %2994 }
 0x1fd   : > { %v7972_v23 = vpop.f32.mrb[70].mxu0  ;;  %9942 = vst [vmem:[#allocation114_spill] sm:$0xff] %v7993_v4  ;;  %v574_v4 = vld [vmem:[%s9760_s1 + $0x5b8] sm:$0xff] }
 0x1fe   : > { %9940 = vst [vmem:[#allocation112_spill] sm:$0xff] %v7972_v23  ;;  %v7976_v63 = vpop.f32.mrb[71].mxu0  ;;  %2025 = vmatmul.mubr.f32.gmra.mrb[176].mxu0 %v567_v9  ;;  %v572_v9 = vld [vmem:[%s9760_s1 + $0x5a8] sm:$0xff] }
 0x1ff   : > { %9941 = vst [vmem:[#allocation113_spill] sm:$0xff] %v7976_v63  ;;  %5548 = vmatprep.mubr.msk.f32.mxu0 %vm807_vm0, %v570_v38  ;;  %4887 = vperm.xlu0 %6189, %v4870_v30   ;;  %v7997_v38 = vpop.f32.mrb[30].mxu1  ;;  %v4872_v30 = vld [vmem:[%s9765_s6 + $0x20] sm:$0xff] }
 0x200   : > { %4794 = vperm.xlu1 %6190, %v4716_v14   ;;  %v8001_v2 = vpop.f32.mrb[31].mxu1 }
 0x201   : > { %v7995_v63 = vpop.f32.mrb[72].mxu0 }
 0x202   : > { %9943 = vst [vmem:[#allocation115_spill] sm:$0xff] %v7995_v63  ;;  %v7999_v23 = vpop.f32.mrb[73].mxu0  ;;  %2031 = vmatmul.mubr.f32.gmra.mrb[178].mxu0 %v569_v54  ;;  %v8010_v63 = vpop.permute.xlu0 %2999  ;;  %v4869_v54 = vld [vmem:[%s9765_s6 + $0x8] sm:$0xff] }
 0x203   : > { %9944 = vst [vmem:[#allocation116_spill] sm:$0xff] %v7999_v23  ;;  %5549 = vmatprep.mubr.msk.f32.mxu0 %vm807_vm0, %v572_v9  ;;  %9945 = vst [vmem:[#allocation117_spill] sm:$0xff] %v8010_v63  ;;  %4897 = vperm.xlu0 %6189, %v4872_v30   ;;  %v8020_v9 = vpop.f32.mrb[32].mxu1  ;;  %v573_v63 = vld [vmem:[%s9760_s1 + $0x5b0] sm:$0xff]  ;;  %v4871_v30 = vld [vmem:[%s9765_s6 + $0x18] sm:$0xff] }
 0x204   : > { %4882 = vperm.xlu1 %6190, %v4869_v54   ;;  %v8024_v25 = vpop.f32.mrb[33].mxu1  ;;  %v8039_v54 = vpop.permute.xlu1 %3004 }
 0x205   : > { %v8018_v14 = vpop.f32.mrb[74].mxu0  ;;  %9948 = vst [vmem:[#allocation120_spill] sm:$0xff] %v8039_v54  ;;  %v578_v54 = vld [vmem:[%s9760_s1 + $0x5d8] sm:$0xff] }
 0x206   : > { %9946 = vst [vmem:[#allocation118_spill] sm:$0xff] %v8018_v14  ;;  %v8022_v23 = vpop.f32.mrb[75].mxu0  ;;  %2037 = vmatmul.mubr.f32.gmra.mrb[180].mxu0 %v571_v0  ;;  %v576_v0 = vld [vmem:[%s9760_s1 + $0x5c8] sm:$0xff] }
 0x207   : > { %9947 = vst [vmem:[#allocation119_spill] sm:$0xff] %v8022_v23  ;;  %5550 = vmatprep.mubr.msk.f32.mxu0 %vm807_vm0, %v574_v4  ;;  %4907 = vperm.xlu0 %6189, %v4874_v59   ;;  %v8043_v4 = vpop.f32.mrb[34].mxu1  ;;  %v5034_v59 = vld [vmem:[%s9767_s8 + $0x8] sm:$0x3] }
 0x208   : > { %4892 = vperm.xlu1 %6190, %v4871_v30   ;;  %v8047_v58 = vpop.f32.mrb[35].mxu1 }
 0x209   : > { %v8041_v23 = vpop.f32.mrb[76].mxu0 }
 0x20a   : > { %9949 = vst [vmem:[#allocation121_spill] sm:$0xff] %v8041_v23  ;;  %v8045_v14 = vpop.f32.mrb[77].mxu0  ;;  %2043 = vmatmul.mubr.f32.gmra.mrb[182].mxu0 %v573_v63  ;;  %v8056_v23 = vpop.permute.xlu0 %3009  ;;  %v4873_v63 = vld [vmem:[%s9765_s6 + $0x28] sm:$0xff] }
 0x20b   : > { %9950 = vst [vmem:[#allocation122_spill] sm:$0xff] %v8045_v14  ;;  %5551 = vmatprep.mubr.msk.f32.mxu0 %vm807_vm0, %v576_v0  ;;  %9951 = vst [vmem:[#allocation123_spill] sm:$0xff] %v8056_v23  ;;  %5042 = vperm.xlu0 %6189, %v5034_v59   ;;  %v8066_v0 = vpop.f32.mrb[36].mxu1  ;;  %v577_v23 = vld [vmem:[%s9760_s1 + $0x5d0] sm:$0xff]  ;;  %v580_v59 = vld [vmem:[%s9760_s1 + $0x5e8] sm:$0xff] }
 0x20c   : > { %4902 = vperm.xlu1 %6190, %v4873_v63   ;;  %v8070_v53 = vpop.f32.mrb[37].mxu1  ;;  %v8082_v63 = vpop.permute.xlu1 %3014 }
 0x20d   : > { %v8064_v30 = vpop.f32.mrb[78].mxu0  ;;  %9954 = vst [vmem:[#allocation126_spill] sm:$0xff] %v8082_v63  ;;  %v582_v63 = vld [vmem:[%s9760_s1 + $0x5f8] sm:$0xff] }
 0x20e   : > { %9952 = vst [vmem:[#allocation124_spill] sm:$0xff] %v8064_v30  ;;  %v8068_v14 = vpop.f32.mrb[79].mxu0  ;;  %2049 = vmatmul.mubr.f32.gmra.mrb[184].mxu0 %v575_v16  ;;  %v8086_v16 = vpop.f32.mrb[38].mxu1 }
 0x20f   : > { %9953 = vst [vmem:[#allocation125_spill] sm:$0xff] %v8068_v14  ;;  %5552 = vmatprep.mubr.msk.f32.mxu0 %vm807_vm0, %v578_v54  ;;  %v8090_v30 = vpop.f32.mrb[39].mxu1  ;;  %v8099_v47 = vpop.permute.xlu0 %3019 }
 0x210   : > { %5037 = vperm.xlu1 %6190, %v5033_v52   ;;  %9957 = vst [vmem:[#allocation129_spill] sm:$0xff] %v8099_v47  ;;  %v5141_v52 = vld [vmem:[%s9769_s10] sm:$0x3]  ;;  %v581_v47 = vld [vmem:[%s9760_s1 + $0x5f0] sm:$0xff]  ;;  %v8119_v7 = vpop.permute.xlu1 %3024 }
 0x211   : > { %v8084_v14 = vpop.f32.mrb[80].mxu0  ;;  %9960 = vst [vmem:[#allocation132_spill] sm:$0xff] %v8119_v7 }
 0x212   : > { %9955 = vst [vmem:[#allocation127_spill] sm:$0xff] %v8084_v14  ;;  %v8088_v54 = vpop.f32.mrb[81].mxu0  ;;  %2055 = vmatmul.mubr.f32.gmra.mrb[186].mxu0 %v577_v23  ;;  %v8106_v23 = vpop.f32.mrb[40].mxu1 }
 0x213   : > { %9956 = vst [vmem:[#allocation128_spill] sm:$0xff] %v8088_v54  ;;  %5553 = vmatprep.mubr.msk.f32.mxu0 %vm807_vm0, %v580_v59  ;;  %v8110_v14 = vpop.f32.mrb[41].mxu1  ;;  %v8136_v7 = vpop.permute.xlu0 %3029 }
 0x214   : > { %5144 = vperm.xlu1 %6190, %v5141_v52   ;;  %9963 = vst [vmem:[#allocation135_spill] sm:$0xff] %v8136_v7  ;;  %v8153_v7 = vpop.permute.xlu1 %3034 }
 0x215   : > { %v8104_v54 = vpop.f32.mrb[82].mxu0  ;;  %9966 = vst [vmem:[#allocation138_spill] sm:$0xff] %v8153_v7 }
 0x216   : > { %9958 = vst [vmem:[#allocation130_spill] sm:$0xff] %v8104_v54  ;;  %v8108_v59 = vpop.f32.mrb[83].mxu0  ;;  %2061 = vmatmul.mubr.f32.gmra.mrb[188].mxu0 %v579_v13  ;;  %v8123_v54 = vpop.f32.mrb[42].mxu1 }
 0x217   : > { %9959 = vst [vmem:[#allocation131_spill] sm:$0xff] %v8108_v59  ;;  %5554 = vmatprep.mubr.msk.f32.mxu0 %vm807_vm0, %v582_v63  ;;  %v8127_v13 = vpop.f32.mrb[43].mxu1  ;;  %v583_v63 = vld [vmem:[%s9760_s1 + $0x600] sm:$0xff]  ;;  %v8170_v7 = vpop.permute.xlu0 %3039 }
 0x218   : > { %v8140_v41 = vpop.f32.mrb[44].mxu1  ;;  %9969 = vst [vmem:[#allocation141_spill] sm:$0xff] %v8170_v7  ;;  %v8187_v7 = vpop.permute.xlu1 %3044 }
 0x219   : > { %v8121_v52 = vpop.f32.mrb[84].mxu0  ;;  %9972 = vst [vmem:[#allocation144_spill] sm:$0xff] %v8187_v7 }
 0x21a   : > { %9961 = vst [vmem:[#allocation133_spill] sm:$0xff] %v8121_v52  ;;  %v8125_v59 = vpop.f32.mrb[85].mxu0  ;;  %2067 = vmatmul.mubr.f32.gmra.mrb[190].mxu0 %v581_v47  ;;  %v8144_v47 = vpop.f32.mrb[45].mxu1 }
 0x21b   : > { %9962 = vst [vmem:[#allocation134_spill] sm:$0xff] %v8125_v59  ;;  %5555 = vmatprep.mubr.msk.f32.mxu0 %vm807_vm0, %v584_v46  ;;  %v585_v46 = vld [vmem:[%s9760_s1 + $0x610] sm:$0xff]  ;;  %v8157_v1 = vpop.f32.mrb[46].mxu1  ;;  %v8204_v7 = vpop.permute.xlu0 %3049 }
 0x21c   : > { %9976 = vst [vmem:[#allocation148_spill] sm:$0xff] %v8204_v7  ;;  %v8221_v7 = vpop.permute.xlu1 %3054 }
 0x21d   : > { %v8138_v52 = vpop.f32.mrb[86].mxu0  ;;  %9981 = vst [vmem:[#allocation153_spill] sm:$0xff] %v8221_v7 }
 0x21e   : > { %9964 = vst [vmem:[#allocation136_spill] sm:$0xff] %v8138_v52  ;;  %v8142_v59 = vpop.f32.mrb[87].mxu0  ;;  %2073 = vmatmul.mubr.f32.gmra.mrb[192].mxu0 %v583_v63  ;;  %v8161_v63 = vpop.f32.mrb[47].mxu1 }
 0x21f   : > { %9965 = vst [vmem:[#allocation137_spill] sm:$0xff] %v8142_v59  ;;  %5556 = vmatprep.mubr.msk.f32.mxu0 %vm807_vm0, %v586_v42  ;;  %v587_v42 = vld [vmem:[%s9760_s1 + $0x620] sm:$0xff]  ;;  %v8174_v57 = vpop.f32.mrb[48].mxu1  ;;  %v8238_v7 = vpop.permute.xlu0 %3059 }
 0x220   : > { %9986 = vst [vmem:[#allocation158_spill] sm:$0xff] %v8238_v7  ;;  %v8255_v7 = vpop.permute.xlu1 %3064 }
 0x221   : > { %v8155_v52 = vpop.f32.mrb[88].mxu0  ;;  %9991 = vst [vmem:[#allocation163_spill] sm:$0xff] %v8255_v7 }
 0x222   : > { %9967 = vst [vmem:[#allocation139_spill] sm:$0xff] %v8155_v52  ;;  %v8159_v59 = vpop.f32.mrb[89].mxu0  ;;  %2079 = vmatmul.mubr.f32.gmra.mrb[194].mxu0 %v585_v46  ;;  %v8178_v46 = vpop.f32.mrb[49].mxu1 }
 0x223   : > { %9968 = vst [vmem:[#allocation140_spill] sm:$0xff] %v8159_v59  ;;  %5557 = vmatprep.mubr.msk.f32.mxu0 %vm807_vm0, %v588_v3  ;;  %v589_v3 = vld [vmem:[%s9760_s1 + $0x630] sm:$0xff]  ;;  %v8191_v31 = vpop.f32.mrb[50].mxu1  ;;  %v8272_v7 = vpop.permute.xlu0 %3069 }
 0x224   : > { %9996 = vst [vmem:[#allocation168_spill] sm:$0xff] %v8272_v7  ;;  %v604_v7 = vld [vmem:[%s9760_s1 + $0x6a8] sm:$0xff] }
 0x225   : > { %v8172_v52 = vpop.f32.mrb[90].mxu0 }
 0x226   : > { %9970 = vst [vmem:[#allocation142_spill] sm:$0xff] %v8172_v52  ;;  %v8176_v59 = vpop.f32.mrb[91].mxu0  ;;  %2085 = vmatmul.mubr.f32.gmra.mrb[196].mxu0 %v587_v42  ;;  %v8195_v42 = vpop.f32.mrb[51].mxu1 }
 0x227   : > { %9971 = vst [vmem:[#allocation143_spill] sm:$0xff] %v8176_v59  ;;  %5558 = vmatprep.mubr.msk.f32.mxu0 %vm807_vm0, %v590_v37  ;;  %9975 = vst [vmem:[#allocation147_spill] sm:$0xff] %v8195_v42  ;;  %v591_v37 = vld [vmem:[%s9760_s1 + $0x640] sm:$0xff]  ;;  %v8208_v26 = vpop.f32.mrb[52].mxu1 }
 0x228   : > { %9978 = vst [vmem:[#allocation150_spill] sm:$0xff] %v8208_v26 }
 0x229   : > { %v8189_v52 = vpop.f32.mrb[92].mxu0 }
 0x22a   : > { %9973 = vst [vmem:[#allocation145_spill] sm:$0xff] %v8189_v52  ;;  %v8193_v59 = vpop.f32.mrb[93].mxu0  ;;  %2091 = vmatmul.mubr.f32.gmra.mrb[198].mxu0 %v589_v3  ;;  %v8212_v3 = vpop.f32.mrb[53].mxu1 }
 0x22b   : > { %9974 = vst [vmem:[#allocation146_spill] sm:$0xff] %v8193_v59  ;;  %5559 = vmatprep.mubr.msk.f32.mxu0 %vm807_vm0, %v592_v33  ;;  %9980 = vst [vmem:[#allocation152_spill] sm:$0xff] %v8212_v3  ;;  %v593_v33 = vld [vmem:[%s9760_s1 + $0x650] sm:$0xff]  ;;  %v8225_v51 = vpop.f32.mrb[54].mxu1 }
 0x22c   : > { %9983 = vst [vmem:[#allocation155_spill] sm:$0xff] %v8225_v51  ;;  %v609_v3 = vld [vmem:[%s9760_s1 + $0x6d0] sm:$0xff] }
 0x22d   : > { %v8206_v52 = vpop.f32.mrb[94].mxu0 }
 0x22e   : > { %9977 = vst [vmem:[#allocation149_spill] sm:$0xff] %v8206_v52  ;;  %v8210_v59 = vpop.f32.mrb[95].mxu0  ;;  %2097 = vmatmul.mubr.f32.gmra.mrb[200].mxu0 %v591_v37  ;;  %v8229_v37 = vpop.f32.mrb[55].mxu1 }
 0x22f   : > { %9979 = vst [vmem:[#allocation151_spill] sm:$0xff] %v8210_v59  ;;  %5560 = vmatprep.mubr.msk.f32.mxu0 %vm807_vm0, %v594_v60  ;;  %9985 = vst [vmem:[#allocation157_spill] sm:$0xff] %v8229_v37  ;;  %v595_v60 = vld [vmem:[%s9760_s1 + $0x660] sm:$0xff]  ;;  %v8242_v17 = vpop.f32.mrb[56].mxu1  ;;  %v600_v37 = vld [vmem:[%s9760_s1 + $0x688] sm:$0xff] }
 0x230   : > { %9988 = vst [vmem:[#allocation160_spill] sm:$0xff] %v8242_v17 }
 0x231   : > { %v8223_v52 = vpop.f32.mrb[96].mxu0 }
 0x232   : > { %9982 = vst [vmem:[#allocation154_spill] sm:$0xff] %v8223_v52  ;;  %v8227_v59 = vpop.f32.mrb[97].mxu0  ;;  %2103 = vmatmul.mubr.f32.gmra.mrb[202].mxu0 %v593_v33  ;;  %v8246_v33 = vpop.f32.mrb[57].mxu1 }
 0x233   : > { %9984 = vst [vmem:[#allocation156_spill] sm:$0xff] %v8227_v59  ;;  %5561 = vmatprep.mubr.msk.f32.mxu0 %vm807_vm0, %v596_v24  ;;  %9990 = vst [vmem:[#allocation162_spill] sm:$0xff] %v8246_v33  ;;  %v597_v24 = vld [vmem:[%s9760_s1 + $0x670] sm:$0xff]  ;;  %v8259_v17 = vpop.f32.mrb[58].mxu1  ;;  %v602_v33 = vld [vmem:[%s9760_s1 + $0x698] sm:$0xff] }
 0x234   : > { %9993 = vst [vmem:[#allocation165_spill] sm:$0xff] %v8259_v17 }
 0x235   : > { %v8240_v52 = vpop.f32.mrb[98].mxu0 }
 0x236   : > { %9987 = vst [vmem:[#allocation159_spill] sm:$0xff] %v8240_v52  ;;  %v8244_v59 = vpop.f32.mrb[99].mxu0  ;;  %2109 = vmatmul.mubr.f32.gmra.mrb[204].mxu0 %v595_v60  ;;  %v8263_v60 = vpop.f32.mrb[59].mxu1 }
 0x237   : > { %9989 = vst [vmem:[#allocation161_spill] sm:$0xff] %v8244_v59  ;;  %5562 = vmatprep.mubr.msk.f32.mxu0 %vm807_vm0, %v598_v19  ;;  %9995 = vst [vmem:[#allocation167_spill] sm:$0xff] %v8263_v60  ;;  %v599_v19 = vld [vmem:[%s9760_s1 + $0x680] sm:$0xff]  ;;  %v8276_v17 = vpop.f32.mrb[60].mxu1  ;;  %v8286_v60 = vpop.permute.xlu1 %3074 }
 0x238   : > { %9998 = vst [vmem:[#allocation170_spill] sm:$0xff] %v8276_v17  ;;  %10001 = vst [vmem:[#allocation173_spill] sm:$0xff] %v8286_v60  ;;  %v8303_v60 = vpop.permute.xlu0 %3079 }
 0x239   : > { %v8257_v52 = vpop.f32.mrb[100].mxu0  ;;  %10006 = vst [vmem:[#allocation178_spill] sm:$0xff] %v8303_v60  ;;  %v605_v60 = vld [vmem:[%s9760_s1 + $0x6b0] sm:$0xff] }
 0x23a   : > { %9992 = vst [vmem:[#allocation164_spill] sm:$0xff] %v8257_v52  ;;  %v8261_v59 = vpop.f32.mrb[101].mxu0  ;;  %2115 = vmatmul.mubr.f32.gmra.mrb[206].mxu0 %v597_v24  ;;  %v8280_v24 = vpop.f32.mrb[61].mxu1 }
 0x23b   : > { %9994 = vst [vmem:[#allocation166_spill] sm:$0xff] %v8261_v59  ;;  %5563 = vmatprep.mubr.msk.f32.mxu0 %vm807_vm0, %v600_v37  ;;  %10000 = vst [vmem:[#allocation172_spill] sm:$0xff] %v8280_v24  ;;  %v601_v37 = vld [vmem:[%s9760_s1 + $0x690] sm:$0xff]  ;;  %v8293_v17 = vpop.f32.mrb[62].mxu1  ;;  %v606_v24 = vld [vmem:[%s9760_s1 + $0x6b8] sm:$0xff]  ;;  %v8324_v51 = vpop.permute.xlu1 %3084 }
 0x23c   : > { %10003 = vst [vmem:[#allocation175_spill] sm:$0xff] %v8293_v17  ;;  %10011 = vst [vmem:[#allocation183_spill] sm:$0xff] %v8324_v51  ;;  %v3090_v62 = vpop.permute.xlu0 %3089 }
 0x23d   : > { %v8274_v52 = vpop.f32.mrb[102].mxu0 }
 0x23e   : > { %9997 = vst [vmem:[#allocation169_spill] sm:$0xff] %v8274_v52  ;;  %v8278_v59 = vpop.f32.mrb[103].mxu0  ;;  %2121 = vmatmul.mubr.f32.gmra.mrb[208].mxu0 %v599_v19  ;;  %v8297_v19 = vpop.f32.mrb[63].mxu1 }
 0x23f   : > { %9999 = vst [vmem:[#allocation171_spill] sm:$0xff] %v8278_v59  ;;  %5564 = vmatprep.mubr.msk.f32.mxu0 %vm807_vm0, %v602_v33  ;;  %10005 = vst [vmem:[#allocation177_spill] sm:$0xff] %v8297_v19  ;;  %v603_v33 = vld [vmem:[%s9760_s1 + $0x6a0] sm:$0xff]  ;;  %v8310_v17 = vpop.f32.mrb[64].mxu1  ;;  %v3095_v51 = vpop.permute.xlu1 %3094 }
 0x240   : > { %10008 = vst [vmem:[#allocation180_spill] sm:$0xff] %v8310_v17 }
 0x241   : > { %v8291_v52 = vpop.f32.mrb[104].mxu0 }
 0x242   : > { %10002 = vst [vmem:[#allocation174_spill] sm:$0xff] %v8291_v52  ;;  %v8295_v59 = vpop.f32.mrb[105].mxu0  ;;  %2127 = vmatmul.mubr.f32.gmra.mrb[210].mxu0 %v601_v37  ;;  %v608_v37 = vld [vmem:[%s9760_s1 + $0x6c8] sm:$0xff] }
 0x243   : > { %10004 = vst [vmem:[#allocation176_spill] sm:$0xff] %v8295_v59  ;;  %5565 = vmatprep.mubr.msk.f32.mxu0 %vm807_vm0, %v604_v7  ;;  %v8316_v7 = vpop.f32.mrb[65].mxu1 }
 0x244   : > { %10010 = vst [vmem:[#allocation182_spill] sm:$0xff] %v8316_v7 }
 0x245   : > { %v8308_v52 = vpop.f32.mrb[106].mxu0 }
 0x246   : > { %10007 = vst [vmem:[#allocation179_spill] sm:$0xff] %v8308_v52  ;;  %v8314_v59 = vpop.f32.mrb[107].mxu0  ;;  %2133 = vmatmul.mubr.f32.gmra.mrb[212].mxu0 %v603_v33  ;;  %v8329_v52 = vpop.f32.mrb[66].mxu1 }
 0x247   : > { %10009 = vst [vmem:[#allocation181_spill] sm:$0xff] %v8314_v59  ;;  %5566 = vmatprep.mubr.msk.f32.mxu0 %vm807_vm0, %v606_v24  ;;  %10012 = vst [vmem:[#allocation184_spill] sm:$0xff] %v8329_v52  ;;  %v8332_v19 = vpop.f32.mrb[67].mxu1  ;;  %v607_v59 = vld [vmem:[%s9760_s1 + $0x6c0] sm:$0xff]  ;;  %v610_v52 = vld [vmem:[%s9760_s1 + $0x6d8] sm:$0xff] }
 0x248   : > { %10013 = vst [vmem:[#allocation185_spill] sm:$0xff] %v8332_v19 }
 0x249   : > { %v1822_v10 = vpop.f32.mrb[108].mxu0 }
 0x24a   : > { %v2661_v33 = vmax.f32 %v1822_v10, %v7699_v29  ;;  %v1824_v7 = vpop.f32.mrb[109].mxu0  ;;  %2139 = vmatmul.mubr.f32.gmra.mrb[214].mxu0 %v605_v60  ;;  %v8342_v29 = vpop.f32.mrb[68].mxu1 }
 0x24b   : > { %v2662_v24 = vmax.f32 %v1824_v7, %v7703_v61  ;;  %5567 = vmatprep.mubr.msk.f32.mxu0 %vm807_vm0, %v608_v37  ;;  %10014 = vst [vmem:[#allocation186_spill] sm:$0xff] %v8342_v29  ;;  %v8345_v61 = vpop.f32.mrb[69].mxu1 }
 0x24c   : > { %v3365_v10 = vadd.f32 %v3090_v62, %v2661_v33  ;;  %10015 = vst [vmem:[#allocation187_spill] sm:$0xff] %v8345_v61  ;;  %v612_v33 = vld [vmem:[%s9760_s1 + $0x6e8] sm:$0xff] }
 0x24d   : > { %v1828_v17 = vpop.f32.mrb[110].mxu0  ;;  %v3366_v37 = vadd.f32 %v3090_v62, %v2662_v24  ;;  %v3100_v24 = vpop.permute.xlu0 %3099 }
 0x24e   : > { %v2663_v60 = vmax.f32 %v1828_v17, %v7719_v28  ;;  %v1830_v19 = vpop.f32.mrb[111].mxu0  ;;  %2145 = vmatmul.mubr.f32.gmra.mrb[216].mxu0 %v607_v59  ;;  %v3541_v28 = vmax.f32 %v3365_v10, 0.0 }
 0x24f   : > { %v2664_v7 = vmax.f32 %v1830_v19, %v7723_v36  ;;  %5568 = vmatprep.mubr.msk.f32.mxu0 %vm807_vm0, %v610_v52  ;;  %v3542_v36 = vmax.f32 %v3366_v37, 0.0 }
 0x250   : > { %v3367_v26 = vadd.f32 %v3095_v51, %v2663_v60  ;;  %v611_v60 = vld [vmem:[%s9760_s1 + $0x6e0] sm:$0xff] }
 0x251   : > { %v3368_v29 = vadd.f32 %v3095_v51, %v2664_v7  ;;  %v1834_v17 = vpop.f32.mrb[112].mxu0 }
 0x252   : > { %v3543_v59 = vmax.f32 %v3367_v26, 0.0  ;;  %v2665_v61 = vmax.f32 %v1834_v17, %v7739_v49  ;;  %v1836_v62 = vpop.f32.mrb[113].mxu0  ;;  %2151 = vmatmul.mubr.f32.gmra.mrb[218].mxu0 %v609_v3  ;;  %v614_v26 = vld [vmem:[%s9760_s1 + $0x6f8] sm:$0xff]  ;;  %v3105_v49 = vpop.permute.xlu1 %3104 }
 0x253   : > { %v3544_v19 = vmax.f32 %v3368_v29, 0.0  ;;  %v2666_v52 = vmax.f32 %v1836_v62, %v7743_v56  ;;  %5569 = vmatprep.mubr.msk.f32.mxu0 %vm807_vm0, %v612_v33  ;;  %v613_v33 = vld [vmem:[%s9760_s1 + $0x6f0] sm:$0xff] }
 0x254   : > { %v8361_v42 = vpack.c.bf16 %v3543_v59, %v3541_v28  ;;  %v3369_v29 = vadd.f32 %v3100_v24, %v2665_v61  ;;  %v616_v28 = vld [vmem:[%s9760_s1 + $0x708] sm:$0xff] }
 0x255   : > { %v1840_v51 = vpop.f32.mrb[114].mxu0  ;;  %v8366_v3 = vpack.c.bf16 %v3544_v19, %v3542_v36  ;;  %v3370_v37 = vadd.f32 %v3100_v24, %v2666_v52 }
 0x256   : > { %v2667_v56 = vmax.f32 %v1840_v51, %v7756_v18  ;;  %v1842_v10 = vpop.f32.mrb[115].mxu0  ;;  %2157 = vmatmul.mubr.f32.gmra.mrb[220].mxu0 %v611_v60  ;;  %v3545_v62 = vmax.f32 %v3369_v29, 0.0  ;;  %v3110_v60 = vpop.permute.xlu0 %3109 }
 0x257   : > { %v2668_v7 = vmax.f32 %v1842_v10, %v7760_v35  ;;  %5570 = vmatprep.mubr.msk.f32.mxu0 %vm807_vm0, %v614_v26  ;;  %v3546_v35 = vmax.f32 %v3370_v37, 0.0  ;;  %v615_v26 = vld [vmem:[%s9760_s1 + $0x700] sm:$0xff]  ;;  %v3115_v29 = vpop.permute.xlu1 %3114 }
 0x258   : > { %v3371_v17 = vadd.f32 %v3105_v49, %v2667_v56 }
 0x259   : > { %v3372_v59 = vadd.f32 %v3105_v49, %v2668_v7  ;;  %v1846_v61 = vpop.f32.mrb[116].mxu0  ;;  %v618_v49 = vld [vmem:[%s9760_s1 + $0x718] sm:$0xff] }
 0x25a   : > { %v3547_v18 = vmax.f32 %v3371_v17, 0.0  ;;  %v2669_v36 = vmax.f32 %v1846_v61, %v7773_v5  ;;  %v1848_v19 = vpop.f32.mrb[117].mxu0  ;;  %2163 = vmatmul.mubr.f32.gmra.mrb[222].mxu0 %v613_v33  ;;  %v617_v17 = vld [vmem:[%s9760_s1 + $0x710] sm:$0xff] }
 0x25b   : > { %v3548_v52 = vmax.f32 %v3372_v59, 0.0  ;;  %v2670_v24 = vmax.f32 %v1848_v19, %v7777_v20  ;;  %5571 = vmatprep.mubr.msk.f32.mxu0 %vm807_vm0, %v616_v28  ;;  %v620_v59 = vld [vmem:[%s9760_s1 + $0x728] sm:$0xff] }
 0x25c   : > { %v8383_v51 = vpack.c.bf16 %v3547_v18, %v3545_v62  ;;  %v3373_v10 = vadd.f32 %v3110_v60, %v2669_v36 }
 0x25d   : > { %v1852_v5 = vpop.f32.mrb[118].mxu0  ;;  %v8388_v56 = vpack.c.bf16 %v3548_v52, %v3546_v35  ;;  %v3374_v7 = vadd.f32 %v3110_v60, %v2670_v24  ;;  %v3120_v24 = vpop.permute.xlu0 %3119  ;;  %v619_v60 = vld [vmem:[%s9760_s1 + $0x720] sm:$0xff] }
 0x25e   : > { %v2671_v20 = vmax.f32 %v1852_v5, %v7793_v45  ;;  %v1854_v37 = vpop.f32.mrb[119].mxu0  ;;  %2169 = vmatmul.mubr.f32.gmra.mrb[224].mxu0 %v615_v26  ;;  %v3549_v18 = vmax.f32 %v3373_v10, 0.0  ;;  %v3125_v5 = vpop.permute.xlu1 %3124 }
 0x25f   : > { %v2672_v33 = vmax.f32 %v1854_v37, %v7797_v21  ;;  %5572 = vmatprep.mubr.msk.f32.mxu0 %vm807_vm0, %v618_v49  ;;  %v3550_v21 = vmax.f32 %v3374_v7, 0.0  ;;  %v622_v49 = vld [vmem:[%s9760_s1 + $0x738] sm:$0xff] }
 0x260   : > { %v3375_v28 = vadd.f32 %v3115_v29, %v2671_v20 }
 0x261   : > { %v3376_v61 = vadd.f32 %v3115_v29, %v2672_v33  ;;  %v1858_v62 = vpop.f32.mrb[120].mxu0  ;;  %v621_v33 = vld [vmem:[%s9760_s1 + $0x730] sm:$0xff] }
 0x262   : > { %v3551_v45 = vmax.f32 %v3375_v28, 0.0  ;;  %v2673_v36 = vmax.f32 %v1858_v62, %v7813_v6  ;;  %v1860_v19 = vpop.f32.mrb[121].mxu0  ;;  %2175 = vmatmul.mubr.f32.gmra.mrb[226].mxu0 %v617_v17  ;;  %v624_v28 = vld [vmem:[%s9760_s1 + $0x748] sm:$0xff] }
 0x263   : > { %v3552_v35 = vmax.f32 %v3376_v61, 0.0  ;;  %v2674_v52 = vmax.f32 %v1860_v19, %v7817_v50  ;;  %5573 = vmatprep.mubr.msk.f32.mxu0 %vm807_vm0, %v620_v59 }
 0x264   : > { %v8405_v26 = vpack.c.bf16 %v3551_v45, %v3549_v18  ;;  %v3377_v10 = vadd.f32 %v3120_v24, %v2673_v36 }
 0x265   : > { %v1864_v6 = vpop.f32.mrb[122].mxu0  ;;  %v8410_v29 = vpack.c.bf16 %v3552_v35, %v3550_v21  ;;  %v3378_v37 = vadd.f32 %v3120_v24, %v2674_v52  ;;  %v3130_v21 = vpop.permute.xlu0 %3129  ;;  %v623_v35 = vld [vmem:[%s9760_s1 + $0x740] sm:$0xff]  ;;  %v626_v24 = vld [vmem:[%s9760_s1 + $0x758] sm:$0xff] }
 0x266   : > { %v2675_v50 = vmax.f32 %v1864_v6, %v7836_v27  ;;  %v1866_v20 = vpop.f32.mrb[123].mxu0  ;;  %2181 = vmatmul.mubr.f32.gmra.mrb[228].mxu0 %v619_v60  ;;  %v3553_v62 = vmax.f32 %v3377_v10, 0.0  ;;  %v3135_v60 = vpop.permute.xlu1 %3134 }
 0x267   : > { %v2676_v7 = vmax.f32 %v1866_v20, %v7840_v40  ;;  %5574 = vmatprep.mubr.msk.f32.mxu0 %vm807_vm0, %v622_v49  ;;  %v3554_v40 = vmax.f32 %v3378_v37, 0.0  ;;  %v625_v20 = vld [vmem:[%s9760_s1 + $0x750] sm:$0xff] }
 0x268   : > { %v3379_v17 = vadd.f32 %v3125_v5, %v2675_v50 }
 0x269   : > { %v3380_v59 = vadd.f32 %v3125_v5, %v2676_v7  ;;  %v1870_v61 = vpop.f32.mrb[124].mxu0  ;;  %v628_v7 = vld [vmem:[%s9760_s1 + $0x768] sm:$0xff] }
 0x26a   : > { %v3555_v27 = vmax.f32 %v3379_v17, 0.0  ;;  %v2677_v18 = vmax.f32 %v1870_v61, %v7859_v11  ;;  %v1872_v45 = vpop.f32.mrb[125].mxu0  ;;  %2187 = vmatmul.mubr.f32.gmra.mrb[230].mxu0 %v621_v33 }
 0x26b   : > { %v3556_v36 = vmax.f32 %v3380_v59, 0.0  ;;  %v2678_v19 = vmax.f32 %v1872_v45, %v7863_v34  ;;  %5575 = vmatprep.mubr.msk.f32.mxu0 %vm807_vm0, %v624_v28  ;;  %v627_v45 = vld [vmem:[%s9760_s1 + $0x760] sm:$0xff] }
 0x26c   : > { %v8427_v52 = vpack.c.bf16 %v3555_v27, %v3553_v62  ;;  %v3381_v6 = vadd.f32 %v3130_v21, %v2677_v18  ;;  %v3140_v18 = vpop.permute.xlu0 %3139 }
 0x26d   : > { %v1876_v11 = vpop.f32.mrb[126].mxu0  ;;  %v8432_v49 = vpack.c.bf16 %v3556_v36, %v3554_v40  ;;  %v3382_v10 = vadd.f32 %v3130_v21, %v2678_v19  ;;  %v630_v36 = vld [vmem:[%s9760_s1 + $0x778] sm:$0xff]  ;;  %v3145_v19 = vpop.permute.xlu1 %3144 }
 0x26e   : > { %v2679_v34 = vmax.f32 %v1876_v11, %v7882_v12  ;;  %v1878_v5 = vpop.f32.mrb[127].mxu0  ;;  %2193 = vmatmul.mubr.f32.gmra.mrb[232].mxu0 %v623_v35  ;;  %v3557_v28 = vmax.f32 %v3381_v6, 0.0  ;;  %v629_v6 = vld [vmem:[%s9760_s1 + $0x770] sm:$0xff] }
 0x26f   : > { %v2680_v50 = vmax.f32 %v1878_v5, %v7886_v55  ;;  %5576 = vmatprep.mubr.msk.f32.mxu0 %vm807_vm0, %v626_v24  ;;  %v3558_v55 = vmax.f32 %v3382_v10, 0.0  ;;  %v632_v5 = vld [vmem:[%s9760_s1 + $0x788] sm:$0xff] }
 0x270   : > { %v3383_v37 = vadd.f32 %v3135_v60, %v2679_v34 }
 0x271   : > { %v3384_v33 = vadd.f32 %v3135_v60, %v2680_v50  ;;  %v1882_v17 = vpop.f32.mrb[128].mxu0 }
 0x272   : > { %v3559_v12 = vmax.f32 %v3383_v37, 0.0  ;;  %v2681_v59 = vmax.f32 %v1882_v17, %v7905_v48  ;;  %v1884_v61 = vpop.f32.mrb[129].mxu0  ;;  %2199 = vmatmul.mubr.f32.gmra.mrb[234].mxu0 %v625_v20 }
 0x273   : > { %v3560_v62 = vmax.f32 %v3384_v33, 0.0  ;;  %v2682_v27 = vmax.f32 %v1884_v61, %v7909_v22  ;;  %5577 = vmatprep.mubr.msk.f32.mxu0 %vm807_vm0, %v628_v7  ;;  %v634_v61 = vld [vmem:[%s9760_s1 + $0x798] sm:$0xff] }
 0x274   : > { %v8449_v40 = vpack.c.bf16 %v3559_v12, %v3557_v28  ;;  %v3385_v35 = vadd.f32 %v3140_v18, %v2681_v59  ;;  %v3150_v28 = vpop.permute.xlu0 %3149  ;;  %v631_v12 = vld [vmem:[%s9760_s1 + $0x780] sm:$0xff] }
 0x275   : > { %v1888_v48 = vpop.f32.mrb[130].mxu0  ;;  %v8454_v21 = vpack.c.bf16 %v3560_v62, %v3558_v55  ;;  %v3386_v11 = vadd.f32 %v3140_v18, %v2682_v27  ;;  %v3155_v55 = vpop.permute.xlu1 %3154 }
 0x276   : > { %v2683_v22 = vmax.f32 %v1888_v48, %v7928_v32  ;;  %v1890_v24 = vpop.f32.mrb[131].mxu0  ;;  %2205 = vmatmul.mubr.f32.gmra.mrb[236].mxu0 %v627_v45  ;;  %v3561_v20 = vmax.f32 %v3385_v35, 0.0  ;;  %v633_v48 = vld [vmem:[%s9760_s1 + $0x790] sm:$0xff]  ;;  %v636_v35 = vld [vmem:[%s9760_s1 + $0x7a8] sm:$0xff] }
 0x277   : > { %v2684_v60 = vmax.f32 %v1890_v24, %v7932_v15  ;;  %5578 = vmatprep.mubr.msk.f32.mxu0 %vm807_vm0, %v630_v36  ;;  %v3562_v15 = vmax.f32 %v3386_v11, 0.0 }
 0x278   : > { %v3387_v34 = vadd.f32 %v3145_v19, %v2683_v22 }
 0x279   : > { %v3388_v10 = vadd.f32 %v3145_v19, %v2684_v60  ;;  %v1894_v50 = vpop.f32.mrb[132].mxu0 }
 0x27a   : > { %v3563_v32 = vmax.f32 %v3387_v34, 0.0  ;;  %v2685_v37 = vmax.f32 %v1894_v50, %v7951_v43  ;;  %v1896_v7 = vpop.f32.mrb[133].mxu0  ;;  %2211 = vmatmul.mubr.f32.gmra.mrb[238].mxu0 %v629_v6  ;;  %v635_v50 = vld [vmem:[%s9760_s1 + $0x7a0] sm:$0xff] }
 0x27b   : > { %v3564_v33 = vmax.f32 %v3388_v10, 0.0  ;;  %v2686_v17 = vmax.f32 %v1896_v7, %v7955_v39  ;;  %5579 = vmatprep.mubr.msk.f32.mxu0 %vm807_vm0, %v632_v5  ;;  %v3160_v10 = vpop.permute.xlu0 %3159 }
 0x27c   : > { %v8471_v59 = vpack.c.bf16 %v3563_v32, %v3561_v20  ;;  %v3389_v27 = vadd.f32 %v3150_v28, %v2685_v37  ;;  %v638_v32 = vld [vmem:[%s9760_s1 + $0x7b8] sm:$0xff]  ;;  %v3165_v37 = vpop.permute.xlu1 %3164 }
 0x27d   : > { %v1900_v43 = vpop.f32.mrb[134].mxu0  ;;  %v8476_v62 = vpack.c.bf16 %v3564_v33, %v3562_v15  ;;  %v3390_v45 = vadd.f32 %v3150_v28, %v2686_v17 }
 0x27e   : > { %v2687_v39 = vmax.f32 %v1900_v43, %v7974_v44  ;;  %v1902_v18 = vpop.f32.mrb[135].mxu0  ;;  %2217 = vmatmul.mubr.f32.gmra.mrb[240].mxu0 %v631_v12  ;;  %v3565_v11 = vmax.f32 %v3389_v27, 0.0  ;;  %v637_v12 = vld [vmem:[%s9760_s1 + $0x7b0] sm:$0xff]  ;;  %v640_v43 = vld [vmem:[%s9760_s1 + $0x7c8] sm:$0xff] }
 0x27f   : > { %v2688_v36 = vmax.f32 %v1902_v18, %v7978_v8  ;;  %5580 = vmatprep.mubr.msk.f32.mxu0 %vm807_vm0, %v634_v61  ;;  %v3566_v8 = vmax.f32 %v3390_v45, 0.0 }
 0x280   : > { %v3391_v19 = vadd.f32 %v3155_v55, %v2687_v39 }
 0x281   : > { %v3392_v22 = vadd.f32 %v3155_v55, %v2688_v36  ;;  %v1906_v24 = vpop.f32.mrb[136].mxu0 }
 0x282   : > { %v3567_v44 = vmax.f32 %v3391_v19, 0.0  ;;  %v2689_v60 = vmax.f32 %v1906_v24, %v7997_v38  ;;  %v1908_v6 = vpop.f32.mrb[137].mxu0  ;;  %2223 = vmatmul.mubr.f32.gmra.mrb[242].mxu0 %v633_v48  ;;  %v3170_v19 = vpop.permute.xlu0 %3169  ;;  %v642_v24 = vld [vmem:[%s9760_s1 + $0x7d8] sm:$0xff] }
 0x283   : > { %v3568_v34 = vmax.f32 %v3392_v22, 0.0  ;;  %v2690_v5 = vmax.f32 %v1908_v6, %v8001_v2  ;;  %5581 = vmatprep.mubr.msk.f32.mxu0 %vm807_vm0, %v636_v35  ;;  %v639_v35 = vld [vmem:[%s9760_s1 + $0x7c0] sm:$0xff] }
 0x284   : > { %v8493_v20 = vpack.c.bf16 %v3567_v44, %v3565_v11  ;;  %v3393_v15 = vadd.f32 %v3160_v10, %v2689_v60  ;;  %v3175_v11 = vpop.permute.xlu1 %3174 }
 0x285   : > { %v1912_v38 = vpop.f32.mrb[138].mxu0  ;;  %v8498_v7 = vpack.c.bf16 %v3568_v34, %v3566_v8  ;;  %v3394_v17 = vadd.f32 %v3160_v10, %v2690_v5  ;;  %v641_v5 = vld [vmem:[%s9760_s1 + $0x7d0] sm:$0xff] }
 0x286   : > { %v2691_v2 = vmax.f32 %v1912_v38, %v8020_v9  ;;  %v1914_v33 = vpop.f32.mrb[139].mxu0  ;;  %2229 = vmatmul.mubr.f32.gmra.mrb[244].mxu0 %v635_v50  ;;  %v3569_v39 = vmax.f32 %v3393_v15, 0.0  ;;  %v644_v50 = vld [vmem:[%s9760_s1 + $0x7e8] sm:$0xff] }
 0x287   : > { %v2692_v28 = vmax.f32 %v1914_v33, %v8024_v25  ;;  %5582 = vmatprep.mubr.msk.f32.mxu0 %vm807_vm0, %v638_v32  ;;  %v3570_v25 = vmax.f32 %v3394_v17, 0.0 }
 0x288   : > { %v3395_v61 = vadd.f32 %v3165_v37, %v2691_v2 }
 0x289   : > { %v3396_v55 = vadd.f32 %v3165_v37, %v2692_v28  ;;  %v1918_v27 = vpop.f32.mrb[140].mxu0  ;;  %v3180_v28 = vpop.permute.xlu0 %3179 }
 0x28a   : > { %v3571_v9 = vmax.f32 %v3395_v61, 0.0  ;;  %v2693_v18 = vmax.f32 %v1918_v27, %v8043_v4  ;;  %v1920_v45 = vpop.f32.mrb[141].mxu0  ;;  %2235 = vmatmul.mubr.f32.gmra.mrb[246].mxu0 %v637_v12  ;;  %v643_v12 = vld [vmem:[%s9760_s1 + $0x7e0] sm:$0xff] }
 0x28b   : > { %v3572_v36 = vmax.f32 %v3396_v55, 0.0  ;;  %v2694_v48 = vmax.f32 %v1920_v45, %v8047_v58  ;;  %5583 = vmatprep.mubr.msk.f32.mxu0 %vm807_vm0, %v640_v43  ;;  %v646_v43 = vld [vmem:[%s9760_s1 + $0x7f8] sm:$0xff]  ;;  %v3185_v55 = vpop.permute.xlu1 %3184 }
 0x28c   : > { %v8515_v22 = vpack.c.bf16 %v3571_v9, %v3569_v39  ;;  %v3397_v60 = vadd.f32 %v3170_v19, %v2693_v18 }
 0x28d   : > { %v1924_v4 = vpop.f32.mrb[142].mxu0  ;;  %v8520_v44 = vpack.c.bf16 %v3572_v36, %v3570_v25  ;;  %v3398_v8 = vadd.f32 %v3170_v19, %v2694_v48  ;;  %v645_v25 = vld [vmem:[%s9760_s1 + $0x7f0] sm:$0xff]  ;;  %v648_v48 = vld [vmem:[%s9760_s1 + $0x808] sm:$0xff] }
 0x28e   : > { %v2695_v58 = vmax.f32 %v1924_v4, %v8066_v0  ;;  %v1926_v6 = vpop.f32.mrb[143].mxu0  ;;  %2241 = vmatmul.mubr.f32.gmra.mrb[248].mxu0 %v639_v35  ;;  %v3573_v37 = vmax.f32 %v3397_v60, 0.0 }
 0x28f   : > { %v2696_v34 = vmax.f32 %v1926_v6, %v8070_v53  ;;  %5584 = vmatprep.mubr.msk.f32.mxu0 %vm807_vm0, %v642_v24  ;;  %v3574_v53 = vmax.f32 %v3398_v8, 0.0  ;;  %v3190_v6 = vpop.permute.xlu0 %3189  ;;  %v647_v8 = vld [vmem:[%s9760_s1 + $0x800] sm:$0xff] }
 0x290   : > { %v3399_v10 = vadd.f32 %v3175_v11, %v2695_v58 }
 0x291   : > { %v3400_v32 = vadd.f32 %v3175_v11, %v2696_v34  ;;  %v1930_v38 = vpop.f32.mrb[144].mxu0 }
 0x292   : > { %v3575_v0 = vmax.f32 %v3399_v10, 0.0  ;;  %v2697_v15 = vmax.f32 %v1930_v38, %v8086_v16  ;;  %v1932_v2 = vpop.f32.mrb[145].mxu0  ;;  %2247 = vmatmul.mubr.f32.gmra.mrb[250].mxu0 %v641_v5  ;;  %v650_v5 = vld [vmem:[%s9760_s1 + $0x818] sm:$0xff]  ;;  %v3195_v10 = vpop.permute.xlu1 %3194 }
 0x293   : > { %v3576_v33 = vmax.f32 %v3400_v32, 0.0  ;;  %v2698_v17 = vmax.f32 %v1932_v2, %v8090_v30  ;;  %5585 = vmatprep.mubr.msk.f32.mxu0 %vm807_vm0, %v644_v50 }
 0x294   : > { %v8537_v61 = vpack.c.bf16 %v3575_v0, %v3573_v37  ;;  %v3401_v39 = vadd.f32 %v3180_v28, %v2697_v15  ;;  %v649_v15 = vld [vmem:[%s9760_s1 + $0x810] sm:$0xff] }
 0x295   : > { %v1936_v16 = vpop.f32.mrb[146].mxu0  ;;  %v8542_v27 = vpack.c.bf16 %v3576_v33, %v3574_v53  ;;  %v3402_v18 = vadd.f32 %v3180_v28, %v2698_v17  ;;  %v652_v53 = vld [vmem:[%s9760_s1 + $0x828] sm:$0xff] }
 0x296   : > { %v2699_v30 = vmax.f32 %v1936_v16, %v8106_v23  ;;  %v1938_v9 = vpop.f32.mrb[147].mxu0  ;;  %2253 = vmatmul.mubr.f32.gmra.mrb[252].mxu0 %v643_v12  ;;  %v3577_v24 = vmax.f32 %v3401_v39, 0.0  ;;  %v3200_v39 = vpop.permute.xlu0 %3199 }
 0x297   : > { %v2700_v45 = vmax.f32 %v1938_v9, %v8110_v14  ;;  %5586 = vmatprep.mubr.msk.f32.mxu0 %vm807_vm0, %v646_v43  ;;  %v3578_v14 = vmax.f32 %v3402_v18, 0.0  ;;  %v654_v18 = vld [vmem:[%s9760_s1 + $0x838] sm:$0xff] }
 0x298   : > { %v3403_v36 = vadd.f32 %v3185_v55, %v2699_v30  ;;  %v651_v30 = vld [vmem:[%s9760_s1 + $0x820] sm:$0xff] }
 0x299   : > { %v3404_v19 = vadd.f32 %v3185_v55, %v2700_v45  ;;  %v1942_v35 = vpop.f32.mrb[148].mxu0  ;;  %v3205_v45 = vpop.permute.xlu1 %3204 }
 0x29a   : > { %v3579_v23 = vmax.f32 %v3403_v36, 0.0  ;;  %v2701_v4 = vmax.f32 %v1942_v35, %v8123_v54  ;;  %v1944_v11 = vpop.f32.mrb[149].mxu0  ;;  %2259 = vmatmul.mubr.f32.gmra.mrb[254].mxu0 %v645_v25 }
 0x29b   : > { %v3580_v60 = vmax.f32 %v3404_v19, 0.0  ;;  %v2702_v58 = vmax.f32 %v1944_v11, %v8127_v13  ;;  %5587 = vmatprep.mubr.msk.f32.mxu0 %vm807_vm0, %v648_v48 }
 0x29c   : > { %v8559_v34 = vpack.c.bf16 %v3579_v23, %v3577_v24  ;;  %v3405_v32 = vadd.f32 %v3190_v6, %v2701_v4  ;;  %v653_v24 = vld [vmem:[%s9760_s1 + $0x830] sm:$0xff]  ;;  %v656_v4 = vld [vmem:[%s9760_s1 + $0x848] sm:$0xff] }
 0x29d   : > { %v1948_v54 = vpop.f32.mrb[150].mxu0  ;;  %v8564_v50 = vpack.c.bf16 %v3580_v60, %v3578_v14  ;;  %v3406_v37 = vadd.f32 %v3190_v6, %v2702_v58 }
 0x29e   : > { %v2703_v13 = vmax.f32 %v1948_v54, %v8140_v41  ;;  %v1950_v38 = vpop.f32.mrb[151].mxu0  ;;  %2265 = vmatmul.mubr.f32.gmra.mrb[0].mxu0 %v647_v8  ;;  %v3581_v28 = vmax.f32 %v3405_v32, 0.0  ;;  %v655_v32 = vld [vmem:[%s9760_s1 + $0x840] sm:$0xff] }
 0x29f   : > { %v2704_v0 = vmax.f32 %v1950_v38, %v8144_v47  ;;  %5588 = vmatprep.mubr.msk.f32.mxu0 %vm807_vm0, %v650_v5  ;;  %v3582_v47 = vmax.f32 %v3406_v37, 0.0  ;;  %v10016_v5 = vld [vmem:[#allocation147_spill] sm:$0xff]  ;;  %v658_v38 = vld [vmem:[%s9760_s1 + $0x858] sm:$0xff]  ;;  %v3215_v37 = vpop.permute.xlu1 %3214 }
 0x2a0   : > { %v3407_v2 = vadd.f32 %v3195_v10, %v2703_v13 }
 0x2a1   : > { %v3408_v33 = vadd.f32 %v3195_v10, %v2704_v0  ;;  %v1954_v17 = vpop.f32.mrb[152].mxu0  ;;  %v3210_v10 = vpop.permute.xlu0 %3209 }
 0x2a2   : > { %v3583_v41 = vmax.f32 %v3407_v2, 0.0  ;;  %v2705_v12 = vmax.f32 %v1954_v17, %v8157_v1  ;;  %v1956_v43 = vpop.f32.mrb[153].mxu0  ;;  %2271 = vmatmul.mubr.f32.gmra.mrb[2].mxu0 %v649_v15  ;;  %v10017_v2 = vld [vmem:[#allocation150_spill] sm:$0xff] }
 0x2a3   : > { %v3584_v16 = vmax.f32 %v3408_v33, 0.0  ;;  %v2706_v55 = vmax.f32 %v1956_v43, %v8161_v63  ;;  %5589 = vmatprep.mubr.msk.f32.mxu0 %vm807_vm0, %v652_v53 }
 0x2a4   : > { %v8581_v9 = vpack.c.bf16 %v3583_v41, %v3581_v28  ;;  %v3409_v36 = vadd.f32 %v3200_v39, %v2705_v12  ;;  %v10018_v28 = vld [vmem:[#allocation152_spill] sm:$0xff]  ;;  %v657_v12 = vld [vmem:[%s9760_s1 + $0x850] sm:$0xff] }
 0x2a5   : > { %v1960_v1 = vpop.f32.mrb[154].mxu0  ;;  %v8586_v25 = vpack.c.bf16 %v3584_v16, %v3582_v47  ;;  %v3410_v19 = vadd.f32 %v3200_v39, %v2706_v55  ;;  %v660_v47 = vld [vmem:[%s9760_s1 + $0x868] sm:$0xff] }
 0x2a6   : > { %v2707_v63 = vmax.f32 %v1960_v1, %v8174_v57  ;;  %v1962_v48 = vpop.f32.mrb[155].mxu0  ;;  %2277 = vmatmul.mubr.f32.gmra.mrb[4].mxu0 %v651_v30  ;;  %v3585_v60 = vmax.f32 %v3409_v36, 0.0 }
 0x2a7   : > { %v2708_v35 = vmax.f32 %v1962_v48, %v8178_v46  ;;  %5590 = vmatprep.mubr.msk.f32.mxu0 %vm807_vm0, %v654_v18  ;;  %v3586_v46 = vmax.f32 %v3410_v19, 0.0  ;;  %v10019_v18 = vld [vmem:[#allocation155_spill] sm:$0xff]  ;;  %v10020_v48 = vld [vmem:[#allocation157_spill] sm:$0xff] }
 0x2a8   : > { %v3411_v23 = vadd.f32 %v3205_v45, %v2707_v63 }
 0x2a9   : > { %v3412_v11 = vadd.f32 %v3205_v45, %v2708_v35  ;;  %v1966_v14 = vpop.f32.mrb[156].mxu0  ;;  %v3220_v35 = vpop.permute.xlu0 %3219 }
 0x2aa   : > { %v3587_v57 = vmax.f32 %v3411_v23, 0.0  ;;  %v2709_v58 = vmax.f32 %v1966_v14, %v8191_v31  ;;  %v1968_v6 = vpop.f32.mrb[157].mxu0  ;;  %2283 = vmatmul.mubr.f32.gmra.mrb[6].mxu0 %v653_v24  ;;  %v659_v24 = vld [vmem:[%s9760_s1 + $0x860] sm:$0xff]  ;;  %v3225_v14 = vpop.permute.xlu1 %3224 }
 0x2ab   : > { %v3588_v8 = vmax.f32 %v3412_v11, 0.0  ;;  %v2710_v54 = vmax.f32 %v1968_v6, %v10016_v5  ;;  %5591 = vmatprep.mubr.msk.f32.mxu0 %vm807_vm0, %v656_v4  ;;  %v662_v4 = vld [vmem:[%s9760_s1 + $0x878] sm:$0xff]  ;;  %v10022_v5 = vld [vmem:[#allocation162_spill] sm:$0xff] }
 0x2ac   : > { %v8603_v13 = vpack.c.bf16 %v3587_v57, %v3585_v60  ;;  %v3413_v15 = vadd.f32 %v3210_v10, %v2709_v58  ;;  %v10021_v58 = vld [vmem:[#allocation160_spill] sm:$0xff] }
 0x2ad   : > { %v1972_v31 = vpop.f32.mrb[158].mxu0  ;;  %v8608_v0 = vpack.c.bf16 %v3588_v8, %v3586_v46  ;;  %v3414_v17 = vadd.f32 %v3210_v10, %v2710_v54  ;;  %v661_v10 = vld [vmem:[%s9760_s1 + $0x870] sm:$0xff] }
 0x2ae   : > { %v2711_v53 = vmax.f32 %v1972_v31, %v10017_v2  ;;  %v1974_v33 = vpop.f32.mrb[159].mxu0  ;;  %2289 = vmatmul.mubr.f32.gmra.mrb[8].mxu0 %v655_v32  ;;  %v3589_v39 = vmax.f32 %v3413_v15, 0.0 }
 0x2af   : > { %v2712_v41 = vmax.f32 %v1974_v33, %v10018_v28  ;;  %5592 = vmatprep.mubr.msk.f32.mxu0 %vm807_vm0, %v658_v38  ;;  %v3590_v36 = vmax.f32 %v3414_v17, 0.0  ;;  %v664_v38 = vld [vmem:[%s9760_s1 + $0x888] sm:$0xff] }
 0x2b0   : > { %v3415_v43 = vadd.f32 %v3215_v37, %v2711_v53  ;;  %v10023_v53 = vld [vmem:[#allocation165_spill] sm:$0xff] }
 0x2b1   : > { %v3416_v16 = vadd.f32 %v3215_v37, %v2712_v41  ;;  %v1978_v55 = vpop.f32.mrb[160].mxu0 }
 0x2b2   : > { %v3591_v30 = vmax.f32 %v3415_v43, 0.0  ;;  %v2713_v1 = vmax.f32 %v1978_v55, %v10019_v18  ;;  %v1980_v45 = vpop.f32.mrb[161].mxu0  ;;  %2295 = vmatmul.mubr.f32.gmra.mrb[10].mxu0 %v657_v12  ;;  %v10024_v12 = vld [vmem:[#allocation167_spill] sm:$0xff]  ;;  %v3235_v18 = vpop.permute.xlu1 %3234 }
 0x2b3   : > { %v3592_v63 = vmax.f32 %v3416_v16, 0.0  ;;  %v2714_v19 = vmax.f32 %v1980_v45, %v10020_v48  ;;  %5593 = vmatprep.mubr.msk.f32.mxu0 %vm807_vm0, %v660_v47  ;;  %v3230_v47 = vpop.permute.xlu0 %3229  ;;  %v663_v16 = vld [vmem:[%s9760_s1 + $0x880] sm:$0xff] }
 0x2b4   : > { %v8625_v23 = vpack.c.bf16 %v3591_v30, %v3589_v39  ;;  %v3417_v57 = vadd.f32 %v3220_v35, %v2713_v1  ;;  %v666_v39 = vld [vmem:[%s9760_s1 + $0x898] sm:$0xff] }
 0x2b5   : > { %v1984_v11 = vpop.f32.mrb[162].mxu0  ;;  %v8630_v60 = vpack.c.bf16 %v3592_v63, %v3590_v36  ;;  %v3418_v8 = vadd.f32 %v3220_v35, %v2714_v19  ;;  %v10025_v36 = vld [vmem:[#allocation170_spill] sm:$0xff]  ;;  %v10026_v35 = vld [vmem:[#allocation172_spill] sm:$0xff] }
 0x2b6   : > { %v2715_v6 = vmax.f32 %v1984_v11, %v10021_v58  ;;  %v1986_v46 = vpop.f32.mrb[163].mxu0  ;;  %2301 = vmatmul.mubr.f32.gmra.mrb[12].mxu0 %v659_v24  ;;  %v3593_v15 = vmax.f32 %v3417_v57, 0.0 }
 0x2b7   : > { %v2716_v54 = vmax.f32 %v1986_v46, %v10022_v5  ;;  %5594 = vmatprep.mubr.msk.f32.mxu0 %vm807_vm0, %v662_v4  ;;  %v3594_v28 = vmax.f32 %v3418_v8, 0.0  ;;  %v665_v4 = vld [vmem:[%s9760_s1 + $0x890] sm:$0xff] }
 0x2b8   : > { %v3419_v32 = vadd.f32 %v3225_v14, %v2715_v6  ;;  %v10027_v8 = vld [vmem:[#allocation175_spill] sm:$0xff] }
 0x2b9   : > { %v3420_v31 = vadd.f32 %v3225_v14, %v2716_v54  ;;  %v1990_v37 = vpop.f32.mrb[164].mxu0  ;;  %v668_v14 = vld [vmem:[%s9760_s1 + $0x8a8] sm:$0xff] }
 0x2ba   : > { %v3595_v2 = vmax.f32 %v3419_v32, 0.0  ;;  %v2717_v33 = vmax.f32 %v1990_v37, %v10023_v53  ;;  %v1992_v17 = vpop.f32.mrb[165].mxu0  ;;  %2307 = vmatmul.mubr.f32.gmra.mrb[14].mxu0 %v661_v10  ;;  %v3240_v37 = vpop.permute.xlu0 %3239  ;;  %v670_v53 = vld [vmem:[%s9760_s1 + $0x8b8] sm:$0xff] }
 0x2bb   : > { %v3596_v41 = vmax.f32 %v3420_v31, 0.0  ;;  %v2718_v43 = vmax.f32 %v1992_v17, %v10024_v12  ;;  %5595 = vmatprep.mubr.msk.f32.mxu0 %vm807_vm0, %v664_v38  ;;  %v10028_v38 = vld [vmem:[#allocation177_spill] sm:$0xff]  ;;  %v3245_v17 = vpop.permute.xlu1 %3244  ;;  %v10029_v12 = vld [vmem:[#allocation180_spill] sm:$0xff] }
 0x2bc   : > { %v8647_v55 = vpack.c.bf16 %v3595_v2, %v3593_v15  ;;  %v3421_v45 = vadd.f32 %v3230_v47, %v2717_v33  ;;  %v667_v15 = vld [vmem:[%s9760_s1 + $0x8a0] sm:$0xff] }
 0x2bd   : > { %v1996_v30 = vpop.f32.mrb[166].mxu0  ;;  %v8652_v1 = vpack.c.bf16 %v3596_v41, %v3594_v28  ;;  %v3422_v19 = vadd.f32 %v3230_v47, %v2718_v43 }
 0x2be   : > { %v2719_v63 = vmax.f32 %v1996_v30, %v10025_v36  ;;  %v1998_v48 = vpop.f32.mrb[167].mxu0  ;;  %2313 = vmatmul.mubr.f32.gmra.mrb[16].mxu0 %v663_v16  ;;  %v3597_v6 = vmax.f32 %v3421_v45, 0.0  ;;  %v672_v36 = vld [vmem:[%s9760_s1 + $0x8c8] sm:$0xff] }
 0x2bf   : > { %v2720_v24 = vmax.f32 %v1998_v48, %v10026_v35  ;;  %5596 = vmatprep.mubr.msk.f32.mxu0 %vm807_vm0, %v666_v39  ;;  %v3598_v10 = vmax.f32 %v3422_v19, 0.0  ;;  %v10030_v39 = vld [vmem:[#allocation182_spill] sm:$0xff] }
 0x2c0   : > { %v3423_v11 = vadd.f32 %v3235_v18, %v2719_v63 }
 0x2c1   : > { %v3424_v57 = vadd.f32 %v3235_v18, %v2720_v24  ;;  %v2002_v58 = vpop.f32.mrb[168].mxu0  ;;  %v669_v18 = vld [vmem:[%s9760_s1 + $0x8b0] sm:$0xff]  ;;  %v10031_v24 = vld [vmem:[#allocation184_spill] sm:$0xff] }
 0x2c2   : > { %v3599_v46 = vmax.f32 %v3423_v11, 0.0  ;;  %v2721_v5 = vmax.f32 %v2002_v58, %v10027_v8  ;;  %v2004_v54 = vpop.f32.mrb[169].mxu0  ;;  %2319 = vmatmul.mubr.f32.gmra.mrb[18].mxu0 %v665_v4  ;;  %v10032_v58 = vld [vmem:[#allocation185_spill] sm:$0xff] }
 0x2c3   : > { %v3600_v32 = vmax.f32 %v3424_v57, 0.0  ;;  %v2722_v31 = vmax.f32 %v2004_v54, %v10028_v38  ;;  %5597 = vmatprep.mubr.msk.f32.mxu0 %vm807_vm0, %v668_v14  ;;  %v671_v8 = vld [vmem:[%s9760_s1 + $0x8c0] sm:$0xff] }
 0x2c4   : > { %v8669_v2 = vpack.c.bf16 %v3599_v46, %v3597_v6  ;;  %v3425_v41 = vadd.f32 %v3240_v37, %v2721_v5  ;;  %v3250_v46 = vpop.permute.xlu0 %3249 }
 0x2c5   : > { %v2008_v33 = vpop.f32.mrb[170].mxu0  ;;  %v8674_v28 = vpack.c.bf16 %v3600_v32, %v3598_v10  ;;  %v3426_v16 = vadd.f32 %v3240_v37, %v2722_v31  ;;  %v3255_v10 = vpop.permute.xlu1 %3254  ;;  %v10033_v31 = vld [vmem:[#allocation186_spill] sm:$0xff] }
 0x2c6   : > { %v2723_v43 = vmax.f32 %v2008_v33, %v10029_v12  ;;  %v2010_v47 = vpop.f32.mrb[171].mxu0  ;;  %2325 = vmatmul.mubr.f32.gmra.mrb[20].mxu0 %v667_v15  ;;  %v3601_v19 = vmax.f32 %v3425_v41, 0.0  ;;  %v10034_v33 = vld [vmem:[#allocation187_spill] sm:$0xff] }
 0x2c7   : > { %v2724_v30 = vmax.f32 %v2010_v47, %v10030_v39  ;;  %5598 = vmatprep.mubr.msk.f32.mxu0 %vm807_vm0, %v670_v53  ;;  %v3602_v14 = vmax.f32 %v3426_v16, 0.0  ;;  %v10035_v39 = vld [vmem:[#allocation5_spill] sm:$0xff] }
 0x2c8   : > { %v3427_v45 = vadd.f32 %v3245_v17, %v2723_v43 }
 0x2c9   : > { %v3428_v63 = vadd.f32 %v3245_v17, %v2724_v30  ;;  %v2014_v48 = vpop.f32.mrb[172].mxu0 }
 0x2ca   : > { %v3603_v35 = vmax.f32 %v3427_v45, 0.0  ;;  %v2725_v4 = vmax.f32 %v2014_v48, %v10031_v24  ;;  %v2016_v11 = vpop.f32.mrb[173].mxu0  ;;  %2331 = vmatmul.mubr.f32.gmra.mrb[22].mxu0 %v669_v18 }
 0x2cb   : > { %v3604_v57 = vmax.f32 %v3428_v63, 0.0  ;;  %v2726_v6 = vmax.f32 %v2016_v11, %v10032_v58  ;;  %5599 = vmatprep.mubr.msk.f32.mxu0 %vm807_vm0, %v672_v36  ;;  %v10036_v63 = vld [vmem:[#allocation6_spill] sm:$0xff] }
 0x2cc   : > { %v8691_v5 = vpack.c.bf16 %v3603_v35, %v3601_v19  ;;  %v3429_v38 = vadd.f32 %v3250_v46, %v2725_v4  ;;  %v10037_v4 = vld [vmem:[#allocation17_spill] sm:$0xff] }
 0x2cd   : > { %v2020_v54 = vpop.f32.mrb[174].mxu0  ;;  %v8693_v32 = vpack.c.bf16 %v3604_v57, %v3602_v14  ;;  %v3430_v53 = vadd.f32 %v3250_v46, %v2726_v6  ;;  %v10038_v14 = vld [vmem:[#allocation7_spill] sm:$0xff]  ;;  %v10039_v46 = vld [vmem:[#allocation8_spill] sm:$0xff] }
 0x2ce   : > { %v2727_v37 = vmax.f32 %v2020_v54, %v10033_v31  ;;  %v2022_v15 = vpop.f32.mrb[175].mxu0  ;;  %2337 = vmatmul.mubr.f32.gmra.mrb[24].mxu0 %v671_v8  ;;  %v3605_v47 = vmax.f32 %v3429_v38, 0.0  ;;  %v10040_v54 = vld [vmem:[#allocation23_spill] sm:$0xff] }
 0x2cf   : > { %v2728_v17 = vmax.f32 %v2022_v15, %v10034_v33  ;;  %v3606_v45 = vmax.f32 %v3430_v53, 0.0  ;;  %v10041_v33 = vld [vmem:[#allocation9_spill] sm:$0xff] }
 0x2d0   : > { %v3431_v41 = vadd.f32 %v3255_v10, %v2727_v37  ;;  %v3610_v37 = vld [vmem:[%s9762_s3 + $0x8] sm:$0xff] }
 0x2d1   : > { %v3432_v12 = vadd.f32 %v3255_v10, %v2728_v17  ;;  %v2026_v43 = vpop.f32.mrb[176].mxu0  ;;  %3962 = vmatprep.mubr.f32.mxu1 %v3610_v37 }
 0x2d2   : > { %v3607_v16 = vmax.f32 %v3431_v41, 0.0  ;;  %v2553_v30 = vmax.f32 %v10035_v39, %v2026_v43  ;;  %v2028_v18 = vpop.f32.mrb[177].mxu0 }
 0x2d3   : > { %v3608_v36 = vmax.f32 %v3432_v12, 0.0  ;;  %v2554_v48 = vmax.f32 %v10036_v63, %v2028_v18  ;;  %v10044_v63 = vld [vmem:[#allocation11_spill] sm:$0xff] }
 0x2d4   : > { %v8699_v19 = vpack.c.bf16 %v3607_v16, %v3605_v47  ;;  %v3257_v11 = vadd.f32 %v10037_v4, %v2553_v30  ;;  %v10042_v47 = vld [vmem:[#allocation10_spill] sm:$0xff] }
 0x2d5   : > { %v2032_v35 = vpop.f32.mrb[178].mxu0  ;;  %v8701_v24 = vpack.c.bf16 %v3608_v36, %v3606_v45  ;;  %v3258_v6 = vadd.f32 %v10037_v4, %v2554_v48  ;;  %v10043_v45 = vld [vmem:[#allocation20_spill] sm:$0xff] }
 0x2d6   : > { %v2555_v57 = vmax.f32 %v10038_v14, %v2032_v35  ;;  %v2034_v58 = vpop.f32.mrb[179].mxu0  ;;  %v3433_v15 = vmax.f32 %v3257_v11, 0.0  ;;  %v10045_v11 = vld [vmem:[#allocation12_spill] sm:$0xff] }
 0x2d7   : > { %v2556_v8 = vmax.f32 %v10039_v46, %v2034_v58  ;;  %v3434_v12 = vmax.f32 %v3258_v6, 0.0 }
 0x2d8   : > { %v3259_v10 = vadd.f32 %v10040_v54, %v2555_v57  ;;  %v10046_v57 = vld [vmem:[#allocation26_spill] sm:$0xff] }
 0x2d9   : > { %v3260_v38 = vadd.f32 %v10040_v54, %v2556_v8  ;;  %v2038_v31 = vpop.f32.mrb[180].mxu0 }
 0x2da   : > { %v3435_v53 = vmax.f32 %v3259_v10, 0.0  ;;  %v2557_v17 = vmax.f32 %v10041_v33, %v2038_v31  ;;  %v2040_v41 = vpop.f32.mrb[181].mxu0  ;;  %v10047_v10 = vld [vmem:[#allocation13_spill] sm:$0xff] }
 0x2db   : > { %v3436_v43 = vmax.f32 %v3260_v38, 0.0  ;;  %v2558_v16 = vmax.f32 %v10042_v47, %v2040_v41 }
 0x2dc   : > { %v5763_v39 = vpack.c.bf16 %v3435_v53, %v3433_v15  ;;  %v3261_v36 = vadd.f32 %v10043_v45, %v2557_v17  ;;  %v10048_v53 = vld [vmem:[#allocation14_spill] sm:$0xff] }
 0x2dd   : > { %v2044_v30 = vpop.f32.mrb[182].mxu0  ;;  %v5761_v18 = vpack.c.bf16 %v3436_v43, %v3434_v12  ;;  %v3262_v4 = vadd.f32 %v10043_v45, %v2558_v16  ;;  %v10049_v43 = vld [vmem:[#allocation27_spill] sm:$0xff]  ;;  %v10051_v45 = vld [vmem:[#allocation16_spill] sm:$0xff] }
 0x2de   : > { %v2559_v48 = vmax.f32 %v10044_v63, %v2044_v30  ;;  %v2046_v35 = vpop.f32.mrb[183].mxu0  ;;  %v3437_v8 = vmax.f32 %v3261_v36, 0.0  ;;  %v10050_v16 = vld [vmem:[#allocation15_spill] sm:$0xff]  ;;  %v10052_v63 = vld [vmem:[#allocation30_spill] sm:$0xff] }
 0x2df   : > { %v2560_v14 = vmax.f32 %v10045_v11, %v2046_v35  ;;  %5762 = vmatprep.subr.bf16.mxu1 %v5761_v18  ;;  %v3438_v37 = vmax.f32 %v3262_v4, 0.0 }
 0x2e0   : > { %v3263_v58 = vadd.f32 %v10046_v57, %v2559_v48  ;;  %5764 = vmatpush1.bf16.msra.mxu1 %v5763_v39 }
 0x2e1   : > { %v3264_v6 = vadd.f32 %v10046_v57, %v2560_v14  ;;  %v2050_v46 = vpop.f32.mrb[184].mxu0  ;;  %v10053_v57 = vld [vmem:[#allocation18_spill] sm:$0xff] }
 0x2e2   : > { %v3439_v54 = vmax.f32 %v3263_v58, 0.0  ;;  %v2561_v38 = vmax.f32 %v10047_v10, %v2050_v46  ;;  %v2052_v31 = vpop.f32.mrb[185].mxu0 }
 0x2e3   : > { %v3440_v15 = vmax.f32 %v3264_v6, 0.0  ;;  %v2562_v33 = vmax.f32 %v10048_v53, %v2052_v31 }
 0x2e4   : > { %v5767_v17 = vpack.c.bf16 %v3439_v54, %v3437_v8  ;;  %v3265_v47 = vadd.f32 %v10049_v43, %v2561_v38  ;;  %v10054_v54 = vld [vmem:[#allocation19_spill] sm:$0xff] }
 0x2e5   : > { %v2056_v41 = vpop.f32.mrb[186].mxu0  ;;  %v5765_v12 = vpack.c.bf16 %v3440_v15, %v3438_v37  ;;  %v3266_v18 = vadd.f32 %v10049_v43, %v2562_v33  ;;  %v10055_v15 = vld [vmem:[#allocation33_spill] sm:$0xff]  ;;  %v10057_v43 = vld [vmem:[#allocation22_spill] sm:$0xff] }
 0x2e6   : > { %v2563_v30 = vmax.f32 %v10050_v16, %v2056_v41  ;;  %v2058_v39 = vpop.f32.mrb[187].mxu0  ;;  %v3441_v11 = vmax.f32 %v3265_v47, 0.0  ;;  %v10056_v33 = vld [vmem:[#allocation21_spill] sm:$0xff]  ;;  %v10058_v16 = vld [vmem:[#allocation36_spill] sm:$0xff] }
 0x2e7   : > { %v2564_v36 = vmax.f32 %v10051_v45, %v2058_v39  ;;  %5766 = vmatprep.subr.bf16.mxu1 %v5765_v12  ;;  %v3442_v46 = vmax.f32 %v3266_v18, 0.0 }
 0x2e8   : > { %v3267_v48 = vadd.f32 %v10052_v63, %v2563_v30  ;;  %5768 = vmatpush1.bf16.msra.mxu1 %v5767_v17 }
 0x2e9   : > { %v3268_v35 = vadd.f32 %v10052_v63, %v2564_v36  ;;  %v2062_v4 = vpop.f32.mrb[188].mxu0  ;;  %v10059_v63 = vld [vmem:[#allocation24_spill] sm:$0xff] }
 0x2ea   : > { %v3443_v14 = vmax.f32 %v3267_v48, 0.0  ;;  %v2565_v58 = vmax.f32 %v10053_v57, %v2062_v4  ;;  %v2064_v6 = vpop.f32.mrb[189].mxu0 }
 0x2eb   : > { %v3444_v8 = vmax.f32 %v3268_v35, 0.0  ;;  %v2566_v10 = vmax.f32 %v10054_v54, %v2064_v6 }
 0x2ec   : > { %v5771_v38 = vpack.c.bf16 %v3443_v14, %v3441_v11  ;;  %v3269_v53 = vadd.f32 %v10055_v15, %v2565_v58  ;;  %v10060_v14 = vld [vmem:[#allocation25_spill] sm:$0xff] }
 0x2ed   : > { %v2068_v31 = vpop.f32.mrb[190].mxu0  ;;  %v5769_v37 = vpack.c.bf16 %v3444_v8, %v3442_v46  ;;  %v3270_v12 = vadd.f32 %v10055_v15, %v2566_v10  ;;  %v10061_v8 = vld [vmem:[#allocation37_spill] sm:$0xff]  ;;  %v10062_v10 = vld [vmem:[#allocation28_spill] sm:$0xff] }
 0x2ee   : > { %v2567_v41 = vmax.f32 %v10056_v33, %v2068_v31  ;;  %v2070_v17 = vpop.f32.mrb[191].mxu0  ;;  %v3445_v45 = vmax.f32 %v3269_v53, 0.0  ;;  %v10063_v15 = vld [vmem:[#allocation29_spill] sm:$0xff]  ;;  %v10064_v33 = vld [vmem:[#allocation40_spill] sm:$0xff] }
 0x2ef   : > { %v2568_v47 = vmax.f32 %v10057_v43, %v2070_v17  ;;  %5770 = vmatprep.subr.bf16.mxu1 %v5769_v37  ;;  %v3446_v4 = vmax.f32 %v3270_v12, 0.0 }
 0x2f0   : > { %v3271_v30 = vadd.f32 %v10058_v16, %v2567_v41  ;;  %5772 = vmatpush1.bf16.msra.mxu1 %v5771_v38 }
 0x2f1   : > { %v3272_v39 = vadd.f32 %v10058_v16, %v2568_v47  ;;  %v2074_v18 = vpop.f32.mrb[192].mxu0  ;;  %v10065_v16 = vld [vmem:[#allocation31_spill] sm:$0xff] }
 0x2f2   : > { %v3447_v36 = vmax.f32 %v3271_v30, 0.0  ;;  %v2569_v48 = vmax.f32 %v10059_v63, %v2074_v18  ;;  %v2076_v35 = vpop.f32.mrb[193].mxu0 }
 0x2f3   : > { %v3448_v11 = vmax.f32 %v3272_v39, 0.0  ;;  %v2570_v57 = vmax.f32 %v10060_v14, %v2076_v35 }
 0x2f4   : > { %v5775_v58 = vpack.c.bf16 %v3447_v36, %v3445_v45  ;;  %v3273_v54 = vadd.f32 %v10061_v8, %v2569_v48  ;;  %v10066_v36 = vld [vmem:[#allocation32_spill] sm:$0xff] }
 0x2f5   : > { %v2080_v6 = vpop.f32.mrb[194].mxu0  ;;  %v5773_v46 = vpack.c.bf16 %v3448_v11, %v3446_v4  ;;  %v3274_v37 = vadd.f32 %v10061_v8, %v2570_v57  ;;  %v10067_v11 = vld [vmem:[#allocation43_spill] sm:$0xff]  ;;  %v10068_v57 = vld [vmem:[#allocation34_spill] sm:$0xff] }
 0x2f6   : > { %v2571_v31 = vmax.f32 %v10062_v10, %v2080_v6  ;;  %v2082_v38 = vpop.f32.mrb[195].mxu0  ;;  %v3449_v43 = vmax.f32 %v3273_v54, 0.0  ;;  %v10069_v8 = vld [vmem:[#allocation35_spill] sm:$0xff]  ;;  %v10070_v10 = vld [vmem:[#allocation46_spill] sm:$0xff] }
 0x2f7   : > { %v2572_v53 = vmax.f32 %v10063_v15, %v2082_v38  ;;  %5774 = vmatprep.subr.bf16.mxu1 %v5773_v46  ;;  %v3450_v18 = vmax.f32 %v3274_v37, 0.0 }
 0x2f8   : > { %v3275_v41 = vadd.f32 %v10064_v33, %v2571_v31  ;;  %5776 = vmatpush1.bf16.msra.mxu1 %v5775_v58 }
 0x2f9   : > { %v3276_v17 = vadd.f32 %v10064_v33, %v2572_v53  ;;  %v2086_v12 = vpop.f32.mrb[196].mxu0  ;;  %v10071_v33 = vld [vmem:[#allocation38_spill] sm:$0xff] }
 0x2fa   : > { %v3451_v47 = vmax.f32 %v3275_v41, 0.0  ;;  %v2573_v30 = vmax.f32 %v10065_v16, %v2086_v12  ;;  %v2088_v39 = vpop.f32.mrb[197].mxu0 }
 0x2fb   : > { %v3452_v45 = vmax.f32 %v3276_v17, 0.0  ;;  %v2574_v63 = vmax.f32 %v10066_v36, %v2088_v39 }
 0x2fc   : > { %v5779_v48 = vpack.c.bf16 %v3451_v47, %v3449_v43  ;;  %v3277_v14 = vadd.f32 %v10067_v11, %v2573_v30  ;;  %v10072_v47 = vld [vmem:[#allocation39_spill] sm:$0xff] }
 0x2fd   : > { %v2092_v35 = vpop.f32.mrb[198].mxu0  ;;  %v5777_v4 = vpack.c.bf16 %v3452_v45, %v3450_v18  ;;  %v3278_v46 = vadd.f32 %v10067_v11, %v2574_v63  ;;  %v10073_v45 = vld [vmem:[#allocation47_spill] sm:$0xff]  ;;  %v10074_v63 = vld [vmem:[#allocation41_spill] sm:$0xff]  ;;  %v10075_v11 = vld [vmem:[#allocation42_spill] sm:$0xff] }
 0x2fe   : > { %v2575_v6 = vmax.f32 %v10068_v57, %v2092_v35  ;;  %v2094_v58 = vpop.f32.mrb[199].mxu0  ;;  %v3453_v15 = vmax.f32 %v3277_v14, 0.0  ;;  %v10076_v57 = vld [vmem:[#allocation50_spill] sm:$0xff] }
 0x2ff   : > { %v2576_v54 = vmax.f32 %v10069_v8, %v2094_v58  ;;  %5778 = vmatprep.subr.bf16.mxu1 %v5777_v4  ;;  %v3454_v12 = vmax.f32 %v3278_v46, 0.0 }
 0x300   : > { %v3279_v31 = vadd.f32 %v10070_v10, %v2575_v6  ;;  %5780 = vmatpush1.bf16.msra.mxu1 %v5779_v48 }
 0x301   : > { %v3280_v38 = vadd.f32 %v10070_v10, %v2576_v54  ;;  %v2098_v37 = vpop.f32.mrb[200].mxu0  ;;  %v10077_v10 = vld [vmem:[#allocation44_spill] sm:$0xff] }
 0x302   : > { %v3455_v53 = vmax.f32 %v3279_v31, 0.0  ;;  %v2577_v41 = vmax.f32 %v10071_v33, %v2098_v37  ;;  %v2100_v17 = vpop.f32.mrb[201].mxu0 }
 0x303   : > { %v3456_v43 = vmax.f32 %v3280_v38, 0.0  ;;  %v2578_v16 = vmax.f32 %v10072_v47, %v2100_v17 }
 0x304   : > { %v5783_v30 = vpack.c.bf16 %v3455_v53, %v3453_v15  ;;  %v3281_v36 = vadd.f32 %v10073_v45, %v2577_v41  ;;  %v10078_v53 = vld [vmem:[#allocation45_spill] sm:$0xff] }
 0x305   : > { %v2104_v39 = vpop.f32.mrb[202].mxu0  ;;  %v5781_v18 = vpack.c.bf16 %v3456_v43, %v3454_v12  ;;  %v3282_v4 = vadd.f32 %v10073_v45, %v2578_v16  ;;  %v10079_v43 = vld [vmem:[#allocation53_spill] sm:$0xff]  ;;  %v10080_v16 = vld [vmem:[#allocation48_spill] sm:$0xff] }
 0x306   : > { %v2579_v35 = vmax.f32 %v10074_v63, %v2104_v39  ;;  %v2106_v48 = vpop.f32.mrb[203].mxu0  ;;  %v3457_v8 = vmax.f32 %v3281_v36, 0.0  ;;  %v10081_v45 = vld [vmem:[#allocation49_spill] sm:$0xff]  ;;  %v10082_v63 = vld [vmem:[#allocation56_spill] sm:$0xff] }
 0x307   : > { %v2580_v14 = vmax.f32 %v10075_v11, %v2106_v48  ;;  %5782 = vmatprep.subr.bf16.mxu1 %v5781_v18  ;;  %v3458_v37 = vmax.f32 %v3282_v4, 0.0 }
 0x308   : > { %v3283_v6 = vadd.f32 %v10076_v57, %v2579_v35  ;;  %5784 = vmatpush1.bf16.msra.mxu1 %v5783_v30 }
 0x309   : > { %v3284_v58 = vadd.f32 %v10076_v57, %v2580_v14  ;;  %v2110_v46 = vpop.f32.mrb[204].mxu0  ;;  %v10083_v57 = vld [vmem:[#allocation51_spill] sm:$0xff] }
 0x30a   : > { %v3459_v54 = vmax.f32 %v3283_v6, 0.0  ;;  %v2581_v31 = vmax.f32 %v10077_v10, %v2110_v46  ;;  %v2112_v38 = vpop.f32.mrb[205].mxu0 }
 0x30b   : > { %v3460_v15 = vmax.f32 %v3284_v58, 0.0  ;;  %v2582_v33 = vmax.f32 %v10078_v53, %v2112_v38 }
 0x30c   : > { %v5787_v41 = vpack.c.bf16 %v3459_v54, %v3457_v8  ;;  %v3285_v47 = vadd.f32 %v10079_v43, %v2581_v31  ;;  %v10084_v54 = vld [vmem:[#allocation52_spill] sm:$0xff] }
 0x30d   : > { %v2116_v17 = vpop.f32.mrb[206].mxu0  ;;  %v5785_v12 = vpack.c.bf16 %v3460_v15, %v3458_v37  ;;  %v3286_v18 = vadd.f32 %v10079_v43, %v2582_v33  ;;  %v10085_v15 = vld [vmem:[#allocation57_spill] sm:$0xff]  ;;  %v10086_v33 = vld [vmem:[#allocation54_spill] sm:$0xff]  ;;  %v10087_v43 = vld [vmem:[#allocation55_spill] sm:$0xff] }
 0x30e   : > { %v2583_v39 = vmax.f32 %v10080_v16, %v2116_v17  ;;  %v2118_v30 = vpop.f32.mrb[207].mxu0  ;;  %v3461_v11 = vmax.f32 %v3285_v47, 0.0  ;;  %v10088_v16 = vld [vmem:[#allocation60_spill] sm:$0xff] }
 0x30f   : > { %v2584_v36 = vmax.f32 %v10081_v45, %v2118_v30  ;;  %5786 = vmatprep.subr.bf16.mxu1 %v5785_v12  ;;  %v3462_v46 = vmax.f32 %v3286_v18, 0.0 }
 0x310   : > { %v3287_v35 = vadd.f32 %v10082_v63, %v2583_v39  ;;  %5788 = vmatpush1.bf16.msra.mxu1 %v5787_v41 }
 0x311   : > { %v3288_v48 = vadd.f32 %v10082_v63, %v2584_v36  ;;  %v2122_v4 = vpop.f32.mrb[208].mxu0  ;;  %v10089_v63 = vld [vmem:[#allocation58_spill] sm:$0xff] }
 0x312   : > { %v3463_v14 = vmax.f32 %v3287_v35, 0.0  ;;  %v2585_v6 = vmax.f32 %v10083_v57, %v2122_v4  ;;  %v2124_v58 = vpop.f32.mrb[209].mxu0 }
 0x313   : > { %v3464_v8 = vmax.f32 %v3288_v48, 0.0  ;;  %v2586_v10 = vmax.f32 %v10084_v54, %v2124_v58 }
 0x314   : > { %v5791_v31 = vpack.c.bf16 %v3463_v14, %v3461_v11  ;;  %v3289_v53 = vadd.f32 %v10085_v15, %v2585_v6  ;;  %v10090_v14 = vld [vmem:[#allocation59_spill] sm:$0xff] }
 0x315   : > { %v2128_v38 = vpop.f32.mrb[210].mxu0  ;;  %v5789_v37 = vpack.c.bf16 %v3464_v8, %v3462_v46  ;;  %v3290_v12 = vadd.f32 %v10085_v15, %v2586_v10  ;;  %v10091_v8 = vld [vmem:[#allocation63_spill] sm:$0xff]  ;;  %v10092_v10 = vld [vmem:[#allocation61_spill] sm:$0xff]  ;;  %v10093_v15 = vld [vmem:[#allocation62_spill] sm:$0xff] }
 0x316   : > { %v2587_v17 = vmax.f32 %v10086_v33, %v2128_v38  ;;  %v2130_v41 = vpop.f32.mrb[211].mxu0  ;;  %v3465_v45 = vmax.f32 %v3289_v53, 0.0  ;;  %v10094_v33 = vld [vmem:[#allocation66_spill] sm:$0xff] }
 0x317   : > { %v2588_v47 = vmax.f32 %v10087_v43, %v2130_v41  ;;  %5790 = vmatprep.subr.bf16.mxu1 %v5789_v37  ;;  %v3466_v4 = vmax.f32 %v3290_v12, 0.0 }
 0x318   : > { %v3291_v39 = vadd.f32 %v10088_v16, %v2587_v17  ;;  %5792 = vmatpush1.bf16.msra.mxu1 %v5791_v31 }
 0x319   : > { %v3292_v30 = vadd.f32 %v10088_v16, %v2588_v47  ;;  %v2134_v18 = vpop.f32.mrb[212].mxu0  ;;  %v10095_v16 = vld [vmem:[#allocation64_spill] sm:$0xff] }
 0x31a   : > { %v3467_v36 = vmax.f32 %v3291_v39, 0.0  ;;  %v2589_v35 = vmax.f32 %v10089_v63, %v2134_v18  ;;  %v2136_v48 = vpop.f32.mrb[213].mxu0 }
 0x31b   : > { %v3468_v11 = vmax.f32 %v3292_v30, 0.0  ;;  %v2590_v57 = vmax.f32 %v10090_v14, %v2136_v48 }
 0x31c   : > { %v5795_v6 = vpack.c.bf16 %v3467_v36, %v3465_v45  ;;  %v3293_v54 = vadd.f32 %v10091_v8, %v2589_v35  ;;  %v10096_v36 = vld [vmem:[#allocation65_spill] sm:$0xff] }
 0x31d   : > { %v2140_v58 = vpop.f32.mrb[214].mxu0  ;;  %v5793_v46 = vpack.c.bf16 %v3468_v11, %v3466_v4  ;;  %v3294_v37 = vadd.f32 %v10091_v8, %v2590_v57  ;;  %v10097_v11 = vld [vmem:[#allocation67_spill] sm:$0xff]  ;;  %v10098_v57 = vld [vmem:[#allocation68_spill] sm:$0xff]  ;;  %v10099_v8 = vld [vmem:[#allocation70_spill] sm:$0xff] }
 0x31e   : > { %v2591_v38 = vmax.f32 %v10092_v10, %v2140_v58  ;;  %v2142_v31 = vpop.f32.mrb[215].mxu0  ;;  %v3469_v43 = vmax.f32 %v3293_v54, 0.0  ;;  %v10100_v10 = vld [vmem:[#allocation72_spill] sm:$0xff] }
 0x31f   : > { %v2592_v53 = vmax.f32 %v10093_v15, %v2142_v31  ;;  %5794 = vmatprep.subr.bf16.mxu1 %v5793_v46  ;;  %v3470_v18 = vmax.f32 %v3294_v37, 0.0 }
 0x320   : > { %v3295_v17 = vadd.f32 %v10094_v33, %v2591_v38  ;;  %5796 = vmatpush1.bf16.msra.mxu1 %v5795_v6 }
 0x321   : > { %v3296_v41 = vadd.f32 %v10094_v33, %v2592_v53  ;;  %v2146_v12 = vpop.f32.mrb[216].mxu0  ;;  %v10101_v33 = vld [vmem:[#allocation73_spill] sm:$0xff] }
 0x322   : > { %v3471_v47 = vmax.f32 %v3295_v17, 0.0  ;;  %v2593_v39 = vmax.f32 %v10095_v16, %v2146_v12  ;;  %v2148_v30 = vpop.f32.mrb[217].mxu0 }
 0x323   : > { %v3472_v45 = vmax.f32 %v3296_v41, 0.0  ;;  %v2594_v63 = vmax.f32 %v10096_v36, %v2148_v30 }
 0x324   : > { %v5799_v35 = vpack.c.bf16 %v3471_v47, %v3469_v43  ;;  %v3297_v14 = vadd.f32 %v10097_v11, %v2593_v39  ;;  %v10102_v47 = vld [vmem:[#allocation74_spill] sm:$0xff] }
 0x325   : > { %v2152_v48 = vpop.f32.mrb[218].mxu0  ;;  %v5797_v4 = vpack.c.bf16 %v3472_v45, %v3470_v18  ;;  %v3298_v46 = vadd.f32 %v10097_v11, %v2594_v63  ;;  %v10103_v45 = vld [vmem:[#allocation75_spill] sm:$0xff]  ;;  %v10104_v63 = vld [vmem:[#allocation76_spill] sm:$0xff]  ;;  %v10105_v11 = vld [vmem:[#allocation77_spill] sm:$0xff] }
 0x326   : > { %v2595_v58 = vmax.f32 %v10098_v57, %v2152_v48  ;;  %v2154_v6 = vpop.f32.mrb[219].mxu0  ;;  %v3473_v15 = vmax.f32 %v3297_v14, 0.0  ;;  %v10106_v57 = vld [vmem:[#allocation78_spill] sm:$0xff] }
 0x327   : > { %v2596_v54 = vmax.f32 %v10099_v8, %v2154_v6  ;;  %5798 = vmatprep.subr.bf16.mxu1 %v5797_v4  ;;  %v3474_v12 = vmax.f32 %v3298_v46, 0.0 }
 0x328   : > { %v3299_v38 = vadd.f32 %v10100_v10, %v2595_v58  ;;  %5800 = vmatpush1.bf16.msra.mxu1 %v5799_v35 }
 0x329   : > { %v3300_v31 = vadd.f32 %v10100_v10, %v2596_v54  ;;  %v2158_v37 = vpop.f32.mrb[220].mxu0  ;;  %v10107_v10 = vld [vmem:[#allocation79_spill] sm:$0xff] }
 0x32a   : > { %v3475_v53 = vmax.f32 %v3299_v38, 0.0  ;;  %v2597_v17 = vmax.f32 %v10101_v33, %v2158_v37  ;;  %v2160_v41 = vpop.f32.mrb[221].mxu0 }
 0x32b   : > { %v3476_v43 = vmax.f32 %v3300_v31, 0.0  ;;  %v2598_v16 = vmax.f32 %v10102_v47, %v2160_v41 }
 0x32c   : > { %v5803_v39 = vpack.c.bf16 %v3475_v53, %v3473_v15  ;;  %v3301_v36 = vadd.f32 %v10103_v45, %v2597_v17  ;;  %v10108_v53 = vld [vmem:[#allocation80_spill] sm:$0xff] }
 0x32d   : > { %v2164_v30 = vpop.f32.mrb[222].mxu0  ;;  %v5801_v18 = vpack.c.bf16 %v3476_v43, %v3474_v12  ;;  %v3302_v4 = vadd.f32 %v10103_v45, %v2598_v16  ;;  %v10109_v43 = vld [vmem:[#allocation81_spill] sm:$0xff]  ;;  %v10110_v16 = vld [vmem:[#allocation82_spill] sm:$0xff]  ;;  %v10111_v45 = vld [vmem:[#allocation83_spill] sm:$0xff] }
 0x32e   : > { %v2599_v48 = vmax.f32 %v10104_v63, %v2164_v30  ;;  %v2166_v35 = vpop.f32.mrb[223].mxu0  ;;  %v3477_v8 = vmax.f32 %v3301_v36, 0.0  ;;  %v10112_v63 = vld [vmem:[#allocation84_spill] sm:$0xff] }
 0x32f   : > { %v2600_v14 = vmax.f32 %v10105_v11, %v2166_v35  ;;  %5802 = vmatprep.subr.bf16.mxu1 %v5801_v18  ;;  %v3478_v37 = vmax.f32 %v3302_v4, 0.0 }
 0x330   : > { %v3303_v58 = vadd.f32 %v10106_v57, %v2599_v48  ;;  %5804 = vmatpush1.bf16.msra.mxu1 %v5803_v39 }
 0x331   : > { %v3304_v6 = vadd.f32 %v10106_v57, %v2600_v14  ;;  %v2170_v46 = vpop.f32.mrb[224].mxu0  ;;  %v10113_v57 = vld [vmem:[#allocation85_spill] sm:$0xff] }
 0x332   : > { %v3479_v54 = vmax.f32 %v3303_v58, 0.0  ;;  %v2601_v38 = vmax.f32 %v10107_v10, %v2170_v46  ;;  %v2172_v31 = vpop.f32.mrb[225].mxu0 }
 0x333   : > { %v3480_v15 = vmax.f32 %v3304_v6, 0.0  ;;  %v2602_v33 = vmax.f32 %v10108_v53, %v2172_v31 }
 0x334   : > { %v5807_v17 = vpack.c.bf16 %v3479_v54, %v3477_v8  ;;  %v3305_v47 = vadd.f32 %v10109_v43, %v2601_v38  ;;  %v10114_v54 = vld [vmem:[#allocation86_spill] sm:$0xff] }
 0x335   : > { %v2176_v41 = vpop.f32.mrb[226].mxu0  ;;  %v5805_v12 = vpack.c.bf16 %v3480_v15, %v3478_v37  ;;  %v3306_v18 = vadd.f32 %v10109_v43, %v2602_v33  ;;  %v10115_v15 = vld [vmem:[#allocation87_spill] sm:$0xff]  ;;  %v10116_v33 = vld [vmem:[#allocation88_spill] sm:$0xff]  ;;  %v10117_v43 = vld [vmem:[#allocation89_spill] sm:$0xff] }
 0x336   : > { %v2603_v30 = vmax.f32 %v10110_v16, %v2176_v41  ;;  %v2178_v39 = vpop.f32.mrb[227].mxu0  ;;  %v3481_v11 = vmax.f32 %v3305_v47, 0.0  ;;  %v10118_v16 = vld [vmem:[#allocation90_spill] sm:$0xff] }
 0x337   : > { %v2604_v36 = vmax.f32 %v10111_v45, %v2178_v39  ;;  %5806 = vmatprep.subr.bf16.mxu1 %v5805_v12  ;;  %v3482_v46 = vmax.f32 %v3306_v18, 0.0 }
 0x338   : > { %v3307_v48 = vadd.f32 %v10112_v63, %v2603_v30  ;;  %5808 = vmatpush1.bf16.msra.mxu1 %v5807_v17 }
 0x339   : > { %v3308_v35 = vadd.f32 %v10112_v63, %v2604_v36  ;;  %v2182_v4 = vpop.f32.mrb[228].mxu0  ;;  %v10119_v63 = vld [vmem:[#allocation91_spill] sm:$0xff] }
 0x33a   : > { %v3483_v14 = vmax.f32 %v3307_v48, 0.0  ;;  %v2605_v58 = vmax.f32 %v10113_v57, %v2182_v4  ;;  %v2184_v6 = vpop.f32.mrb[229].mxu0 }
 0x33b   : > { %v3484_v8 = vmax.f32 %v3308_v35, 0.0  ;;  %v2606_v10 = vmax.f32 %v10114_v54, %v2184_v6 }
 0x33c   : > { %v5811_v38 = vpack.c.bf16 %v3483_v14, %v3481_v11  ;;  %v3309_v53 = vadd.f32 %v10115_v15, %v2605_v58  ;;  %v10120_v14 = vld [vmem:[#allocation92_spill] sm:$0xff] }
 0x33d   : > { %v2188_v31 = vpop.f32.mrb[230].mxu0  ;;  %v5809_v37 = vpack.c.bf16 %v3484_v8, %v3482_v46  ;;  %v3310_v12 = vadd.f32 %v10115_v15, %v2606_v10  ;;  %v10121_v8 = vld [vmem:[#allocation93_spill] sm:$0xff]  ;;  %v10122_v10 = vld [vmem:[#allocation94_spill] sm:$0xff]  ;;  %v10123_v15 = vld [vmem:[#allocation95_spill] sm:$0xff] }
 0x33e   : > { %v2607_v41 = vmax.f32 %v10116_v33, %v2188_v31  ;;  %v2190_v17 = vpop.f32.mrb[231].mxu0  ;;  %v3485_v45 = vmax.f32 %v3309_v53, 0.0  ;;  %v10124_v33 = vld [vmem:[#allocation96_spill] sm:$0xff] }
 0x33f   : > { %v2608_v47 = vmax.f32 %v10117_v43, %v2190_v17  ;;  %5810 = vmatprep.subr.bf16.mxu1 %v5809_v37  ;;  %v3486_v4 = vmax.f32 %v3310_v12, 0.0 }
 0x340   : > { %v3311_v30 = vadd.f32 %v10118_v16, %v2607_v41  ;;  %5812 = vmatpush1.bf16.msra.mxu1 %v5811_v38 }
 0x341   : > { %v3312_v39 = vadd.f32 %v10118_v16, %v2608_v47  ;;  %v2194_v18 = vpop.f32.mrb[232].mxu0  ;;  %v10125_v16 = vld [vmem:[#allocation97_spill] sm:$0xff] }
 0x342   : > { %v3487_v36 = vmax.f32 %v3311_v30, 0.0  ;;  %v2609_v48 = vmax.f32 %v10119_v63, %v2194_v18  ;;  %v2196_v35 = vpop.f32.mrb[233].mxu0 }
 0x343   : > { %v3488_v11 = vmax.f32 %v3312_v39, 0.0  ;;  %v2610_v57 = vmax.f32 %v10120_v14, %v2196_v35 }
 0x344   : > { %v5815_v58 = vpack.c.bf16 %v3487_v36, %v3485_v45  ;;  %v3313_v54 = vadd.f32 %v10121_v8, %v2609_v48  ;;  %v10126_v36 = vld [vmem:[#allocation98_spill] sm:$0xff] }
 0x345   : > { %v2200_v6 = vpop.f32.mrb[234].mxu0  ;;  %v5813_v46 = vpack.c.bf16 %v3488_v11, %v3486_v4  ;;  %v3314_v37 = vadd.f32 %v10121_v8, %v2610_v57  ;;  %v10127_v11 = vld [vmem:[#allocation99_spill] sm:$0xff]  ;;  %v10128_v57 = vld [vmem:[#allocation100_spill] sm:$0xff]  ;;  %v10129_v8 = vld [vmem:[#allocation101_spill] sm:$0xff] }
 0x346   : > { %v2611_v31 = vmax.f32 %v10122_v10, %v2200_v6  ;;  %v2202_v38 = vpop.f32.mrb[235].mxu0  ;;  %v3489_v43 = vmax.f32 %v3313_v54, 0.0  ;;  %v10130_v10 = vld [vmem:[#allocation102_spill] sm:$0xff] }
 0x347   : > { %v2612_v53 = vmax.f32 %v10123_v15, %v2202_v38  ;;  %5814 = vmatprep.subr.bf16.mxu1 %v5813_v46  ;;  %v3490_v18 = vmax.f32 %v3314_v37, 0.0 }
 0x348   : > { %v3315_v41 = vadd.f32 %v10124_v33, %v2611_v31  ;;  %5816 = vmatpush1.bf16.msra.mxu1 %v5815_v58 }
 0x349   : > { %v3316_v17 = vadd.f32 %v10124_v33, %v2612_v53  ;;  %v2206_v12 = vpop.f32.mrb[236].mxu0  ;;  %v10131_v33 = vld [vmem:[#allocation103_spill] sm:$0xff] }
 0x34a   : > { %v3491_v47 = vmax.f32 %v3315_v41, 0.0  ;;  %v2613_v30 = vmax.f32 %v10125_v16, %v2206_v12  ;;  %v2208_v39 = vpop.f32.mrb[237].mxu0 }
 0x34b   : > { %v3492_v45 = vmax.f32 %v3316_v17, 0.0  ;;  %v2614_v63 = vmax.f32 %v10126_v36, %v2208_v39 }
 0x34c   : > { %v5819_v48 = vpack.c.bf16 %v3491_v47, %v3489_v43  ;;  %v3317_v14 = vadd.f32 %v10127_v11, %v2613_v30  ;;  %v10132_v47 = vld [vmem:[#allocation104_spill] sm:$0xff] }
 0x34d   : > { %v2212_v35 = vpop.f32.mrb[238].mxu0  ;;  %v5817_v4 = vpack.c.bf16 %v3492_v45, %v3490_v18  ;;  %v3318_v46 = vadd.f32 %v10127_v11, %v2614_v63  ;;  %v10133_v45 = vld [vmem:[#allocation105_spill] sm:$0xff]  ;;  %v10134_v63 = vld [vmem:[#allocation106_spill] sm:$0xff]  ;;  %v10135_v11 = vld [vmem:[#allocation107_spill] sm:$0xff] }
 0x34e   : > { %v2615_v6 = vmax.f32 %v10128_v57, %v2212_v35  ;;  %v2214_v58 = vpop.f32.mrb[239].mxu0  ;;  %v3493_v15 = vmax.f32 %v3317_v14, 0.0  ;;  %v10136_v57 = vld [vmem:[#allocation108_spill] sm:$0xff] }
 0x34f   : > { %v2616_v54 = vmax.f32 %v10129_v8, %v2214_v58  ;;  %5818 = vmatprep.subr.bf16.mxu1 %v5817_v4  ;;  %v3494_v12 = vmax.f32 %v3318_v46, 0.0  ;;  %v3609_v58 = vld [vmem:[%s9762_s3] sm:$0xff] }
 0x350   : > { %v3319_v31 = vadd.f32 %v10130_v10, %v2615_v6  ;;  %5820 = vmatpush1.bf16.msra.mxu1 %v5819_v48 }
 0x351   : > { %v3320_v38 = vadd.f32 %v10130_v10, %v2616_v54  ;;  %v2218_v37 = vpop.f32.mrb[240].mxu0  ;;  %v3616_v54 = vld [vmem:[%s9762_s3 + $0x38] sm:$0xff] }
 0x352   : > { %v3495_v53 = vmax.f32 %v3319_v31, 0.0  ;;  %v2617_v41 = vmax.f32 %v10131_v33, %v2218_v37  ;;  %v2220_v17 = vpop.f32.mrb[241].mxu0 }
 0x353   : > { %v3496_v43 = vmax.f32 %v3320_v38, 0.0  ;;  %v2618_v16 = vmax.f32 %v10132_v47, %v2220_v17  ;;  %v10137_v38 = vld [vmem:[#allocation109_spill] sm:$0xff] }
 0x354   : > { %v5823_v30 = vpack.c.bf16 %v3495_v53, %v3493_v15  ;;  %v3321_v36 = vadd.f32 %v10133_v45, %v2617_v41  ;;  %v10138_v41 = vld [vmem:[#allocation110_spill] sm:$0xff] }
 0x355   : > { %v2224_v39 = vpop.f32.mrb[242].mxu0  ;;  %v5821_v18 = vpack.c.bf16 %v3496_v43, %v3494_v12  ;;  %v3322_v4 = vadd.f32 %v10133_v45, %v2618_v16  ;;  %v3615_v43 = vld [vmem:[%s9762_s3 + $0x30] sm:$0xff]  ;;  %v10140_v45 = vld [vmem:[#allocation112_spill] sm:$0xff] }
 0x356   : > { %v2619_v35 = vmax.f32 %v10134_v63, %v2224_v39  ;;  %v2226_v48 = vpop.f32.mrb[243].mxu0  ;;  %v3497_v10 = vmax.f32 %v3321_v36, 0.0  ;;  %v10139_v39 = vld [vmem:[#allocation111_spill] sm:$0xff] }
 0x357   : > { %v2620_v14 = vmax.f32 %v10135_v11, %v2226_v48  ;;  %5822 = vmatprep.subr.bf16.mxu1 %v5821_v18  ;;  %v3498_v53 = vmax.f32 %v3322_v4, 0.0  ;;  %v10141_v48 = vld [vmem:[#allocation113_spill] sm:$0xff]  ;;  %v10142_v11 = vld [vmem:[#allocation114_spill] sm:$0xff] }
 0x358   : > { %v3323_v6 = vadd.f32 %v10136_v57, %v2619_v35  ;;  %5824 = vmatpush1.bf16.msra.mxu1 %v5823_v30  ;;  %v3622_v30 = vld [vmem:[%s9762_s3 + $0x68] sm:$0xff] }
 0x359   : > { %v3324_v46 = vadd.f32 %v10136_v57, %v2620_v14  ;;  %v2230_v8 = vpop.f32.mrb[244].mxu0  ;;  %v3621_v57 = vld [vmem:[%s9762_s3 + $0x60] sm:$0xff] }
 0x35a   : > { %v3499_v31 = vmax.f32 %v3323_v6, 0.0  ;;  %v2621_v37 = vmax.f32 %v10137_v38, %v2230_v8  ;;  %v2232_v15 = vpop.f32.mrb[245].mxu0 }
 0x35b   : > { %v3500_v33 = vmax.f32 %v3324_v46, 0.0  ;;  %v2622_v17 = vmax.f32 %v10138_v41, %v2232_v15  ;;  %3963 = vmatmul.mubr.f32.vlgmr.msra.gmra.mrb[70].mxu1 %v3609_v58  ;;  %v3628_v46 = vld [vmem:[%s9762_s3 + $0x98] sm:$0xff] }
 0x35c   : > { %v5827_v12 = vpack.c.bf16 %v3499_v31, %v3497_v10  ;;  %3968 = vmatprep.mubr.f32.mxu1 %v3616_v54  ;;  %v3325_v18 = vadd.f32 %v10139_v39, %v2621_v37  ;;  %v10143_v10 = vld [vmem:[#allocation115_spill] sm:$0xff] }
 0x35d   : > { %v2236_v47 = vpop.f32.mrb[246].mxu0  ;;  %v5825_v16 = vpack.c.bf16 %v3500_v33, %v3498_v53  ;;  %v3326_v35 = vadd.f32 %v10139_v39, %v2622_v17  ;;  %v10144_v53 = vld [vmem:[#allocation116_spill] sm:$0xff]  ;;  %v3627_v17 = vld [vmem:[%s9762_s3 + $0x90] sm:$0xff]  ;;  %v10146_v39 = vld [vmem:[#allocation118_spill] sm:$0xff] }
 0x35e   : > { %v2623_v36 = vmax.f32 %v10140_v45, %v2236_v47  ;;  %v2238_v63 = vpop.f32.mrb[247].mxu0  ;;  %v3501_v8 = vmax.f32 %v3325_v18, 0.0  ;;  %v3634_v47 = vld [vmem:[%s9762_s3 + $0xc8] sm:$0xff] }
 0x35f   : > { %v2624_v4 = vmax.f32 %v10141_v48, %v2238_v63  ;;  %3969 = vmatmul.mubr.f32.gmra.mrb[72].mxu1 %v3615_v43  ;;  %5826 = vmatprep.subr.bf16.mxu1 %v5825_v16  ;;  %v3502_v37 = vmax.f32 %v3326_v35, 0.0  ;;  %v10145_v16 = vld [vmem:[#allocation117_spill] sm:$0xff]  ;;  %v10147_v63 = vld [vmem:[#allocation119_spill] sm:$0xff]  ;;  %v10148_v48 = vld [vmem:[#allocation120_spill] sm:$0xff] }
 0x360   : > { %v3327_v14 = vadd.f32 %v10142_v11, %v2623_v36  ;;  %5828 = vmatpush1.bf16.msra.mxu1 %v5827_v12  ;;  %3974 = vmatprep.mubr.f32.mxu1 %v3622_v30 }
 0x361   : > { %v3328_v6 = vadd.f32 %v10142_v11, %v2624_v4  ;;  %v2242_v58 = vpop.f32.mrb[248].mxu0  ;;  %v3633_v11 = vld [vmem:[%s9762_s3 + $0xc0] sm:$0xff] }
 0x362   : > { %v3503_v54 = vmax.f32 %v3327_v14, 0.0  ;;  %v2625_v31 = vmax.f32 %v10143_v10, %v2242_v58  ;;  %v2244_v38 = vpop.f32.mrb[249].mxu0 }
 0x363   : > { %v3504_v15 = vmax.f32 %v3328_v6, 0.0  ;;  %v2626_v33 = vmax.f32 %v10144_v53, %v2244_v38  ;;  %3975 = vmatmul.mubr.f32.gmra.mrb[74].mxu1 %v3621_v57  ;;  %v3640_v6 = vld [vmem:[%s9762_s3 + $0xf8] sm:$0xff] }
 0x364   : > { %v5831_v41 = vpack.c.bf16 %v3503_v54, %v3501_v8  ;;  %3980 = vmatprep.mubr.f32.mxu1 %v3628_v46  ;;  %v3329_v30 = vadd.f32 %v10145_v16, %v2625_v31  ;;  %v10149_v8 = vld [vmem:[#allocation121_spill] sm:$0xff] }
 0x365   : > { %v2248_v12 = vpop.f32.mrb[250].mxu0  ;;  %v5829_v43 = vpack.c.bf16 %v3504_v15, %v3502_v37  ;;  %v3330_v36 = vadd.f32 %v10145_v16, %v2626_v33  ;;  %v10150_v37 = vld [vmem:[#allocation122_spill] sm:$0xff]  ;;  %v3639_v33 = vld [vmem:[%s9762_s3 + $0xf0] sm:$0xff]  ;;  %v10152_v16 = vld [vmem:[#allocation124_spill] sm:$0xff] }
 0x366   : > { %v2627_v18 = vmax.f32 %v10146_v39, %v2248_v12  ;;  %v2250_v45 = vpop.f32.mrb[251].mxu0  ;;  %v3505_v58 = vmax.f32 %v3329_v30, 0.0  ;;  %v3646_v12 = vld [vmem:[%s9762_s3 + $0x128] sm:$0xff] }
 0x367   : > { %v2628_v35 = vmax.f32 %v10147_v63, %v2250_v45  ;;  %3981 = vmatmul.mubr.f32.gmra.mrb[76].mxu1 %v3627_v17  ;;  %5830 = vmatprep.subr.bf16.mxu1 %v5829_v43  ;;  %v3506_v31 = vmax.f32 %v3330_v36, 0.0  ;;  %v10151_v43 = vld [vmem:[#allocation123_spill] sm:$0xff]  ;;  %v10153_v45 = vld [vmem:[#allocation125_spill] sm:$0xff]  ;;  %v10154_v63 = vld [vmem:[#allocation126_spill] sm:$0xff] }
 0x368   : > { %v3331_v4 = vadd.f32 %v10148_v48, %v2627_v18  ;;  %5832 = vmatpush1.bf16.msra.mxu1 %v5831_v41  ;;  %3986 = vmatprep.mubr.f32.mxu1 %v3634_v47 }
 0x369   : > { %v3332_v14 = vadd.f32 %v10148_v48, %v2628_v35  ;;  %v2254_v57 = vpop.f32.mrb[252].mxu0  ;;  %v3645_v48 = vld [vmem:[%s9762_s3 + $0x120] sm:$0xff] }
 0x36a   : > { %v3507_v46 = vmax.f32 %v3331_v4, 0.0  ;;  %v2629_v54 = vmax.f32 %v10149_v8, %v2254_v57  ;;  %v2256_v10 = vpop.f32.mrb[253].mxu0 }
 0x36b   : > { %v3508_v38 = vmax.f32 %v3332_v14, 0.0  ;;  %v2630_v15 = vmax.f32 %v10150_v37, %v2256_v10  ;;  %3987 = vmatmul.mubr.f32.gmra.mrb[78].mxu1 %v3633_v11  ;;  %v3652_v14 = vld [vmem:[%s9762_s3 + $0x158] sm:$0xff] }
 0x36c   : > { %v5835_v53 = vpack.c.bf16 %v3507_v46, %v3505_v58  ;;  %3992 = vmatprep.mubr.f32.mxu1 %v3640_v6  ;;  %v3333_v47 = vadd.f32 %v10151_v43, %v2629_v54  ;;  %v10155_v58 = vld [vmem:[#allocation127_spill] sm:$0xff] }
 0x36d   : > { %v2260_v41 = vpop.f32.mrb[254].mxu0  ;;  %v5833_v17 = vpack.c.bf16 %v3508_v38, %v3506_v31  ;;  %v3334_v18 = vadd.f32 %v10151_v43, %v2630_v15  ;;  %v10156_v31 = vld [vmem:[#allocation128_spill] sm:$0xff]  ;;  %v3651_v15 = vld [vmem:[%s9762_s3 + $0x150] sm:$0xff]  ;;  %v10158_v43 = vld [vmem:[#allocation130_spill] sm:$0xff] }
 0x36e   : > { %v2631_v30 = vmax.f32 %v10152_v16, %v2260_v41  ;;  %v2262_v39 = vpop.f32.mrb[255].mxu0  ;;  %v3509_v57 = vmax.f32 %v3333_v47, 0.0  ;;  %v3658_v41 = vld [vmem:[%s9762_s3 + $0x188] sm:$0xff] }
 0x36f   : > { %v2632_v36 = vmax.f32 %v10153_v45, %v2262_v39  ;;  %3993 = vmatmul.mubr.f32.gmra.mrb[80].mxu1 %v3639_v33  ;;  %5834 = vmatprep.subr.bf16.mxu1 %v5833_v17  ;;  %v3510_v54 = vmax.f32 %v3334_v18, 0.0  ;;  %v10157_v17 = vld [vmem:[#allocation129_spill] sm:$0xff]  ;;  %v10159_v39 = vld [vmem:[#allocation131_spill] sm:$0xff]  ;;  %v10160_v45 = vld [vmem:[#allocation132_spill] sm:$0xff] }
 0x370   : > { %v3335_v35 = vadd.f32 %v10154_v63, %v2631_v30  ;;  %5836 = vmatpush1.bf16.msra.mxu1 %v5835_v53  ;;  %3998 = vmatprep.mubr.f32.mxu1 %v3646_v12 }
 0x371   : > { %v3336_v4 = vadd.f32 %v10154_v63, %v2632_v36  ;;  %v2266_v11 = vpop.f32.mrb[0].mxu0  ;;  %v3657_v63 = vld [vmem:[%s9762_s3 + $0x180] sm:$0xff] }
 0x372   : > { %v3511_v6 = vmax.f32 %v3335_v35, 0.0  ;;  %v2633_v46 = vmax.f32 %v10155_v58, %v2266_v11  ;;  %v2268_v8 = vpop.f32.mrb[1].mxu0 }
 0x373   : > { %v3512_v10 = vmax.f32 %v3336_v4, 0.0  ;;  %v2634_v38 = vmax.f32 %v10156_v31, %v2268_v8  ;;  %3999 = vmatmul.mubr.f32.gmra.mrb[82].mxu1 %v3645_v48  ;;  %v3664_v4 = vld [vmem:[%s9762_s3 + $0x1b8] sm:$0xff] }
 0x374   : > { %v5839_v37 = vpack.c.bf16 %v3511_v6, %v3509_v57  ;;  %4004 = vmatprep.mubr.f32.mxu1 %v3652_v14  ;;  %v3337_v12 = vadd.f32 %v10157_v17, %v2633_v46  ;;  %v10161_v57 = vld [vmem:[#allocation133_spill] sm:$0xff] }
 0x375   : > { %v2272_v53 = vpop.f32.mrb[2].mxu0  ;;  %v5837_v33 = vpack.c.bf16 %v3512_v10, %v3510_v54  ;;  %v3338_v30 = vadd.f32 %v10157_v17, %v2634_v38  ;;  %v10162_v54 = vld [vmem:[#allocation134_spill] sm:$0xff]  ;;  %v3663_v38 = vld [vmem:[%s9762_s3 + $0x1b0] sm:$0xff]  ;;  %v10164_v17 = vld [vmem:[#allocation136_spill] sm:$0xff] }
 0x376   : > { %v2635_v47 = vmax.f32 %v10158_v43, %v2272_v53  ;;  %v2274_v16 = vpop.f32.mrb[3].mxu0  ;;  %v3513_v11 = vmax.f32 %v3337_v12, 0.0  ;;  %v3670_v53 = vld [vmem:[%s9762_s3 + $0x1e8] sm:$0xff] }
 0x377   : > { %v2636_v18 = vmax.f32 %v10159_v39, %v2274_v16  ;;  %4005 = vmatmul.mubr.f32.gmra.mrb[84].mxu1 %v3651_v15  ;;  %5838 = vmatprep.subr.bf16.mxu1 %v5837_v33  ;;  %v3514_v46 = vmax.f32 %v3338_v30, 0.0  ;;  %v10163_v33 = vld [vmem:[#allocation135_spill] sm:$0xff]  ;;  %v10165_v16 = vld [vmem:[#allocation137_spill] sm:$0xff]  ;;  %v10166_v39 = vld [vmem:[#allocation138_spill] sm:$0xff] }
 0x378   : > { %v3339_v36 = vadd.f32 %v10160_v45, %v2635_v47  ;;  %5840 = vmatpush1.bf16.msra.mxu1 %v5839_v37  ;;  %4010 = vmatprep.mubr.f32.mxu1 %v3658_v41 }
 0x379   : > { %v3340_v35 = vadd.f32 %v10160_v45, %v2636_v18  ;;  %v2278_v48 = vpop.f32.mrb[4].mxu0  ;;  %v3669_v45 = vld [vmem:[%s9762_s3 + $0x1e0] sm:$0xff] }
 0x37a   : > { %v3515_v14 = vmax.f32 %v3339_v36, 0.0  ;;  %v2637_v6 = vmax.f32 %v10161_v57, %v2278_v48  ;;  %v2280_v58 = vpop.f32.mrb[5].mxu0 }
 0x37b   : > { %v3516_v8 = vmax.f32 %v3340_v35, 0.0  ;;  %v2638_v10 = vmax.f32 %v10162_v54, %v2280_v58  ;;  %4011 = vmatmul.mubr.f32.gmra.mrb[86].mxu1 %v3657_v63  ;;  %v3676_v35 = vld [vmem:[%s9762_s3 + $0x218] sm:$0xff] }
 0x37c   : > { %v5843_v31 = vpack.c.bf16 %v3515_v14, %v3513_v11  ;;  %4016 = vmatprep.mubr.f32.mxu1 %v3664_v4  ;;  %v3341_v41 = vadd.f32 %v10163_v33, %v2637_v6  ;;  %v10167_v11 = vld [vmem:[#allocation139_spill] sm:$0xff] }
 0x37d   : > { %v2284_v37 = vpop.f32.mrb[6].mxu0  ;;  %v5841_v15 = vpack.c.bf16 %v3516_v8, %v3514_v46  ;;  %v3342_v47 = vadd.f32 %v10163_v33, %v2638_v10  ;;  %v10168_v46 = vld [vmem:[#allocation140_spill] sm:$0xff]  ;;  %v3675_v10 = vld [vmem:[%s9762_s3 + $0x210] sm:$0xff]  ;;  %v10170_v33 = vld [vmem:[#allocation142_spill] sm:$0xff] }
 0x37e   : > { %v2639_v12 = vmax.f32 %v10164_v17, %v2284_v37  ;;  %v2286_v43 = vpop.f32.mrb[7].mxu0  ;;  %v3517_v48 = vmax.f32 %v3341_v41, 0.0  ;;  %v3682_v37 = vld [vmem:[%s9762_s3 + $0x248] sm:$0xff] }
 0x37f   : > { %v2640_v30 = vmax.f32 %v10165_v16, %v2286_v43  ;;  %4017 = vmatmul.mubr.f32.gmra.mrb[88].mxu1 %v3663_v38  ;;  %5842 = vmatprep.subr.bf16.mxu1 %v5841_v15  ;;  %v3518_v6 = vmax.f32 %v3342_v47, 0.0  ;;  %v10169_v15 = vld [vmem:[#allocation141_spill] sm:$0xff]  ;;  %v10171_v43 = vld [vmem:[#allocation143_spill] sm:$0xff]  ;;  %v10172_v16 = vld [vmem:[#allocation144_spill] sm:$0xff] }
 0x380   : > { %v3343_v18 = vadd.f32 %v10166_v39, %v2639_v12  ;;  %5844 = vmatpush1.bf16.msra.mxu1 %v5843_v31  ;;  %4022 = vmatprep.mubr.f32.mxu1 %v3670_v53 }
 0x381   : > { %v3344_v36 = vadd.f32 %v10166_v39, %v2640_v30  ;;  %v2290_v63 = vpop.f32.mrb[8].mxu0  ;;  %v3681_v39 = vld [vmem:[%s9762_s3 + $0x240] sm:$0xff] }
 0x382   : > { %v3519_v4 = vmax.f32 %v3343_v18, 0.0  ;;  %v2641_v14 = vmax.f32 %v10167_v11, %v2290_v63  ;;  %v2292_v57 = vpop.f32.mrb[9].mxu0 }
 0x383   : > { %v3520_v58 = vmax.f32 %v3344_v36, 0.0  ;;  %v2642_v8 = vmax.f32 %v10168_v46, %v2292_v57  ;;  %4023 = vmatmul.mubr.f32.gmra.mrb[90].mxu1 %v3669_v45  ;;  %v3688_v36 = vld [vmem:[%s9762_s3 + $0x278] sm:$0xff] }
 0x384   : > { %v5847_v54 = vpack.c.bf16 %v3519_v4, %v3517_v48  ;;  %4028 = vmatprep.mubr.f32.mxu1 %v3676_v35  ;;  %v3345_v53 = vadd.f32 %v10169_v15, %v2641_v14  ;;  %v10173_v48 = vld [vmem:[#allocation145_spill] sm:$0xff] }
 0x385   : > { %v2296_v31 = vpop.f32.mrb[10].mxu0  ;;  %v5845_v38 = vpack.c.bf16 %v3520_v58, %v3518_v6  ;;  %v3346_v12 = vadd.f32 %v10169_v15, %v2642_v8  ;;  %v10174_v6 = vld [vmem:[#allocation146_spill] sm:$0xff]  ;;  %v3687_v8 = vld [vmem:[%s9762_s3 + $0x270] sm:$0xff]  ;;  %v10176_v15 = vld [vmem:[#allocation149_spill] sm:$0xff] }
 0x386   : > { %v2643_v41 = vmax.f32 %v10170_v33, %v2296_v31  ;;  %v2298_v17 = vpop.f32.mrb[11].mxu0  ;;  %v3521_v63 = vmax.f32 %v3345_v53, 0.0  ;;  %v3694_v31 = vld [vmem:[%s9762_s3 + $0x2a8] sm:$0xff] }
 0x387   : > { %v2644_v47 = vmax.f32 %v10171_v43, %v2298_v17  ;;  %4029 = vmatmul.mubr.f32.gmra.mrb[92].mxu1 %v3675_v10  ;;  %5846 = vmatprep.subr.bf16.mxu1 %v5845_v38  ;;  %v3522_v14 = vmax.f32 %v3346_v12, 0.0  ;;  %v10175_v38 = vld [vmem:[#allocation148_spill] sm:$0xff]  ;;  %v10177_v17 = vld [vmem:[#allocation151_spill] sm:$0xff]  ;;  %v10178_v43 = vld [vmem:[#allocation153_spill] sm:$0xff] }
 0x388   : > { %v3347_v30 = vadd.f32 %v10172_v16, %v2643_v41  ;;  %5848 = vmatpush1.bf16.msra.mxu1 %v5847_v54  ;;  %4034 = vmatprep.mubr.f32.mxu1 %v3682_v37 }
 0x389   : > { %v3348_v18 = vadd.f32 %v10172_v16, %v2644_v47  ;;  %v2302_v45 = vpop.f32.mrb[12].mxu0  ;;  %v3693_v16 = vld [vmem:[%s9762_s3 + $0x2a0] sm:$0xff] }
 0x38a   : > { %v3523_v35 = vmax.f32 %v3347_v30, 0.0  ;;  %v2645_v4 = vmax.f32 %v10173_v48, %v2302_v45  ;;  %v2304_v11 = vpop.f32.mrb[13].mxu0 }
 0x38b   : > { %v3524_v57 = vmax.f32 %v3348_v18, 0.0  ;;  %v2646_v58 = vmax.f32 %v10174_v6, %v2304_v11  ;;  %4035 = vmatmul.mubr.f32.gmra.mrb[94].mxu1 %v3681_v39  ;;  %v3700_v18 = vld [vmem:[%s9762_s3 + $0x2d8] sm:$0xff] }
 0x38c   : > { %v5851_v46 = vpack.c.bf16 %v3523_v35, %v3521_v63  ;;  %4040 = vmatprep.mubr.f32.mxu1 %v3688_v36  ;;  %v3349_v37 = vadd.f32 %v10175_v38, %v2645_v4  ;;  %v10179_v63 = vld [vmem:[#allocation154_spill] sm:$0xff] }
 0x38d   : > { %v2308_v54 = vpop.f32.mrb[14].mxu0  ;;  %v5849_v10 = vpack.c.bf16 %v3524_v57, %v3522_v14  ;;  %v3350_v41 = vadd.f32 %v10175_v38, %v2646_v58  ;;  %v10180_v14 = vld [vmem:[#allocation156_spill] sm:$0xff]  ;;  %v3699_v58 = vld [vmem:[%s9762_s3 + $0x2d0] sm:$0xff] }
 0x38e   : > { %v2647_v53 = vmax.f32 %v10176_v15, %v2308_v54  ;;  %v2310_v33 = vpop.f32.mrb[15].mxu0  ;;  %v3525_v45 = vmax.f32 %v3349_v37, 0.0  ;;  %v3706_v54 = vld [vmem:[%s9762_s3 + $0x308] sm:$0xff]  ;;  %v10182_v38 = vld [vmem:[#allocation159_spill] sm:$0xff] }
 0x38f   : > { %v2648_v12 = vmax.f32 %v10177_v17, %v2310_v33  ;;  %4041 = vmatmul.mubr.f32.gmra.mrb[96].mxu1 %v3687_v8  ;;  %5850 = vmatprep.subr.bf16.mxu1 %v5849_v10  ;;  %v3526_v4 = vmax.f32 %v3350_v41, 0.0  ;;  %v10181_v10 = vld [vmem:[#allocation158_spill] sm:$0xff]  ;;  %v10183_v33 = vld [vmem:[#allocation161_spill] sm:$0xff]  ;;  %v10184_v17 = vld [vmem:[#allocation163_spill] sm:$0xff] }
 0x390   : > { %v3351_v47 = vadd.f32 %v10178_v43, %v2647_v53  ;;  %5852 = vmatpush1.bf16.msra.mxu1 %v5851_v46  ;;  %4046 = vmatprep.mubr.f32.mxu1 %v3694_v31 }
 0x391   : > { %v3352_v30 = vadd.f32 %v10178_v43, %v2648_v12  ;;  %v2314_v39 = vpop.f32.mrb[16].mxu0  ;;  %v3705_v43 = vld [vmem:[%s9762_s3 + $0x300] sm:$0xff] }
 0x392   : > { %v3527_v36 = vmax.f32 %v3351_v47, 0.0  ;;  %v2649_v35 = vmax.f32 %v10179_v63, %v2314_v39  ;;  %v2316_v48 = vpop.f32.mrb[17].mxu0 }
 0x393   : > { %v3528_v11 = vmax.f32 %v3352_v30, 0.0  ;;  %v2650_v57 = vmax.f32 %v10180_v14, %v2316_v48  ;;  %4047 = vmatmul.mubr.f32.gmra.mrb[98].mxu1 %v3693_v16  ;;  %v3712_v30 = vld [vmem:[%s9762_s3 + $0x338] sm:$0xff] }
 0x394   : > { %v5855_v6 = vpack.c.bf16 %v3527_v36, %v3525_v45  ;;  %4052 = vmatprep.mubr.f32.mxu1 %v3700_v18  ;;  %v3353_v31 = vadd.f32 %v10181_v10, %v2649_v35  ;;  %v10185_v45 = vld [vmem:[#allocation164_spill] sm:$0xff] }
 0x395   : > { %v2320_v46 = vpop.f32.mrb[18].mxu0  ;;  %v5853_v8 = vpack.c.bf16 %v3528_v11, %v3526_v4  ;;  %v3354_v53 = vadd.f32 %v10181_v10, %v2650_v57  ;;  %v10186_v4 = vld [vmem:[#allocation166_spill] sm:$0xff]  ;;  %v3711_v57 = vld [vmem:[%s9762_s3 + $0x330] sm:$0xff]  ;;  %v10188_v10 = vld [vmem:[#allocation169_spill] sm:$0xff] }
 0x396   : > { %v2651_v37 = vmax.f32 %v10182_v38, %v2320_v46  ;;  %v2322_v15 = vpop.f32.mrb[19].mxu0  ;;  %v3529_v39 = vmax.f32 %v3353_v31, 0.0  ;;  %v3718_v46 = vld [vmem:[%s9762_s3 + $0x368] sm:$0xff] }
 0x397   : > { %v2652_v41 = vmax.f32 %v10183_v33, %v2322_v15  ;;  %4053 = vmatmul.mubr.f32.gmra.mrb[100].mxu1 %v3699_v58  ;;  %5854 = vmatprep.subr.bf16.mxu1 %v5853_v8  ;;  %v3530_v35 = vmax.f32 %v3354_v53, 0.0  ;;  %v10187_v8 = vld [vmem:[#allocation168_spill] sm:$0xff]  ;;  %v10189_v15 = vld [vmem:[#allocation171_spill] sm:$0xff]  ;;  %v10190_v33 = vld [vmem:[#allocation173_spill] sm:$0xff] }
 0x398   : > { %v3355_v12 = vadd.f32 %v10184_v17, %v2651_v37  ;;  %5856 = vmatpush1.bf16.msra.mxu1 %v5855_v6  ;;  %4058 = vmatprep.mubr.f32.mxu1 %v3706_v54 }
 0x399   : > { %v3356_v47 = vadd.f32 %v10184_v17, %v2652_v41  ;;  %v2326_v16 = vpop.f32.mrb[20].mxu0  ;;  %v3717_v17 = vld [vmem:[%s9762_s3 + $0x360] sm:$0xff] }
 0x39a   : > { %v3531_v18 = vmax.f32 %v3355_v12, 0.0  ;;  %v2653_v36 = vmax.f32 %v10185_v45, %v2326_v16  ;;  %v2328_v63 = vpop.f32.mrb[21].mxu0  ;;  %v10191_v16 = vld [vmem:[#allocation179_spill] sm:$0xff] }
 0x39b   : > { %v3532_v48 = vmax.f32 %v3356_v47, 0.0  ;;  %v2654_v11 = vmax.f32 %v10186_v4, %v2328_v63  ;;  %4059 = vmatmul.mubr.f32.gmra.mrb[102].mxu1 %v3705_v43  ;;  %v3724_v47 = vld [vmem:[%s9762_s3 + $0x398] sm:$0xff] }
 0x39c   : > { %v5859_v14 = vpack.c.bf16 %v3531_v18, %v3529_v39  ;;  %4064 = vmatprep.mubr.f32.mxu1 %v3712_v30  ;;  %v3357_v54 = vadd.f32 %v10187_v8, %v2653_v36  ;;  %v10192_v30 = vld [vmem:[#allocation69_spill] sm:$0xff]  ;;  %v10194_v18 = vld [vmem:[#allocation183_spill] sm:$0xff] }
 0x39d   : > { %v2332_v6 = vpop.f32.mrb[22].mxu0  ;;  %v5857_v58 = vpack.c.bf16 %v3532_v48, %v3530_v35  ;;  %v3358_v37 = vadd.f32 %v10187_v8, %v2654_v11  ;;  %v10193_v39 = vmax.f32 %v10191_v16, %v10192_v30  ;;  %v10195_v35 = vld [vmem:[#allocation174_spill] sm:$0xff]  ;;  %v10196_v11 = vld [vmem:[#allocation181_spill] sm:$0xff]  ;;  %v10199_v8 = vld [vmem:[#allocation176_spill] sm:$0xff] }
 0x39e   : > { %v2655_v31 = vmax.f32 %v10188_v10, %v2332_v6  ;;  %v2334_v38 = vpop.f32.mrb[23].mxu0  ;;  %v3533_v36 = vmax.f32 %v3357_v54, 0.0  ;;  %v3723_v54 = vld [vmem:[%s9762_s3 + $0x390] sm:$0xff] }
 0x39f   : > { %v2656_v53 = vmax.f32 %v10189_v15, %v2334_v38  ;;  %4065 = vmatmul.mubr.f32.gmra.mrb[104].mxu1 %v3711_v57  ;;  %5858 = vmatprep.subr.bf16.mxu1 %v5857_v58  ;;  %v3363_v45 = vadd.f32 %v10194_v18, %v10193_v39  ;;  %v3534_v58 = vmax.f32 %v3358_v37, 0.0  ;;  %v10200_v38 = vld [vmem:[#allocation178_spill] sm:$0xff]  ;;  %v3736_v39 = vld [vmem:[%s9762_s3 + $0x3f8] sm:$0xff] }
 0x3a0   : > { %v3359_v41 = vadd.f32 %v10190_v33, %v2655_v31  ;;  %5860 = vmatpush1.bf16.msra.mxu1 %v5859_v14  ;;  %4070 = vmatprep.mubr.f32.mxu1 %v3718_v46  ;;  %v10197_v14 = vld [vmem:[#allocation71_spill] sm:$0xff] }
 0x3a1   : > { %v3360_v12 = vadd.f32 %v10190_v33, %v2656_v53  ;;  %v2338_v43 = vpop.f32.mrb[24].mxu0  ;;  %v10198_v57 = vmax.f32 %v10196_v11, %v10197_v14  ;;  %v3539_v37 = vmax.f32 %v3363_v45, 0.0  ;;  %v3742_v45 = vld [vmem:[%s9762_s3 + $0x428] sm:$0xff]  ;;  %v3789_v11 = vld [vmem:[%s9762_s3 + $0x5a0] sm:$0xff]  ;;  %v3796_v14 = vld [vmem:[%s9762_s3 + $0x5d8] sm:$0xff] }
 0x3a2   : > { %v3535_v63 = vmax.f32 %v3359_v41, 0.0  ;;  %v2657_v48 = vmax.f32 %v10195_v35, %v2338_v43  ;;  %v2340_v4 = vpop.f32.mrb[25].mxu0  ;;  %v3730_v41 = vld [vmem:[%s9762_s3 + $0x3c8] sm:$0xff]  ;;  %v3784_v35 = vld [vmem:[%s9762_s3 + $0x578] sm:$0xff] }
 0x3a3   : > { %v3364_v6 = vadd.f32 %v10194_v18, %v10198_v57  ;;  %v3536_v46 = vmax.f32 %v3360_v12, 0.0  ;;  %v2658_v10 = vmax.f32 %v10199_v8, %v2340_v4  ;;  %4071 = vmatmul.mubr.f32.gmra.mrb[106].mxu1 %v3717_v17  ;;  %v3735_v18 = vld [vmem:[%s9762_s3 + $0x3f0] sm:$0xff]  ;;  %v3790_v4 = vld [vmem:[%s9762_s3 + $0x5a8] sm:$0xff]  ;;  %v3617_v8 = vld [vmem:[%s9762_s3 + $0x40] sm:$0xff] }
 0x3a4   : > { %v5863_v31 = vpack.c.bf16 %v3535_v63, %v3533_v36  ;;  %v3361_v15 = vadd.f32 %v10200_v38, %v2657_v48  ;;  %4076 = vmatprep.mubr.f32.mxu1 %v3724_v47  ;;  %v3729_v47 = vld [vmem:[%s9762_s3 + $0x3c0] sm:$0xff]  ;;  %v3748_v63 = vld [vmem:[%s9762_s3 + $0x458] sm:$0xff]  ;;  %v3783_v48 = vld [vmem:[%s9762_s3 + $0x570] sm:$0xff] }
 0x3a5   : > { %v3362_v53 = vadd.f32 %v10200_v38, %v2658_v10  ;;  %v5861_v33 = vpack.c.bf16 %v3536_v46, %v3534_v58  ;;  %v3540_v43 = vmax.f32 %v3364_v6, 0.0  ;;  %v3741_v36 = vld [vmem:[%s9762_s3 + $0x420] sm:$0xff]  ;;  %v3795_v57 = vld [vmem:[%s9762_s3 + $0x5d0] sm:$0xff]  ;;  %v3612_v6 = vld [vmem:[%s9762_s3 + $0x18] sm:$0xff] }
 0x3a6   : > { %v3537_v12 = vmax.f32 %v3361_v15, 0.0  ;;  %v3611_v58 = vld [vmem:[%s9762_s3 + $0x10] sm:$0xff]  ;;  %v3618_v46 = vld [vmem:[%s9762_s3 + $0x48] sm:$0xff]  ;;  %v3624_v10 = vld [vmem:[%s9762_s3 + $0x78] sm:$0xff] }
 0x3a7   : > { %v3538_v16 = vmax.f32 %v3362_v53, 0.0  ;;  %4077 = vmatmul.mubr.f32.gmra.mrb[108].mxu1 %v3723_v54  ;;  %5862 = vmatprep.subr.bf16.mxu1 %v5861_v33  ;;  %v3696_v38 = vld [vmem:[%s9762_s3 + $0x2b8] sm:$0xff]  ;;  %v3702_v15 = vld [vmem:[%s9762_s3 + $0x2e8] sm:$0xff]  ;;  %v3701_v54 = vld [vmem:[%s9762_s3 + $0x2e0] sm:$0xff] }
 0x3a8   : > { %v5867_v17 = vpack.c.bf16 %v3539_v37, %v3537_v12  ;;  %5864 = vmatpush1.bf16.msra.mxu1 %v5863_v31  ;;  %4082 = vmatprep.mubr.f32.mxu1 %v3730_v41  ;;  %v3623_v31 = vld [vmem:[%s9762_s3 + $0x70] sm:$0xff]  ;;  %v3708_v53 = vld [vmem:[%s9762_s3 + $0x318] sm:$0xff]  ;;  %v3714_v41 = vld [vmem:[%s9762_s3 + $0x348] sm:$0xff] }
 0x3a9   : > { %v5865_v30 = vpack.c.bf16 %v3540_v43, %v3538_v16  ;;  %v3707_v33 = vld [vmem:[%s9762_s3 + $0x310] sm:$0xff]  ;;  %v3713_v37 = vld [vmem:[%s9762_s3 + $0x340] sm:$0xff]  ;;  %v3720_v12 = vld [vmem:[%s9762_s3 + $0x378] sm:$0xff] }
 0x3aa   : > { %v3719_v43 = vld [vmem:[%s9762_s3 + $0x370] sm:$0xff]  ;;  %v3726_v16 = vld [vmem:[%s9762_s3 + $0x3a8] sm:$0xff] }
 0x3ab   : > { %4083 = vmatmul.mubr.f32.gmra.mrb[110].mxu1 %v3729_v47  ;;  %5866 = vmatprep.subr.bf16.mxu1 %v5865_v30  ;;  %v3732_v47 = vld [vmem:[%s9762_s3 + $0x3d8] sm:$0xff]  ;;  %v3731_v30 = vld [vmem:[%s9762_s3 + $0x3d0] sm:$0xff] }
 0x3ac   : > { %5868 = vmatpush1.bf16.msra.mxu1 %v5867_v17  ;;  %4088 = vmatprep.mubr.f32.mxu1 %v3736_v39  ;;  %v3725_v17 = vld [vmem:[%s9762_s3 + $0x3a0] sm:$0xff]  ;;  %v3738_v39 = vld [vmem:[%s9762_s3 + $0x408] sm:$0xff] }
 0x3ad   : > { %5870 = vmatprep.subr.bf16.mxu1 %v8366_v3  ;;  %v3747_v3 = vld [vmem:[%s9762_s3 + $0x450] sm:$0xff] }
 0x3af   : > { %4089 = vmatmul.mubr.f32.gmra.mrb[112].mxu1 %v3735_v18  ;;  %v3737_v18 = vld [vmem:[%s9762_s3 + $0x400] sm:$0xff] }
 0x3b0   : > { %5872 = vmatpush1.bf16.msra.mxu1 %v8361_v42  ;;  %4094 = vmatprep.mubr.f32.mxu1 %v3742_v45  ;;  %v3754_v42 = vld [vmem:[%s9762_s3 + $0x488] sm:$0xff]  ;;  %v3744_v45 = vld [vmem:[%s9762_s3 + $0x438] sm:$0xff] }
 0x3b1   : > { %5874 = vmatprep.subr.bf16.mxu1 %v8388_v56  ;;  %v3753_v56 = vld [vmem:[%s9762_s3 + $0x480] sm:$0xff] }
 0x3b3   : > { %4095 = vmatmul.mubr.f32.gmra.mrb[114].mxu1 %v3741_v36  ;;  %v3743_v36 = vld [vmem:[%s9762_s3 + $0x430] sm:$0xff] }
 0x3b4   : > { %5876 = vmatpush1.bf16.msra.mxu1 %v8383_v51  ;;  %4100 = vmatprep.mubr.f32.mxu1 %v3748_v63  ;;  %v3760_v51 = vld [vmem:[%s9762_s3 + $0x4b8] sm:$0xff]  ;;  %v3750_v63 = vld [vmem:[%s9762_s3 + $0x468] sm:$0xff] }
 0x3b5   : > { %5878 = vmatprep.subr.bf16.mxu1 %v8410_v29  ;;  %v3759_v29 = vld [vmem:[%s9762_s3 + $0x4b0] sm:$0xff] }
 0x3b7   : > { %4101 = vmatmul.mubr.f32.gmra.mrb[116].mxu1 %v3747_v3  ;;  %v3749_v3 = vld [vmem:[%s9762_s3 + $0x460] sm:$0xff] }
 0x3b8   : > { %5880 = vmatpush1.bf16.msra.mxu1 %v8405_v26  ;;  %4106 = vmatprep.mubr.f32.mxu1 %v3754_v42  ;;  %v3766_v26 = vld [vmem:[%s9762_s3 + $0x4e8] sm:$0xff]  ;;  %v3756_v42 = vld [vmem:[%s9762_s3 + $0x498] sm:$0xff] }
 0x3b9   : > { %5882 = vmatprep.subr.bf16.mxu1 %v8432_v49  ;;  %v3765_v49 = vld [vmem:[%s9762_s3 + $0x4e0] sm:$0xff] }
 0x3bb   : > { %4107 = vmatmul.mubr.f32.gmra.mrb[118].mxu1 %v3753_v56  ;;  %v3755_v56 = vld [vmem:[%s9762_s3 + $0x490] sm:$0xff] }
 0x3bc   : > { %5884 = vmatpush1.bf16.msra.mxu1 %v8427_v52  ;;  %4112 = vmatprep.mubr.f32.mxu1 %v3760_v51  ;;  %v3772_v52 = vld [vmem:[%s9762_s3 + $0x518] sm:$0xff]  ;;  %v3762_v51 = vld [vmem:[%s9762_s3 + $0x4c8] sm:$0xff] }
 0x3bd   : > { %5886 = vmatprep.subr.bf16.mxu1 %v8454_v21  ;;  %v3771_v21 = vld [vmem:[%s9762_s3 + $0x510] sm:$0xff] }
 0x3bf   : > { %4113 = vmatmul.mubr.f32.gmra.mrb[120].mxu1 %v3759_v29  ;;  %v3761_v29 = vld [vmem:[%s9762_s3 + $0x4c0] sm:$0xff] }
 0x3c0   : > { %5888 = vmatpush1.bf16.msra.mxu1 %v8449_v40  ;;  %4118 = vmatprep.mubr.f32.mxu1 %v3766_v26  ;;  %v3778_v40 = vld [vmem:[%s9762_s3 + $0x548] sm:$0xff]  ;;  %v3768_v26 = vld [vmem:[%s9762_s3 + $0x4f8] sm:$0xff] }
 0x3c1   : > { %5890 = vmatprep.subr.bf16.mxu1 %v8476_v62  ;;  %v3777_v62 = vld [vmem:[%s9762_s3 + $0x540] sm:$0xff] }
 0x3c3   : > { %4119 = vmatmul.mubr.f32.gmra.mrb[122].mxu1 %v3765_v49  ;;  %v3767_v49 = vld [vmem:[%s9762_s3 + $0x4f0] sm:$0xff] }
 0x3c4   : > { %4124 = vmatprep.mubr.f32.mxu1 %v3772_v52  ;;  %v3774_v52 = vld [vmem:[%s9762_s3 + $0x528] sm:$0xff] }
 0x3c7   : > { %4125 = vmatmul.mubr.f32.gmra.mrb[124].mxu1 %v3771_v21  ;;  %v3773_v21 = vld [vmem:[%s9762_s3 + $0x520] sm:$0xff] }
 0x3c8   : > { %4130 = vmatprep.mubr.f32.mxu1 %v3778_v40  ;;  %v3780_v40 = vld [vmem:[%s9762_s3 + $0x558] sm:$0xff] }
 0x3cb   : > { %4131 = vmatmul.mubr.f32.gmra.mrb[126].mxu1 %v3777_v62  ;;  %v3779_v62 = vld [vmem:[%s9762_s3 + $0x550] sm:$0xff] }
 0x3cc   : > { %4136 = vmatprep.mubr.f32.mxu1 %v3784_v35  ;;  %v3786_v35 = vld [vmem:[%s9762_s3 + $0x588] sm:$0xff] }
 0x3cf   : > { %4137 = vmatmul.mubr.f32.gmra.mrb[128].mxu1 %v3783_v48  ;;  %v3785_v48 = vld [vmem:[%s9762_s3 + $0x580] sm:$0xff] }
 0x3d0   : > { %4142 = vmatprep.mubr.f32.mxu1 %v3790_v4  ;;  %v3792_v4 = vld [vmem:[%s9762_s3 + $0x5b8] sm:$0xff] }
 0x3d3   : > { %4143 = vmatmul.mubr.f32.gmra.mrb[130].mxu1 %v3789_v11  ;;  %v3791_v11 = vld [vmem:[%s9762_s3 + $0x5b0] sm:$0xff] }
 0x3d4   : > { %4148 = vmatprep.mubr.f32.mxu1 %v3796_v14  ;;  %v3798_v14 = vld [vmem:[%s9762_s3 + $0x5e8] sm:$0xff] }
 0x3d7   : > { %4149 = vmatmul.mubr.f32.gmra.mrb[132].mxu1 %v3795_v57  ;;  %v3797_v57 = vld [vmem:[%s9762_s3 + $0x5e0] sm:$0xff] }
 0x3d8   : > { %4219 = vmatprep.mubr.f32.mxu1 %v3612_v6  ;;  %v3614_v6 = vld [vmem:[%s9762_s3 + $0x28] sm:$0xff] }
 0x3db   : > { %4220 = vmatmul.mubr.f32.vlgmr.msra.gmra.mrb[70].mxu1 %v3611_v58  ;;  %v3613_v58 = vld [vmem:[%s9762_s3 + $0x20] sm:$0xff] }
 0x3dc   : > { %5892 = vmatpush1.bf16.msra.mxu1 %v8471_v59  ;;  %4225 = vmatprep.mubr.f32.mxu1 %v3618_v46  ;;  %v3630_v59 = vld [vmem:[%s9762_s3 + $0xa8] sm:$0xff]  ;;  %v3620_v46 = vld [vmem:[%s9762_s3 + $0x58] sm:$0xff] }
 0x3dd   : > { %5894 = vmatprep.subr.bf16.mxu1 %v8498_v7  ;;  %v3629_v7 = vld [vmem:[%s9762_s3 + $0xa0] sm:$0xff] }
 0x3df   : > { %4226 = vmatmul.mubr.f32.gmra.mrb[72].mxu1 %v3617_v8  ;;  %v3619_v8 = vld [vmem:[%s9762_s3 + $0x50] sm:$0xff] }
 0x3e0   : > { %5896 = vmatpush1.bf16.msra.mxu1 %v8493_v20  ;;  %4231 = vmatprep.mubr.f32.mxu1 %v3624_v10  ;;  %v3636_v20 = vld [vmem:[%s9762_s3 + $0xd8] sm:$0xff]  ;;  %v3626_v10 = vld [vmem:[%s9762_s3 + $0x88] sm:$0xff] }
 0x3e1   : > { %5898 = vmatprep.subr.bf16.mxu1 %v8520_v44  ;;  %v3635_v44 = vld [vmem:[%s9762_s3 + $0xd0] sm:$0xff] }
 0x3e3   : > { %4232 = vmatmul.mubr.f32.gmra.mrb[74].mxu1 %v3623_v31  ;;  %v3625_v31 = vld [vmem:[%s9762_s3 + $0x80] sm:$0xff] }
 0x3e4   : > { %5900 = vmatpush1.bf16.msra.mxu1 %v8515_v22  ;;  %4237 = vmatprep.mubr.f32.mxu1 %v3630_v59  ;;  %v3642_v22 = vld [vmem:[%s9762_s3 + $0x108] sm:$0xff]  ;;  %v3632_v59 = vld [vmem:[%s9762_s3 + $0xb8] sm:$0xff] }
 0x3e5   : > { %5902 = vmatprep.subr.bf16.mxu1 %v8542_v27  ;;  %v3641_v27 = vld [vmem:[%s9762_s3 + $0x100] sm:$0xff] }
 0x3e7   : > { %4238 = vmatmul.mubr.f32.gmra.mrb[76].mxu1 %v3629_v7  ;;  %v3631_v7 = vld [vmem:[%s9762_s3 + $0xb0] sm:$0xff] }
 0x3e8   : > { %5904 = vmatpush1.bf16.msra.mxu1 %v8537_v61  ;;  %4243 = vmatprep.mubr.f32.mxu1 %v3636_v20  ;;  %v3648_v61 = vld [vmem:[%s9762_s3 + $0x138] sm:$0xff]  ;;  %v3638_v20 = vld [vmem:[%s9762_s3 + $0xe8] sm:$0xff] }
 0x3e9   : > { %5906 = vmatprep.subr.bf16.mxu1 %v8564_v50  ;;  %v3647_v50 = vld [vmem:[%s9762_s3 + $0x130] sm:$0xff] }
 0x3eb   : > { %4244 = vmatmul.mubr.f32.gmra.mrb[78].mxu1 %v3635_v44  ;;  %v3637_v44 = vld [vmem:[%s9762_s3 + $0xe0] sm:$0xff] }
 0x3ec   : > { %5908 = vmatpush1.bf16.msra.mxu1 %v8559_v34  ;;  %4249 = vmatprep.mubr.f32.mxu1 %v3642_v22  ;;  %v3654_v34 = vld [vmem:[%s9762_s3 + $0x168] sm:$0xff]  ;;  %v3644_v22 = vld [vmem:[%s9762_s3 + $0x118] sm:$0xff] }
 0x3ed   : > { %5910 = vmatprep.subr.bf16.mxu1 %v8586_v25  ;;  %v3653_v25 = vld [vmem:[%s9762_s3 + $0x160] sm:$0xff] }
 0x3ef   : > { %4250 = vmatmul.mubr.f32.gmra.mrb[80].mxu1 %v3641_v27  ;;  %v3643_v27 = vld [vmem:[%s9762_s3 + $0x110] sm:$0xff] }
 0x3f0   : > { %5912 = vmatpush1.bf16.msra.mxu1 %v8581_v9  ;;  %4255 = vmatprep.mubr.f32.mxu1 %v3648_v61  ;;  %v3660_v9 = vld [vmem:[%s9762_s3 + $0x198] sm:$0xff]  ;;  %v3650_v61 = vld [vmem:[%s9762_s3 + $0x148] sm:$0xff] }
 0x3f1   : > { %5914 = vmatprep.subr.bf16.mxu1 %v8608_v0  ;;  %v3659_v0 = vld [vmem:[%s9762_s3 + $0x190] sm:$0xff] }
 0x3f3   : > { %4256 = vmatmul.mubr.f32.gmra.mrb[82].mxu1 %v3647_v50  ;;  %v3649_v50 = vld [vmem:[%s9762_s3 + $0x140] sm:$0xff] }
 0x3f4   : > { %5916 = vmatpush1.bf16.msra.mxu1 %v8603_v13  ;;  %4261 = vmatprep.mubr.f32.mxu1 %v3654_v34  ;;  %v3666_v13 = vld [vmem:[%s9762_s3 + $0x1c8] sm:$0xff]  ;;  %v3656_v34 = vld [vmem:[%s9762_s3 + $0x178] sm:$0xff] }
 0x3f5   : > { %5918 = vmatprep.subr.bf16.mxu1 %v8630_v60  ;;  %v3665_v60 = vld [vmem:[%s9762_s3 + $0x1c0] sm:$0xff] }
 0x3f7   : > { %4262 = vmatmul.mubr.f32.gmra.mrb[84].mxu1 %v3653_v25  ;;  %v3655_v25 = vld [vmem:[%s9762_s3 + $0x170] sm:$0xff] }
 0x3f8   : > { %5920 = vmatpush1.bf16.msra.mxu1 %v8625_v23  ;;  %4267 = vmatprep.mubr.f32.mxu1 %v3660_v9  ;;  %v3672_v23 = vld [vmem:[%s9762_s3 + $0x1f8] sm:$0xff]  ;;  %v3662_v9 = vld [vmem:[%s9762_s3 + $0x1a8] sm:$0xff] }
 0x3f9   : > { %5922 = vmatprep.subr.bf16.mxu1 %v8652_v1  ;;  %v3671_v1 = vld [vmem:[%s9762_s3 + $0x1f0] sm:$0xff] }
 0x3fb   : > { %4268 = vmatmul.mubr.f32.gmra.mrb[86].mxu1 %v3659_v0  ;;  %v3661_v0 = vld [vmem:[%s9762_s3 + $0x1a0] sm:$0xff] }
 0x3fc   : > { %5924 = vmatpush1.bf16.msra.mxu1 %v8647_v55  ;;  %4273 = vmatprep.mubr.f32.mxu1 %v3666_v13  ;;  %v3678_v55 = vld [vmem:[%s9762_s3 + $0x228] sm:$0xff]  ;;  %v3668_v13 = vld [vmem:[%s9762_s3 + $0x1d8] sm:$0xff] }
 0x3fd   : > { %5926 = vmatprep.subr.bf16.mxu1 %v8674_v28  ;;  %v3677_v28 = vld [vmem:[%s9762_s3 + $0x220] sm:$0xff] }
 0x3ff   : > { %4274 = vmatmul.mubr.f32.gmra.mrb[88].mxu1 %v3665_v60  ;;  %v3667_v60 = vld [vmem:[%s9762_s3 + $0x1d0] sm:$0xff] }
 0x400   : > { %5928 = vmatpush1.bf16.msra.mxu1 %v8669_v2  ;;  %4279 = vmatprep.mubr.f32.mxu1 %v3672_v23  ;;  %v3684_v2 = vld [vmem:[%s9762_s3 + $0x258] sm:$0xff]  ;;  %v3674_v23 = vld [vmem:[%s9762_s3 + $0x208] sm:$0xff] }
 0x401   : > { %5930 = vmatprep.subr.bf16.mxu1 %v8693_v32  ;;  %v3683_v32 = vld [vmem:[%s9762_s3 + $0x250] sm:$0xff] }
 0x403   : > { %4280 = vmatmul.mubr.f32.gmra.mrb[90].mxu1 %v3671_v1  ;;  %v3673_v1 = vld [vmem:[%s9762_s3 + $0x200] sm:$0xff] }
 0x404   : > { %5932 = vmatpush1.bf16.msra.mxu1 %v8691_v5  ;;  %4285 = vmatprep.mubr.f32.mxu1 %v3678_v55  ;;  %v3690_v5 = vld [vmem:[%s9762_s3 + $0x288] sm:$0xff]  ;;  %v3680_v55 = vld [vmem:[%s9762_s3 + $0x238] sm:$0xff] }
 0x405   : > { %5934 = vmatprep.subr.bf16.mxu1 %v8701_v24  ;;  %v3689_v24 = vld [vmem:[%s9762_s3 + $0x280] sm:$0xff] }
 0x407   : > { %4286 = vmatmul.mubr.f32.gmra.mrb[92].mxu1 %v3677_v28  ;;  %v3679_v28 = vld [vmem:[%s9762_s3 + $0x230] sm:$0xff] }
 0x408   : > { %5936 = vmatpush1.bf16.msra.mxu1 %v8699_v19  ;;  %4291 = vmatprep.mubr.f32.mxu1 %v3684_v2  ;;  %v3695_v19 = vld [vmem:[%s9762_s3 + $0x2b0] sm:$0xff]  ;;  %v3686_v2 = vld [vmem:[%s9762_s3 + $0x268] sm:$0xff] }
 0x40b   : > { %4292 = vmatmul.mubr.f32.gmra.mrb[94].mxu1 %v3683_v32  ;;  %v3685_v32 = vld [vmem:[%s9762_s3 + $0x260] sm:$0xff] }
 0x40c   : > { %4297 = vmatprep.mubr.f32.mxu1 %v3690_v5  ;;  %v3692_v5 = vld [vmem:[%s9762_s3 + $0x298] sm:$0xff] }
 0x40f   : > { %4298 = vmatmul.mubr.f32.gmra.mrb[96].mxu1 %v3689_v24  ;;  %v3691_v24 = vld [vmem:[%s9762_s3 + $0x290] sm:$0xff] }
 0x410   : > { %4303 = vmatprep.mubr.f32.mxu1 %v3696_v38  ;;  %v3698_v38 = vld [vmem:[%s9762_s3 + $0x2c8] sm:$0xff] }
 0x413   : > { %4304 = vmatmul.mubr.f32.gmra.mrb[98].mxu1 %v3695_v19  ;;  %v3697_v19 = vld [vmem:[%s9762_s3 + $0x2c0] sm:$0xff] }
 0x414   : > { %4309 = vmatprep.mubr.f32.mxu1 %v3702_v15  ;;  %v3704_v15 = vld [vmem:[%s9762_s3 + $0x2f8] sm:$0xff] }
 0x417   : > { %4310 = vmatmul.mubr.f32.gmra.mrb[100].mxu1 %v3701_v54  ;;  %v3703_v54 = vld [vmem:[%s9762_s3 + $0x2f0] sm:$0xff] }
 0x418   : > { %4315 = vmatprep.mubr.f32.mxu1 %v3708_v53  ;;  %v3710_v53 = vld [vmem:[%s9762_s3 + $0x328] sm:$0xff] }
 0x41b   : > { %4316 = vmatmul.mubr.f32.gmra.mrb[102].mxu1 %v3707_v33  ;;  %v3709_v33 = vld [vmem:[%s9762_s3 + $0x320] sm:$0xff] }
 0x41c   : > { %4321 = vmatprep.mubr.f32.mxu1 %v3714_v41  ;;  %v3716_v41 = vld [vmem:[%s9762_s3 + $0x358] sm:$0xff] }
 0x41f   : > { %4322 = vmatmul.mubr.f32.gmra.mrb[104].mxu1 %v3713_v37  ;;  %v3715_v37 = vld [vmem:[%s9762_s3 + $0x350] sm:$0xff] }
 0x420   : > { %4327 = vmatprep.mubr.f32.mxu1 %v3720_v12  ;;  %v3722_v12 = vld [vmem:[%s9762_s3 + $0x388] sm:$0xff] }
 0x423   : > { %4328 = vmatmul.mubr.f32.gmra.mrb[106].mxu1 %v3719_v43  ;;  %v3721_v43 = vld [vmem:[%s9762_s3 + $0x380] sm:$0xff] }
 0x424   : > { %4333 = vmatprep.mubr.f32.mxu1 %v3726_v16  ;;  %v3728_v16 = vld [vmem:[%s9762_s3 + $0x3b8] sm:$0xff] }
 0x427   : > { %4334 = vmatmul.mubr.f32.gmra.mrb[108].mxu1 %v3725_v17  ;;  %v3727_v17 = vld [vmem:[%s9762_s3 + $0x3b0] sm:$0xff] }
 0x428   : > { %4339 = vmatprep.mubr.f32.mxu1 %v3732_v47  ;;  %v3734_v47 = vld [vmem:[%s9762_s3 + $0x3e8] sm:$0xff] }
 0x42b   : > { %4340 = vmatmul.mubr.f32.gmra.mrb[110].mxu1 %v3731_v30  ;;  %v3733_v30 = vld [vmem:[%s9762_s3 + $0x3e0] sm:$0xff] }
 0x42c   : > { %4345 = vmatprep.mubr.f32.mxu1 %v3738_v39  ;;  %v3740_v39 = vld [vmem:[%s9762_s3 + $0x418] sm:$0xff] }
 0x42f   : > { %4346 = vmatmul.mubr.f32.gmra.mrb[112].mxu1 %v3737_v18  ;;  %v3739_v18 = vld [vmem:[%s9762_s3 + $0x410] sm:$0xff] }
 0x430   : > { %4351 = vmatprep.mubr.f32.mxu1 %v3744_v45  ;;  %v3746_v45 = vld [vmem:[%s9762_s3 + $0x448] sm:$0xff] }
 0x433   : > { %4352 = vmatmul.mubr.f32.gmra.mrb[114].mxu1 %v3743_v36  ;;  %v3745_v36 = vld [vmem:[%s9762_s3 + $0x440] sm:$0xff] }
 0x434   : > { %4357 = vmatprep.mubr.f32.mxu1 %v3750_v63  ;;  %v3752_v63 = vld [vmem:[%s9762_s3 + $0x478] sm:$0xff] }
 0x437   : > { %4358 = vmatmul.mubr.f32.gmra.mrb[116].mxu1 %v3749_v3  ;;  %v3751_v3 = vld [vmem:[%s9762_s3 + $0x470] sm:$0xff] }
 0x438   : > { %4363 = vmatprep.mubr.f32.mxu1 %v3756_v42  ;;  %v3758_v42 = vld [vmem:[%s9762_s3 + $0x4a8] sm:$0xff] }
 0x43b   : > { %4364 = vmatmul.mubr.f32.gmra.mrb[118].mxu1 %v3755_v56  ;;  %v3757_v56 = vld [vmem:[%s9762_s3 + $0x4a0] sm:$0xff] }
 0x43c   : > { %4369 = vmatprep.mubr.f32.mxu1 %v3762_v51  ;;  %v3764_v51 = vld [vmem:[%s9762_s3 + $0x4d8] sm:$0xff] }
 0x43f   : > { %4370 = vmatmul.mubr.f32.gmra.mrb[120].mxu1 %v3761_v29  ;;  %v3763_v29 = vld [vmem:[%s9762_s3 + $0x4d0] sm:$0xff] }
 0x440   : > { %4375 = vmatprep.mubr.f32.mxu1 %v3768_v26  ;;  %v3770_v26 = vld [vmem:[%s9762_s3 + $0x508] sm:$0xff] }
 0x443   : > { %4376 = vmatmul.mubr.f32.gmra.mrb[122].mxu1 %v3767_v49  ;;  %v3769_v49 = vld [vmem:[%s9762_s3 + $0x500] sm:$0xff] }
 0x444   : > { %4381 = vmatprep.mubr.f32.mxu1 %v3774_v52  ;;  %v3776_v52 = vld [vmem:[%s9762_s3 + $0x538] sm:$0xff] }
 0x447   : > { %4382 = vmatmul.mubr.f32.gmra.mrb[124].mxu1 %v3773_v21  ;;  %v3775_v21 = vld [vmem:[%s9762_s3 + $0x530] sm:$0xff] }
 0x448   : > { %4387 = vmatprep.mubr.f32.mxu1 %v3780_v40  ;;  %v3782_v40 = vld [vmem:[%s9762_s3 + $0x568] sm:$0xff] }
 0x44b   : > { %4388 = vmatmul.mubr.f32.gmra.mrb[126].mxu1 %v3779_v62  ;;  %v3781_v62 = vld [vmem:[%s9762_s3 + $0x560] sm:$0xff] }
 0x44c   : > { %4393 = vmatprep.mubr.f32.mxu1 %v3786_v35  ;;  %v3788_v35 = vld [vmem:[%s9762_s3 + $0x598] sm:$0xff] }
 0x44f   : > { %4394 = vmatmul.mubr.f32.gmra.mrb[128].mxu1 %v3785_v48  ;;  %v3787_v48 = vld [vmem:[%s9762_s3 + $0x590] sm:$0xff] }
 0x450   : > { %4399 = vmatprep.mubr.f32.mxu1 %v3792_v4  ;;  %v3794_v4 = vld [vmem:[%s9762_s3 + $0x5c8] sm:$0xff] }
 0x453   : > { %4400 = vmatmul.mubr.f32.gmra.mrb[130].mxu1 %v3791_v11  ;;  %v3793_v11 = vld [vmem:[%s9762_s3 + $0x5c0] sm:$0xff] }
 0x454   : > { %4405 = vmatprep.mubr.f32.mxu1 %v3798_v14  ;;  %v3800_v14 = vld [vmem:[%s9762_s3 + $0x5f8] sm:$0xff] }
 0x457   : > { %4406 = vmatmul.mubr.f32.gmra.mrb[132].mxu1 %v3797_v57  ;;  %v3799_v57 = vld [vmem:[%s9762_s3 + $0x5f0] sm:$0xff] }
 0x458   : > { %5635 = vmatprep.mubr.msk.f32.mxu1 %vm3801_vm2, %v3614_v6 }
 0x45b   : > { %4477 = vmatmul.mubr.f32.vlgmr.msra.gmra.mrb[70].mxu1 %v3613_v58 }
 0x45c   : > { %5636 = vmatprep.mubr.msk.f32.mxu1 %vm3801_vm2, %v3620_v46 }
 0x45f   : > { %4483 = vmatmul.mubr.f32.gmra.mrb[72].mxu1 %v3619_v8 }
 0x460   : > { %5637 = vmatprep.mubr.msk.f32.mxu1 %vm3801_vm2, %v3626_v10 }
 0x463   : > { %4489 = vmatmul.mubr.f32.gmra.mrb[74].mxu1 %v3625_v31  ;;  %v6272_v31 = vmov 0.0  }
 0x464   : > { %5638 = vmatprep.mubr.msk.f32.mxu1 %vm3801_vm2, %v3632_v59 }
 0x467   : > { %4495 = vmatmul.mubr.f32.gmra.mrb[76].mxu1 %v3631_v7 }
 0x468   : > { %5639 = vmatprep.mubr.msk.f32.mxu1 %vm3801_vm2, %v3638_v20 }
 0x46b   : > { %4501 = vmatmul.mubr.f32.gmra.mrb[78].mxu1 %v3637_v44 }
 0x46c   : > { %5640 = vmatprep.mubr.msk.f32.mxu1 %vm3801_vm2, %v3644_v22 }
 0x46f   : > { %4507 = vmatmul.mubr.f32.gmra.mrb[80].mxu1 %v3643_v27 }
 0x470   : > { %5641 = vmatprep.mubr.msk.f32.mxu1 %vm3801_vm2, %v3650_v61 }
 0x473   : > { %4513 = vmatmul.mubr.f32.gmra.mrb[82].mxu1 %v3649_v50 }
 0x474   : > { %5642 = vmatprep.mubr.msk.f32.mxu1 %vm3801_vm2, %v3656_v34 }
 0x477   : > { %4519 = vmatmul.mubr.f32.gmra.mrb[84].mxu1 %v3655_v25 }
 0x478   : > { %5643 = vmatprep.mubr.msk.f32.mxu1 %vm3801_vm2, %v3662_v9 }
 0x47b   : > { %4525 = vmatmul.mubr.f32.gmra.mrb[86].mxu1 %v3661_v0 }
 0x47c   : > { %5644 = vmatprep.mubr.msk.f32.mxu1 %vm3801_vm2, %v3668_v13 }
 0x47f   : > { %4531 = vmatmul.mubr.f32.gmra.mrb[88].mxu1 %v3667_v60 }
 0x480   : > { %5645 = vmatprep.mubr.msk.f32.mxu1 %vm3801_vm2, %v3674_v23 }
 0x483   : > { %4537 = vmatmul.mubr.f32.gmra.mrb[90].mxu1 %v3673_v1 }
 0x484   : > { %5646 = vmatprep.mubr.msk.f32.mxu1 %vm3801_vm2, %v3680_v55 }
 0x487   : > { %4543 = vmatmul.mubr.f32.gmra.mrb[92].mxu1 %v3679_v28 }
 0x488   : > { %5647 = vmatprep.mubr.msk.f32.mxu1 %vm3801_vm2, %v3686_v2 }
 0x48b   : > { %4549 = vmatmul.mubr.f32.gmra.mrb[94].mxu1 %v3685_v32 }
 0x48c   : > { %5648 = vmatprep.mubr.msk.f32.mxu1 %vm3801_vm2, %v3692_v5 }
 0x48f   : > { %4555 = vmatmul.mubr.f32.gmra.mrb[96].mxu1 %v3691_v24 }
 0x490   : > { %5649 = vmatprep.mubr.msk.f32.mxu1 %vm3801_vm2, %v3698_v38 }
 0x493   : > { %4561 = vmatmul.mubr.f32.gmra.mrb[98].mxu1 %v3697_v19 }
 0x494   : > { %5650 = vmatprep.mubr.msk.f32.mxu1 %vm3801_vm2, %v3704_v15 }
 0x497   : > { %4567 = vmatmul.mubr.f32.gmra.mrb[100].mxu1 %v3703_v54 }
 0x498   : > { %5651 = vmatprep.mubr.msk.f32.mxu1 %vm3801_vm2, %v3710_v53 }
 0x49b   : > { %4573 = vmatmul.mubr.f32.gmra.mrb[102].mxu1 %v3709_v33 }
 0x49c   : > { %5652 = vmatprep.mubr.msk.f32.mxu1 %vm3801_vm2, %v3716_v41 }
 0x49f   : > { %4579 = vmatmul.mubr.f32.gmra.mrb[104].mxu1 %v3715_v37 }
 0x4a0   : > { %5653 = vmatprep.mubr.msk.f32.mxu1 %vm3801_vm2, %v3722_v12 }
 0x4a3   : > { %4585 = vmatmul.mubr.f32.gmra.mrb[106].mxu1 %v3721_v43  ;;  %v4720_v43 = vpop.permute.xlu0 %4719 }
 0x4a4   : > { %5654 = vmatprep.mubr.msk.f32.mxu1 %vm3801_vm2, %v3728_v16 }
 0x4a7   : > { %4591 = vmatmul.mubr.f32.gmra.mrb[108].mxu1 %v3727_v17 }
 0x4a8   : > { %5655 = vmatprep.mubr.msk.f32.mxu1 %vm3801_vm2, %v3734_v47 }
 0x4ab   : > { %4597 = vmatmul.mubr.f32.gmra.mrb[110].mxu1 %v3733_v30 }
 0x4ac   : > { %5656 = vmatprep.mubr.msk.f32.mxu1 %vm3801_vm2, %v3740_v39  ;;  %v4725_v39 = vpop.permute.xlu1 %4724 }
 0x4af   : > { %4603 = vmatmul.mubr.f32.gmra.mrb[112].mxu1 %v3739_v18 }
 0x4b0   : > { %5657 = vmatprep.mubr.msk.f32.mxu1 %vm3801_vm2, %v3746_v45 }
 0x4b3   : > { %4609 = vmatmul.mubr.f32.gmra.mrb[114].mxu1 %v3745_v36 }
 0x4b4   : > { %5658 = vmatprep.mubr.msk.f32.mxu1 %vm3801_vm2, %v3752_v63 }
 0x4b7   : > { %4615 = vmatmul.mubr.f32.gmra.mrb[116].mxu1 %v3751_v3 }
 0x4b8   : > { %5659 = vmatprep.mubr.msk.f32.mxu1 %vm3801_vm2, %v3758_v42 }
 0x4bb   : > { %4621 = vmatmul.mubr.f32.gmra.mrb[118].mxu1 %v3757_v56 }
 0x4bc   : > { %5660 = vmatprep.mubr.msk.f32.mxu1 %vm3801_vm2, %v3764_v51 }
 0x4bf   : > { %4627 = vmatmul.mubr.f32.gmra.mrb[120].mxu1 %v3763_v29 }
 0x4c0   : > { %5661 = vmatprep.mubr.msk.f32.mxu1 %vm3801_vm2, %v3770_v26 }
 0x4c3   : > { %4633 = vmatmul.mubr.f32.gmra.mrb[122].mxu1 %v3769_v49 }
 0x4c4   : > { %5662 = vmatprep.mubr.msk.f32.mxu1 %vm3801_vm2, %v3776_v52 }
 0x4c7   : > { %4639 = vmatmul.mubr.f32.gmra.mrb[124].mxu1 %v3775_v21 }
 0x4c8   : > { %5663 = vmatprep.mubr.msk.f32.mxu1 %vm3801_vm2, %v3782_v40  ;;  %v4730_v40 = vpop.permute.xlu0 %4729 }
 0x4cb   : > { %4645 = vmatmul.mubr.f32.gmra.mrb[126].mxu1 %v3781_v62 }
 0x4cc   : > { %5664 = vmatprep.mubr.msk.f32.mxu1 %vm3801_vm2, %v3788_v35 }
 0x4cf   : > { %4651 = vmatmul.mubr.f32.gmra.mrb[128].mxu1 %v3787_v48 }
 0x4d0   : > { %5665 = vmatprep.mubr.msk.f32.mxu1 %vm3801_vm2, %v3794_v4 }
 0x4d3   : > { %4657 = vmatmul.mubr.f32.gmra.mrb[130].mxu1 %v3793_v11 }
 0x4d4   : > { %5666 = vmatprep.mubr.msk.f32.mxu1 %vm3801_vm2, %v3800_v14  ;;  %v4735_v14 = vpop.permute.xlu1 %4734 }
 0x4d7   : > { %4663 = vmatmul.mubr.f32.gmra.mrb[132].mxu1 %v3799_v57 }
 0x4d8   : > { %4974 = vmatprep.mubr.f32.mxu1 %v6272_v31 }
 0x52e   : > { %v4478_v6 = vpop.f32.mrb[70].mxu1 }
 0x52f   : > { %v4480_v58 = vpop.f32.mrb[71].mxu1 }
 0x532   : > { %v4484_v46 = vpop.f32.mrb[72].mxu1 }
 0x533   : > { %v4486_v8 = vpop.f32.mrb[73].mxu1 }
 0x536   : > { %v4490_v10 = vpop.f32.mrb[74].mxu1 }
 0x537   : > { %v4492_v59 = vpop.f32.mrb[75].mxu1 }
 0x53a   : > { %v4496_v7 = vpop.f32.mrb[76].mxu1 }
 0x53b   : > { %v4498_v20 = vpop.f32.mrb[77].mxu1 }
 0x53e   : > { %v9564_v44 = vpop.f32.mrb[78].mxu1 }
 0x53f   : > { %v9566_v22 = vpop.f32.mrb[79].mxu1 }
 0x542   : > { %v9568_v27 = vpop.f32.mrb[80].mxu1 }
 0x543   : > { %v9570_v61 = vpop.f32.mrb[81].mxu1 }
 0x546   : > { %v9572_v50 = vpop.f32.mrb[82].mxu1 }
 0x547   : > { %v9574_v34 = vpop.f32.mrb[83].mxu1 }
 0x54a   : > { %v9576_v25 = vpop.f32.mrb[84].mxu1 }
 0x54b   : > { %v9578_v9 = vpop.f32.mrb[85].mxu1 }
 0x54e   : > { %v9580_v0 = vpop.f32.mrb[86].mxu1 }
 0x54f   : > { %v9582_v13 = vpop.f32.mrb[87].mxu1 }
 0x552   : > { %v9584_v60 = vpop.f32.mrb[88].mxu1 }
 0x553   : > { %v9586_v23 = vpop.f32.mrb[89].mxu1 }
 0x556   : > { %v9588_v1 = vpop.f32.mrb[90].mxu1 }
 0x557   : > { %v9590_v55 = vpop.f32.mrb[91].mxu1 }
 0x55a   : > { %v9592_v28 = vpop.f32.mrb[92].mxu1 }
 0x55b   : > { %v9594_v2 = vpop.f32.mrb[93].mxu1 }
 0x55e   : > { %v9596_v32 = vpop.f32.mrb[94].mxu1 }
 0x55f   : > { %v9598_v5 = vpop.f32.mrb[95].mxu1 }
 0x562   : > { %v9600_v24 = vpop.f32.mrb[96].mxu1 }
 0x563   : > { %v9602_v38 = vpop.f32.mrb[97].mxu1 }
 0x566   : > { %v9604_v19 = vpop.f32.mrb[98].mxu1 }
 0x567   : > { %v9606_v15 = vpop.f32.mrb[99].mxu1 }
 0x56a   : > { %v9608_v54 = vpop.f32.mrb[100].mxu1 }
 0x56b   : > { %v9610_v53 = vpop.f32.mrb[101].mxu1 }
 0x56e   : > { %v4574_v33 = vpop.f32.mrb[102].mxu1 }
 0x56f   : > { %v4669_v41 = vmax.f32 %v4478_v6, %v4574_v33  ;;  %v4576_v37 = vpop.f32.mrb[103].mxu1 }
 0x570   : > { %v4670_v12 = vmax.f32 %v4480_v58, %v4576_v37 }
 0x571   : > { %v4797_v17 = vadd.f32 %v4720_v43, %v4669_v41 }
 0x572   : > { %v4580_v16 = vpop.f32.mrb[104].mxu1  ;;  %v4798_v18 = vadd.f32 %v4720_v43, %v4670_v12 }
 0x573   : > { %v4671_v47 = vmax.f32 %v4484_v46, %v4580_v16  ;;  %v4582_v30 = vpop.f32.mrb[105].mxu1  ;;  %v4829_v42 = vmax.f32 %v4797_v17, 0.0 }
 0x574   : > { %v4672_v45 = vmax.f32 %v4486_v8, %v4582_v30  ;;  %v4830_v26 = vmax.f32 %v4798_v18, 0.0  ;;  %v4745_v18 = vpop.permute.xlu1 %4744 }
 0x575   : > { %v4799_v36 = vadd.f32 %v4725_v39, %v4671_v47 }
 0x576   : > { %v4800_v63 = vadd.f32 %v4725_v39, %v4672_v45  ;;  %v4586_v3 = vpop.f32.mrb[106].mxu1 }
 0x577   : > { %v4831_v56 = vmax.f32 %v4799_v36, 0.0  ;;  %v4673_v51 = vmax.f32 %v4490_v10, %v4586_v3  ;;  %v4588_v29 = vpop.f32.mrb[107].mxu1 }
 0x578   : > { %v4832_v49 = vmax.f32 %v4800_v63, 0.0  ;;  %v4674_v52 = vmax.f32 %v4492_v59, %v4588_v29 }
 0x579   : > { %v5939_v21 = vpack.c.bf16 %v4831_v56, %v4829_v42  ;;  %v4801_v48 = vadd.f32 %v4730_v40, %v4673_v51 }
 0x57a   : > { %v4592_v62 = vpop.f32.mrb[108].mxu1  ;;  %v5937_v35 = vpack.c.bf16 %v4832_v49, %v4830_v26  ;;  %v4802_v57 = vadd.f32 %v4730_v40, %v4674_v52 }
 0x57b   : > { %v4675_v4 = vmax.f32 %v4496_v7, %v4592_v62  ;;  %v4594_v11 = vpop.f32.mrb[109].mxu1  ;;  %v4833_v10 = vmax.f32 %v4801_v48, 0.0  ;;  %v4740_v7 = vpop.permute.xlu0 %4739 }
 0x57c   : > { %v4676_v6 = vmax.f32 %v4498_v20, %v4594_v11  ;;  %5938 = vmatprep.subr.bf16.mxu1 %v5937_v35  ;;  %v4834_v37 = vmax.f32 %v4802_v57, 0.0  ;;  %v4755_v48 = vpop.permute.xlu1 %4754 }
 0x57d   : > { %v4803_v58 = vadd.f32 %v4735_v14, %v4675_v4  ;;  %5940 = vmatpush1.bf16.msra.mxu1 %v5939_v21 }
 0x57e   : > { %v4804_v46 = vadd.f32 %v4735_v14, %v4676_v6  ;;  %v4598_v8 = vpop.f32.mrb[110].mxu1 }
 0x57f   : > { %v4835_v33 = vmax.f32 %v4803_v58, 0.0  ;;  %v4677_v41 = vmax.f32 %v9564_v44, %v4598_v8  ;;  %v4600_v59 = vpop.f32.mrb[111].mxu1  ;;  %v4750_v52 = vpop.permute.xlu0 %4749 }
 0x580   : > { %v4836_v12 = vmax.f32 %v4804_v46, 0.0  ;;  %v4678_v43 = vmax.f32 %v9566_v22, %v4600_v59 }
 0x581   : > { %v5943_v16 = vpack.c.bf16 %v4835_v33, %v4833_v10  ;;  %v4805_v30 = vadd.f32 %v4740_v7, %v4677_v41 }
 0x582   : > { %v4604_v17 = vpop.f32.mrb[112].mxu1  ;;  %v5941_v47 = vpack.c.bf16 %v4836_v12, %v4834_v37  ;;  %v4806_v45 = vadd.f32 %v4740_v7, %v4678_v43 }
 0x583   : > { %v4679_v20 = vmax.f32 %v9568_v27, %v4604_v17  ;;  %v4606_v39 = vpop.f32.mrb[113].mxu1  ;;  %v4837_v42 = vmax.f32 %v4805_v30, 0.0  ;;  %v4760_v41 = vpop.permute.xlu0 %4759 }
 0x584   : > { %v4680_v36 = vmax.f32 %v9570_v61, %v4606_v39  ;;  %5942 = vmatprep.subr.bf16.mxu1 %v5941_v47  ;;  %v4838_v29 = vmax.f32 %v4806_v45, 0.0 }
 0x585   : > { %v4807_v63 = vadd.f32 %v4745_v18, %v4679_v20  ;;  %5944 = vmatpush1.bf16.msra.mxu1 %v5943_v16  ;;  %v4765_v16 = vpop.permute.xlu1 %4764 }
 0x586   : > { %v4808_v44 = vadd.f32 %v4745_v18, %v4680_v36  ;;  %v4610_v3 = vpop.f32.mrb[114].mxu1 }
 0x587   : > { %v4839_v56 = vmax.f32 %v4807_v63, 0.0  ;;  %v4681_v22 = vmax.f32 %v9572_v50, %v4610_v3  ;;  %v4612_v51 = vpop.f32.mrb[115].mxu1 }
 0x588   : > { %v4840_v26 = vmax.f32 %v4808_v44, 0.0  ;;  %v4682_v49 = vmax.f32 %v9574_v34, %v4612_v51  ;;  %v4770_v44 = vpop.permute.xlu0 %4769 }
 0x589   : > { %v5947_v27 = vpack.c.bf16 %v4839_v56, %v4837_v42  ;;  %v4809_v62 = vadd.f32 %v4750_v52, %v4681_v22  ;;  %v4775_v51 = vpop.permute.xlu1 %4774 }
 0x58a   : > { %v4616_v21 = vpop.f32.mrb[116].mxu1  ;;  %v5945_v40 = vpack.c.bf16 %v4840_v26, %v4838_v29  ;;  %v4810_v4 = vadd.f32 %v4750_v52, %v4682_v49 }
 0x58b   : > { %v4683_v61 = vmax.f32 %v9576_v25, %v4616_v21  ;;  %v4618_v35 = vpop.f32.mrb[117].mxu1  ;;  %v4841_v6 = vmax.f32 %v4809_v62, 0.0 }
 0x58c   : > { %v4684_v11 = vmax.f32 %v9578_v9, %v4618_v35  ;;  %5946 = vmatprep.subr.bf16.mxu1 %v5945_v40  ;;  %v4842_v8 = vmax.f32 %v4810_v4, 0.0 }
 0x58d   : > { %v4811_v14 = vadd.f32 %v4755_v48, %v4683_v61  ;;  %5948 = vmatpush1.bf16.msra.mxu1 %v5947_v27 }
 0x58e   : > { %v4812_v50 = vadd.f32 %v4755_v48, %v4684_v11  ;;  %v4622_v57 = vpop.f32.mrb[118].mxu1  ;;  %v4780_v48 = vpop.permute.xlu0 %4779 }
 0x58f   : > { %v4843_v58 = vmax.f32 %v4811_v14, 0.0  ;;  %v4685_v34 = vmax.f32 %v9580_v0, %v4622_v57  ;;  %v4624_v46 = vpop.f32.mrb[119].mxu1  ;;  %v4785_v57 = vpop.permute.xlu1 %4784 }
 0x590   : > { %v4844_v10 = vmax.f32 %v4812_v50, 0.0  ;;  %v4686_v33 = vmax.f32 %v9582_v13, %v4624_v46 }
 0x591   : > { %v5951_v25 = vpack.c.bf16 %v4843_v58, %v4841_v6  ;;  %v4813_v12 = vadd.f32 %v4760_v41, %v4685_v34 }
 0x592   : > { %v4628_v59 = vpop.f32.mrb[120].mxu1  ;;  %v5949_v37 = vpack.c.bf16 %v4844_v10, %v4842_v8  ;;  %v4814_v7 = vadd.f32 %v4760_v41, %v4686_v33 }
 0x593   : > { %v4687_v9 = vmax.f32 %v9584_v60, %v4628_v59  ;;  %v4630_v43 = vpop.f32.mrb[121].mxu1  ;;  %v4845_v20 = vmax.f32 %v4813_v12, 0.0 }
 0x594   : > { %v4688_v17 = vmax.f32 %v9586_v23, %v4630_v43  ;;  %5950 = vmatprep.subr.bf16.mxu1 %v5949_v37  ;;  %v4846_v45 = vmax.f32 %v4814_v7, 0.0  ;;  %v4790_v37 = vpop.permute.xlu0 %4789  ;;  %v4795_v7 = vpop.permute.xlu1 %4794 }
 0x595   : > { %v4815_v47 = vadd.f32 %v4765_v16, %v4687_v9  ;;  %5952 = vmatpush1.bf16.msra.mxu1 %v5951_v25 }
 0x596   : > { %v4816_v0 = vadd.f32 %v4765_v16, %v4688_v17  ;;  %v4634_v30 = vpop.f32.mrb[122].mxu1 }
 0x597   : > { %v4847_v39 = vmax.f32 %v4815_v47, 0.0  ;;  %v4689_v13 = vmax.f32 %v9588_v1, %v4634_v30  ;;  %v4636_v18 = vpop.f32.mrb[123].mxu1 }
 0x598   : > { %v4848_v36 = vmax.f32 %v4816_v0, 0.0  ;;  %v4690_v63 = vmax.f32 %v9590_v55, %v4636_v18 }
 0x599   : > { %v5955_v60 = vpack.c.bf16 %v4847_v39, %v4845_v20  ;;  %v4817_v56 = vadd.f32 %v4770_v44, %v4689_v13 }
 0x59a   : > { %v4640_v3 = vpop.f32.mrb[124].mxu1  ;;  %v5953_v42 = vpack.c.bf16 %v4848_v36, %v4846_v45  ;;  %v4818_v29 = vadd.f32 %v4770_v44, %v4690_v63  ;;  %v4863_v45 = vld [vmem:[%s9764_s5 + $0x10] sm:$0xff]  ;;  %v4864_v36 = vld [vmem:[%s9764_s5 + $0x18] sm:$0xff]  ;;  %v4865_v63 = vld [vmem:[%s9764_s5 + $0x20] sm:$0xff] }
 0x59b   : > { %v4691_v23 = vmax.f32 %v9592_v28, %v4640_v3  ;;  %v4642_v22 = vpop.f32.mrb[125].mxu1  ;;  %v4849_v52 = vmax.f32 %v4817_v56, 0.0  ;;  %v4867_v44 = vld [vmem:[%s9764_s5 + $0x30] sm:$0x3]  ;;  %v4878_v56 = vpop.permute.xlu0 %4877 }
 0x59c   : > { %v4692_v26 = vmax.f32 %v9594_v2, %v4642_v22  ;;  %5954 = vmatprep.subr.bf16.mxu1 %v5953_v42  ;;  %v4850_v62 = vmax.f32 %v4818_v29, 0.0  ;;  %v4883_v22 = vpop.permute.xlu1 %4882 }
 0x59d   : > { %v4819_v49 = vadd.f32 %v4775_v51, %v4691_v23  ;;  %5956 = vmatpush1.bf16.msra.mxu1 %v5955_v60  ;;  %v4866_v60 = vld [vmem:[%s9764_s5 + $0x28] sm:$0xff] }
 0x59e   : > { %v4820_v1 = vadd.f32 %v4775_v51, %v4692_v26  ;;  %v4646_v27 = vpop.f32.mrb[126].mxu1 }
 0x59f   : > { %v4851_v21 = vmax.f32 %v4819_v49, 0.0  ;;  %v4693_v55 = vmax.f32 %v9596_v32, %v4646_v27  ;;  %v4648_v40 = vpop.f32.mrb[127].mxu1 }
 0x5a0   : > { %v4852_v61 = vmax.f32 %v4820_v1, 0.0  ;;  %v4694_v35 = vmax.f32 %v9598_v5, %v4648_v40 }
 0x5a1   : > { %v5959_v28 = vpack.c.bf16 %v4851_v21, %v4849_v52  ;;  %v4821_v14 = vadd.f32 %v4780_v48, %v4693_v55 }
 0x5a2   : > { %v4652_v4 = vpop.f32.mrb[128].mxu1  ;;  %v5957_v11 = vpack.c.bf16 %v4852_v61, %v4850_v62  ;;  %v4822_v6 = vadd.f32 %v4780_v48, %v4694_v35  ;;  %v4888_v35 = vpop.permute.xlu0 %4887 }
 0x5a3   : > { %v4695_v2 = vmax.f32 %v9600_v24, %v4652_v4  ;;  %v4654_v50 = vpop.f32.mrb[129].mxu1  ;;  %v4853_v8 = vmax.f32 %v4821_v14, 0.0  ;;  %v4893_v4 = vpop.permute.xlu1 %4892 }
 0x5a4   : > { %v4696_v58 = vmax.f32 %v9602_v38, %v4654_v50  ;;  %5958 = vmatprep.subr.bf16.mxu1 %v5957_v11  ;;  %v4854_v25 = vmax.f32 %v4822_v6, 0.0 }
 0x5a5   : > { %v4823_v34 = vadd.f32 %v4785_v57, %v4695_v2  ;;  %5960 = vmatpush1.bf16.msra.mxu1 %v5959_v28 }
 0x5a6   : > { %v4824_v32 = vadd.f32 %v4785_v57, %v4696_v58  ;;  %v4658_v46 = vpop.f32.mrb[130].mxu1 }
 0x5a7   : > { %v4855_v10 = vmax.f32 %v4823_v34, 0.0  ;;  %v4697_v5 = vmax.f32 %v9604_v19, %v4658_v46  ;;  %v4660_v33 = vpop.f32.mrb[131].mxu1 }
 0x5a8   : > { %v4856_v41 = vmax.f32 %v4824_v32, 0.0  ;;  %v4698_v59 = vmax.f32 %v9606_v15, %v4660_v33 }
 0x5a9   : > { %v5963_v24 = vpack.c.bf16 %v4855_v10, %v4853_v8  ;;  %v4825_v43 = vadd.f32 %v4790_v37, %v4697_v5  ;;  %v4898_v5 = vpop.permute.xlu0 %4897 }
 0x5aa   : > { %v4664_v12 = vpop.f32.mrb[132].mxu1  ;;  %v5961_v9 = vpack.c.bf16 %v4856_v41, %v4854_v25  ;;  %v4826_v17 = vadd.f32 %v4790_v37, %v4698_v59  ;;  %v4903_v41 = vpop.permute.xlu1 %4902 }
 0x5ab   : > { %v4699_v38 = vmax.f32 %v9608_v54, %v4664_v12  ;;  %v4666_v16 = vpop.f32.mrb[133].mxu1  ;;  %v4857_v30 = vmax.f32 %v4825_v43, 0.0  ;;  %v4861_v54 = vld [vmem:[%s9764_s5] sm:$0xff] }
 0x5ac   : > { %v4700_v47 = vmax.f32 %v9610_v53, %v4666_v16  ;;  %5962 = vmatprep.subr.bf16.mxu1 %v5961_v9  ;;  %v4858_v39 = vmax.f32 %v4826_v17, 0.0  ;;  %v4862_v53 = vld [vmem:[%s9764_s5 + $0x8] sm:$0xff] }
 0x5ad   : > { %v4827_v0 = vadd.f32 %v4795_v7, %v4699_v38  ;;  %5964 = vmatpush1.bf16.msra.mxu1 %v5963_v24 }
 0x5ae   : > { %v4828_v19 = vadd.f32 %v4795_v7, %v4700_v47  ;;  %v4908_v47 = vpop.permute.xlu0 %4907 }
 0x5af   : > { %v4859_v20 = vmax.f32 %v4827_v0, 0.0 }
 0x5b0   : > { %v4860_v15 = vmax.f32 %v4828_v19, 0.0 }
 0x5b1   : > { %v5967_v13 = vpack.c.bf16 %v4859_v20, %v4857_v30 }
 0x5b2   : > { %v5965_v18 = vpack.c.bf16 %v4860_v15, %v4858_v39 }
 0x5b4   : > { %5966 = vmatprep.subr.bf16.mxu1 %v5965_v18  ;;  %v5031_v18 = vld [vmem:[%s9766_s7] sm:$0xff] }
 0x5b5   : > { %5968 = vmatpush1.bf16.msra.mxu1 %v5967_v13 }
 0x5b8   : > { %4975 = vmatmul.mubr.f32.vlgmr.msra.gmra.mrb[134].mxu1 %v4861_v54  ;;  %v5032_v54 = vld [vmem:[%s9766_s7 + $0x8] sm:$0x3] }
 0x5b9   : > { %4980 = vmatprep.mubr.f32.mxu1 %v6272_v31 }
 0x5bc   : > { %4981 = vmatmul.mubr.f32.gmra.mrb[136].mxu1 %v4862_v53 }
 0x5bd   : > { %4986 = vmatprep.mubr.f32.mxu1 %v6272_v31 }
 0x5c0   : > { %4987 = vmatmul.mubr.f32.gmra.mrb[138].mxu1 %v4863_v45 }
 0x5c1   : > { %4992 = vmatprep.mubr.f32.mxu1 %v6272_v31 }
 0x5c4   : > { %4993 = vmatmul.mubr.f32.gmra.mrb[140].mxu1 %v4864_v36  ;;  %v5038_v36 = vpop.permute.xlu1 %5037 }
 0x5c5   : > { %4998 = vmatprep.mubr.f32.mxu1 %v6272_v31 }
 0x5c8   : > { %4999 = vmatmul.mubr.f32.gmra.mrb[142].mxu1 %v4865_v63 }
 0x5c9   : > { %5004 = vmatprep.mubr.f32.mxu1 %v6272_v31 }
 0x5cc   : > { %5005 = vmatmul.mubr.f32.gmra.mrb[144].mxu1 %v4866_v60  ;;  %v5043_v60 = vpop.permute.xlu0 %5042 }
 0x5cd   : > { %5010 = vmatprep.mubr.f32.mxu1 %v6272_v31 }
 0x5d0   : > { %5011 = vmatmul.mubr.f32.gmra.mrb[146].mxu1 %v4867_v44 }
 0x5d1   : > { %5123 = vmatprep.mubr.f32.mxu1 %v6272_v31 }
 0x68b   : > { %v4976_v3 = vpop.f32.mrb[134].mxu1 }
 0x68c   : > { %v4978_v42 = vpop.f32.mrb[135].mxu1  ;;  %v4977_v23 = vadd.f32 %v4976_v3, %v4878_v56 }
 0x68d   : > { %v4979_v51 = vadd.f32 %v4978_v42, %v4878_v56 }
 0x68e   : > { %v5017_v27 = vmax.f32 %v4977_v23, 0.0 }
 0x68f   : > { %v4982_v29 = vpop.f32.mrb[136].mxu1  ;;  %v5018_v21 = vmax.f32 %v4979_v51, 0.0 }
 0x690   : > { %v4983_v26 = vadd.f32 %v4982_v29, %v4883_v22  ;;  %v4984_v49 = vpop.f32.mrb[137].mxu1 }
 0x691   : > { %v4985_v1 = vadd.f32 %v4984_v49, %v4883_v22 }
 0x692   : > { %v5019_v52 = vmax.f32 %v4983_v26, 0.0 }
 0x693   : > { %v5020_v55 = vmax.f32 %v4985_v1, 0.0  ;;  %v4988_v40 = vpop.f32.mrb[138].mxu1 }
 0x694   : > { %v5971_v62 = vpack.c.bf16 %v5019_v52, %v5017_v27  ;;  %v4990_v61 = vpop.f32.mrb[139].mxu1  ;;  %v4989_v48 = vadd.f32 %v4988_v40, %v4888_v35  ;;  %v5140_v27 = vld [vmem:[%s9768_s9] sm:$0x3]  ;;  %v5145_v52 = vpop.permute.xlu1 %5144 }
 0x695   : > { %v5969_v28 = vpack.c.bf16 %v5020_v55, %v5018_v21  ;;  %v4991_v11 = vadd.f32 %v4990_v61, %v4888_v35 }
 0x696   : > { %v5021_v6 = vmax.f32 %v4989_v48, 0.0 }
 0x697   : > { %v4994_v14 = vpop.f32.mrb[140].mxu1  ;;  %5970 = vmatprep.subr.bf16.mxu1 %v5969_v28  ;;  %v5022_v34 = vmax.f32 %v4991_v11, 0.0 }
 0x698   : > { %v4995_v2 = vadd.f32 %v4994_v14, %v4893_v4  ;;  %v4996_v50 = vpop.f32.mrb[141].mxu1  ;;  %5972 = vmatpush1.bf16.msra.mxu1 %v5971_v62 }
 0x699   : > { %v4997_v57 = vadd.f32 %v4996_v50, %v4893_v4 }
 0x69a   : > { %v5023_v58 = vmax.f32 %v4995_v2, 0.0 }
 0x69b   : > { %v5024_v32 = vmax.f32 %v4997_v57, 0.0  ;;  %v5000_v46 = vpop.f32.mrb[142].mxu1 }
 0x69c   : > { %v5975_v8 = vpack.c.bf16 %v5023_v58, %v5021_v6  ;;  %v5002_v10 = vpop.f32.mrb[143].mxu1  ;;  %v5001_v25 = vadd.f32 %v5000_v46, %v4898_v5 }
 0x69d   : > { %v5973_v33 = vpack.c.bf16 %v5024_v32, %v5022_v34  ;;  %v5003_v59 = vadd.f32 %v5002_v10, %v4898_v5 }
 0x69e   : > { %v5025_v43 = vmax.f32 %v5001_v25, 0.0 }
 0x69f   : > { %v5006_v24 = vpop.f32.mrb[144].mxu1  ;;  %5974 = vmatprep.subr.bf16.mxu1 %v5973_v33  ;;  %v5026_v16 = vmax.f32 %v5003_v59, 0.0 }
 0x6a0   : > { %v5007_v37 = vadd.f32 %v5006_v24, %v4903_v41  ;;  %v5008_v12 = vpop.f32.mrb[145].mxu1  ;;  %5976 = vmatpush1.bf16.msra.mxu1 %v5975_v8 }
 0x6a1   : > { %v5009_v9 = vadd.f32 %v5008_v12, %v4903_v41 }
 0x6a2   : > { %v5027_v38 = vmax.f32 %v5007_v37, 0.0 }
 0x6a3   : > { %v5028_v7 = vmax.f32 %v5009_v9, 0.0  ;;  %v5012_v17 = vpop.f32.mrb[146].mxu1 }
 0x6a4   : > { %v5979_v0 = vpack.c.bf16 %v5027_v38, %v5025_v43  ;;  %v5014_v19 = vpop.f32.mrb[147].mxu1  ;;  %v5013_v39 = vadd.f32 %v5012_v17, %v4908_v47  ;;  %v5286_v38 = vlaneseq }
 0x6a5   : > { %v5977_v30 = vpack.c.bf16 %v5028_v7, %v5026_v16  ;;  %v5015_v20 = vadd.f32 %v5014_v19, %v4908_v47 }
 0x6a6   : > { %v5029_v13 = vmax.f32 %v5013_v39, 0.0  ;;  %v5287_v7 = vshrl.u32 %v5286_v38, 7 }
 0x6a7   : > { %v5030_v15 = vmax.f32 %v5015_v20, 0.0  ;;  %5978 = vmatprep.subr.bf16.mxu1 %v5977_v30 }
 0x6a8   : > { %5980 = vmatpush1.bf16.msra.mxu1 %v5979_v0  ;;  %v5300_v19 = vsub.s32 1, %v5287_v7  ;;  %vm5324_vm10 = vcmp.eq.s32.totalorder %v5287_v7, 4  ;;  %vm5315_vm11 = vcmp.eq.s32.totalorder %v5287_v7, 3  ;;  %vm5288_vm12 = vcmp.eq.s32.totalorder %v5287_v7, 0 }
 0x6a9   : > { %5667 = vmatprep.subr.msk.mxu1 %vm5052_vm3, %v5030_v15  ;;  %vm5306_vm13 = vcmp.eq.s32.totalorder %v5287_v7, 2  ;;  %vm5297_vm14 = vcmp.eq.s32.totalorder %v5287_v7, 1 }
 0x6ac   : > { %5668 = vmatpush1.msk.msra.mxu1 %vm5052_vm3, %v5029_v13 }
 0x6ad   : > { %5669 = vmatmul.mubr.msk.f32.vlgmr.msra.gmra.mrb[148].mxu1 %vm5045_vm4, %v5031_v18 }
 0x6ae   : > { %5129 = vmatprep.mubr.f32.mxu1 %v6272_v31 }
 0x6b1   : > { %5670 = vmatmul.mubr.msk.f32.gmra.mrb[150].mxu1 %vm5045_vm4, %v5032_v54 }
 0x6b2   : > { %5221 = vmatprep.mubr.f32.mxu1 %v6272_v31 }
 0x780   : > { %v5125_v53 = vpop.f32.mrb[148].mxu1 }
 0x781   : > { %v5127_v45 = vpop.f32.mrb[149].mxu1  ;;  %v5126_v63 = vadd.f32 %v5125_v53, %v5038_v36 }
 0x782   : > { %v5128_v44 = vadd.f32 %v5127_v45, %v5038_v36  ;;  %v5291_v36 = vsub.s32 0, %v5287_v7 }
 0x783   : > { %v5136_v22 = vmax.f32 %v5126_v63, 0.0 }
 0x784   : > { %v5131_v3 = vpop.f32.mrb[150].mxu1  ;;  %v5137_v29 = vmax.f32 %v5128_v44, 0.0 }
 0x785   : > { %v5132_v42 = vadd.f32 %v5131_v3, %v5043_v60  ;;  %v5133_v56 = vpop.f32.mrb[151].mxu1 }
 0x786   : > { %v5134_v23 = vadd.f32 %v5133_v56, %v5043_v60 }
 0x787   : > { %v5138_v51 = vmax.f32 %v5132_v42, 0.0 }
 0x788   : > { %v5139_v26 = vmax.f32 %v5134_v23, 0.0 }
 0x789   : > { %v5984_v49 = vpack.c.bf16 %v5138_v51, %v5136_v22 }
 0x78a   : > { %v5981_v1 = vpack.c.bf16 %v5139_v26, %v5137_v29 }
 0x78c   : > { %5983 = vmatprep.subr.msk.bf16.mxu1 %vm5982_vm6, %v5981_v1 }
 0x78d   : > { %5986 = vmatpush1.bf16.msk.msra.mxu1 %vm5982_vm6, %v5984_v49 }
 0x790   : > { %5673 = vmatmul.mubr.msk.f32.vlgmr.msra.gmra.mrb[152].mxu1 %vm5147_vm7, %v5140_v27 }
 0x863   : > { %v5223_v21 = vpop.f32.mrb[152].mxu1 }
 0x864   : > { %v5224_v55 = vadd.f32 %v5223_v21, %v5145_v52  ;;  %v5225_v40 = vpop.f32.mrb[153].mxu1 }
 0x865   : > { %v5226_v62 = vadd.f32 %v5225_v40, %v5145_v52 }
 0x866   : > { %v9678_v61 = vmax.f32 %v5224_v55, 0.0 }
 0x867   : > { %v9680_v35 = vmax.f32 %v5226_v62, 0.0 }
 0x868   : > { %v5232_v28 = vrot.slane %v9678_v61, 1  ;;  %v5278_v43 = vrot.slane %v9678_v61, 7  ;;  %v5301_v3 = vrot.slane %v9678_v61, %v5300_v19  ;;  %v5292_v22 = vrot.slane %v9678_v61, %v5291_v36 }
 0x869   : > { %v5233_v48 = vrot.slane %v9680_v35, 1  ;;  %v5279_v16 = vrot.slane %v9680_v35, 7  ;;  %v5305_v51 = vrot.slane %v9680_v35, %v5300_v19  ;;  %v5296_v49 = vrot.slane %v9680_v35, %v5291_v36 }
 0x86a   : > { %v5236_v4 = vmax.f32 %v9678_v61, %v5232_v28  ;;  %vm5282_vm8 = vcmp.gt.f32.partialorder %v9678_v61, %v5278_v43 }
 0x86b   : > { %v5237_v11 = vmax.f32 %v9680_v35, %v5233_v48  ;;  %vm5283_vm9 = vcmp.gt.f32.partialorder %v9680_v35, %v5279_v16  ;;  %v5284_v17 = vsel %vm5282_vm8, 1.0, %v6272_v31 }
 0x86c   : > { %v5238_v14 = vsub.f32 %v9678_v61, %v5236_v4  ;;  %v5246_v2 = vrot.slane %v5236_v4, 7  ;;  %v5285_v0 = vsel %vm5283_vm9, 1.0, %v6272_v31  ;;  %v5328_v15 = vrot.slane %v5284_v17, %v5300_v19 }
 0x86d   : > { %v5239_v50 = vsub.f32 %v9680_v35, %v5237_v11  ;;  %v5247_v57 = vrot.slane %v5237_v11, 7  ;;  %v5332_v53 = vrot.slane %v5285_v0, %v5300_v19 }
 0x86e   : > { %v5250_v6 = vsub.f32 %v9678_v61, %v5246_v2  ;;  %v5240_v34 = vmul.f32 1.442695, %v5238_v14  ;;  %v5333_v44 = vsel %vm5324_vm10, %v5328_v15, 0.0 }
 0x86f   : > { %v5251_v58 = vsub.f32 %v9680_v35, %v5247_v57  ;;  %v5242_v46 = vmul.f32 1.442695, %v5239_v50  ;;  %v5334_v56 = vsel %vm5324_vm10, %v5332_v53, 0.0 }
 0x870   : > { %v5252_v32 = vmul.f32 1.442695, %v5250_v6 }
 0x871   : > { %v5254_v8 = vmul.f32 1.442695, %v5251_v58 }
 0x872   : > { %6191 = vpow2.f32 %v5252_v32 }
 0x873   : > { %6193 = vpow2.f32 %v5254_v8 }
 0x874   : > { %6195 = vpow2.f32 %v5240_v34 }
 0x875   : > { %6197 = vpow2.f32 %v5242_v46 }
 0x87c   : > { %v6192_v10 = vpop.eup %6191 }
 0x87d   : > { %v6194_v5 = vpop.eup %6193  ;;  %v5258_v33 = vrot.slane %v6192_v10, 1 }
 0x87e   : > { %v6196_v25 = vpop.eup %6195  ;;  %v5259_v41 = vrot.slane %v6194_v5, 1 }
 0x87f   : > { %v6198_v59 = vpop.eup %6197  ;;  %v5262_v24 = vadd.f32 %v6196_v25, %v5258_v33 }
 0x880   : > { %v5263_v37 = vadd.f32 %v6198_v59, %v5259_v41 }
 0x881   : > { %6199 = vrcp.f32 %v5262_v24  ;;  %v5270_v12 = vrot.slane %v5262_v24, 7 }
 0x882   : > { %6201 = vrcp.f32 %v5263_v37  ;;  %v5271_v9 = vrot.slane %v5263_v37, 7 }
 0x883   : > { %6203 = vrcp.f32 %v5270_v12 }
 0x884   : > { %6205 = vrcp.f32 %v5271_v9 }
 0x88b   : > { %v6200_v47 = vpop.eup %6199 }
 0x88c   : > { %v6202_v30 = vpop.eup %6201  ;;  %v5265_v39 = vmul.f32 %v6200_v47, %v6196_v25 }
 0x88d   : > { %v6204_v20 = vpop.eup %6203  ;;  %v5267_v18 = vmul.f32 %v6202_v30, %v6198_v59 }
 0x88e   : > { %v6206_v13 = vpop.eup %6205  ;;  %v5275_v54 = vmul.f32 %v6204_v20, %v6192_v10  ;;  %v5310_v31 = vrot.slane %v5265_v39, %v5291_v36 }
 0x88f   : > { %v5277_v45 = vmul.f32 %v6206_v13, %v6194_v5  ;;  %v5314_v42 = vrot.slane %v5267_v18, %v5291_v36 }
 0x890   : > { %v5319_v63 = vrot.slane %v5275_v54, %v5300_v19 }
 0x891   : > { %v5323_v60 = vrot.slane %v5277_v45, %v5300_v19 }
 0x892   : > { %v5335_v23 = vsel %vm5315_vm11, %v5319_v63, %v5333_v44 }
 0x893   : > { %v5336_v29 = vsel %vm5315_vm11, %v5323_v60, %v5334_v56  ;;  %v5337_v26 = vsel %vm5306_vm13, %v5310_v31, %v5335_v23 }
 0x894   : > { %v5338_v1 = vsel %vm5306_vm13, %v5314_v42, %v5336_v29  ;;  %v5339_v27 = vsel %vm5297_vm14, %v5301_v3, %v5337_v26 }
 0x895   : > { %v5340_v52 = vsel %vm5297_vm14, %v5305_v51, %v5338_v1  ;;  %v5341_v21 = vsel %vm5288_vm12, %v5292_v22, %v5339_v27 }
 0x896   : > { %v5342_v55 = vsel %vm5288_vm12, %v5296_v49, %v5340_v52  ;;  %5343 = vst [vmem:[%s382_s14] sm:$0xff] %v5341_v21 }
 0x897   : > { %5344 = vst [vmem:[%s382_s14 + $0x8] sm:$0xff] %v5342_v55 }
 0x898   : > { %6220 = shalt.err (!%p6217_p3)
}
 0x899   : > { %s6221_s30 = scalar_lea.hbm %s9714_s22, 256  ;;  %s6225_s16 = scalar_lea.hbm %s9770_s11, 512 }
 0x89a   : > { %p6222_p4 = scmp.ne.s32.totalorder %s9714_s22, %s6221_s30  ;;  %p6226_p9 = scmp.lt.u32.totalorder %s9714_s22, %s9770_s11 }
 0x89b   : > { %p6227_p10 = scmp.lt.u32.totalorder %s6225_s16, %s6221_s30  ;;  %p6229_p12 = scmp.lt.u32.totalorder %s6221_s30, %s9714_s22 }
 0x89c   : > { %p6223_p7 = pnand %p6222_p4, %p6373_p5 }
 0x89d   : > { %p6228_p11 = por %p6227_p10, %p6226_p9 }
 0x89e   : > { %p6224_p8 = pneg %p6223_p7 }
 0x89f   : > { %p6230_p13 = por %p6229_p12, %p6228_p11 }
 0x8a1   : > { %p6231_p0 = pnand %p6230_p13, %p6224_p8 }
 0x8a3   : > { %6234 = shalt.err (!%p6231_p0)
}
 0x8a4   : > { %6147 = dma.vmem_to_hbm [thread:$0]  (%p6373_p5), %s9716_s15, 256, %s9714_s22, %s5346_s24  }
 0x8a5 PF: > { %p6153_p1 = scmp.ge.s32.totalorder %s6269_s20, 2  ;;  %s5372_s25 = sand.u32 1, %s6257_s17  }
 0x8a6   : > { %s5373_s13 = scalar_lea.sflag [#allocation3], %s5372_s25 }
 0x8a7   : > { %p6150_p2 = pnand %p6153_p1, %p6377_p6 }
 0x8a9   : > { %6252 = dma.done.wait (!%p6150_p2), %s5373_s13, 256  }
 0x8aa   : > { %6254 = vsyncadd (!%p6150_p2), %s5373_s13, 4294967040  ;;  %p21_p3 = scmp.ge.s32.totalorder %s6360_s23, 4   ;;  %s10201_s17 = smov %s6261_s18 }
 0x8ab   : > { %s10202_s18 = smov %s6265_s19  ;;  %s10203_s19 = smov %s6371_s26 }
 0x8ac   : > { %s10204_s20 = smov %s6360_s23  ;;  %23 = sbr.rel (!%p21_p3) target bundleno = 3 (0x3), region = 99 }
 0x8b3   :  { %5378 = vsyncpa [#allocation3], 1 }
 0x8b4   :  { %5380 = vsyncpa [#allocation3 + $0x1], 1 }

// kernel: tpu_custom_call.1
= control target key start
LH: loop header
LB: loop body
LE: loop exit
PB: predicated region body
PF: predicated region fallthrough
CT: control target
= control target key end

     0   :  { %16 = vsyncpa [#allocation3], 0  ;;  %s9759_s0 = inlined_call_operand.vmem [shape: f32[512,240], index: 0, kind: input, shape index: {}]   ;;  %s9760_s1 = inlined_call_operand.vmem [shape: f32[1408,240], index: 1, kind: input, shape index: {}]   ;;  %s9761_s2 = inlined_call_operand.vmem [shape: f32[704,1], index: 2, kind: input, shape index: {}]   ;;  %s9762_s3 = inlined_call_operand.vmem [shape: f32[256,704], index: 3, kind: input, shape index: {}]   ;;  %s9763_s4 = inlined_call_operand.vmem [shape: f32[128,1], index: 4, kind: input, shape index: {}]   ;;  %s9764_s5 = inlined_call_operand.vmem [shape: f32[50,128], index: 5, kind: input, shape index: {}]   ;;  %s9765_s6 = inlined_call_operand.vmem [shape: f32[50,1], index: 6, kind: input, shape index: {}]   ;;  %s9766_s7 = inlined_call_operand.vmem [shape: f32[10,50], index: 7, kind: input, shape index: {}]   ;;  %s9767_s8 = inlined_call_operand.vmem [shape: f32[10,1], index: 8, kind: input, shape index: {}]   ;;  %s9768_s9 = inlined_call_operand.vmem [shape: f32[2,10], index: 9, kind: input, shape index: {}]   ;;  %s9769_s10 = inlined_call_operand.vmem [shape: f32[2,1], index: 10, kind: input, shape index: {}]   ;;  %s9770_s11 = inlined_call_operand.hbm [shape: f32[8,512], index: 11, kind: output, shape index: {}]  }
   0x1   :  { %18 = vsyncpa [#allocation3 + $0x1], 0  ;;  %s6335_s17 = smov 0   ;;  %s6337_s18 = smov 0  }
   0x2   :  { %s6339_s19 = smov 0   ;;  %s6341_s20 = smov 0  }
   0x3 LB: > { %s6356_s21 = sadd.s32 4294967295, %s6269_s20   ;;  %s5419_s22 = sadd.s32 4294967294, %s6269_s20   ;;  %s6269_s20 = sphi %s6341_s20, %s10204_s20   ;;  %s6265_s19 = sphi %s6339_s19, %s10203_s19   ;;  %s6261_s18 = sphi %s6337_s18, %s10202_s18   ;;  %s6257_s17 = sphi %s6335_s17, %s10201_s17  }
   0x4   : > { %s6360_s23 = sadd.s32 1, %s6269_s20   ;;  %s267_s24 = sadd.s32 1, %s6265_s19 }
   0x5   : > { %s264_s25 = ssub.s32 %s6269_s20, %s6360_s23  ;;  %p277_p0 = scmp.ne.s32.totalorder %s6265_s19, %s6261_s18 }
   0x6   : > { %p265_p1 = scmp.eq.s32.totalorder %s264_s25, 0  ;;  %p278_p2 = scmp.eq.s32.totalorder %s6356_s21, 1 }
   0x7   : > { %p283_p3 = scmp.ne.s32.totalorder %s6261_s18, %s6257_s17  ;;  %p284_p4 = scmp.eq.s32.totalorder %s5419_s22, 1 }
   0x8   : > { %s6371_s26 = scalar_select %p265_p1, %s6265_s19, %s267_s24  }
   0x9   : > { %p6373_p5 = por %p278_p2, %p277_p0  ;;  %p6377_p6 = por %p284_p4, %p283_p3 }
   0xa   : > { %p5422_p7 = scmp.ge.s32.totalorder %s6269_s20, 1  ;;  %p342_p8 = scmp.lt.s32.totalorder %s6269_s20, 3 }
   0xc   : > { %p343_p9 = pnand %p5422_p7, %p342_p8 }
   0xe   : > { %346 = sbr.rel (%p343_p9) target bundleno = 2213 (0x8a5), region = 64 }
  0x15   : > { %s5424_s29 = sshll.u32 %s6356_s21, 5  ;;  %vm807_vm0 = vcmask 916480   ;;  %v392_v0 = vld [vmem:[%s9760_s1 + $0x8] sm:$0xff]  ;;  %vm3801_vm2 = vcmask 523264   ;;  %vm5052_vm3 = vcmask 1041408   ;;  %vm5045_vm4 = vcmask 408576  }
  0x16   : > { %p384_p10 = scmp.lt.s32.totalorder %s5424_s29, 63  ;;  %5459 = vmatprep.mubr.msk.f32.mxu0 %vm807_vm0, %v392_v0  ;;  %vm6395_vm1 = vmpackc.low %vm807_vm0, %vm807_vm0  ;;  %v396_v1 = vld [vmem:[%s9760_s1 + $0x28] sm:$0xff]  ;;  %vm6273_vm5 = vmmov 1   ;;  %vm5147_vm7 = vcmask 80896   ;;  %s380_s30 = sand.u32 1, %s6261_s18  }
  0x17   : > { %vm5982_vm6 = vmpackc.low %vm5052_vm3, %vm6273_vm5  ;;  %s5423_s12 = sshll.u32 %s380_s30, 4  ;;  %s5346_s24 = scalar_lea.sflag [#allocation3], %s380_s30 }
  0x18   : > { %s10206_s29 = smov (!%p384_p10, %s5424_s29), 63  ;;  %s382_s14 = scalar_lea.vmem [#allocation2], %s5423_s12 }
  0x19   : > { %s5679_s13 = sshll.u32 %s10206_s29, 4  ;;  %s5360_s15 = sshll.u32 %s382_s14, 4  ;;  %s9716_s15 = int_to_ptr.vmem [resolvable:$true] %s5360_s15 }
  0x1a   : > { %s6391_s16 = scalar_lea.vmem %s9759_s0, %s5679_s13  ;;  %s5680_s13 = sshll.u32 %s6356_s21, 8 }
  0x1b   : > { %v744_v2 = vld [vmem:[%s6391_s16 + $0x8] sm:$0xff]  ;;  %v746_v3 = vld [vmem:[%s6391_s16 + $0x18] sm:$0xff]  ;;  %v743_v4 = vld [vmem:[%s6391_s16] sm:$0xff]  ;;  %s9714_s22 = scalar_lea.hbm %s9770_s11, %s5680_s13  ;;  %s6207_s25 = scalar_lea.vmem %s9716_s15, 256 }
  0x1c   : > { %v5681_v5 = vpack.c.bf16 %v746_v3, %v744_v2  ;;  %v745_v6 = vld [vmem:[%s6391_s16 + $0x10] sm:$0xff]  ;;  %v748_v7 = vld [vmem:[%s6391_s16 + $0x28] sm:$0xff]  ;;  %v750_v8 = vld [vmem:[%s6391_s16 + $0x38] sm:$0xff]  ;;  %p6208_p11 = scmp.ne.s32.totalorder %s9716_s15, %s6207_s25  ;;  %s6274_s29 = smov [#allocation2]  }
  0x1d   : > { %v5684_v9 = vpack.c.bf16 %v745_v6, %v743_v4  ;;  %v5686_v10 = vpack.c.bf16 %v750_v8, %v748_v7  ;;  %v747_v11 = vld [vmem:[%s6391_s16 + $0x20] sm:$0xff]  ;;  %v749_v12 = vld [vmem:[%s6391_s16 + $0x30] sm:$0xff]  ;;  %v752_v13 = vld [vmem:[%s6391_s16 + $0x48] sm:$0xff]  ;;  %s6211_s12 = sshll.u32 %s6274_s29, 4  ;;  %s6212_s12 = int_to_ptr.vmem [resolvable:$false] %s6211_s12 }
  0x1e   : > { %5683 = vmatprep.subr.msk.bf16.mxu0 %vm6395_vm1, %v5681_v5  ;;  %5987 = vmatprep.subr.msk.bf16.mxu1 %vm6395_vm1, %v5681_v5  ;;  %v754_v14 = vld [vmem:[%s6391_s16 + $0x58] sm:$0xff]  ;;  %v5689_v15 = vpack.c.bf16 %v749_v12, %v747_v11  ;;  %v751_v17 = vld [vmem:[%s6391_s16 + $0x40] sm:$0xff]  ;;  %v753_v18 = vld [vmem:[%s6391_s16 + $0x50] sm:$0xff]  ;;  %p6209_p12 = pnand %p6208_p11, %p6373_p5  ;;  %s6213_s13 = scalar_lea.vmem %s6212_s12, 512 }
  0x1f   : > { %5685 = vmatpush1.bf16.xpose.msra.mxu0 %v5684_v9  ;;  %6003 = vmatpush1.bf16.xpose.msra.mxu1 %v5684_v9  ;;  %v5691_v16 = vpack.c.bf16 %v754_v14, %v752_v13  ;;  %v756_v19 = vld [vmem:[%s6391_s16 + $0x68] sm:$0xff]  ;;  %v758_v20 = vld [vmem:[%s6391_s16 + $0x78] sm:$0xff]  ;;  %v5694_v21 = vpack.c.bf16 %v753_v18, %v751_v17  ;;  %v755_v23 = vld [vmem:[%s6391_s16 + $0x60] sm:$0xff]  ;;  %p6214_p0 = scmp.lt.s32.totalorder %s9716_s15, %s6212_s12  ;;  %p6215_p1 = scmp.lt.s32.totalorder %s6213_s13, %s6207_s25 }
  0x20   : > { %5688 = vmatprep.subr.msk.bf16.mxu0 %vm6395_vm1, %v5686_v10  ;;  %5988 = vmatprep.subr.msk.bf16.mxu1 %vm6395_vm1, %v5686_v10  ;;  %v5696_v22 = vpack.c.bf16 %v758_v20, %v756_v19  ;;  %v757_v24 = vld [vmem:[%s6391_s16 + $0x70] sm:$0xff]  ;;  %v760_v25 = vld [vmem:[%s6391_s16 + $0x88] sm:$0xff]  ;;  %v762_v26 = vld [vmem:[%s6391_s16 + $0x98] sm:$0xff]  ;;  %p6210_p13 = pneg %p6209_p12 }
  0x21   : > { %v5699_v27 = vpack.c.bf16 %v757_v24, %v755_v23  ;;  %v5701_v28 = vpack.c.bf16 %v762_v26, %v760_v25  ;;  %v759_v29 = vld [vmem:[%s6391_s16 + $0x80] sm:$0xff]  ;;  %v761_v30 = vld [vmem:[%s6391_s16 + $0x90] sm:$0xff]  ;;  %v764_v31 = vld [vmem:[%s6391_s16 + $0xa8] sm:$0xff]  ;;  %p6216_p2 = por %p6215_p1, %p6214_p0 }
  0x22   : > { %v766_v32 = vld [vmem:[%s6391_s16 + $0xb8] sm:$0xff]  ;;  %v5704_v33 = vpack.c.bf16 %v761_v30, %v759_v29  ;;  %v763_v35 = vld [vmem:[%s6391_s16 + $0xa0] sm:$0xff]  ;;  %v765_v36 = vld [vmem:[%s6391_s16 + $0xb0] sm:$0xff] }
  0x23   : > { %v5706_v34 = vpack.c.bf16 %v766_v32, %v764_v31  ;;  %v768_v37 = vld [vmem:[%s6391_s16 + $0xc8] sm:$0xff]  ;;  %v770_v38 = vld [vmem:[%s6391_s16 + $0xd8] sm:$0xff]  ;;  %v5709_v39 = vpack.c.bf16 %v765_v36, %v763_v35  ;;  %v767_v41 = vld [vmem:[%s6391_s16 + $0xc0] sm:$0xff]  ;;  %p6217_p3 = pnand %p6216_p2, %p6210_p13 }
  0x24   : > { %v5711_v40 = vpack.c.bf16 %v770_v38, %v768_v37  ;;  %v769_v42 = vld [vmem:[%s6391_s16 + $0xd0] sm:$0xff]  ;;  %v772_v43 = vld [vmem:[%s6391_s16 + $0xe8] sm:$0xff]  ;;  %v774_v44 = vld [vmem:[%s6391_s16 + $0xf8] sm:$0xff] }
  0x25   : > { %v5714_v45 = vpack.c.bf16 %v769_v42, %v767_v41  ;;  %v5716_v46 = vpack.c.bf16 %v774_v44, %v772_v43  ;;  %v771_v47 = vld [vmem:[%s6391_s16 + $0xe0] sm:$0xff]  ;;  %v773_v48 = vld [vmem:[%s6391_s16 + $0xf0] sm:$0xff]  ;;  %v776_v49 = vld [vmem:[%s6391_s16 + $0x108] sm:$0xff] }
  0x26   : > { %v778_v50 = vld [vmem:[%s6391_s16 + $0x118] sm:$0xff]  ;;  %v5719_v51 = vpack.c.bf16 %v773_v48, %v771_v47  ;;  %v775_v53 = vld [vmem:[%s6391_s16 + $0x100] sm:$0xff]  ;;  %v777_v54 = vld [vmem:[%s6391_s16 + $0x110] sm:$0xff] }
  0x27   : > { %5690 = vmatpush1.bf16.xpose.msra.mxu0 %v5689_v15  ;;  %6004 = vmatpush1.bf16.xpose.msra.mxu1 %v5689_v15  ;;  %v5721_v52 = vpack.c.bf16 %v778_v50, %v776_v49  ;;  %v780_v55 = vld [vmem:[%s6391_s16 + $0x128] sm:$0xff]  ;;  %v782_v56 = vld [vmem:[%s6391_s16 + $0x138] sm:$0xff]  ;;  %v5724_v57 = vpack.c.bf16 %v777_v54, %v775_v53  ;;  %v779_v59 = vld [vmem:[%s6391_s16 + $0x120] sm:$0xff] }
  0x28   : > { %5693 = vmatprep.subr.msk.bf16.mxu0 %vm6395_vm1, %v5691_v16  ;;  %5989 = vmatprep.subr.msk.bf16.mxu1 %vm6395_vm1, %v5691_v16  ;;  %v5726_v58 = vpack.c.bf16 %v782_v56, %v780_v55  ;;  %v781_v60 = vld [vmem:[%s6391_s16 + $0x130] sm:$0xff]  ;;  %v784_v61 = vld [vmem:[%s6391_s16 + $0x148] sm:$0xff]  ;;  %v786_v62 = vld [vmem:[%s6391_s16 + $0x158] sm:$0xff] }
  0x29   : > { %v5729_v63 = vpack.c.bf16 %v781_v60, %v779_v59  ;;  %v5731_v0 = vpack.c.bf16 %v786_v62, %v784_v61  ;;  %v783_v2 = vld [vmem:[%s6391_s16 + $0x140] sm:$0xff]  ;;  %v785_v3 = vld [vmem:[%s6391_s16 + $0x150] sm:$0xff]  ;;  %v788_v4 = vld [vmem:[%s6391_s16 + $0x168] sm:$0xff] }
  0x2a   : > { %v790_v5 = vld [vmem:[%s6391_s16 + $0x178] sm:$0xff]  ;;  %v5734_v6 = vpack.c.bf16 %v785_v3, %v783_v2  ;;  %v787_v8 = vld [vmem:[%s6391_s16 + $0x160] sm:$0xff]  ;;  %v789_v9 = vld [vmem:[%s6391_s16 + $0x170] sm:$0xff] }
  0x2b   : > { %v5736_v7 = vpack.c.bf16 %v790_v5, %v788_v4  ;;  %v792_v10 = vld [vmem:[%s6391_s16 + $0x188] sm:$0xff]  ;;  %v794_v11 = vld [vmem:[%s6391_s16 + $0x198] sm:$0xff]  ;;  %v5739_v12 = vpack.c.bf16 %v789_v9, %v787_v8  ;;  %v791_v14 = vld [vmem:[%s6391_s16 + $0x180] sm:$0xff]  ;;  %v6271_v8 = vmov 0  }
  0x2c   : > { %v5741_v13 = vpack.c.bf16 %v794_v11, %v792_v10  ;;  %v793_v15 = vld [vmem:[%s6391_s16 + $0x190] sm:$0xff]  ;;  %v796_v16 = vld [vmem:[%s6391_s16 + $0x1a8] sm:$0xff]  ;;  %v798_v17 = vld [vmem:[%s6391_s16 + $0x1b8] sm:$0xff]  ;;  %6190 = vset.pattern.permute.xlu1 %v6271_v8  ;;  %6189 = vset.pattern.permute.xlu0 %v6271_v8 }
  0x2d   : > { %v5744_v18 = vpack.c.bf16 %v793_v15, %v791_v14  ;;  %v5746_v19 = vpack.c.bf16 %v798_v17, %v796_v16  ;;  %v795_v20 = vld [vmem:[%s6391_s16 + $0x1a0] sm:$0xff]  ;;  %v802_v23 = vld [vmem:[%s6391_s16 + $0x1d8] sm:$0xff]  ;;  %v393_v37 = vld [vmem:[%s9760_s1 + $0x10] sm:$0xff] }
  0x2e   : > { %v799_v26 = vld [vmem:[%s6391_s16 + $0x1c0] sm:$0xff]  ;;  %v806_v29 = vld [vmem:[%s6391_s16 + $0x1f8] sm:$0xff]  ;;  %v400_v41 = vld [vmem:[%s9760_s1 + $0x48] sm:$0xff] }
  0x2f   : > { %5695 = vmatpush1.bf16.xpose.msra.mxu0 %v5694_v21  ;;  %6005 = vmatpush1.bf16.xpose.msra.mxu1 %v5694_v21  ;;  %v797_v21 = vld [vmem:[%s6391_s16 + $0x1b0] sm:$0xff]  ;;  %v803_v32 = vld [vmem:[%s6391_s16 + $0x1e0] sm:$0xff]  ;;  %v394_v36 = vld [vmem:[%s9760_s1 + $0x18] sm:$0xff] }
  0x30   : > { %5698 = vmatprep.subr.msk.bf16.mxu0 %vm6395_vm1, %v5696_v22  ;;  %5990 = vmatprep.subr.msk.bf16.mxu1 %vm6395_vm1, %v5696_v22  ;;  %v800_v22 = vld [vmem:[%s6391_s16 + $0x1c8] sm:$0xff]  ;;  %v5749_v24 = vpack.c.bf16 %v797_v21, %v795_v20  ;;  %v391_v35 = vld [vmem:[%s9760_s1] sm:$0xff]  ;;  %v402_v43 = vld [vmem:[%s9760_s1 + $0x58] sm:$0xff] }
  0x31   : > { %v5751_v25 = vpack.c.bf16 %v802_v23, %v800_v22  ;;  %v395_v38 = vld [vmem:[%s9760_s1 + $0x20] sm:$0xff]  ;;  %v401_v44 = vld [vmem:[%s9760_s1 + $0x50] sm:$0xff]  ;;  %v406_v47 = vld [vmem:[%s9760_s1 + $0x78] sm:$0xff] }
  0x32   : > { %v399_v42 = vld [vmem:[%s9760_s1 + $0x40] sm:$0xff]  ;;  %v405_v48 = vld [vmem:[%s9760_s1 + $0x70] sm:$0xff]  ;;  %v408_v49 = vld [vmem:[%s9760_s1 + $0x88] sm:$0xff] }
  0x33   : > { %v407_v50 = vld [vmem:[%s9760_s1 + $0x80] sm:$0xff]  ;;  %v412_v53 = vld [vmem:[%s9760_s1 + $0xa8] sm:$0xff]  ;;  %v414_v55 = vld [vmem:[%s9760_s1 + $0xb8] sm:$0xff] }
  0x34   : > { %v411_v54 = vld [vmem:[%s9760_s1 + $0xa0] sm:$0xff]  ;;  %v413_v56 = vld [vmem:[%s9760_s1 + $0xb0] sm:$0xff]  ;;  %v418_v59 = vld [vmem:[%s9760_s1 + $0xd8] sm:$0xff] }
  0x35   : > { %v417_v60 = vld [vmem:[%s9760_s1 + $0xd0] sm:$0xff]  ;;  %v420_v61 = vld [vmem:[%s9760_s1 + $0xe8] sm:$0xff]  ;;  %v419_v62 = vld [vmem:[%s9760_s1 + $0xe0] sm:$0xff] }
  0x36   : > { %v424_v2 = vld [vmem:[%s9760_s1 + $0x108] sm:$0xff]  ;;  %v423_v3 = vld [vmem:[%s9760_s1 + $0x100] sm:$0xff]  ;;  %v426_v4 = vld [vmem:[%s9760_s1 + $0x118] sm:$0xff] }
  0x37   : > { %5700 = vmatpush1.bf16.xpose.msra.mxu0 %v5699_v27  ;;  %6006 = vmatpush1.bf16.xpose.msra.mxu1 %v5699_v27  ;;  %v801_v27 = vld [vmem:[%s6391_s16 + $0x1d0] sm:$0xff]  ;;  %v428_v9 = vld [vmem:[%s9760_s1 + $0x128] sm:$0xff]  ;;  %v2732_v10 = vld [vmem:[%s9761_s2 + $0x18] sm:$0xff] }
  0x38   : > { %5703 = vmatprep.subr.msk.bf16.mxu0 %vm6395_vm1, %v5701_v28  ;;  %5991 = vmatprep.subr.msk.bf16.mxu1 %vm6395_vm1, %v5701_v28  ;;  %v804_v28 = vld [vmem:[%s6391_s16 + $0x1e8] sm:$0xff]  ;;  %v5754_v30 = vpack.c.bf16 %v801_v27, %v799_v26  ;;  %v2731_v5 = vld [vmem:[%s9761_s2 + $0x10] sm:$0xff]  ;;  %v2733_v15 = vld [vmem:[%s9761_s2 + $0x20] sm:$0xff] }
  0x39   : > { %v5756_v31 = vpack.c.bf16 %v806_v29, %v804_v28  ;;  %2829 = vperm.xlu1 %6190, %v2731_v5   ;;  %v2730_v11 = vld [vmem:[%s9761_s2 + $0x8] sm:$0xff]  ;;  %v429_v16 = vld [vmem:[%s9760_s1 + $0x130] sm:$0xff]  ;;  %v431_v20 = vld [vmem:[%s9760_s1 + $0x140] sm:$0xff] }
  0x3a   : > { %v2734_v14 = vld [vmem:[%s9761_s2 + $0x28] sm:$0xff]  ;;  %v434_v21 = vld [vmem:[%s9760_s1 + $0x158] sm:$0xff]  ;;  %v2737_v23 = vld [vmem:[%s9761_s2 + $0x40] sm:$0xff] }
  0x3b   : > { %v432_v17 = vld [vmem:[%s9760_s1 + $0x148] sm:$0xff]  ;;  %v674_v26 = vld [vmem:[%s9760_s1 + $0x8d8] sm:$0xff]  ;;  %v673_v27 = vld [vmem:[%s9760_s1 + $0x8d0] sm:$0xff] }
  0x3c   : > { %v2738_v22 = vld [vmem:[%s9761_s2 + $0x48] sm:$0xff]  ;;  %5600 = vmatprep.mubr.msk.f32.mxu1 %vm807_vm0, %v674_v26  ;;  %v2740_v28 = vld [vmem:[%s9761_s2 + $0x58] sm:$0xff]  ;;  %v2739_v29 = vld [vmem:[%s9761_s2 + $0x50] sm:$0xff] }
  0x3d   : > { %2834 = vperm.xlu1 %6190, %v2732_v10   ;;  %v687_v5 = vld [vmem:[%s9760_s1 + $0x940] sm:$0xff]  ;;  %v449_v8 = vld [vmem:[%s9760_s1 + $0x1d0] sm:$0xff]  ;;  %v690_v10 = vld [vmem:[%s9760_s1 + $0x958] sm:$0xff] }
  0x3e   : > { %v455_v26 = vld [vmem:[%s9760_s1 + $0x200] sm:$0xff] }
  0x3f   : > { %5705 = vmatpush1.bf16.xpose.msra.mxu0 %v5704_v33  ;;  %6007 = vmatpush1.bf16.xpose.msra.mxu1 %v5704_v33  ;;  %v805_v33 = vld [vmem:[%s6391_s16 + $0x1f0] sm:$0xff] }
  0x40   : > { %5708 = vmatprep.subr.msk.bf16.mxu0 %vm6395_vm1, %v5706_v34  ;;  %5992 = vmatprep.subr.msk.bf16.mxu1 %vm6395_vm1, %v5706_v34  ;;  %v5759_v34 = vpack.c.bf16 %v805_v33, %v803_v32  ;;  %v676_v32 = vld [vmem:[%s9760_s1 + $0x8e8] sm:$0xff]  ;;  %v675_v33 = vld [vmem:[%s9760_s1 + $0x8e0] sm:$0xff] }
  0x41   : > { %2844 = vperm.xlu1 %6190, %v2734_v14   ;;  %v451_v14 = vld [vmem:[%s9760_s1 + $0x1e0] sm:$0xff] }
  0x47   : > { %5710 = vmatpush1.bf16.xpose.msra.mxu0 %v5709_v39  ;;  %6008 = vmatpush1.bf16.xpose.msra.mxu1 %v5709_v39  ;;  %v398_v39 = vld [vmem:[%s9760_s1 + $0x38] sm:$0xff] }
  0x48   : > { %5713 = vmatprep.subr.msk.bf16.mxu0 %vm6395_vm1, %v5711_v40  ;;  %5993 = vmatprep.subr.msk.bf16.mxu1 %vm6395_vm1, %v5711_v40  ;;  %v397_v40 = vld [vmem:[%s9760_s1 + $0x30] sm:$0xff] }
  0x4f   : > { %5715 = vmatpush1.bf16.xpose.msra.mxu0 %v5714_v45  ;;  %6009 = vmatpush1.bf16.xpose.msra.mxu1 %v5714_v45  ;;  %v404_v45 = vld [vmem:[%s9760_s1 + $0x68] sm:$0xff] }
  0x50   : > { %5718 = vmatprep.subr.msk.bf16.mxu0 %vm6395_vm1, %v5716_v46  ;;  %5994 = vmatprep.subr.msk.bf16.mxu1 %vm6395_vm1, %v5716_v46  ;;  %v403_v46 = vld [vmem:[%s9760_s1 + $0x60] sm:$0xff] }
  0x57   : > { %5720 = vmatpush1.bf16.xpose.msra.mxu0 %v5719_v51  ;;  %6010 = vmatpush1.bf16.xpose.msra.mxu1 %v5719_v51  ;;  %v410_v51 = vld [vmem:[%s9760_s1 + $0x98] sm:$0xff] }
  0x58   : > { %5723 = vmatprep.subr.msk.bf16.mxu0 %vm6395_vm1, %v5721_v52  ;;  %5995 = vmatprep.subr.msk.bf16.mxu1 %vm6395_vm1, %v5721_v52  ;;  %v409_v52 = vld [vmem:[%s9760_s1 + $0x90] sm:$0xff] }
  0x5f   : > { %5725 = vmatpush1.bf16.xpose.msra.mxu0 %v5724_v57  ;;  %6011 = vmatpush1.bf16.xpose.msra.mxu1 %v5724_v57  ;;  %v416_v57 = vld [vmem:[%s9760_s1 + $0xc8] sm:$0xff] }
  0x60   : > { %5728 = vmatprep.subr.msk.bf16.mxu0 %vm6395_vm1, %v5726_v58  ;;  %5996 = vmatprep.subr.msk.bf16.mxu1 %vm6395_vm1, %v5726_v58  ;;  %v415_v58 = vld [vmem:[%s9760_s1 + $0xc0] sm:$0xff] }
  0x67   : > { %5730 = vmatpush1.bf16.xpose.msra.mxu0 %v5729_v63  ;;  %6012 = vmatpush1.bf16.xpose.msra.mxu1 %v5729_v63  ;;  %v422_v63 = vld [vmem:[%s9760_s1 + $0xf8] sm:$0xff] }
  0x68   : > { %5733 = vmatprep.subr.msk.bf16.mxu0 %vm6395_vm1, %v5731_v0  ;;  %5997 = vmatprep.subr.msk.bf16.mxu1 %vm6395_vm1, %v5731_v0  ;;  %v421_v0 = vld [vmem:[%s9760_s1 + $0xf0] sm:$0xff] }
  0x6f   : > { %5735 = vmatpush1.bf16.xpose.msra.mxu0 %v5734_v6  ;;  %6013 = vmatpush1.bf16.xpose.msra.mxu1 %v5734_v6  ;;  %v2729_v6 = vld [vmem:[%s9761_s2] sm:$0xff] }
  0x70   : > { %5738 = vmatprep.subr.msk.bf16.mxu0 %vm6395_vm1, %v5736_v7  ;;  %5998 = vmatprep.subr.msk.bf16.mxu1 %vm6395_vm1, %v5736_v7  ;;  %v425_v7 = vld [vmem:[%s9760_s1 + $0x110] sm:$0xff] }
  0x71   : > { %2819 = vperm.xlu0 %6189, %v2729_v6   ;;  %v2754_v6 = vld [vmem:[%s9761_s2 + $0xc8] sm:$0xff] }
  0x75   : > { %2824 = vperm.xlu0 %6189, %v2730_v11   ;;  %v689_v11 = vld [vmem:[%s9760_s1 + $0x950] sm:$0xff] }
  0x77   : > { %5740 = vmatpush1.bf16.xpose.msra.mxu0 %v5739_v12  ;;  %6014 = vmatpush1.bf16.xpose.msra.mxu1 %v5739_v12  ;;  %v427_v12 = vld [vmem:[%s9760_s1 + $0x120] sm:$0xff] }
  0x78   : > { %5743 = vmatprep.subr.msk.bf16.mxu0 %vm6395_vm1, %v5741_v13  ;;  %5999 = vmatprep.subr.msk.bf16.mxu1 %vm6395_vm1, %v5741_v13  ;;  %v430_v13 = vld [vmem:[%s9760_s1 + $0x138] sm:$0xff] }
  0x79   : > { %2839 = vperm.xlu0 %6189, %v2733_v15   ;;  %v454_v15 = vld [vmem:[%s9760_s1 + $0x1f8] sm:$0xff] }
  0x7f   : > { %5745 = vmatpush1.bf16.xpose.msra.mxu0 %v5744_v18  ;;  %6015 = vmatpush1.bf16.xpose.msra.mxu1 %v5744_v18  ;;  %v2736_v18 = vld [vmem:[%s9761_s2 + $0x38] sm:$0xff] }
  0x80   : > { %5748 = vmatprep.subr.msk.bf16.mxu0 %vm6395_vm1, %v5746_v19  ;;  %6000 = vmatprep.subr.msk.bf16.mxu1 %vm6395_vm1, %v5746_v19  ;;  %v2735_v19 = vld [vmem:[%s9761_s2 + $0x30] sm:$0xff] }
  0x81   : > { %2854 = vperm.xlu1 %6190, %v2736_v18   ;;  %2849 = vperm.xlu0 %6189, %v2735_v19   ;;  %v2758_v18 = vld [vmem:[%s9761_s2 + $0xe8] sm:$0xff]  ;;  %v2757_v19 = vld [vmem:[%s9761_s2 + $0xe0] sm:$0xff] }
  0x85   : > { %2864 = vperm.xlu1 %6190, %v2738_v22   ;;  %2859 = vperm.xlu0 %6189, %v2737_v23   ;;  %v694_v22 = vld [vmem:[%s9760_s1 + $0x978] sm:$0xff]  ;;  %v693_v23 = vld [vmem:[%s9760_s1 + $0x970] sm:$0xff] }
  0x87   : > { %5750 = vmatpush1.bf16.xpose.msra.mxu0 %v5749_v24  ;;  %6016 = vmatpush1.bf16.xpose.msra.mxu1 %v5749_v24  ;;  %v433_v24 = vld [vmem:[%s9760_s1 + $0x150] sm:$0xff] }
  0x88   : > { %5753 = vmatprep.subr.msk.bf16.mxu0 %vm6395_vm1, %v5751_v25  ;;  %6001 = vmatprep.subr.msk.bf16.mxu1 %vm6395_vm1, %v5751_v25  ;;  %v436_v25 = vld [vmem:[%s9760_s1 + $0x168] sm:$0xff] }
  0x89   : > { %2874 = vperm.xlu1 %6190, %v2740_v28   ;;  %2869 = vperm.xlu0 %6189, %v2739_v29   ;;  %v696_v28 = vld [vmem:[%s9760_s1 + $0x988] sm:$0xff]  ;;  %v695_v29 = vld [vmem:[%s9760_s1 + $0x980] sm:$0xff] }
  0x8f   : > { %5755 = vmatpush1.bf16.xpose.msra.mxu0 %v5754_v30  ;;  %6017 = vmatpush1.bf16.xpose.msra.mxu1 %v5754_v30  ;;  %v435_v30 = vld [vmem:[%s9760_s1 + $0x160] sm:$0xff] }
  0x90   : > { %5758 = vmatprep.subr.msk.bf16.mxu0 %vm6395_vm1, %v5756_v31  ;;  %6002 = vmatprep.subr.msk.bf16.mxu1 %vm6395_vm1, %v5756_v31  ;;  %v438_v31 = vld [vmem:[%s9760_s1 + $0x178] sm:$0xff] }
  0x97   : > { %5760 = vmatpush1.bf16.xpose.msra.mxu0 %v5759_v34  ;;  %6018 = vmatpush1.bf16.xpose.msra.mxu1 %v5759_v34  ;;  %v2742_v34 = vld [vmem:[%s9761_s2 + $0x68] sm:$0xff] }
  0x98   : > { %2884 = vperm.xlu1 %6190, %v2742_v34   ;;  %v698_v34 = vld [vmem:[%s9760_s1 + $0x998] sm:$0xff] }
  0x9e   : > { %1497 = vmatmul.mubr.f32.vlgmr.msra.gmra.mrb[0].mxu0 %v391_v35  ;;  %2343 = vmatmul.mubr.f32.vlgmr.msra.gmra.mrb[0].mxu1 %v673_v27  ;;  %v2741_v35 = vld [vmem:[%s9761_s2 + $0x60] sm:$0xff]  ;;  %v458_v27 = vld [vmem:[%s9760_s1 + $0x218] sm:$0xff] }
  0x9f   : > { %5460 = vmatprep.mubr.msk.f32.mxu0 %vm807_vm0, %v394_v36  ;;  %5601 = vmatprep.mubr.msk.f32.mxu1 %vm807_vm0, %v676_v32  ;;  %v437_v36 = vld [vmem:[%s9760_s1 + $0x170] sm:$0xff] }
  0xa0   : > { %2879 = vperm.xlu0 %6189, %v2741_v35   ;;  %v457_v32 = vld [vmem:[%s9760_s1 + $0x210] sm:$0xff] }
  0xa1   : > { %v697_v35 = vld [vmem:[%s9760_s1 + $0x990] sm:$0xff] }
  0xa2   : > { %1503 = vmatmul.mubr.f32.gmra.mrb[2].mxu0 %v393_v37  ;;  %2349 = vmatmul.mubr.f32.gmra.mrb[2].mxu1 %v675_v33  ;;  %v440_v37 = vld [vmem:[%s9760_s1 + $0x188] sm:$0xff] }
  0xa3   : > { %5461 = vmatprep.mubr.msk.f32.mxu0 %vm807_vm0, %v396_v1  ;;  %v678_v1 = vld [vmem:[%s9760_s1 + $0x8f8] sm:$0xff]  ;;  %v460_v33 = vld [vmem:[%s9760_s1 + $0x228] sm:$0xff] }
  0xa4   : > { %5602 = vmatprep.mubr.msk.f32.mxu1 %vm807_vm0, %v678_v1  ;;  %v459_v1 = vld [vmem:[%s9760_s1 + $0x220] sm:$0xff] }
  0xa6   : > { %1509 = vmatmul.mubr.f32.gmra.mrb[4].mxu0 %v395_v38  ;;  %v677_v38 = vld [vmem:[%s9760_s1 + $0x8f0] sm:$0xff] }
  0xa7   : > { %5462 = vmatprep.mubr.msk.f32.mxu0 %vm807_vm0, %v398_v39  ;;  %2355 = vmatmul.mubr.f32.gmra.mrb[4].mxu1 %v677_v38  ;;  %v2744_v39 = vld [vmem:[%s9761_s2 + $0x78] sm:$0xff] }
  0xa8   : > { %2894 = vperm.xlu1 %6190, %v2744_v39   ;;  %v462_v38 = vld [vmem:[%s9760_s1 + $0x238] sm:$0xff]  ;;  %v700_v39 = vld [vmem:[%s9760_s1 + $0x9a8] sm:$0xff] }
  0xaa   : > { %1515 = vmatmul.mubr.f32.gmra.mrb[6].mxu0 %v397_v40  ;;  %v2743_v40 = vld [vmem:[%s9761_s2 + $0x70] sm:$0xff] }
  0xab   : > { %5463 = vmatprep.mubr.msk.f32.mxu0 %vm807_vm0, %v400_v41  ;;  %v439_v41 = vld [vmem:[%s9760_s1 + $0x180] sm:$0xff]  ;;  %2889 = vperm.xlu0 %6189, %v2743_v40  }
  0xac   : > { %v699_v40 = vld [vmem:[%s9760_s1 + $0x9a0] sm:$0xff] }
  0xae   : > { %1521 = vmatmul.mubr.f32.gmra.mrb[8].mxu0 %v399_v42  ;;  %v442_v42 = vld [vmem:[%s9760_s1 + $0x198] sm:$0xff] }
  0xaf   : > { %5464 = vmatprep.mubr.msk.f32.mxu0 %vm807_vm0, %v402_v43  ;;  %v680_v43 = vld [vmem:[%s9760_s1 + $0x908] sm:$0xff] }
  0xb0   : > { %5603 = vmatprep.mubr.msk.f32.mxu1 %vm807_vm0, %v680_v43  ;;  %v461_v43 = vld [vmem:[%s9760_s1 + $0x230] sm:$0xff] }
  0xb2   : > { %1527 = vmatmul.mubr.f32.gmra.mrb[10].mxu0 %v401_v44  ;;  %v679_v44 = vld [vmem:[%s9760_s1 + $0x900] sm:$0xff] }
  0xb3   : > { %5465 = vmatprep.mubr.msk.f32.mxu0 %vm807_vm0, %v404_v45  ;;  %2361 = vmatmul.mubr.f32.gmra.mrb[6].mxu1 %v679_v44  ;;  %v2746_v45 = vld [vmem:[%s9761_s2 + $0x88] sm:$0xff] }
  0xb4   : > { %2904 = vperm.xlu1 %6190, %v2746_v45   ;;  %v464_v44 = vld [vmem:[%s9760_s1 + $0x248] sm:$0xff]  ;;  %v702_v45 = vld [vmem:[%s9760_s1 + $0x9b8] sm:$0xff] }
  0xb6   : > { %1533 = vmatmul.mubr.f32.gmra.mrb[12].mxu0 %v403_v46  ;;  %v2745_v46 = vld [vmem:[%s9761_s2 + $0x80] sm:$0xff] }
  0xb7   : > { %5466 = vmatprep.mubr.msk.f32.mxu0 %vm807_vm0, %v406_v47  ;;  %v441_v47 = vld [vmem:[%s9760_s1 + $0x190] sm:$0xff]  ;;  %2899 = vperm.xlu0 %6189, %v2745_v46  }
  0xb8   : > { %v701_v46 = vld [vmem:[%s9760_s1 + $0x9b0] sm:$0xff] }
  0xba   : > { %1539 = vmatmul.mubr.f32.gmra.mrb[14].mxu0 %v405_v48  ;;  %v444_v48 = vld [vmem:[%s9760_s1 + $0x1a8] sm:$0xff] }
  0xbb   : > { %5467 = vmatprep.mubr.msk.f32.mxu0 %vm807_vm0, %v408_v49  ;;  %v682_v49 = vld [vmem:[%s9760_s1 + $0x918] sm:$0xff] }
  0xbc   : > { %5604 = vmatprep.mubr.msk.f32.mxu1 %vm807_vm0, %v682_v49  ;;  %v463_v49 = vld [vmem:[%s9760_s1 + $0x240] sm:$0xff] }
  0xbe   : > { %1545 = vmatmul.mubr.f32.gmra.mrb[16].mxu0 %v407_v50  ;;  %v681_v50 = vld [vmem:[%s9760_s1 + $0x910] sm:$0xff] }
  0xbf   : > { %5468 = vmatprep.mubr.msk.f32.mxu0 %vm807_vm0, %v410_v51  ;;  %2367 = vmatmul.mubr.f32.gmra.mrb[8].mxu1 %v681_v50  ;;  %v2748_v51 = vld [vmem:[%s9761_s2 + $0x98] sm:$0xff] }
  0xc0   : > { %2914 = vperm.xlu1 %6190, %v2748_v51   ;;  %v466_v50 = vld [vmem:[%s9760_s1 + $0x258] sm:$0xff]  ;;  %v704_v51 = vld [vmem:[%s9760_s1 + $0x9c8] sm:$0xff] }
  0xc2   : > { %1551 = vmatmul.mubr.f32.gmra.mrb[18].mxu0 %v409_v52  ;;  %v2747_v52 = vld [vmem:[%s9761_s2 + $0x90] sm:$0xff] }
  0xc3   : > { %5469 = vmatprep.mubr.msk.f32.mxu0 %vm807_vm0, %v412_v53  ;;  %v443_v53 = vld [vmem:[%s9760_s1 + $0x1a0] sm:$0xff]  ;;  %2909 = vperm.xlu0 %6189, %v2747_v52  }
  0xc4   : > { %v703_v52 = vld [vmem:[%s9760_s1 + $0x9c0] sm:$0xff] }
  0xc6   : > { %1557 = vmatmul.mubr.f32.gmra.mrb[20].mxu0 %v411_v54  ;;  %v446_v54 = vld [vmem:[%s9760_s1 + $0x1b8] sm:$0xff] }
  0xc7   : > { %5470 = vmatprep.mubr.msk.f32.mxu0 %vm807_vm0, %v414_v55  ;;  %v684_v55 = vld [vmem:[%s9760_s1 + $0x928] sm:$0xff] }
  0xc8   : > { %5605 = vmatprep.mubr.msk.f32.mxu1 %vm807_vm0, %v684_v55  ;;  %v465_v55 = vld [vmem:[%s9760_s1 + $0x250] sm:$0xff] }
  0xca   : > { %1563 = vmatmul.mubr.f32.gmra.mrb[22].mxu0 %v413_v56  ;;  %v683_v56 = vld [vmem:[%s9760_s1 + $0x920] sm:$0xff] }
  0xcb   : > { %5471 = vmatprep.mubr.msk.f32.mxu0 %vm807_vm0, %v416_v57  ;;  %2373 = vmatmul.mubr.f32.gmra.mrb[10].mxu1 %v683_v56  ;;  %v2750_v57 = vld [vmem:[%s9761_s2 + $0xa8] sm:$0xff] }
  0xcc   : > { %2924 = vperm.xlu1 %6190, %v2750_v57   ;;  %v468_v56 = vld [vmem:[%s9760_s1 + $0x268] sm:$0xff]  ;;  %v706_v57 = vld [vmem:[%s9760_s1 + $0x9d8] sm:$0xff] }
  0xce   : > { %1569 = vmatmul.mubr.f32.gmra.mrb[24].mxu0 %v415_v58  ;;  %v2749_v58 = vld [vmem:[%s9761_s2 + $0xa0] sm:$0xff] }
  0xcf   : > { %5472 = vmatprep.mubr.msk.f32.mxu0 %vm807_vm0, %v418_v59  ;;  %v445_v59 = vld [vmem:[%s9760_s1 + $0x1b0] sm:$0xff]  ;;  %2919 = vperm.xlu0 %6189, %v2749_v58  }
  0xd0   : > { %v705_v58 = vld [vmem:[%s9760_s1 + $0x9d0] sm:$0xff] }
  0xd2   : > { %1575 = vmatmul.mubr.f32.gmra.mrb[26].mxu0 %v417_v60  ;;  %v448_v60 = vld [vmem:[%s9760_s1 + $0x1c8] sm:$0xff] }
  0xd3   : > { %5473 = vmatprep.mubr.msk.f32.mxu0 %vm807_vm0, %v420_v61  ;;  %v686_v61 = vld [vmem:[%s9760_s1 + $0x938] sm:$0xff] }
  0xd4   : > { %5606 = vmatprep.mubr.msk.f32.mxu1 %vm807_vm0, %v686_v61  ;;  %v467_v61 = vld [vmem:[%s9760_s1 + $0x260] sm:$0xff] }
  0xd6   : > { %1581 = vmatmul.mubr.f32.gmra.mrb[28].mxu0 %v419_v62  ;;  %v685_v62 = vld [vmem:[%s9760_s1 + $0x930] sm:$0xff] }
  0xd7   : > { %5474 = vmatprep.mubr.msk.f32.mxu0 %vm807_vm0, %v422_v63  ;;  %2379 = vmatmul.mubr.f32.gmra.mrb[12].mxu1 %v685_v62  ;;  %v2752_v63 = vld [vmem:[%s9761_s2 + $0xb8] sm:$0xff] }
  0xd8   : > { %2934 = vperm.xlu1 %6190, %v2752_v63   ;;  %v470_v62 = vld [vmem:[%s9760_s1 + $0x278] sm:$0xff]  ;;  %v708_v63 = vld [vmem:[%s9760_s1 + $0x9e8] sm:$0xff] }
  0xda   : > { %1587 = vmatmul.mubr.f32.gmra.mrb[30].mxu0 %v421_v0  ;;  %v2751_v0 = vld [vmem:[%s9761_s2 + $0xb0] sm:$0xff] }
  0xdb   : > { %5475 = vmatprep.mubr.msk.f32.mxu0 %vm807_vm0, %v424_v2  ;;  %v447_v2 = vld [vmem:[%s9760_s1 + $0x1c0] sm:$0xff]  ;;  %2929 = vperm.xlu0 %6189, %v2751_v0  }
  0xdc   : > { %2944 = vperm.xlu1 %6190, %v2754_v6   ;;  %v707_v0 = vld [vmem:[%s9760_s1 + $0x9e0] sm:$0xff]  ;;  %v710_v6 = vld [vmem:[%s9760_s1 + $0x9f8] sm:$0xff] }
  0xde   : > { %1593 = vmatmul.mubr.f32.gmra.mrb[32].mxu0 %v423_v3  ;;  %v450_v3 = vld [vmem:[%s9760_s1 + $0x1d8] sm:$0xff] }
  0xdf   : > { %5476 = vmatprep.mubr.msk.f32.mxu0 %vm807_vm0, %v426_v4  ;;  %v688_v4 = vld [vmem:[%s9760_s1 + $0x948] sm:$0xff] }
  0xe0   : > { %5607 = vmatprep.mubr.msk.f32.mxu1 %vm807_vm0, %v688_v4  ;;  %v469_v4 = vld [vmem:[%s9760_s1 + $0x270] sm:$0xff] }
  0xe1   : > { %2385 = vmatmul.mubr.f32.gmra.mrb[14].mxu1 %v687_v5  ;;  %v472_v5 = vld [vmem:[%s9760_s1 + $0x288] sm:$0xff] }
  0xe2   : > { %1599 = vmatmul.mubr.f32.gmra.mrb[34].mxu0 %v425_v7  ;;  %v2753_v7 = vld [vmem:[%s9761_s2 + $0xc0] sm:$0xff]  ;;  %5608 = vmatprep.mubr.msk.f32.mxu1 %vm807_vm0, %v690_v10 }
  0xe3   : > { %5477 = vmatprep.mubr.msk.f32.mxu0 %vm807_vm0, %v428_v9  ;;  %v452_v9 = vld [vmem:[%s9760_s1 + $0x1e8] sm:$0xff]  ;;  %2939 = vperm.xlu0 %6189, %v2753_v7   ;;  %v709_v7 = vld [vmem:[%s9760_s1 + $0x9f0] sm:$0xff]  ;;  %v471_v10 = vld [vmem:[%s9760_s1 + $0x280] sm:$0xff] }
  0xe5   : > { %2391 = vmatmul.mubr.f32.gmra.mrb[16].mxu1 %v689_v11  ;;  %v474_v11 = vld [vmem:[%s9760_s1 + $0x298] sm:$0xff] }
  0xe6   : > { %1605 = vmatmul.mubr.f32.gmra.mrb[36].mxu0 %v427_v12  ;;  %v2756_v12 = vld [vmem:[%s9761_s2 + $0xd8] sm:$0xff] }
  0xe7   : > { %5478 = vmatprep.mubr.msk.f32.mxu0 %vm807_vm0, %v430_v13  ;;  %v2755_v13 = vld [vmem:[%s9761_s2 + $0xd0] sm:$0xff]  ;;  %2954 = vperm.xlu1 %6190, %v2756_v12   ;;  %v712_v12 = vld [vmem:[%s9760_s1 + $0xa08] sm:$0xff] }
  0xe8   : > { %2949 = vperm.xlu0 %6189, %v2755_v13   ;;  %v711_v13 = vld [vmem:[%s9760_s1 + $0xa00] sm:$0xff] }
  0xea   : > { %1611 = vmatmul.mubr.f32.gmra.mrb[38].mxu0 %v429_v16  ;;  %v692_v16 = vld [vmem:[%s9760_s1 + $0x968] sm:$0xff] }
  0xeb   : > { %5479 = vmatprep.mubr.msk.f32.mxu0 %vm807_vm0, %v432_v17  ;;  %5609 = vmatprep.mubr.msk.f32.mxu1 %vm807_vm0, %v692_v16  ;;  %v691_v17 = vld [vmem:[%s9760_s1 + $0x960] sm:$0xff]  ;;  %v473_v16 = vld [vmem:[%s9760_s1 + $0x290] sm:$0xff] }
  0xec   : > { %2397 = vmatmul.mubr.f32.gmra.mrb[18].mxu1 %v691_v17  ;;  %2964 = vperm.xlu1 %6190, %v2758_v18   ;;  %v476_v17 = vld [vmem:[%s9760_s1 + $0x2a8] sm:$0xff]  ;;  %v714_v18 = vld [vmem:[%s9760_s1 + $0xa18] sm:$0xff] }
  0xed   : > { %2959 = vperm.xlu0 %6189, %v2757_v19   ;;  %5610 = vmatprep.mubr.msk.f32.mxu1 %vm807_vm0, %v694_v22  ;;  %v713_v19 = vld [vmem:[%s9760_s1 + $0xa10] sm:$0xff]  ;;  %v475_v22 = vld [vmem:[%s9760_s1 + $0x2a0] sm:$0xff] }
  0xee   : > { %1617 = vmatmul.mubr.f32.gmra.mrb[40].mxu0 %v431_v20  ;;  %v453_v20 = vld [vmem:[%s9760_s1 + $0x1f0] sm:$0xff] }
  0xef   : > { %5480 = vmatprep.mubr.msk.f32.mxu0 %vm807_vm0, %v434_v21  ;;  %v456_v21 = vld [vmem:[%s9760_s1 + $0x208] sm:$0xff] }
  0xf0   : > { %2403 = vmatmul.mubr.f32.gmra.mrb[20].mxu1 %v693_v23  ;;  %v478_v23 = vld [vmem:[%s9760_s1 + $0x2b8] sm:$0xff] }
  0xf1   : > { %5611 = vmatprep.mubr.msk.f32.mxu1 %vm807_vm0, %v696_v28  ;;  %v477_v28 = vld [vmem:[%s9760_s1 + $0x2b0] sm:$0xff] }
  0xf2   : > { %1623 = vmatmul.mubr.f32.gmra.mrb[42].mxu0 %v433_v24  ;;  %v2760_v24 = vld [vmem:[%s9761_s2 + $0xf8] sm:$0xff] }
  0xf3   : > { %5481 = vmatprep.mubr.msk.f32.mxu0 %vm807_vm0, %v436_v25  ;;  %v2759_v25 = vld [vmem:[%s9761_s2 + $0xf0] sm:$0xff]  ;;  %2974 = vperm.xlu1 %6190, %v2760_v24   ;;  %v716_v24 = vld [vmem:[%s9760_s1 + $0xa28] sm:$0xff] }
  0xf4   : > { %2969 = vperm.xlu0 %6189, %v2759_v25   ;;  %2409 = vmatmul.mubr.f32.gmra.mrb[22].mxu1 %v695_v29  ;;  %v715_v25 = vld [vmem:[%s9760_s1 + $0xa20] sm:$0xff]  ;;  %v480_v29 = vld [vmem:[%s9760_s1 + $0x2c8] sm:$0xff] }
  0xf5   : > { %5612 = vmatprep.mubr.msk.f32.mxu1 %vm807_vm0, %v698_v34  ;;  %v482_v34 = vld [vmem:[%s9760_s1 + $0x2d8] sm:$0xff] }
  0xf6   : > { %1629 = vmatmul.mubr.f32.gmra.mrb[44].mxu0 %v435_v30  ;;  %v2762_v30 = vld [vmem:[%s9761_s2 + $0x108] sm:$0xff] }
  0xf7   : > { %5482 = vmatprep.mubr.msk.f32.mxu0 %vm807_vm0, %v438_v31  ;;  %v2761_v31 = vld [vmem:[%s9761_s2 + $0x100] sm:$0xff]  ;;  %2984 = vperm.xlu1 %6190, %v2762_v30   ;;  %v718_v30 = vld [vmem:[%s9760_s1 + $0xa38] sm:$0xff] }
  0xf8   : > { %2979 = vperm.xlu0 %6189, %v2761_v31   ;;  %2415 = vmatmul.mubr.f32.gmra.mrb[24].mxu1 %v697_v35  ;;  %v717_v31 = vld [vmem:[%s9760_s1 + $0xa30] sm:$0xff]  ;;  %v720_v35 = vld [vmem:[%s9760_s1 + $0xa48] sm:$0xff] }
  0xf9   : > { %5613 = vmatprep.mubr.msk.f32.mxu1 %vm807_vm0, %v700_v39  ;;  %v722_v39 = vld [vmem:[%s9760_s1 + $0xa58] sm:$0xff] }
  0xfa   : > { %1635 = vmatmul.mubr.f32.gmra.mrb[46].mxu0 %v437_v36  ;;  %v2764_v36 = vld [vmem:[%s9761_s2 + $0x118] sm:$0xff] }
  0xfb   : > { %5483 = vmatprep.mubr.msk.f32.mxu0 %vm807_vm0, %v440_v37  ;;  %v2763_v37 = vld [vmem:[%s9761_s2 + $0x110] sm:$0xff]  ;;  %2994 = vperm.xlu1 %6190, %v2764_v36   ;;  %v719_v36 = vld [vmem:[%s9760_s1 + $0xa40] sm:$0xff] }
  0xfc   : > { %2989 = vperm.xlu0 %6189, %v2763_v37   ;;  %2421 = vmatmul.mubr.f32.gmra.mrb[26].mxu1 %v699_v40  ;;  %v2784_v37 = vld [vmem:[%s9761_s2 + $0x1b8] sm:$0xff]  ;;  %v721_v40 = vld [vmem:[%s9760_s1 + $0xa50] sm:$0xff] }
  0xfd   : > { %5614 = vmatprep.mubr.msk.f32.mxu1 %vm807_vm0, %v702_v45  ;;  %v723_v45 = vld [vmem:[%s9760_s1 + $0xa60] sm:$0xff] }
  0xfe   : > { %1641 = vmatmul.mubr.f32.gmra.mrb[48].mxu0 %v439_v41  ;;  %v2766_v41 = vld [vmem:[%s9761_s2 + $0x128] sm:$0xff] }
  0xff   : > { %5484 = vmatprep.mubr.msk.f32.mxu0 %vm807_vm0, %v442_v42  ;;  %v2765_v42 = vld [vmem:[%s9761_s2 + $0x120] sm:$0xff]  ;;  %3004 = vperm.xlu1 %6190, %v2766_v41  }
 0x100   : > { %2999 = vperm.xlu0 %6189, %v2765_v42   ;;  %2427 = vmatmul.mubr.f32.gmra.mrb[28].mxu1 %v701_v46  ;;  %v2785_v41 = vld [vmem:[%s9761_s2 + $0x1c0] sm:$0xff]  ;;  %v2786_v46 = vld [vmem:[%s9761_s2 + $0x1c8] sm:$0xff] }
 0x101   : > { %5615 = vmatprep.mubr.msk.f32.mxu1 %vm807_vm0, %v704_v51  ;;  %v483_v42 = vld [vmem:[%s9760_s1 + $0x2e0] sm:$0xff]  ;;  %v2787_v51 = vld [vmem:[%s9761_s2 + $0x1d0] sm:$0xff] }
 0x102   : > { %1647 = vmatmul.mubr.f32.gmra.mrb[50].mxu0 %v441_v47  ;;  %v2768_v47 = vld [vmem:[%s9761_s2 + $0x138] sm:$0xff] }
 0x103   : > { %5485 = vmatprep.mubr.msk.f32.mxu0 %vm807_vm0, %v444_v48  ;;  %v2767_v48 = vld [vmem:[%s9761_s2 + $0x130] sm:$0xff]  ;;  %3014 = vperm.xlu1 %6190, %v2768_v47  }
 0x104   : > { %3009 = vperm.xlu0 %6189, %v2767_v48   ;;  %2433 = vmatmul.mubr.f32.gmra.mrb[30].mxu1 %v703_v52  ;;  %v485_v47 = vld [vmem:[%s9760_s1 + $0x2f0] sm:$0xff]  ;;  %v488_v48 = vld [vmem:[%s9760_s1 + $0x308] sm:$0xff]  ;;  %v487_v52 = vld [vmem:[%s9760_s1 + $0x300] sm:$0xff] }
 0x105   : > { %5616 = vmatprep.mubr.msk.f32.mxu1 %vm807_vm0, %v706_v57  ;;  %v489_v57 = vld [vmem:[%s9760_s1 + $0x310] sm:$0xff] }
 0x106   : > { %1653 = vmatmul.mubr.f32.gmra.mrb[52].mxu0 %v443_v53  ;;  %v2770_v53 = vld [vmem:[%s9761_s2 + $0x148] sm:$0xff] }
 0x107   : > { %5486 = vmatprep.mubr.msk.f32.mxu0 %vm807_vm0, %v446_v54  ;;  %v2769_v54 = vld [vmem:[%s9761_s2 + $0x140] sm:$0xff]  ;;  %3024 = vperm.xlu1 %6190, %v2770_v53   ;;  %v490_v53 = vld [vmem:[%s9760_s1 + $0x318] sm:$0xff] }
 0x108   : > { %3019 = vperm.xlu0 %6189, %v2769_v54   ;;  %2439 = vmatmul.mubr.f32.gmra.mrb[32].mxu1 %v705_v58  ;;  %v728_v54 = vld [vmem:[%s9760_s1 + $0xa88] sm:$0xff] }
 0x109   : > { %5617 = vmatprep.mubr.msk.f32.mxu1 %vm807_vm0, %v708_v63  ;;  %v492_v58 = vld [vmem:[%s9760_s1 + $0x328] sm:$0xff]  ;;  %v494_v63 = vld [vmem:[%s9760_s1 + $0x338] sm:$0xff] }
 0x10a   : > { %1659 = vmatmul.mubr.f32.gmra.mrb[54].mxu0 %v445_v59  ;;  %v2772_v59 = vld [vmem:[%s9761_s2 + $0x158] sm:$0xff] }
 0x10b   : > { %5487 = vmatprep.mubr.msk.f32.mxu0 %vm807_vm0, %v448_v60  ;;  %v2771_v60 = vld [vmem:[%s9761_s2 + $0x150] sm:$0xff]  ;;  %3034 = vperm.xlu1 %6190, %v2772_v59   ;;  %v730_v59 = vld [vmem:[%s9760_s1 + $0xa98] sm:$0xff] }
 0x10c   : > { %3029 = vperm.xlu0 %6189, %v2771_v60   ;;  %2445 = vmatmul.mubr.f32.gmra.mrb[34].mxu1 %v707_v0  ;;  %v729_v60 = vld [vmem:[%s9760_s1 + $0xa90] sm:$0xff]  ;;  %v732_v0 = vld [vmem:[%s9760_s1 + $0xaa8] sm:$0xff] }
 0x10d   : > { %5618 = vmatprep.mubr.msk.f32.mxu1 %vm807_vm0, %v710_v6  ;;  %v734_v6 = vld [vmem:[%s9760_s1 + $0xab8] sm:$0xff] }
 0x10e   : > { %1665 = vmatmul.mubr.f32.gmra.mrb[56].mxu0 %v447_v2  ;;  %v2774_v2 = vld [vmem:[%s9761_s2 + $0x168] sm:$0xff] }
 0x10f   : > { %5488 = vmatprep.mubr.msk.f32.mxu0 %vm807_vm0, %v450_v3  ;;  %v2773_v3 = vld [vmem:[%s9761_s2 + $0x160] sm:$0xff]  ;;  %3044 = vperm.xlu1 %6190, %v2774_v2  }
 0x110   : > { %3039 = vperm.xlu0 %6189, %v2773_v3   ;;  %2451 = vmatmul.mubr.f32.gmra.mrb[36].mxu1 %v709_v7  ;;  %v731_v2 = vld [vmem:[%s9760_s1 + $0xaa0] sm:$0xff]  ;;  %v2790_v3 = vld [vmem:[%s9761_s2 + $0x1e8] sm:$0xff]  ;;  %v733_v7 = vld [vmem:[%s9760_s1 + $0xab0] sm:$0xff] }
 0x111   : > { %5619 = vmatprep.mubr.msk.f32.mxu1 %vm807_vm0, %v712_v12  ;;  %v735_v12 = vld [vmem:[%s9760_s1 + $0xac0] sm:$0xff] }
 0x112   : > { %1671 = vmatmul.mubr.f32.gmra.mrb[58].mxu0 %v449_v8  ;;  %v2776_v8 = vld [vmem:[%s9761_s2 + $0x178] sm:$0xff] }
 0x113   : > { %5489 = vmatprep.mubr.msk.f32.mxu0 %vm807_vm0, %v452_v9  ;;  %v2775_v9 = vld [vmem:[%s9761_s2 + $0x170] sm:$0xff]  ;;  %3054 = vperm.xlu1 %6190, %v2776_v8  }
 0x114   : > { %3049 = vperm.xlu0 %6189, %v2775_v9   ;;  %2457 = vmatmul.mubr.f32.gmra.mrb[38].mxu1 %v711_v13  ;;  %v2791_v8 = vld [vmem:[%s9761_s2 + $0x1f0] sm:$0xff]  ;;  %v495_v9 = vld [vmem:[%s9760_s1 + $0x340] sm:$0xff]  ;;  %v2792_v13 = vld [vmem:[%s9761_s2 + $0x1f8] sm:$0xff] }
 0x115   : > { %5620 = vmatprep.mubr.msk.f32.mxu1 %vm807_vm0, %v714_v18  ;;  %v737_v18 = vld [vmem:[%s9760_s1 + $0xad0] sm:$0xff] }
 0x116   : > { %1677 = vmatmul.mubr.f32.gmra.mrb[60].mxu0 %v451_v14  ;;  %v2778_v14 = vld [vmem:[%s9761_s2 + $0x188] sm:$0xff] }
 0x117   : > { %5490 = vmatprep.mubr.msk.f32.mxu0 %vm807_vm0, %v454_v15  ;;  %v2777_v15 = vld [vmem:[%s9761_s2 + $0x180] sm:$0xff]  ;;  %3064 = vperm.xlu1 %6190, %v2778_v14   ;;  %v497_v14 = vld [vmem:[%s9760_s1 + $0x350] sm:$0xff] }
 0x118   : > { %3059 = vperm.xlu0 %6189, %v2777_v15   ;;  %2463 = vmatmul.mubr.f32.gmra.mrb[40].mxu1 %v713_v19  ;;  %v500_v15 = vld [vmem:[%s9760_s1 + $0x368] sm:$0xff] }
 0x119   : > { %5621 = vmatprep.mubr.msk.f32.mxu1 %vm807_vm0, %v716_v24 }
 0x11a   : > { %1683 = vmatmul.mubr.f32.gmra.mrb[62].mxu0 %v453_v20  ;;  %v2780_v20 = vld [vmem:[%s9761_s2 + $0x198] sm:$0xff] }
 0x11b   : > { %5491 = vmatprep.mubr.msk.f32.mxu0 %vm807_vm0, %v456_v21  ;;  %v2779_v21 = vld [vmem:[%s9761_s2 + $0x190] sm:$0xff]  ;;  %3074 = vperm.xlu1 %6190, %v2780_v20   ;;  %v2793_v20 = vld [vmem:[%s9761_s2 + $0x200] sm:$0xff] }
 0x11c   : > { %3069 = vperm.xlu0 %6189, %v2779_v21   ;;  %2469 = vmatmul.mubr.f32.gmra.mrb[42].mxu1 %v715_v25  ;;  %v499_v21 = vld [vmem:[%s9760_s1 + $0x360] sm:$0xff] }
 0x11d   : > { %5622 = vmatprep.mubr.msk.f32.mxu1 %vm807_vm0, %v718_v30  ;;  %v739_v25 = vld [vmem:[%s9760_s1 + $0xae0] sm:$0xff]  ;;  %v742_v30 = vld [vmem:[%s9760_s1 + $0xaf8] sm:$0xff] }
 0x11e   : > { %1689 = vmatmul.mubr.f32.gmra.mrb[64].mxu0 %v455_v26  ;;  %v2782_v26 = vld [vmem:[%s9761_s2 + $0x1a8] sm:$0xff] }
 0x11f   : > { %5492 = vmatprep.mubr.msk.f32.mxu0 %vm807_vm0, %v458_v27  ;;  %v2781_v27 = vld [vmem:[%s9761_s2 + $0x1a0] sm:$0xff]  ;;  %3084 = vperm.xlu1 %6190, %v2782_v26  }
 0x120   : > { %3079 = vperm.xlu0 %6189, %v2781_v27   ;;  %2475 = vmatmul.mubr.f32.gmra.mrb[44].mxu1 %v717_v31  ;;  %v2794_v27 = vld [vmem:[%s9761_s2 + $0x208] sm:$0xff] }
 0x121   : > { %5623 = vmatprep.mubr.msk.f32.mxu1 %vm807_vm0, %v720_v35  ;;  %v503_v35 = vld [vmem:[%s9760_s1 + $0x380] sm:$0xff] }
 0x122   : > { %1695 = vmatmul.mubr.f32.gmra.mrb[66].mxu0 %v457_v32  ;;  %v2783_v32 = vld [vmem:[%s9761_s2 + $0x1b0] sm:$0xff] }
 0x123   : > { %5493 = vmatprep.mubr.msk.f32.mxu0 %vm807_vm0, %v460_v33  ;;  %v479_v33 = vld [vmem:[%s9760_s1 + $0x2c0] sm:$0xff]  ;;  %3094 = vperm.xlu1 %6190, %v2784_v37  }
 0x124   : > { %3089 = vperm.xlu0 %6189, %v2783_v32   ;;  %2481 = vmatmul.mubr.f32.gmra.mrb[46].mxu1 %v719_v36  ;;  %v741_v32 = vld [vmem:[%s9760_s1 + $0xaf0] sm:$0xff]  ;;  %v506_v36 = vld [vmem:[%s9760_s1 + $0x398] sm:$0xff] }
 0x125   : > { %5624 = vmatprep.mubr.msk.f32.mxu1 %vm807_vm0, %v722_v39  ;;  %v505_v39 = vld [vmem:[%s9760_s1 + $0x390] sm:$0xff] }
 0x126   : > { %1701 = vmatmul.mubr.f32.gmra.mrb[68].mxu0 %v459_v1  ;;  %v481_v1 = vld [vmem:[%s9760_s1 + $0x2d0] sm:$0xff] }
 0x127   : > { %5494 = vmatprep.mubr.msk.f32.mxu0 %vm807_vm0, %v462_v38  ;;  %v484_v38 = vld [vmem:[%s9760_s1 + $0x2e8] sm:$0xff]  ;;  %3104 = vperm.xlu1 %6190, %v2786_v46  }
 0x128   : > { %2487 = vmatmul.mubr.f32.gmra.mrb[48].mxu1 %v721_v40  ;;  %3099 = vperm.xlu0 %6189, %v2785_v41   ;;  %v508_v40 = vld [vmem:[%s9760_s1 + $0x3a8] sm:$0xff] }
 0x12a   : > { %1707 = vmatmul.mubr.f32.gmra.mrb[70].mxu0 %v461_v43  ;;  %v486_v43 = vld [vmem:[%s9760_s1 + $0x2f8] sm:$0xff] }
 0x12b   : > { %5495 = vmatprep.mubr.msk.f32.mxu0 %vm807_vm0, %v464_v44  ;;  %v724_v44 = vld [vmem:[%s9760_s1 + $0xa68] sm:$0xff] }
 0x12c   : > { %5625 = vmatprep.mubr.msk.f32.mxu1 %vm807_vm0, %v724_v44  ;;  %3109 = vperm.xlu0 %6189, %v2787_v51   ;;  %v507_v44 = vld [vmem:[%s9760_s1 + $0x3a0] sm:$0xff]  ;;  %v7425_v51 = vpop.permute.xlu0 %2819 }
 0x12d   : > { %2493 = vmatmul.mubr.f32.gmra.mrb[50].mxu1 %v723_v45  ;;  %v510_v45 = vld [vmem:[%s9760_s1 + $0x3b8] sm:$0xff]  ;;  %9845 = vst [vmem:[#allocation17_spill] sm:$0xff] %v7425_v51 }
 0x12e   : > { %1713 = vmatmul.mubr.f32.gmra.mrb[72].mxu0 %v463_v49  ;;  %v726_v49 = vld [vmem:[%s9760_s1 + $0xa78] sm:$0xff] }
 0x12f   : > { %5496 = vmatprep.mubr.msk.f32.mxu0 %vm807_vm0, %v466_v50  ;;  %5626 = vmatprep.mubr.msk.f32.mxu1 %vm807_vm0, %v726_v49  ;;  %v725_v50 = vld [vmem:[%s9760_s1 + $0xa70] sm:$0xff] }
 0x130   : > { %v509_v49 = vld [vmem:[%s9760_s1 + $0x3b0] sm:$0xff] }
 0x131   : > { %2499 = vmatmul.mubr.f32.gmra.mrb[52].mxu1 %v725_v50  ;;  %v512_v50 = vld [vmem:[%s9760_s1 + $0x3c8] sm:$0xff] }
 0x132   : > { %1719 = vmatmul.mubr.f32.gmra.mrb[74].mxu0 %v465_v55  ;;  %5627 = vmatprep.mubr.msk.f32.mxu1 %vm807_vm0, %v728_v54  ;;  %v727_v55 = vld [vmem:[%s9760_s1 + $0xa80] sm:$0xff]  ;;  %v2799_v54 = vld [vmem:[%s9761_s2 + $0x230] sm:$0xff] }
 0x133   : > { %5497 = vmatprep.mubr.msk.f32.mxu0 %vm807_vm0, %v468_v56  ;;  %v2788_v56 = vld [vmem:[%s9761_s2 + $0x1d8] sm:$0xff] }
 0x134   : > { %3114 = vperm.xlu1 %6190, %v2788_v56   ;;  %v514_v56 = vld [vmem:[%s9760_s1 + $0x3d8] sm:$0xff] }
 0x135   : > { %2505 = vmatmul.mubr.f32.gmra.mrb[54].mxu1 %v727_v55  ;;  %v511_v55 = vld [vmem:[%s9760_s1 + $0x3c0] sm:$0xff] }
 0x136   : > { %1725 = vmatmul.mubr.f32.gmra.mrb[76].mxu0 %v467_v61  ;;  %5628 = vmatprep.mubr.msk.f32.mxu1 %vm807_vm0, %v730_v59  ;;  %v2789_v61 = vld [vmem:[%s9761_s2 + $0x1e0] sm:$0xff] }
 0x137   : > { %5498 = vmatprep.mubr.msk.f32.mxu0 %vm807_vm0, %v470_v62  ;;  %v491_v62 = vld [vmem:[%s9760_s1 + $0x320] sm:$0xff]  ;;  %3119 = vperm.xlu0 %6189, %v2789_v61   ;;  %v2800_v61 = vld [vmem:[%s9761_s2 + $0x238] sm:$0xff] }
 0x138   : > { %3124 = vperm.xlu1 %6190, %v2790_v3  }
 0x139   : > { %2511 = vmatmul.mubr.f32.gmra.mrb[56].mxu1 %v729_v60  ;;  %v7447_v60 = vpop.permute.xlu0 %2824 }
 0x13a   : > { %1731 = vmatmul.mubr.f32.gmra.mrb[78].mxu0 %v469_v4  ;;  %5629 = vmatprep.mubr.msk.f32.mxu1 %vm807_vm0, %v732_v0  ;;  %v493_v4 = vld [vmem:[%s9760_s1 + $0x330] sm:$0xff]  ;;  %9851 = vst [vmem:[#allocation23_spill] sm:$0xff] %v7447_v60  ;;  %v594_v60 = vld [vmem:[%s9760_s1 + $0x658] sm:$0xff] }
 0x13b   : > { %5499 = vmatprep.mubr.msk.f32.mxu0 %vm807_vm0, %v472_v5  ;;  %v496_v5 = vld [vmem:[%s9760_s1 + $0x348] sm:$0xff]  ;;  %3129 = vperm.xlu0 %6189, %v2791_v8  }
 0x13c   : > { %3134 = vperm.xlu1 %6190, %v2792_v13  }
 0x13d   : > { %2517 = vmatmul.mubr.f32.gmra.mrb[58].mxu1 %v731_v2 }
 0x13e   : > { %1737 = vmatmul.mubr.f32.gmra.mrb[80].mxu0 %v471_v10  ;;  %5630 = vmatprep.mubr.msk.f32.mxu1 %vm807_vm0, %v734_v6  ;;  %v498_v10 = vld [vmem:[%s9760_s1 + $0x358] sm:$0xff] }
 0x13f   : > { %5500 = vmatprep.mubr.msk.f32.mxu0 %vm807_vm0, %v474_v11  ;;  %v736_v11 = vld [vmem:[%s9760_s1 + $0xac8] sm:$0xff]  ;;  %3139 = vperm.xlu0 %6189, %v2793_v20   ;;  %v518_v6 = vld [vmem:[%s9760_s1 + $0x3f8] sm:$0xff]  ;;  %v519_v20 = vld [vmem:[%s9760_s1 + $0x400] sm:$0xff] }
 0x140   : > { %3144 = vperm.xlu1 %6190, %v2794_v27   ;;  %v2804_v27 = vld [vmem:[%s9761_s2 + $0x258] sm:$0xff] }
 0x141   : > { %2523 = vmatmul.mubr.f32.gmra.mrb[60].mxu1 %v733_v7  ;;  %v7475_v7 = vpop.permute.xlu0 %2839 }
 0x142   : > { %1743 = vmatmul.mubr.f32.gmra.mrb[82].mxu0 %v473_v16  ;;  %5631 = vmatprep.mubr.msk.f32.mxu1 %vm807_vm0, %v736_v11  ;;  %v738_v16 = vld [vmem:[%s9760_s1 + $0xad8] sm:$0xff]  ;;  %9855 = vst [vmem:[#allocation27_spill] sm:$0xff] %v7475_v7  ;;  %v517_v11 = vld [vmem:[%s9760_s1 + $0x3f0] sm:$0xff] }
 0x143   : > { %5501 = vmatprep.mubr.msk.f32.mxu0 %vm807_vm0, %v476_v17 }
 0x145   : > { %2529 = vmatmul.mubr.f32.gmra.mrb[62].mxu1 %v735_v12  ;;  %v520_v12 = vld [vmem:[%s9760_s1 + $0x408] sm:$0xff] }
 0x146   : > { %1749 = vmatmul.mubr.f32.gmra.mrb[84].mxu0 %v475_v22  ;;  %5632 = vmatprep.mubr.msk.f32.mxu1 %vm807_vm0, %v738_v16  ;;  %v502_v22 = vld [vmem:[%s9760_s1 + $0x378] sm:$0xff]  ;;  %v7497_v16 = vpop.permute.xlu0 %2849 }
 0x147   : > { %5502 = vmatprep.mubr.msk.f32.mxu0 %vm807_vm0, %v478_v23  ;;  %v740_v23 = vld [vmem:[%s9760_s1 + $0xae8] sm:$0xff]  ;;  %9861 = vst [vmem:[#allocation33_spill] sm:$0xff] %v7497_v16  ;;  %v575_v16 = vld [vmem:[%s9760_s1 + $0x5c0] sm:$0xff] }
 0x149   : > { %2535 = vmatmul.mubr.f32.gmra.mrb[64].mxu1 %v737_v18  ;;  %v2803_v18 = vld [vmem:[%s9761_s2 + $0x250] sm:$0xff] }
 0x14a   : > { %1755 = vmatmul.mubr.f32.gmra.mrb[86].mxu0 %v477_v28  ;;  %5633 = vmatprep.mubr.msk.f32.mxu1 %vm807_vm0, %v740_v23  ;;  %v501_v28 = vld [vmem:[%s9760_s1 + $0x370] sm:$0xff] }
 0x14b   : > { %5503 = vmatprep.mubr.msk.f32.mxu0 %vm807_vm0, %v480_v29  ;;  %v504_v29 = vld [vmem:[%s9760_s1 + $0x388] sm:$0xff] }
 0x14d   : > { %2541 = vmatmul.mubr.f32.gmra.mrb[66].mxu1 %v739_v25 }
 0x14e   : > { %1761 = vmatmul.mubr.f32.gmra.mrb[88].mxu0 %v479_v33  ;;  %5634 = vmatprep.mubr.msk.f32.mxu1 %vm807_vm0, %v742_v30  ;;  %v7525_v30 = vpop.permute.xlu0 %2859 }
 0x14f   : > { %5504 = vmatprep.mubr.msk.f32.mxu0 %vm807_vm0, %v482_v34  ;;  %v2795_v34 = vld [vmem:[%s9761_s2 + $0x210] sm:$0xff]  ;;  %9865 = vst [vmem:[#allocation37_spill] sm:$0xff] %v7525_v30 }
 0x150   : > { %3149 = vperm.xlu0 %6189, %v2795_v34   ;;  %v4870_v30 = vld [vmem:[%s9765_s6 + $0x10] sm:$0xff] }
 0x151   : > { %2547 = vmatmul.mubr.f32.gmra.mrb[68].mxu1 %v741_v32 }
 0x152   : > { %1767 = vmatmul.mubr.f32.gmra.mrb[90].mxu0 %v481_v1 }
 0x153   : > { %5505 = vmatprep.mubr.msk.f32.mxu0 %vm807_vm0, %v484_v38  ;;  %v2796_v38 = vld [vmem:[%s9761_s2 + $0x218] sm:$0xff] }
 0x154   : > { %3154 = vperm.xlu1 %6190, %v2796_v38   ;;  %v526_v38 = vld [vmem:[%s9760_s1 + $0x438] sm:$0xff] }
 0x156   : > { %1773 = vmatmul.mubr.f32.gmra.mrb[92].mxu0 %v483_v42 }
 0x157   : > { %5506 = vmatprep.mubr.msk.f32.mxu0 %vm807_vm0, %v486_v43  ;;  %v2797_v43 = vld [vmem:[%s9761_s2 + $0x220] sm:$0xff] }
 0x158   : > { %3159 = vperm.xlu0 %6189, %v2797_v43  }
 0x15a   : > { %1779 = vmatmul.mubr.f32.gmra.mrb[94].mxu0 %v485_v47 }
 0x15b   : > { %5507 = vmatprep.mubr.msk.f32.mxu0 %vm807_vm0, %v488_v48  ;;  %v2798_v48 = vld [vmem:[%s9761_s2 + $0x228] sm:$0xff] }
 0x15c   : > { %3164 = vperm.xlu1 %6190, %v2798_v48   ;;  %3169 = vperm.xlu0 %6189, %v2799_v54   ;;  %v525_v48 = vld [vmem:[%s9760_s1 + $0x430] sm:$0xff] }
 0x15e   : > { %1785 = vmatmul.mubr.f32.gmra.mrb[96].mxu0 %v487_v52 }
 0x15f   : > { %5508 = vmatprep.mubr.msk.f32.mxu0 %vm807_vm0, %v490_v53 }
 0x160   : > { %3174 = vperm.xlu1 %6190, %v2800_v61   ;;  %v527_v61 = vld [vmem:[%s9760_s1 + $0x440] sm:$0xff] }
 0x162   : > { %1791 = vmatmul.mubr.f32.gmra.mrb[98].mxu0 %v489_v57  ;;  %v7441_v57 = vpop.permute.xlu1 %2829 }
 0x163   : > { %5509 = vmatprep.mubr.msk.f32.mxu0 %vm807_vm0, %v492_v58  ;;  %9848 = vst [vmem:[#allocation20_spill] sm:$0xff] %v7441_v57 }
 0x166   : > { %1797 = vmatmul.mubr.f32.gmra.mrb[100].mxu0 %v491_v62  ;;  %v513_v62 = vld [vmem:[%s9760_s1 + $0x3d0] sm:$0xff]  ;;  %v7463_v3 = vpop.permute.xlu1 %2834 }
 0x167   : > { %5510 = vmatprep.mubr.msk.f32.mxu0 %vm807_vm0, %v494_v63  ;;  %v516_v63 = vld [vmem:[%s9760_s1 + $0x3e8] sm:$0xff]  ;;  %9854 = vst [vmem:[#allocation26_spill] sm:$0xff] %v7463_v3 }
 0x168   : > { %v588_v3 = vld [vmem:[%s9760_s1 + $0x628] sm:$0xff] }
 0x16a   : > { %1803 = vmatmul.mubr.f32.gmra.mrb[102].mxu0 %v493_v4  ;;  %v2801_v4 = vld [vmem:[%s9761_s2 + $0x240] sm:$0xff]  ;;  %v7491_v13 = vpop.permute.xlu1 %2844 }
 0x16b   : > { %5511 = vmatprep.mubr.msk.f32.mxu0 %vm807_vm0, %v496_v5  ;;  %v515_v5 = vld [vmem:[%s9760_s1 + $0x3e0] sm:$0xff]  ;;  %3179 = vperm.xlu0 %6189, %v2801_v4   ;;  %9858 = vst [vmem:[#allocation30_spill] sm:$0xff] %v7491_v13 }
 0x16c   : > { %v579_v13 = vld [vmem:[%s9760_s1 + $0x5e0] sm:$0xff] }
 0x16e   : > { %1809 = vmatmul.mubr.f32.gmra.mrb[104].mxu0 %v495_v9  ;;  %v7513_v25 = vpop.permute.xlu1 %2854 }
 0x16f   : > { %5512 = vmatprep.mubr.msk.f32.mxu0 %vm807_vm0, %v498_v10  ;;  %v2802_v10 = vld [vmem:[%s9761_s2 + $0x248] sm:$0xff]  ;;  %3189 = vperm.xlu0 %6189, %v2803_v18   ;;  %9864 = vst [vmem:[#allocation36_spill] sm:$0xff] %v7513_v25 }
 0x170   : > { %3184 = vperm.xlu1 %6190, %v2802_v10   ;;  %v529_v10 = vld [vmem:[%s9760_s1 + $0x450] sm:$0xff] }
 0x171   : > { %v7323_v17 = vpop.f32.mrb[0].mxu0 }
 0x172   : > { %9833 = vst [vmem:[#allocation5_spill] sm:$0xff] %v7323_v17  ;;  %v7329_v19 = vpop.f32.mrb[1].mxu0  ;;  %1815 = vmatmul.mubr.f32.gmra.mrb[106].mxu0 %v497_v14 }
 0x173   : > { %9834 = vst [vmem:[#allocation6_spill] sm:$0xff] %v7329_v19  ;;  %5513 = vmatprep.mubr.msk.f32.mxu0 %vm807_vm0, %v500_v15  ;;  %v598_v19 = vld [vmem:[%s9760_s1 + $0x678] sm:$0xff] }
 0x174   : > { %3194 = vperm.xlu1 %6190, %v2804_v27   ;;  %v2809_v27 = vld [vmem:[%s9761_s2 + $0x280] sm:$0xff] }
 0x175   : > { %v7344_v24 = vpop.f32.mrb[2].mxu0 }
 0x176   : > { %9835 = vst [vmem:[#allocation7_spill] sm:$0xff] %v7344_v24  ;;  %v7350_v26 = vpop.f32.mrb[3].mxu0  ;;  %1821 = vmatmul.mubr.f32.gmra.mrb[108].mxu0 %v499_v21  ;;  %v522_v21 = vld [vmem:[%s9760_s1 + $0x418] sm:$0xff]  ;;  %v596_v24 = vld [vmem:[%s9760_s1 + $0x668] sm:$0xff] }
 0x177   : > { %9836 = vst [vmem:[#allocation8_spill] sm:$0xff] %v7350_v26  ;;  %5514 = vmatprep.mubr.msk.f32.mxu0 %vm807_vm0, %v502_v22 }
 0x179   : > { %v7365_v31 = vpop.f32.mrb[4].mxu0 }
 0x17a   : > { %9837 = vst [vmem:[#allocation9_spill] sm:$0xff] %v7365_v31  ;;  %v7371_v33 = vpop.f32.mrb[5].mxu0  ;;  %1827 = vmatmul.mubr.f32.gmra.mrb[110].mxu0 %v501_v28  ;;  %v521_v28 = vld [vmem:[%s9760_s1 + $0x410] sm:$0xff] }
 0x17b   : > { %9838 = vst [vmem:[#allocation10_spill] sm:$0xff] %v7371_v33  ;;  %5515 = vmatprep.mubr.msk.f32.mxu0 %vm807_vm0, %v504_v29  ;;  %v524_v29 = vld [vmem:[%s9760_s1 + $0x428] sm:$0xff] }
 0x17c   : > { %v592_v33 = vld [vmem:[%s9760_s1 + $0x648] sm:$0xff] }
 0x17d   : > { %v7383_v37 = vpop.f32.mrb[6].mxu0 }
 0x17e   : > { %9839 = vst [vmem:[#allocation11_spill] sm:$0xff] %v7383_v37  ;;  %v7385_v1 = vpop.f32.mrb[7].mxu0  ;;  %1833 = vmatmul.mubr.f32.gmra.mrb[112].mxu0 %v503_v35  ;;  %v2805_v35 = vld [vmem:[%s9761_s2 + $0x260] sm:$0xff]  ;;  %v590_v37 = vld [vmem:[%s9760_s1 + $0x638] sm:$0xff] }
 0x17f   : > { %9840 = vst [vmem:[#allocation12_spill] sm:$0xff] %v7385_v1  ;;  %5516 = vmatprep.mubr.msk.f32.mxu0 %vm807_vm0, %v506_v36  ;;  %v523_v36 = vld [vmem:[%s9760_s1 + $0x420] sm:$0xff]  ;;  %3199 = vperm.xlu0 %6189, %v2805_v35  }
 0x181   : > { %v7397_v41 = vpop.f32.mrb[8].mxu0 }
 0x182   : > { %9841 = vst [vmem:[#allocation13_spill] sm:$0xff] %v7397_v41  ;;  %v7399_v42 = vpop.f32.mrb[9].mxu0  ;;  %1839 = vmatmul.mubr.f32.gmra.mrb[114].mxu0 %v505_v39  ;;  %v7541_v39 = vpop.permute.xlu1 %2864 }
 0x183   : > { %9842 = vst [vmem:[#allocation14_spill] sm:$0xff] %v7399_v42  ;;  %5517 = vmatprep.mubr.msk.f32.mxu0 %vm807_vm0, %v508_v40  ;;  %9868 = vst [vmem:[#allocation40_spill] sm:$0xff] %v7541_v39  ;;  %v586_v42 = vld [vmem:[%s9760_s1 + $0x618] sm:$0xff] }
 0x185   : > { %v7411_v46 = vpop.f32.mrb[10].mxu0 }
 0x186   : > { %9843 = vst [vmem:[#allocation15_spill] sm:$0xff] %v7411_v46  ;;  %v7413_v47 = vpop.f32.mrb[11].mxu0  ;;  %1845 = vmatmul.mubr.f32.gmra.mrb[116].mxu0 %v507_v44  ;;  %v7547_v44 = vpop.permute.xlu0 %2869  ;;  %v584_v46 = vld [vmem:[%s9760_s1 + $0x608] sm:$0xff] }
 0x187   : > { %9844 = vst [vmem:[#allocation16_spill] sm:$0xff] %v7413_v47  ;;  %5518 = vmatprep.mubr.msk.f32.mxu0 %vm807_vm0, %v510_v45  ;;  %9871 = vst [vmem:[#allocation43_spill] sm:$0xff] %v7547_v44  ;;  %v2806_v45 = vld [vmem:[%s9761_s2 + $0x268] sm:$0xff]  ;;  %v563_v44 = vld [vmem:[%s9760_s1 + $0x560] sm:$0xff] }
 0x188   : > { %3204 = vperm.xlu1 %6190, %v2806_v45   ;;  %v2810_v45 = vld [vmem:[%s9761_s2 + $0x288] sm:$0xff] }
 0x189   : > { %v7427_v52 = vpop.f32.mrb[12].mxu0 }
 0x18a   : > { %9846 = vst [vmem:[#allocation18_spill] sm:$0xff] %v7427_v52  ;;  %v7429_v53 = vpop.f32.mrb[13].mxu0  ;;  %1851 = vmatmul.mubr.f32.gmra.mrb[118].mxu0 %v509_v49  ;;  %v528_v49 = vld [vmem:[%s9760_s1 + $0x448] sm:$0xff]  ;;  %v5033_v52 = vld [vmem:[%s9767_s8] sm:$0xff] }
 0x18b   : > { %9847 = vst [vmem:[#allocation19_spill] sm:$0xff] %v7429_v53  ;;  %5519 = vmatprep.mubr.msk.f32.mxu0 %vm807_vm0, %v512_v50 }
 0x18d   : > { %v7443_v58 = vpop.f32.mrb[14].mxu0 }
 0x18e   : > { %9849 = vst [vmem:[#allocation21_spill] sm:$0xff] %v7443_v58  ;;  %v7445_v59 = vpop.f32.mrb[15].mxu0  ;;  %1857 = vmatmul.mubr.f32.gmra.mrb[120].mxu0 %v511_v55  ;;  %v7563_v55 = vpop.permute.xlu1 %2874 }
 0x18f   : > { %9850 = vst [vmem:[#allocation22_spill] sm:$0xff] %v7445_v59  ;;  %5520 = vmatprep.mubr.msk.f32.mxu0 %vm807_vm0, %v514_v56  ;;  %9874 = vst [vmem:[#allocation46_spill] sm:$0xff] %v7563_v55  ;;  %v2807_v56 = vld [vmem:[%s9761_s2 + $0x270] sm:$0xff] }
 0x190   : > { %3209 = vperm.xlu0 %6189, %v2807_v56   ;;  %v4874_v59 = vld [vmem:[%s9765_s6 + $0x30] sm:$0x3] }
 0x191   : > { %v7459_v0 = vpop.f32.mrb[16].mxu0 }
 0x192   : > { %9852 = vst [vmem:[#allocation24_spill] sm:$0xff] %v7459_v0  ;;  %v7461_v2 = vpop.f32.mrb[17].mxu0  ;;  %1863 = vmatmul.mubr.f32.gmra.mrb[122].mxu0 %v513_v62  ;;  %v530_v62 = vld [vmem:[%s9760_s1 + $0x458] sm:$0xff]  ;;  %v571_v0 = vld [vmem:[%s9760_s1 + $0x5a0] sm:$0xff] }
 0x193   : > { %9853 = vst [vmem:[#allocation25_spill] sm:$0xff] %v7461_v2  ;;  %5521 = vmatprep.mubr.msk.f32.mxu0 %vm807_vm0, %v516_v63  ;;  %v7575_v63 = vpop.permute.xlu0 %2879 }
 0x194   : > { %9875 = vst [vmem:[#allocation47_spill] sm:$0xff] %v7575_v63  ;;  %3219 = vperm.xlu0 %6189, %v2809_v27   ;;  %v4707_v63 = vld [vmem:[%s9763_s4 + $0x30] sm:$0xff] }
 0x195   : > { %v7477_v8 = vpop.f32.mrb[18].mxu0 }
 0x196   : > { %9856 = vst [vmem:[#allocation28_spill] sm:$0xff] %v7477_v8  ;;  %v7479_v9 = vpop.f32.mrb[19].mxu0  ;;  %1869 = vmatmul.mubr.f32.gmra.mrb[124].mxu0 %v515_v5 }
 0x197   : > { %9857 = vst [vmem:[#allocation29_spill] sm:$0xff] %v7479_v9  ;;  %5522 = vmatprep.mubr.msk.f32.mxu0 %vm807_vm0, %v518_v6  ;;  %v2808_v6 = vld [vmem:[%s9761_s2 + $0x278] sm:$0xff]  ;;  %v567_v9 = vld [vmem:[%s9760_s1 + $0x580] sm:$0xff] }
 0x198   : > { %3214 = vperm.xlu1 %6190, %v2808_v6   ;;  %v2811_v6 = vld [vmem:[%s9761_s2 + $0x290] sm:$0xff] }
 0x199   : > { %v7493_v14 = vpop.f32.mrb[20].mxu0  ;;  %3229 = vperm.xlu0 %6189, %v2811_v6   ;;  %v540_v6 = vld [vmem:[%s9760_s1 + $0x4a8] sm:$0xff] }
 0x19a   : > { %9859 = vst [vmem:[#allocation31_spill] sm:$0xff] %v7493_v14  ;;  %v7495_v15 = vpop.f32.mrb[21].mxu0  ;;  %1875 = vmatmul.mubr.f32.gmra.mrb[126].mxu0 %v517_v11  ;;  %v532_v11 = vld [vmem:[%s9760_s1 + $0x468] sm:$0xff]  ;;  %v4715_v14 = vld [vmem:[%s9763_s4 + $0x70] sm:$0xff] }
 0x19b   : > { %9860 = vst [vmem:[#allocation32_spill] sm:$0xff] %v7495_v15  ;;  %5523 = vmatprep.mubr.msk.f32.mxu0 %vm807_vm0, %v520_v12  ;;  %v7591_v12 = vpop.permute.xlu1 %2884 }
 0x19c   : > { %9878 = vst [vmem:[#allocation50_spill] sm:$0xff] %v7591_v12  ;;  %3224 = vperm.xlu1 %6190, %v2810_v45   ;;  %v555_v12 = vld [vmem:[%s9760_s1 + $0x520] sm:$0xff] }
 0x19d   : > { %v7509_v22 = vpop.f32.mrb[22].mxu0 }
 0x19e   : > { %9862 = vst [vmem:[#allocation34_spill] sm:$0xff] %v7509_v22  ;;  %v7511_v23 = vpop.f32.mrb[23].mxu0  ;;  %1881 = vmatmul.mubr.f32.gmra.mrb[128].mxu0 %v519_v20 }
 0x19f   : > { %9863 = vst [vmem:[#allocation35_spill] sm:$0xff] %v7511_v23  ;;  %5524 = vmatprep.mubr.msk.f32.mxu0 %vm807_vm0, %v522_v21  ;;  %v7597_v21 = vpop.permute.xlu0 %2889  ;;  %v4711_v23 = vld [vmem:[%s9763_s4 + $0x50] sm:$0xff] }
 0x1a0   : > { %9881 = vst [vmem:[#allocation53_spill] sm:$0xff] %v7597_v21 }
 0x1a1   : > { %v7527_v32 = vpop.f32.mrb[24].mxu0 }
 0x1a2   : > { %9866 = vst [vmem:[#allocation38_spill] sm:$0xff] %v7527_v32  ;;  %v7529_v34 = vpop.f32.mrb[25].mxu0  ;;  %1887 = vmatmul.mubr.f32.gmra.mrb[130].mxu0 %v521_v28  ;;  %v531_v28 = vld [vmem:[%s9760_s1 + $0x460] sm:$0xff] }
 0x1a3   : > { %9867 = vst [vmem:[#allocation39_spill] sm:$0xff] %v7529_v34  ;;  %5525 = vmatprep.mubr.msk.f32.mxu0 %vm807_vm0, %v524_v29  ;;  %v534_v29 = vld [vmem:[%s9760_s1 + $0x478] sm:$0xff]  ;;  %v7625_v56 = vpop.permute.xlu0 %2899  ;;  %v559_v32 = vld [vmem:[%s9760_s1 + $0x540] sm:$0xff] }
 0x1a4   : > { %9885 = vst [vmem:[#allocation57_spill] sm:$0xff] %v7625_v56 }
 0x1a5   : > { %v7543_v40 = vpop.f32.mrb[26].mxu0 }
 0x1a6   : > { %9869 = vst [vmem:[#allocation41_spill] sm:$0xff] %v7543_v40  ;;  %v7545_v43 = vpop.f32.mrb[27].mxu0  ;;  %1893 = vmatmul.mubr.f32.gmra.mrb[132].mxu0 %v523_v36 }
 0x1a7   : > { %9870 = vst [vmem:[#allocation42_spill] sm:$0xff] %v7545_v43  ;;  %5526 = vmatprep.mubr.msk.f32.mxu0 %vm807_vm0, %v526_v38  ;;  %v7613_v38 = vpop.permute.xlu1 %2894  ;;  %v7647_v45 = vpop.permute.xlu0 %2909 }
 0x1a8   : > { %9884 = vst [vmem:[#allocation56_spill] sm:$0xff] %v7613_v38  ;;  %9891 = vst [vmem:[#allocation63_spill] sm:$0xff] %v7647_v45  ;;  %v552_v38 = vld [vmem:[%s9760_s1 + $0x508] sm:$0xff] }
 0x1a9   : > { %v7559_v50 = vpop.f32.mrb[28].mxu0 }
 0x1aa   : > { %9872 = vst [vmem:[#allocation44_spill] sm:$0xff] %v7559_v50  ;;  %v7561_v54 = vpop.f32.mrb[29].mxu0  ;;  %1899 = vmatmul.mubr.f32.gmra.mrb[134].mxu0 %v525_v48  ;;  %v533_v48 = vld [vmem:[%s9760_s1 + $0x470] sm:$0xff] }
 0x1ab   : > { %9873 = vst [vmem:[#allocation45_spill] sm:$0xff] %v7561_v54  ;;  %5527 = vmatprep.mubr.msk.f32.mxu0 %vm807_vm0, %v528_v49  ;;  %v536_v49 = vld [vmem:[%s9760_s1 + $0x488] sm:$0xff]  ;;  %v7641_v27 = vpop.permute.xlu1 %2904  ;;  %v7675_v45 = vpop.permute.xlu0 %2919  ;;  %v4703_v54 = vld [vmem:[%s9763_s4 + $0x10] sm:$0xff] }
 0x1ac   : > { %9888 = vst [vmem:[#allocation60_spill] sm:$0xff] %v7641_v27  ;;  %9895 = vst [vmem:[#allocation67_spill] sm:$0xff] %v7675_v45  ;;  %v543_v27 = vld [vmem:[%s9760_s1 + $0x4c0] sm:$0xff] }
 0x1ad   : > { %v7577_v4 = vpop.f32.mrb[30].mxu0 }
 0x1ae   : > { %9876 = vst [vmem:[#allocation48_spill] sm:$0xff] %v7577_v4  ;;  %v7579_v5 = vpop.f32.mrb[31].mxu0  ;;  %1905 = vmatmul.mubr.f32.gmra.mrb[136].mxu0 %v527_v61  ;;  %v554_v4 = vld [vmem:[%s9760_s1 + $0x518] sm:$0xff] }
 0x1af   : > { %9877 = vst [vmem:[#allocation49_spill] sm:$0xff] %v7579_v5  ;;  %5528 = vmatprep.mubr.msk.f32.mxu0 %vm807_vm0, %v530_v62 }
 0x1b1   : > { %v7593_v18 = vpop.f32.mrb[32].mxu0 }
 0x1b2   : > { %9879 = vst [vmem:[#allocation51_spill] sm:$0xff] %v7593_v18  ;;  %v7595_v20 = vpop.f32.mrb[33].mxu0  ;;  %1911 = vmatmul.mubr.f32.gmra.mrb[138].mxu0 %v529_v10  ;;  %v535_v10 = vld [vmem:[%s9760_s1 + $0x480] sm:$0xff] }
 0x1b3   : > { %9880 = vst [vmem:[#allocation52_spill] sm:$0xff] %v7595_v20  ;;  %5529 = vmatprep.mubr.msk.f32.mxu0 %vm807_vm0, %v532_v11  ;;  %v538_v11 = vld [vmem:[%s9760_s1 + $0x498] sm:$0xff]  ;;  %v547_v20 = vld [vmem:[%s9760_s1 + $0x4e0] sm:$0xff] }
 0x1b5   : > { %v7609_v35 = vpop.f32.mrb[34].mxu0 }
 0x1b6   : > { %9882 = vst [vmem:[#allocation54_spill] sm:$0xff] %v7609_v35  ;;  %v7611_v36 = vpop.f32.mrb[35].mxu0  ;;  %1917 = vmatmul.mubr.f32.gmra.mrb[140].mxu0 %v531_v28  ;;  %v545_v35 = vld [vmem:[%s9760_s1 + $0x4d0] sm:$0xff] }
 0x1b7   : > { %9883 = vst [vmem:[#allocation55_spill] sm:$0xff] %v7611_v36  ;;  %5530 = vmatprep.mubr.msk.f32.mxu0 %vm807_vm0, %v534_v29 }
 0x1b9   : > { %v7627_v61 = vpop.f32.mrb[36].mxu0 }
 0x1ba   : > { %9886 = vst [vmem:[#allocation58_spill] sm:$0xff] %v7627_v61  ;;  %v7629_v62 = vpop.f32.mrb[37].mxu0  ;;  %1923 = vmatmul.mubr.f32.gmra.mrb[142].mxu0 %v533_v48  ;;  %v2812_v48 = vld [vmem:[%s9761_s2 + $0x298] sm:$0xff] }
 0x1bb   : > { %9887 = vst [vmem:[#allocation59_spill] sm:$0xff] %v7629_v62  ;;  %5531 = vmatprep.mubr.msk.f32.mxu0 %vm807_vm0, %v536_v49  ;;  %v537_v49 = vld [vmem:[%s9760_s1 + $0x490] sm:$0xff]  ;;  %3234 = vperm.xlu1 %6190, %v2812_v48   ;;  %v539_v48 = vld [vmem:[%s9760_s1 + $0x4a0] sm:$0xff] }
 0x1bd   : > { %v7643_v28 = vpop.f32.mrb[38].mxu0 }
 0x1be   : > { %9889 = vst [vmem:[#allocation61_spill] sm:$0xff] %v7643_v28  ;;  %v7645_v29 = vpop.f32.mrb[39].mxu0  ;;  %1929 = vmatmul.mubr.f32.gmra.mrb[144].mxu0 %v535_v10 }
 0x1bf   : > { %9890 = vst [vmem:[#allocation62_spill] sm:$0xff] %v7645_v29  ;;  %5532 = vmatprep.mubr.msk.f32.mxu0 %vm807_vm0, %v538_v11  ;;  %v7663_v29 = vpop.permute.xlu1 %2914  ;;  %v2813_v11 = vld [vmem:[%s9761_s2 + $0x2a0] sm:$0xff] }
 0x1c0   : > { %9894 = vst [vmem:[#allocation66_spill] sm:$0xff] %v7663_v29  ;;  %3239 = vperm.xlu0 %6189, %v2813_v11   ;;  %v2814_v11 = vld [vmem:[%s9761_s2 + $0x2a8] sm:$0xff] }
 0x1c1   : > { %v7659_v28 = vpop.f32.mrb[40].mxu0  ;;  %3244 = vperm.xlu1 %6190, %v2814_v11   ;;  %v546_v11 = vld [vmem:[%s9760_s1 + $0x4d8] sm:$0xff] }
 0x1c2   : > { %9892 = vst [vmem:[#allocation64_spill] sm:$0xff] %v7659_v28  ;;  %v7661_v10 = vpop.f32.mrb[41].mxu0  ;;  %1935 = vmatmul.mubr.f32.gmra.mrb[146].mxu0 %v537_v49  ;;  %v542_v28 = vld [vmem:[%s9760_s1 + $0x4b8] sm:$0xff] }
 0x1c3   : > { %9893 = vst [vmem:[#allocation65_spill] sm:$0xff] %v7661_v10  ;;  %5533 = vmatprep.mubr.msk.f32.mxu0 %vm807_vm0, %v540_v6  ;;  %v7679_v10 = vpop.f32.mrb[0].mxu1  ;;  %v541_v6 = vld [vmem:[%s9760_s1 + $0x4b0] sm:$0xff]  ;;  %v7695_v45 = vpop.permute.xlu1 %2924 }
 0x1c4   : > { %9897 = vst [vmem:[#allocation69_spill] sm:$0xff] %v7679_v10  ;;  %v7683_v62 = vpop.f32.mrb[1].mxu1  ;;  %9900 = vst [vmem:[#allocation72_spill] sm:$0xff] %v7695_v45  ;;  %v2815_v45 = vld [vmem:[%s9761_s2 + $0x2b0] sm:$0xff] }
 0x1c5   : > { %v7677_v49 = vpop.f32.mrb[42].mxu0  ;;  %9899 = vst [vmem:[#allocation71_spill] sm:$0xff] %v7683_v62  ;;  %3249 = vperm.xlu0 %6189, %v2815_v45   ;;  %v548_v45 = vld [vmem:[%s9760_s1 + $0x4e8] sm:$0xff] }
 0x1c6   : > { %9896 = vst [vmem:[#allocation68_spill] sm:$0xff] %v7677_v49  ;;  %v7681_v29 = vpop.f32.mrb[43].mxu0  ;;  %1941 = vmatmul.mubr.f32.gmra.mrb[148].mxu0 %v539_v48  ;;  %v544_v49 = vld [vmem:[%s9760_s1 + $0x4c8] sm:$0xff] }
 0x1c7   : > { %9898 = vst [vmem:[#allocation70_spill] sm:$0xff] %v7681_v29  ;;  %5534 = vmatprep.mubr.msk.f32.mxu0 %vm807_vm0, %v542_v28  ;;  %v7699_v29 = vpop.f32.mrb[2].mxu1 }
 0x1c8   : > { %v7703_v61 = vpop.f32.mrb[3].mxu1 }
 0x1c9   : > { %v7697_v48 = vpop.f32.mrb[44].mxu0 }
 0x1ca   : > { %9901 = vst [vmem:[#allocation73_spill] sm:$0xff] %v7697_v48  ;;  %v7701_v28 = vpop.f32.mrb[45].mxu0  ;;  %1947 = vmatmul.mubr.f32.gmra.mrb[150].mxu0 %v541_v6  ;;  %v7715_v48 = vpop.permute.xlu0 %2929 }
 0x1cb   : > { %9902 = vst [vmem:[#allocation74_spill] sm:$0xff] %v7701_v28  ;;  %5535 = vmatprep.mubr.msk.f32.mxu0 %vm807_vm0, %v544_v49  ;;  %9903 = vst [vmem:[#allocation75_spill] sm:$0xff] %v7715_v48  ;;  %v7719_v28 = vpop.f32.mrb[4].mxu1  ;;  %v2816_v48 = vld [vmem:[%s9761_s2 + $0x2b8] sm:$0xff] }
 0x1cc   : > { %v7723_v36 = vpop.f32.mrb[5].mxu1  ;;  %3254 = vperm.xlu1 %6190, %v2816_v48  }
 0x1cd   : > { %v7717_v6 = vpop.f32.mrb[46].mxu0 }
 0x1ce   : > { %9904 = vst [vmem:[#allocation76_spill] sm:$0xff] %v7717_v6  ;;  %v7721_v49 = vpop.f32.mrb[47].mxu0  ;;  %1953 = vmatmul.mubr.f32.gmra.mrb[152].mxu0 %v543_v27  ;;  %v7735_v6 = vpop.permute.xlu1 %2934 }
 0x1cf   : > { %9905 = vst [vmem:[#allocation77_spill] sm:$0xff] %v7721_v49  ;;  %5536 = vmatprep.mubr.msk.f32.mxu0 %vm807_vm0, %v546_v11  ;;  %9906 = vst [vmem:[#allocation78_spill] sm:$0xff] %v7735_v6  ;;  %v7739_v49 = vpop.f32.mrb[6].mxu1  ;;  %v550_v6 = vld [vmem:[%s9760_s1 + $0x4f8] sm:$0xff]  ;;  %v7752_v48 = vpop.permute.xlu0 %2939 }
 0x1d0   : > { %v7743_v56 = vpop.f32.mrb[7].mxu1  ;;  %9909 = vst [vmem:[#allocation81_spill] sm:$0xff] %v7752_v48 }
 0x1d1   : > { %v7737_v27 = vpop.f32.mrb[48].mxu0  ;;  %v7756_v18 = vpop.f32.mrb[8].mxu1 }
 0x1d2   : > { %9907 = vst [vmem:[#allocation79_spill] sm:$0xff] %v7737_v27  ;;  %v7741_v11 = vpop.f32.mrb[49].mxu0  ;;  %1959 = vmatmul.mubr.f32.gmra.mrb[154].mxu0 %v545_v35  ;;  %v7760_v35 = vpop.f32.mrb[9].mxu1 }
 0x1d3   : > { %9908 = vst [vmem:[#allocation80_spill] sm:$0xff] %v7741_v11  ;;  %5537 = vmatprep.mubr.msk.f32.mxu0 %vm807_vm0, %v548_v45  ;;  %v549_v45 = vld [vmem:[%s9760_s1 + $0x4f0] sm:$0xff]  ;;  %v7769_v48 = vpop.permute.xlu1 %2944  ;;  %v7773_v5 = vpop.f32.mrb[10].mxu1 }
 0x1d4   : > { %9912 = vst [vmem:[#allocation84_spill] sm:$0xff] %v7769_v48  ;;  %v7786_v48 = vpop.permute.xlu0 %2949 }
 0x1d5   : > { %v7754_v27 = vpop.f32.mrb[50].mxu0  ;;  %9915 = vst [vmem:[#allocation87_spill] sm:$0xff] %v7786_v48  ;;  %v553_v48 = vld [vmem:[%s9760_s1 + $0x510] sm:$0xff] }
 0x1d6   : > { %9910 = vst [vmem:[#allocation82_spill] sm:$0xff] %v7754_v27  ;;  %v7758_v11 = vpop.f32.mrb[51].mxu0  ;;  %1965 = vmatmul.mubr.f32.gmra.mrb[156].mxu0 %v547_v20  ;;  %v7777_v20 = vpop.f32.mrb[11].mxu1 }
 0x1d7   : > { %9911 = vst [vmem:[#allocation83_spill] sm:$0xff] %v7758_v11  ;;  %5538 = vmatprep.mubr.msk.f32.mxu0 %vm807_vm0, %v550_v6  ;;  %v551_v6 = vld [vmem:[%s9760_s1 + $0x500] sm:$0xff] }
 0x1d8   : > { %v7826_v43 = vpop.permute.xlu0 %2959 }
 0x1d9   : > { %v7771_v27 = vpop.f32.mrb[52].mxu0  ;;  %9921 = vst [vmem:[#allocation93_spill] sm:$0xff] %v7826_v43  ;;  %v557_v43 = vld [vmem:[%s9760_s1 + $0x530] sm:$0xff] }
 0x1da   : > { %9913 = vst [vmem:[#allocation85_spill] sm:$0xff] %v7771_v27  ;;  %v7775_v11 = vpop.f32.mrb[53].mxu0  ;;  %1971 = vmatmul.mubr.f32.gmra.mrb[158].mxu0 %v549_v45  ;;  %v4701_v27 = vld [vmem:[%s9763_s4] sm:$0xff]  ;;  %v7793_v45 = vpop.f32.mrb[12].mxu1 }
 0x1db   : > { %9914 = vst [vmem:[#allocation86_spill] sm:$0xff] %v7775_v11  ;;  %5539 = vmatprep.mubr.msk.f32.mxu0 %vm807_vm0, %v552_v38  ;;  %4719 = vperm.xlu0 %6189, %v4701_v27   ;;  %v7797_v21 = vpop.f32.mrb[13].mxu1  ;;  %v556_v27 = vld [vmem:[%s9760_s1 + $0x528] sm:$0xff] }
 0x1dd   : > { %v7791_v11 = vpop.f32.mrb[54].mxu0 }
 0x1de   : > { %9916 = vst [vmem:[#allocation88_spill] sm:$0xff] %v7791_v11  ;;  %v7795_v38 = vpop.f32.mrb[55].mxu0  ;;  %1977 = vmatmul.mubr.f32.gmra.mrb[160].mxu0 %v551_v6  ;;  %v7809_v11 = vpop.permute.xlu1 %2954 }
 0x1df   : > { %9917 = vst [vmem:[#allocation89_spill] sm:$0xff] %v7795_v38  ;;  %5540 = vmatprep.mubr.msk.f32.mxu0 %vm807_vm0, %v554_v4  ;;  %9918 = vst [vmem:[#allocation90_spill] sm:$0xff] %v7809_v11  ;;  %4729 = vperm.xlu0 %6189, %v4703_v54   ;;  %v7813_v6 = vpop.f32.mrb[14].mxu1  ;;  %v558_v11 = vld [vmem:[%s9760_s1 + $0x538] sm:$0xff]  ;;  %v4705_v54 = vld [vmem:[%s9763_s4 + $0x20] sm:$0xff] }
 0x1e0   : > { %v7817_v50 = vpop.f32.mrb[15].mxu1 }
 0x1e1   : > { %v7811_v38 = vpop.f32.mrb[56].mxu0 }
 0x1e2   : > { %9919 = vst [vmem:[#allocation91_spill] sm:$0xff] %v7811_v38  ;;  %v7815_v4 = vpop.f32.mrb[57].mxu0  ;;  %1983 = vmatmul.mubr.f32.gmra.mrb[162].mxu0 %v553_v48  ;;  %v4702_v48 = vld [vmem:[%s9763_s4 + $0x8] sm:$0xff] }
 0x1e3   : > { %9920 = vst [vmem:[#allocation92_spill] sm:$0xff] %v7815_v4  ;;  %5541 = vmatprep.mubr.msk.f32.mxu0 %vm807_vm0, %v556_v27  ;;  %4739 = vperm.xlu0 %6189, %v4705_v54   ;;  %v7836_v27 = vpop.f32.mrb[16].mxu1  ;;  %v4704_v54 = vld [vmem:[%s9763_s4 + $0x18] sm:$0xff] }
 0x1e4   : > { %4724 = vperm.xlu1 %6190, %v4702_v48   ;;  %v7840_v40 = vpop.f32.mrb[17].mxu1  ;;  %v7855_v48 = vpop.permute.xlu1 %2964 }
 0x1e5   : > { %v7834_v4 = vpop.f32.mrb[58].mxu0  ;;  %9924 = vst [vmem:[#allocation96_spill] sm:$0xff] %v7855_v48  ;;  %v562_v48 = vld [vmem:[%s9760_s1 + $0x558] sm:$0xff] }
 0x1e6   : > { %9922 = vst [vmem:[#allocation94_spill] sm:$0xff] %v7834_v4  ;;  %v7838_v38 = vpop.f32.mrb[59].mxu0  ;;  %1989 = vmatmul.mubr.f32.gmra.mrb[164].mxu0 %v555_v12  ;;  %v560_v12 = vld [vmem:[%s9760_s1 + $0x548] sm:$0xff] }
 0x1e7   : > { %9923 = vst [vmem:[#allocation95_spill] sm:$0xff] %v7838_v38  ;;  %5542 = vmatprep.mubr.msk.f32.mxu0 %vm807_vm0, %v558_v11  ;;  %4749 = vperm.xlu0 %6189, %v4707_v63   ;;  %v7859_v11 = vpop.f32.mrb[18].mxu1  ;;  %v4709_v63 = vld [vmem:[%s9763_s4 + $0x40] sm:$0xff] }
 0x1e8   : > { %4734 = vperm.xlu1 %6190, %v4704_v54   ;;  %v7863_v34 = vpop.f32.mrb[19].mxu1 }
 0x1e9   : > { %v7857_v38 = vpop.f32.mrb[60].mxu0 }
 0x1ea   : > { %9925 = vst [vmem:[#allocation97_spill] sm:$0xff] %v7857_v38  ;;  %v7861_v4 = vpop.f32.mrb[61].mxu0  ;;  %1995 = vmatmul.mubr.f32.gmra.mrb[166].mxu0 %v557_v43  ;;  %v7872_v38 = vpop.permute.xlu0 %2969  ;;  %v4706_v43 = vld [vmem:[%s9763_s4 + $0x28] sm:$0xff] }
 0x1eb   : > { %9926 = vst [vmem:[#allocation98_spill] sm:$0xff] %v7861_v4  ;;  %5543 = vmatprep.mubr.msk.f32.mxu0 %vm807_vm0, %v560_v12  ;;  %9927 = vst [vmem:[#allocation99_spill] sm:$0xff] %v7872_v38  ;;  %4759 = vperm.xlu0 %6189, %v4709_v63   ;;  %v7882_v12 = vpop.f32.mrb[20].mxu1  ;;  %v561_v38 = vld [vmem:[%s9760_s1 + $0x550] sm:$0xff]  ;;  %v4708_v63 = vld [vmem:[%s9763_s4 + $0x38] sm:$0xff] }
 0x1ec   : > { %4744 = vperm.xlu1 %6190, %v4706_v43   ;;  %v7886_v55 = vpop.f32.mrb[21].mxu1  ;;  %v7901_v43 = vpop.permute.xlu1 %2974 }
 0x1ed   : > { %v7880_v54 = vpop.f32.mrb[62].mxu0  ;;  %9930 = vst [vmem:[#allocation102_spill] sm:$0xff] %v7901_v43  ;;  %v566_v43 = vld [vmem:[%s9760_s1 + $0x578] sm:$0xff] }
 0x1ee   : > { %9928 = vst [vmem:[#allocation100_spill] sm:$0xff] %v7880_v54  ;;  %v7884_v4 = vpop.f32.mrb[63].mxu0  ;;  %2001 = vmatmul.mubr.f32.gmra.mrb[168].mxu0 %v559_v32  ;;  %v564_v32 = vld [vmem:[%s9760_s1 + $0x568] sm:$0xff] }
 0x1ef   : > { %9929 = vst [vmem:[#allocation101_spill] sm:$0xff] %v7884_v4  ;;  %5544 = vmatprep.mubr.msk.f32.mxu0 %vm807_vm0, %v562_v48  ;;  %4769 = vperm.xlu0 %6189, %v4711_v23   ;;  %v7905_v48 = vpop.f32.mrb[22].mxu1  ;;  %v4713_v23 = vld [vmem:[%s9763_s4 + $0x60] sm:$0xff] }
 0x1f0   : > { %4754 = vperm.xlu1 %6190, %v4708_v63   ;;  %v7909_v22 = vpop.f32.mrb[23].mxu1 }
 0x1f1   : > { %v7903_v4 = vpop.f32.mrb[64].mxu0 }
 0x1f2   : > { %9931 = vst [vmem:[#allocation103_spill] sm:$0xff] %v7903_v4  ;;  %v7907_v54 = vpop.f32.mrb[65].mxu0  ;;  %2007 = vmatmul.mubr.f32.gmra.mrb[170].mxu0 %v561_v38  ;;  %v7918_v4 = vpop.permute.xlu0 %2979  ;;  %v4710_v38 = vld [vmem:[%s9763_s4 + $0x48] sm:$0xff] }
 0x1f3   : > { %9932 = vst [vmem:[#allocation104_spill] sm:$0xff] %v7907_v54  ;;  %5545 = vmatprep.mubr.msk.f32.mxu0 %vm807_vm0, %v564_v32  ;;  %9933 = vst [vmem:[#allocation105_spill] sm:$0xff] %v7918_v4  ;;  %4779 = vperm.xlu0 %6189, %v4713_v23   ;;  %v7928_v32 = vpop.f32.mrb[24].mxu1  ;;  %v565_v4 = vld [vmem:[%s9760_s1 + $0x570] sm:$0xff]  ;;  %v4712_v23 = vld [vmem:[%s9763_s4 + $0x58] sm:$0xff] }
 0x1f4   : > { %4764 = vperm.xlu1 %6190, %v4710_v38   ;;  %v7932_v15 = vpop.f32.mrb[25].mxu1  ;;  %v7947_v38 = vpop.permute.xlu1 %2984 }
 0x1f5   : > { %v7926_v63 = vpop.f32.mrb[66].mxu0  ;;  %9936 = vst [vmem:[#allocation108_spill] sm:$0xff] %v7947_v38  ;;  %v570_v38 = vld [vmem:[%s9760_s1 + $0x598] sm:$0xff] }
 0x1f6   : > { %9934 = vst [vmem:[#allocation106_spill] sm:$0xff] %v7926_v63  ;;  %v7930_v54 = vpop.f32.mrb[67].mxu0  ;;  %2013 = vmatmul.mubr.f32.gmra.mrb[172].mxu0 %v563_v44  ;;  %v568_v44 = vld [vmem:[%s9760_s1 + $0x588] sm:$0xff] }
 0x1f7   : > { %9935 = vst [vmem:[#allocation107_spill] sm:$0xff] %v7930_v54  ;;  %5546 = vmatprep.mubr.msk.f32.mxu0 %vm807_vm0, %v566_v43  ;;  %4789 = vperm.xlu0 %6189, %v4715_v14   ;;  %v7951_v43 = vpop.f32.mrb[26].mxu1  ;;  %v4868_v14 = vld [vmem:[%s9765_s6] sm:$0xff] }
 0x1f8   : > { %4774 = vperm.xlu1 %6190, %v4712_v23   ;;  %v7955_v39 = vpop.f32.mrb[27].mxu1 }
 0x1f9   : > { %v7949_v54 = vpop.f32.mrb[68].mxu0 }
 0x1fa   : > { %9937 = vst [vmem:[#allocation109_spill] sm:$0xff] %v7949_v54  ;;  %v7953_v63 = vpop.f32.mrb[69].mxu0  ;;  %2019 = vmatmul.mubr.f32.gmra.mrb[174].mxu0 %v565_v4  ;;  %v7964_v54 = vpop.permute.xlu0 %2989  ;;  %v4714_v4 = vld [vmem:[%s9763_s4 + $0x68] sm:$0xff] }
 0x1fb   : > { %9938 = vst [vmem:[#allocation110_spill] sm:$0xff] %v7953_v63  ;;  %5547 = vmatprep.mubr.msk.f32.mxu0 %vm807_vm0, %v568_v44  ;;  %9939 = vst [vmem:[#allocation111_spill] sm:$0xff] %v7964_v54  ;;  %4877 = vperm.xlu0 %6189, %v4868_v14   ;;  %v7974_v44 = vpop.f32.mrb[28].mxu1  ;;  %v569_v54 = vld [vmem:[%s9760_s1 + $0x590] sm:$0xff]  ;;  %v4716_v14 = vld [vmem:[%s9763_s4 + $0x78] sm:$0xff] }
 0x1fc   : > { %4784 = vperm.xlu1 %6190, %v4714_v4   ;;  %v7978_v8 = vpop.f32.mrb[29].mxu1  ;;  %v7993_v4 = vpop.permute.xlu1 %2994 }
 0x1fd   : > { %v7972_v23 = vpop.f32.mrb[70].mxu0  ;;  %9942 = vst [vmem:[#allocation114_spill] sm:$0xff] %v7993_v4  ;;  %v574_v4 = vld [vmem:[%s9760_s1 + $0x5b8] sm:$0xff] }
 0x1fe   : > { %9940 = vst [vmem:[#allocation112_spill] sm:$0xff] %v7972_v23  ;;  %v7976_v63 = vpop.f32.mrb[71].mxu0  ;;  %2025 = vmatmul.mubr.f32.gmra.mrb[176].mxu0 %v567_v9  ;;  %v572_v9 = vld [vmem:[%s9760_s1 + $0x5a8] sm:$0xff] }
 0x1ff   : > { %9941 = vst [vmem:[#allocation113_spill] sm:$0xff] %v7976_v63  ;;  %5548 = vmatprep.mubr.msk.f32.mxu0 %vm807_vm0, %v570_v38  ;;  %4887 = vperm.xlu0 %6189, %v4870_v30   ;;  %v7997_v38 = vpop.f32.mrb[30].mxu1  ;;  %v4872_v30 = vld [vmem:[%s9765_s6 + $0x20] sm:$0xff] }
 0x200   : > { %4794 = vperm.xlu1 %6190, %v4716_v14   ;;  %v8001_v2 = vpop.f32.mrb[31].mxu1 }
 0x201   : > { %v7995_v63 = vpop.f32.mrb[72].mxu0 }
 0x202   : > { %9943 = vst [vmem:[#allocation115_spill] sm:$0xff] %v7995_v63  ;;  %v7999_v23 = vpop.f32.mrb[73].mxu0  ;;  %2031 = vmatmul.mubr.f32.gmra.mrb[178].mxu0 %v569_v54  ;;  %v8010_v63 = vpop.permute.xlu0 %2999  ;;  %v4869_v54 = vld [vmem:[%s9765_s6 + $0x8] sm:$0xff] }
 0x203   : > { %9944 = vst [vmem:[#allocation116_spill] sm:$0xff] %v7999_v23  ;;  %5549 = vmatprep.mubr.msk.f32.mxu0 %vm807_vm0, %v572_v9  ;;  %9945 = vst [vmem:[#allocation117_spill] sm:$0xff] %v8010_v63  ;;  %4897 = vperm.xlu0 %6189, %v4872_v30   ;;  %v8020_v9 = vpop.f32.mrb[32].mxu1  ;;  %v573_v63 = vld [vmem:[%s9760_s1 + $0x5b0] sm:$0xff]  ;;  %v4871_v30 = vld [vmem:[%s9765_s6 + $0x18] sm:$0xff] }
 0x204   : > { %4882 = vperm.xlu1 %6190, %v4869_v54   ;;  %v8024_v25 = vpop.f32.mrb[33].mxu1  ;;  %v8039_v54 = vpop.permute.xlu1 %3004 }
 0x205   : > { %v8018_v14 = vpop.f32.mrb[74].mxu0  ;;  %9948 = vst [vmem:[#allocation120_spill] sm:$0xff] %v8039_v54  ;;  %v578_v54 = vld [vmem:[%s9760_s1 + $0x5d8] sm:$0xff] }
 0x206   : > { %9946 = vst [vmem:[#allocation118_spill] sm:$0xff] %v8018_v14  ;;  %v8022_v23 = vpop.f32.mrb[75].mxu0  ;;  %2037 = vmatmul.mubr.f32.gmra.mrb[180].mxu0 %v571_v0  ;;  %v576_v0 = vld [vmem:[%s9760_s1 + $0x5c8] sm:$0xff] }
 0x207   : > { %9947 = vst [vmem:[#allocation119_spill] sm:$0xff] %v8022_v23  ;;  %5550 = vmatprep.mubr.msk.f32.mxu0 %vm807_vm0, %v574_v4  ;;  %4907 = vperm.xlu0 %6189, %v4874_v59   ;;  %v8043_v4 = vpop.f32.mrb[34].mxu1  ;;  %v5034_v59 = vld [vmem:[%s9767_s8 + $0x8] sm:$0x3] }
 0x208   : > { %4892 = vperm.xlu1 %6190, %v4871_v30   ;;  %v8047_v58 = vpop.f32.mrb[35].mxu1 }
 0x209   : > { %v8041_v23 = vpop.f32.mrb[76].mxu0 }
 0x20a   : > { %9949 = vst [vmem:[#allocation121_spill] sm:$0xff] %v8041_v23  ;;  %v8045_v14 = vpop.f32.mrb[77].mxu0  ;;  %2043 = vmatmul.mubr.f32.gmra.mrb[182].mxu0 %v573_v63  ;;  %v8056_v23 = vpop.permute.xlu0 %3009  ;;  %v4873_v63 = vld [vmem:[%s9765_s6 + $0x28] sm:$0xff] }
 0x20b   : > { %9950 = vst [vmem:[#allocation122_spill] sm:$0xff] %v8045_v14  ;;  %5551 = vmatprep.mubr.msk.f32.mxu0 %vm807_vm0, %v576_v0  ;;  %9951 = vst [vmem:[#allocation123_spill] sm:$0xff] %v8056_v23  ;;  %5042 = vperm.xlu0 %6189, %v5034_v59   ;;  %v8066_v0 = vpop.f32.mrb[36].mxu1  ;;  %v577_v23 = vld [vmem:[%s9760_s1 + $0x5d0] sm:$0xff]  ;;  %v580_v59 = vld [vmem:[%s9760_s1 + $0x5e8] sm:$0xff] }
 0x20c   : > { %4902 = vperm.xlu1 %6190, %v4873_v63   ;;  %v8070_v53 = vpop.f32.mrb[37].mxu1  ;;  %v8082_v63 = vpop.permute.xlu1 %3014 }
 0x20d   : > { %v8064_v30 = vpop.f32.mrb[78].mxu0  ;;  %9954 = vst [vmem:[#allocation126_spill] sm:$0xff] %v8082_v63  ;;  %v582_v63 = vld [vmem:[%s9760_s1 + $0x5f8] sm:$0xff] }
 0x20e   : > { %9952 = vst [vmem:[#allocation124_spill] sm:$0xff] %v8064_v30  ;;  %v8068_v14 = vpop.f32.mrb[79].mxu0  ;;  %2049 = vmatmul.mubr.f32.gmra.mrb[184].mxu0 %v575_v16  ;;  %v8086_v16 = vpop.f32.mrb[38].mxu1 }
 0x20f   : > { %9953 = vst [vmem:[#allocation125_spill] sm:$0xff] %v8068_v14  ;;  %5552 = vmatprep.mubr.msk.f32.mxu0 %vm807_vm0, %v578_v54  ;;  %v8090_v30 = vpop.f32.mrb[39].mxu1  ;;  %v8099_v47 = vpop.permute.xlu0 %3019 }
 0x210   : > { %5037 = vperm.xlu1 %6190, %v5033_v52   ;;  %9957 = vst [vmem:[#allocation129_spill] sm:$0xff] %v8099_v47  ;;  %v5141_v52 = vld [vmem:[%s9769_s10] sm:$0x3]  ;;  %v581_v47 = vld [vmem:[%s9760_s1 + $0x5f0] sm:$0xff]  ;;  %v8119_v7 = vpop.permute.xlu1 %3024 }
 0x211   : > { %v8084_v14 = vpop.f32.mrb[80].mxu0  ;;  %9960 = vst [vmem:[#allocation132_spill] sm:$0xff] %v8119_v7 }
 0x212   : > { %9955 = vst [vmem:[#allocation127_spill] sm:$0xff] %v8084_v14  ;;  %v8088_v54 = vpop.f32.mrb[81].mxu0  ;;  %2055 = vmatmul.mubr.f32.gmra.mrb[186].mxu0 %v577_v23  ;;  %v8106_v23 = vpop.f32.mrb[40].mxu1 }
 0x213   : > { %9956 = vst [vmem:[#allocation128_spill] sm:$0xff] %v8088_v54  ;;  %5553 = vmatprep.mubr.msk.f32.mxu0 %vm807_vm0, %v580_v59  ;;  %v8110_v14 = vpop.f32.mrb[41].mxu1  ;;  %v8136_v7 = vpop.permute.xlu0 %3029 }
 0x214   : > { %5144 = vperm.xlu1 %6190, %v5141_v52   ;;  %9963 = vst [vmem:[#allocation135_spill] sm:$0xff] %v8136_v7  ;;  %v8153_v7 = vpop.permute.xlu1 %3034 }
 0x215   : > { %v8104_v54 = vpop.f32.mrb[82].mxu0  ;;  %9966 = vst [vmem:[#allocation138_spill] sm:$0xff] %v8153_v7 }
 0x216   : > { %9958 = vst [vmem:[#allocation130_spill] sm:$0xff] %v8104_v54  ;;  %v8108_v59 = vpop.f32.mrb[83].mxu0  ;;  %2061 = vmatmul.mubr.f32.gmra.mrb[188].mxu0 %v579_v13  ;;  %v8123_v54 = vpop.f32.mrb[42].mxu1 }
 0x217   : > { %9959 = vst [vmem:[#allocation131_spill] sm:$0xff] %v8108_v59  ;;  %5554 = vmatprep.mubr.msk.f32.mxu0 %vm807_vm0, %v582_v63  ;;  %v8127_v13 = vpop.f32.mrb[43].mxu1  ;;  %v583_v63 = vld [vmem:[%s9760_s1 + $0x600] sm:$0xff]  ;;  %v8170_v7 = vpop.permute.xlu0 %3039 }
 0x218   : > { %v8140_v41 = vpop.f32.mrb[44].mxu1  ;;  %9969 = vst [vmem:[#allocation141_spill] sm:$0xff] %v8170_v7  ;;  %v8187_v7 = vpop.permute.xlu1 %3044 }
 0x219   : > { %v8121_v52 = vpop.f32.mrb[84].mxu0  ;;  %9972 = vst [vmem:[#allocation144_spill] sm:$0xff] %v8187_v7 }
 0x21a   : > { %9961 = vst [vmem:[#allocation133_spill] sm:$0xff] %v8121_v52  ;;  %v8125_v59 = vpop.f32.mrb[85].mxu0  ;;  %2067 = vmatmul.mubr.f32.gmra.mrb[190].mxu0 %v581_v47  ;;  %v8144_v47 = vpop.f32.mrb[45].mxu1 }
 0x21b   : > { %9962 = vst [vmem:[#allocation134_spill] sm:$0xff] %v8125_v59  ;;  %5555 = vmatprep.mubr.msk.f32.mxu0 %vm807_vm0, %v584_v46  ;;  %v585_v46 = vld [vmem:[%s9760_s1 + $0x610] sm:$0xff]  ;;  %v8157_v1 = vpop.f32.mrb[46].mxu1  ;;  %v8204_v7 = vpop.permute.xlu0 %3049 }
 0x21c   : > { %9976 = vst [vmem:[#allocation148_spill] sm:$0xff] %v8204_v7  ;;  %v8221_v7 = vpop.permute.xlu1 %3054 }
 0x21d   : > { %v8138_v52 = vpop.f32.mrb[86].mxu0  ;;  %9981 = vst [vmem:[#allocation153_spill] sm:$0xff] %v8221_v7 }
 0x21e   : > { %9964 = vst [vmem:[#allocation136_spill] sm:$0xff] %v8138_v52  ;;  %v8142_v59 = vpop.f32.mrb[87].mxu0  ;;  %2073 = vmatmul.mubr.f32.gmra.mrb[192].mxu0 %v583_v63  ;;  %v8161_v63 = vpop.f32.mrb[47].mxu1 }
 0x21f   : > { %9965 = vst [vmem:[#allocation137_spill] sm:$0xff] %v8142_v59  ;;  %5556 = vmatprep.mubr.msk.f32.mxu0 %vm807_vm0, %v586_v42  ;;  %v587_v42 = vld [vmem:[%s9760_s1 + $0x620] sm:$0xff]  ;;  %v8174_v57 = vpop.f32.mrb[48].mxu1  ;;  %v8238_v7 = vpop.permute.xlu0 %3059 }
 0x220   : > { %9986 = vst [vmem:[#allocation158_spill] sm:$0xff] %v8238_v7  ;;  %v8255_v7 = vpop.permute.xlu1 %3064 }
 0x221   : > { %v8155_v52 = vpop.f32.mrb[88].mxu0  ;;  %9991 = vst [vmem:[#allocation163_spill] sm:$0xff] %v8255_v7 }
 0x222   : > { %9967 = vst [vmem:[#allocation139_spill] sm:$0xff] %v8155_v52  ;;  %v8159_v59 = vpop.f32.mrb[89].mxu0  ;;  %2079 = vmatmul.mubr.f32.gmra.mrb[194].mxu0 %v585_v46  ;;  %v8178_v46 = vpop.f32.mrb[49].mxu1 }
 0x223   : > { %9968 = vst [vmem:[#allocation140_spill] sm:$0xff] %v8159_v59  ;;  %5557 = vmatprep.mubr.msk.f32.mxu0 %vm807_vm0, %v588_v3  ;;  %v589_v3 = vld [vmem:[%s9760_s1 + $0x630] sm:$0xff]  ;;  %v8191_v31 = vpop.f32.mrb[50].mxu1  ;;  %v8272_v7 = vpop.permute.xlu0 %3069 }
 0x224   : > { %9996 = vst [vmem:[#allocation168_spill] sm:$0xff] %v8272_v7  ;;  %v604_v7 = vld [vmem:[%s9760_s1 + $0x6a8] sm:$0xff] }
 0x225   : > { %v8172_v52 = vpop.f32.mrb[90].mxu0 }
 0x226   : > { %9970 = vst [vmem:[#allocation142_spill] sm:$0xff] %v8172_v52  ;;  %v8176_v59 = vpop.f32.mrb[91].mxu0  ;;  %2085 = vmatmul.mubr.f32.gmra.mrb[196].mxu0 %v587_v42  ;;  %v8195_v42 = vpop.f32.mrb[51].mxu1 }
 0x227   : > { %9971 = vst [vmem:[#allocation143_spill] sm:$0xff] %v8176_v59  ;;  %5558 = vmatprep.mubr.msk.f32.mxu0 %vm807_vm0, %v590_v37  ;;  %9975 = vst [vmem:[#allocation147_spill] sm:$0xff] %v8195_v42  ;;  %v591_v37 = vld [vmem:[%s9760_s1 + $0x640] sm:$0xff]  ;;  %v8208_v26 = vpop.f32.mrb[52].mxu1 }
 0x228   : > { %9978 = vst [vmem:[#allocation150_spill] sm:$0xff] %v8208_v26 }
 0x229   : > { %v8189_v52 = vpop.f32.mrb[92].mxu0 }
 0x22a   : > { %9973 = vst [vmem:[#allocation145_spill] sm:$0xff] %v8189_v52  ;;  %v8193_v59 = vpop.f32.mrb[93].mxu0  ;;  %2091 = vmatmul.mubr.f32.gmra.mrb[198].mxu0 %v589_v3  ;;  %v8212_v3 = vpop.f32.mrb[53].mxu1 }
 0x22b   : > { %9974 = vst [vmem:[#allocation146_spill] sm:$0xff] %v8193_v59  ;;  %5559 = vmatprep.mubr.msk.f32.mxu0 %vm807_vm0, %v592_v33  ;;  %9980 = vst [vmem:[#allocation152_spill] sm:$0xff] %v8212_v3  ;;  %v593_v33 = vld [vmem:[%s9760_s1 + $0x650] sm:$0xff]  ;;  %v8225_v51 = vpop.f32.mrb[54].mxu1 }
 0x22c   : > { %9983 = vst [vmem:[#allocation155_spill] sm:$0xff] %v8225_v51  ;;  %v609_v3 = vld [vmem:[%s9760_s1 + $0x6d0] sm:$0xff] }
 0x22d   : > { %v8206_v52 = vpop.f32.mrb[94].mxu0 }
 0x22e   : > { %9977 = vst [vmem:[#allocation149_spill] sm:$0xff] %v8206_v52  ;;  %v8210_v59 = vpop.f32.mrb[95].mxu0  ;;  %2097 = vmatmul.mubr.f32.gmra.mrb[200].mxu0 %v591_v37  ;;  %v8229_v37 = vpop.f32.mrb[55].mxu1 }
 0x22f   : > { %9979 = vst [vmem:[#allocation151_spill] sm:$0xff] %v8210_v59  ;;  %5560 = vmatprep.mubr.msk.f32.mxu0 %vm807_vm0, %v594_v60  ;;  %9985 = vst [vmem:[#allocation157_spill] sm:$0xff] %v8229_v37  ;;  %v595_v60 = vld [vmem:[%s9760_s1 + $0x660] sm:$0xff]  ;;  %v8242_v17 = vpop.f32.mrb[56].mxu1  ;;  %v600_v37 = vld [vmem:[%s9760_s1 + $0x688] sm:$0xff] }
 0x230   : > { %9988 = vst [vmem:[#allocation160_spill] sm:$0xff] %v8242_v17 }
 0x231   : > { %v8223_v52 = vpop.f32.mrb[96].mxu0 }
 0x232   : > { %9982 = vst [vmem:[#allocation154_spill] sm:$0xff] %v8223_v52  ;;  %v8227_v59 = vpop.f32.mrb[97].mxu0  ;;  %2103 = vmatmul.mubr.f32.gmra.mrb[202].mxu0 %v593_v33  ;;  %v8246_v33 = vpop.f32.mrb[57].mxu1 }
 0x233   : > { %9984 = vst [vmem:[#allocation156_spill] sm:$0xff] %v8227_v59  ;;  %5561 = vmatprep.mubr.msk.f32.mxu0 %vm807_vm0, %v596_v24  ;;  %9990 = vst [vmem:[#allocation162_spill] sm:$0xff] %v8246_v33  ;;  %v597_v24 = vld [vmem:[%s9760_s1 + $0x670] sm:$0xff]  ;;  %v8259_v17 = vpop.f32.mrb[58].mxu1  ;;  %v602_v33 = vld [vmem:[%s9760_s1 + $0x698] sm:$0xff] }
 0x234   : > { %9993 = vst [vmem:[#allocation165_spill] sm:$0xff] %v8259_v17 }
 0x235   : > { %v8240_v52 = vpop.f32.mrb[98].mxu0 }
 0x236   : > { %9987 = vst [vmem:[#allocation159_spill] sm:$0xff] %v8240_v52  ;;  %v8244_v59 = vpop.f32.mrb[99].mxu0  ;;  %2109 = vmatmul.mubr.f32.gmra.mrb[204].mxu0 %v595_v60  ;;  %v8263_v60 = vpop.f32.mrb[59].mxu1 }
 0x237   : > { %9989 = vst [vmem:[#allocation161_spill] sm:$0xff] %v8244_v59  ;;  %5562 = vmatprep.mubr.msk.f32.mxu0 %vm807_vm0, %v598_v19  ;;  %9995 = vst [vmem:[#allocation167_spill] sm:$0xff] %v8263_v60  ;;  %v599_v19 = vld [vmem:[%s9760_s1 + $0x680] sm:$0xff]  ;;  %v8276_v17 = vpop.f32.mrb[60].mxu1  ;;  %v8286_v60 = vpop.permute.xlu1 %3074 }
 0x238   : > { %9998 = vst [vmem:[#allocation170_spill] sm:$0xff] %v8276_v17  ;;  %10001 = vst [vmem:[#allocation173_spill] sm:$0xff] %v8286_v60  ;;  %v8303_v60 = vpop.permute.xlu0 %3079 }
 0x239   : > { %v8257_v52 = vpop.f32.mrb[100].mxu0  ;;  %10006 = vst [vmem:[#allocation178_spill] sm:$0xff] %v8303_v60  ;;  %v605_v60 = vld [vmem:[%s9760_s1 + $0x6b0] sm:$0xff] }
 0x23a   : > { %9992 = vst [vmem:[#allocation164_spill] sm:$0xff] %v8257_v52  ;;  %v8261_v59 = vpop.f32.mrb[101].mxu0  ;;  %2115 = vmatmul.mubr.f32.gmra.mrb[206].mxu0 %v597_v24  ;;  %v8280_v24 = vpop.f32.mrb[61].mxu1 }
 0x23b   : > { %9994 = vst [vmem:[#allocation166_spill] sm:$0xff] %v8261_v59  ;;  %5563 = vmatprep.mubr.msk.f32.mxu0 %vm807_vm0, %v600_v37  ;;  %10000 = vst [vmem:[#allocation172_spill] sm:$0xff] %v8280_v24  ;;  %v601_v37 = vld [vmem:[%s9760_s1 + $0x690] sm:$0xff]  ;;  %v8293_v17 = vpop.f32.mrb[62].mxu1  ;;  %v606_v24 = vld [vmem:[%s9760_s1 + $0x6b8] sm:$0xff]  ;;  %v8324_v51 = vpop.permute.xlu1 %3084 }
 0x23c   : > { %10003 = vst [vmem:[#allocation175_spill] sm:$0xff] %v8293_v17  ;;  %10011 = vst [vmem:[#allocation183_spill] sm:$0xff] %v8324_v51  ;;  %v3090_v62 = vpop.permute.xlu0 %3089 }
 0x23d   : > { %v8274_v52 = vpop.f32.mrb[102].mxu0 }
 0x23e   : > { %9997 = vst [vmem:[#allocation169_spill] sm:$0xff] %v8274_v52  ;;  %v8278_v59 = vpop.f32.mrb[103].mxu0  ;;  %2121 = vmatmul.mubr.f32.gmra.mrb[208].mxu0 %v599_v19  ;;  %v8297_v19 = vpop.f32.mrb[63].mxu1 }
 0x23f   : > { %9999 = vst [vmem:[#allocation171_spill] sm:$0xff] %v8278_v59  ;;  %5564 = vmatprep.mubr.msk.f32.mxu0 %vm807_vm0, %v602_v33  ;;  %10005 = vst [vmem:[#allocation177_spill] sm:$0xff] %v8297_v19  ;;  %v603_v33 = vld [vmem:[%s9760_s1 + $0x6a0] sm:$0xff]  ;;  %v8310_v17 = vpop.f32.mrb[64].mxu1  ;;  %v3095_v51 = vpop.permute.xlu1 %3094 }
 0x240   : > { %10008 = vst [vmem:[#allocation180_spill] sm:$0xff] %v8310_v17 }
 0x241   : > { %v8291_v52 = vpop.f32.mrb[104].mxu0 }
 0x242   : > { %10002 = vst [vmem:[#allocation174_spill] sm:$0xff] %v8291_v52  ;;  %v8295_v59 = vpop.f32.mrb[105].mxu0  ;;  %2127 = vmatmul.mubr.f32.gmra.mrb[210].mxu0 %v601_v37  ;;  %v608_v37 = vld [vmem:[%s9760_s1 + $0x6c8] sm:$0xff] }
 0x243   : > { %10004 = vst [vmem:[#allocation176_spill] sm:$0xff] %v8295_v59  ;;  %5565 = vmatprep.mubr.msk.f32.mxu0 %vm807_vm0, %v604_v7  ;;  %v8316_v7 = vpop.f32.mrb[65].mxu1 }
 0x244   : > { %10010 = vst [vmem:[#allocation182_spill] sm:$0xff] %v8316_v7 }
 0x245   : > { %v8308_v52 = vpop.f32.mrb[106].mxu0 }
 0x246   : > { %10007 = vst [vmem:[#allocation179_spill] sm:$0xff] %v8308_v52  ;;  %v8314_v59 = vpop.f32.mrb[107].mxu0  ;;  %2133 = vmatmul.mubr.f32.gmra.mrb[212].mxu0 %v603_v33  ;;  %v8329_v52 = vpop.f32.mrb[66].mxu1 }
 0x247   : > { %10009 = vst [vmem:[#allocation181_spill] sm:$0xff] %v8314_v59  ;;  %5566 = vmatprep.mubr.msk.f32.mxu0 %vm807_vm0, %v606_v24  ;;  %10012 = vst [vmem:[#allocation184_spill] sm:$0xff] %v8329_v52  ;;  %v8332_v19 = vpop.f32.mrb[67].mxu1  ;;  %v607_v59 = vld [vmem:[%s9760_s1 + $0x6c0] sm:$0xff]  ;;  %v610_v52 = vld [vmem:[%s9760_s1 + $0x6d8] sm:$0xff] }
 0x248   : > { %10013 = vst [vmem:[#allocation185_spill] sm:$0xff] %v8332_v19 }
 0x249   : > { %v1822_v10 = vpop.f32.mrb[108].mxu0 }
 0x24a   : > { %v2661_v33 = vmax.f32 %v1822_v10, %v7699_v29  ;;  %v1824_v7 = vpop.f32.mrb[109].mxu0  ;;  %2139 = vmatmul.mubr.f32.gmra.mrb[214].mxu0 %v605_v60  ;;  %v8342_v29 = vpop.f32.mrb[68].mxu1 }
 0x24b   : > { %v2662_v24 = vmax.f32 %v1824_v7, %v7703_v61  ;;  %5567 = vmatprep.mubr.msk.f32.mxu0 %vm807_vm0, %v608_v37  ;;  %10014 = vst [vmem:[#allocation186_spill] sm:$0xff] %v8342_v29  ;;  %v8345_v61 = vpop.f32.mrb[69].mxu1 }
 0x24c   : > { %v3365_v10 = vadd.f32 %v3090_v62, %v2661_v33  ;;  %10015 = vst [vmem:[#allocation187_spill] sm:$0xff] %v8345_v61  ;;  %v612_v33 = vld [vmem:[%s9760_s1 + $0x6e8] sm:$0xff] }
 0x24d   : > { %v1828_v17 = vpop.f32.mrb[110].mxu0  ;;  %v3366_v37 = vadd.f32 %v3090_v62, %v2662_v24  ;;  %v3100_v24 = vpop.permute.xlu0 %3099 }
 0x24e   : > { %v2663_v60 = vmax.f32 %v1828_v17, %v7719_v28  ;;  %v1830_v19 = vpop.f32.mrb[111].mxu0  ;;  %2145 = vmatmul.mubr.f32.gmra.mrb[216].mxu0 %v607_v59  ;;  %v3541_v28 = vmax.f32 %v3365_v10, 0.0 }
 0x24f   : > { %v2664_v7 = vmax.f32 %v1830_v19, %v7723_v36  ;;  %5568 = vmatprep.mubr.msk.f32.mxu0 %vm807_vm0, %v610_v52  ;;  %v3542_v36 = vmax.f32 %v3366_v37, 0.0 }
 0x250   : > { %v3367_v26 = vadd.f32 %v3095_v51, %v2663_v60  ;;  %v611_v60 = vld [vmem:[%s9760_s1 + $0x6e0] sm:$0xff] }
 0x251   : > { %v3368_v29 = vadd.f32 %v3095_v51, %v2664_v7  ;;  %v1834_v17 = vpop.f32.mrb[112].mxu0 }
 0x252   : > { %v3543_v59 = vmax.f32 %v3367_v26, 0.0  ;;  %v2665_v61 = vmax.f32 %v1834_v17, %v7739_v49  ;;  %v1836_v62 = vpop.f32.mrb[113].mxu0  ;;  %2151 = vmatmul.mubr.f32.gmra.mrb[218].mxu0 %v609_v3  ;;  %v614_v26 = vld [vmem:[%s9760_s1 + $0x6f8] sm:$0xff]  ;;  %v3105_v49 = vpop.permute.xlu1 %3104 }
 0x253   : > { %v3544_v19 = vmax.f32 %v3368_v29, 0.0  ;;  %v2666_v52 = vmax.f32 %v1836_v62, %v7743_v56  ;;  %5569 = vmatprep.mubr.msk.f32.mxu0 %vm807_vm0, %v612_v33  ;;  %v613_v33 = vld [vmem:[%s9760_s1 + $0x6f0] sm:$0xff] }
 0x254   : > { %v8361_v42 = vpack.c.bf16 %v3543_v59, %v3541_v28  ;;  %v3369_v29 = vadd.f32 %v3100_v24, %v2665_v61  ;;  %v616_v28 = vld [vmem:[%s9760_s1 + $0x708] sm:$0xff] }
 0x255   : > { %v1840_v51 = vpop.f32.mrb[114].mxu0  ;;  %v8366_v3 = vpack.c.bf16 %v3544_v19, %v3542_v36  ;;  %v3370_v37 = vadd.f32 %v3100_v24, %v2666_v52 }
 0x256   : > { %v2667_v56 = vmax.f32 %v1840_v51, %v7756_v18  ;;  %v1842_v10 = vpop.f32.mrb[115].mxu0  ;;  %2157 = vmatmul.mubr.f32.gmra.mrb[220].mxu0 %v611_v60  ;;  %v3545_v62 = vmax.f32 %v3369_v29, 0.0  ;;  %v3110_v60 = vpop.permute.xlu0 %3109 }
 0x257   : > { %v2668_v7 = vmax.f32 %v1842_v10, %v7760_v35  ;;  %5570 = vmatprep.mubr.msk.f32.mxu0 %vm807_vm0, %v614_v26  ;;  %v3546_v35 = vmax.f32 %v3370_v37, 0.0  ;;  %v615_v26 = vld [vmem:[%s9760_s1 + $0x700] sm:$0xff]  ;;  %v3115_v29 = vpop.permute.xlu1 %3114 }
 0x258   : > { %v3371_v17 = vadd.f32 %v3105_v49, %v2667_v56 }
 0x259   : > { %v3372_v59 = vadd.f32 %v3105_v49, %v2668_v7  ;;  %v1846_v61 = vpop.f32.mrb[116].mxu0  ;;  %v618_v49 = vld [vmem:[%s9760_s1 + $0x718] sm:$0xff] }
 0x25a   : > { %v3547_v18 = vmax.f32 %v3371_v17, 0.0  ;;  %v2669_v36 = vmax.f32 %v1846_v61, %v7773_v5  ;;  %v1848_v19 = vpop.f32.mrb[117].mxu0  ;;  %2163 = vmatmul.mubr.f32.gmra.mrb[222].mxu0 %v613_v33  ;;  %v617_v17 = vld [vmem:[%s9760_s1 + $0x710] sm:$0xff] }
 0x25b   : > { %v3548_v52 = vmax.f32 %v3372_v59, 0.0  ;;  %v2670_v24 = vmax.f32 %v1848_v19, %v7777_v20  ;;  %5571 = vmatprep.mubr.msk.f32.mxu0 %vm807_vm0, %v616_v28  ;;  %v620_v59 = vld [vmem:[%s9760_s1 + $0x728] sm:$0xff] }
 0x25c   : > { %v8383_v51 = vpack.c.bf16 %v3547_v18, %v3545_v62  ;;  %v3373_v10 = vadd.f32 %v3110_v60, %v2669_v36 }
 0x25d   : > { %v1852_v5 = vpop.f32.mrb[118].mxu0  ;;  %v8388_v56 = vpack.c.bf16 %v3548_v52, %v3546_v35  ;;  %v3374_v7 = vadd.f32 %v3110_v60, %v2670_v24  ;;  %v3120_v24 = vpop.permute.xlu0 %3119  ;;  %v619_v60 = vld [vmem:[%s9760_s1 + $0x720] sm:$0xff] }
 0x25e   : > { %v2671_v20 = vmax.f32 %v1852_v5, %v7793_v45  ;;  %v1854_v37 = vpop.f32.mrb[119].mxu0  ;;  %2169 = vmatmul.mubr.f32.gmra.mrb[224].mxu0 %v615_v26  ;;  %v3549_v18 = vmax.f32 %v3373_v10, 0.0  ;;  %v3125_v5 = vpop.permute.xlu1 %3124 }
 0x25f   : > { %v2672_v33 = vmax.f32 %v1854_v37, %v7797_v21  ;;  %5572 = vmatprep.mubr.msk.f32.mxu0 %vm807_vm0, %v618_v49  ;;  %v3550_v21 = vmax.f32 %v3374_v7, 0.0  ;;  %v622_v49 = vld [vmem:[%s9760_s1 + $0x738] sm:$0xff] }
 0x260   : > { %v3375_v28 = vadd.f32 %v3115_v29, %v2671_v20 }
 0x261   : > { %v3376_v61 = vadd.f32 %v3115_v29, %v2672_v33  ;;  %v1858_v62 = vpop.f32.mrb[120].mxu0  ;;  %v621_v33 = vld [vmem:[%s9760_s1 + $0x730] sm:$0xff] }
 0x262   : > { %v3551_v45 = vmax.f32 %v3375_v28, 0.0  ;;  %v2673_v36 = vmax.f32 %v1858_v62, %v7813_v6  ;;  %v1860_v19 = vpop.f32.mrb[121].mxu0  ;;  %2175 = vmatmul.mubr.f32.gmra.mrb[226].mxu0 %v617_v17  ;;  %v624_v28 = vld [vmem:[%s9760_s1 + $0x748] sm:$0xff] }
 0x263   : > { %v3552_v35 = vmax.f32 %v3376_v61, 0.0  ;;  %v2674_v52 = vmax.f32 %v1860_v19, %v7817_v50  ;;  %5573 = vmatprep.mubr.msk.f32.mxu0 %vm807_vm0, %v620_v59 }
 0x264   : > { %v8405_v26 = vpack.c.bf16 %v3551_v45, %v3549_v18  ;;  %v3377_v10 = vadd.f32 %v3120_v24, %v2673_v36 }
 0x265   : > { %v1864_v6 = vpop.f32.mrb[122].mxu0  ;;  %v8410_v29 = vpack.c.bf16 %v3552_v35, %v3550_v21  ;;  %v3378_v37 = vadd.f32 %v3120_v24, %v2674_v52  ;;  %v3130_v21 = vpop.permute.xlu0 %3129  ;;  %v623_v35 = vld [vmem:[%s9760_s1 + $0x740] sm:$0xff]  ;;  %v626_v24 = vld [vmem:[%s9760_s1 + $0x758] sm:$0xff] }
 0x266   : > { %v2675_v50 = vmax.f32 %v1864_v6, %v7836_v27  ;;  %v1866_v20 = vpop.f32.mrb[123].mxu0  ;;  %2181 = vmatmul.mubr.f32.gmra.mrb[228].mxu0 %v619_v60  ;;  %v3553_v62 = vmax.f32 %v3377_v10, 0.0  ;;  %v3135_v60 = vpop.permute.xlu1 %3134 }
 0x267   : > { %v2676_v7 = vmax.f32 %v1866_v20, %v7840_v40  ;;  %5574 = vmatprep.mubr.msk.f32.mxu0 %vm807_vm0, %v622_v49  ;;  %v3554_v40 = vmax.f32 %v3378_v37, 0.0  ;;  %v625_v20 = vld [vmem:[%s9760_s1 + $0x750] sm:$0xff] }
 0x268   : > { %v3379_v17 = vadd.f32 %v3125_v5, %v2675_v50 }
 0x269   : > { %v3380_v59 = vadd.f32 %v3125_v5, %v2676_v7  ;;  %v1870_v61 = vpop.f32.mrb[124].mxu0  ;;  %v628_v7 = vld [vmem:[%s9760_s1 + $0x768] sm:$0xff] }
 0x26a   : > { %v3555_v27 = vmax.f32 %v3379_v17, 0.0  ;;  %v2677_v18 = vmax.f32 %v1870_v61, %v7859_v11  ;;  %v1872_v45 = vpop.f32.mrb[125].mxu0  ;;  %2187 = vmatmul.mubr.f32.gmra.mrb[230].mxu0 %v621_v33 }
 0x26b   : > { %v3556_v36 = vmax.f32 %v3380_v59, 0.0  ;;  %v2678_v19 = vmax.f32 %v1872_v45, %v7863_v34  ;;  %5575 = vmatprep.mubr.msk.f32.mxu0 %vm807_vm0, %v624_v28  ;;  %v627_v45 = vld [vmem:[%s9760_s1 + $0x760] sm:$0xff] }
 0x26c   : > { %v8427_v52 = vpack.c.bf16 %v3555_v27, %v3553_v62  ;;  %v3381_v6 = vadd.f32 %v3130_v21, %v2677_v18  ;;  %v3140_v18 = vpop.permute.xlu0 %3139 }
 0x26d   : > { %v1876_v11 = vpop.f32.mrb[126].mxu0  ;;  %v8432_v49 = vpack.c.bf16 %v3556_v36, %v3554_v40  ;;  %v3382_v10 = vadd.f32 %v3130_v21, %v2678_v19  ;;  %v630_v36 = vld [vmem:[%s9760_s1 + $0x778] sm:$0xff]  ;;  %v3145_v19 = vpop.permute.xlu1 %3144 }
 0x26e   : > { %v2679_v34 = vmax.f32 %v1876_v11, %v7882_v12  ;;  %v1878_v5 = vpop.f32.mrb[127].mxu0  ;;  %2193 = vmatmul.mubr.f32.gmra.mrb[232].mxu0 %v623_v35  ;;  %v3557_v28 = vmax.f32 %v3381_v6, 0.0  ;;  %v629_v6 = vld [vmem:[%s9760_s1 + $0x770] sm:$0xff] }
 0x26f   : > { %v2680_v50 = vmax.f32 %v1878_v5, %v7886_v55  ;;  %5576 = vmatprep.mubr.msk.f32.mxu0 %vm807_vm0, %v626_v24  ;;  %v3558_v55 = vmax.f32 %v3382_v10, 0.0  ;;  %v632_v5 = vld [vmem:[%s9760_s1 + $0x788] sm:$0xff] }
 0x270   : > { %v3383_v37 = vadd.f32 %v3135_v60, %v2679_v34 }
 0x271   : > { %v3384_v33 = vadd.f32 %v3135_v60, %v2680_v50  ;;  %v1882_v17 = vpop.f32.mrb[128].mxu0 }
 0x272   : > { %v3559_v12 = vmax.f32 %v3383_v37, 0.0  ;;  %v2681_v59 = vmax.f32 %v1882_v17, %v7905_v48  ;;  %v1884_v61 = vpop.f32.mrb[129].mxu0  ;;  %2199 = vmatmul.mubr.f32.gmra.mrb[234].mxu0 %v625_v20 }
 0x273   : > { %v3560_v62 = vmax.f32 %v3384_v33, 0.0  ;;  %v2682_v27 = vmax.f32 %v1884_v61, %v7909_v22  ;;  %5577 = vmatprep.mubr.msk.f32.mxu0 %vm807_vm0, %v628_v7  ;;  %v634_v61 = vld [vmem:[%s9760_s1 + $0x798] sm:$0xff] }
 0x274   : > { %v8449_v40 = vpack.c.bf16 %v3559_v12, %v3557_v28  ;;  %v3385_v35 = vadd.f32 %v3140_v18, %v2681_v59  ;;  %v3150_v28 = vpop.permute.xlu0 %3149  ;;  %v631_v12 = vld [vmem:[%s9760_s1 + $0x780] sm:$0xff] }
 0x275   : > { %v1888_v48 = vpop.f32.mrb[130].mxu0  ;;  %v8454_v21 = vpack.c.bf16 %v3560_v62, %v3558_v55  ;;  %v3386_v11 = vadd.f32 %v3140_v18, %v2682_v27  ;;  %v3155_v55 = vpop.permute.xlu1 %3154 }
 0x276   : > { %v2683_v22 = vmax.f32 %v1888_v48, %v7928_v32  ;;  %v1890_v24 = vpop.f32.mrb[131].mxu0  ;;  %2205 = vmatmul.mubr.f32.gmra.mrb[236].mxu0 %v627_v45  ;;  %v3561_v20 = vmax.f32 %v3385_v35, 0.0  ;;  %v633_v48 = vld [vmem:[%s9760_s1 + $0x790] sm:$0xff]  ;;  %v636_v35 = vld [vmem:[%s9760_s1 + $0x7a8] sm:$0xff] }
 0x277   : > { %v2684_v60 = vmax.f32 %v1890_v24, %v7932_v15  ;;  %5578 = vmatprep.mubr.msk.f32.mxu0 %vm807_vm0, %v630_v36  ;;  %v3562_v15 = vmax.f32 %v3386_v11, 0.0 }
 0x278   : > { %v3387_v34 = vadd.f32 %v3145_v19, %v2683_v22 }
 0x279   : > { %v3388_v10 = vadd.f32 %v3145_v19, %v2684_v60  ;;  %v1894_v50 = vpop.f32.mrb[132].mxu0 }
 0x27a   : > { %v3563_v32 = vmax.f32 %v3387_v34, 0.0  ;;  %v2685_v37 = vmax.f32 %v1894_v50, %v7951_v43  ;;  %v1896_v7 = vpop.f32.mrb[133].mxu0  ;;  %2211 = vmatmul.mubr.f32.gmra.mrb[238].mxu0 %v629_v6  ;;  %v635_v50 = vld [vmem:[%s9760_s1 + $0x7a0] sm:$0xff] }
 0x27b   : > { %v3564_v33 = vmax.f32 %v3388_v10, 0.0  ;;  %v2686_v17 = vmax.f32 %v1896_v7, %v7955_v39  ;;  %5579 = vmatprep.mubr.msk.f32.mxu0 %vm807_vm0, %v632_v5  ;;  %v3160_v10 = vpop.permute.xlu0 %3159 }
 0x27c   : > { %v8471_v59 = vpack.c.bf16 %v3563_v32, %v3561_v20  ;;  %v3389_v27 = vadd.f32 %v3150_v28, %v2685_v37  ;;  %v638_v32 = vld [vmem:[%s9760_s1 + $0x7b8] sm:$0xff]  ;;  %v3165_v37 = vpop.permute.xlu1 %3164 }
 0x27d   : > { %v1900_v43 = vpop.f32.mrb[134].mxu0  ;;  %v8476_v62 = vpack.c.bf16 %v3564_v33, %v3562_v15  ;;  %v3390_v45 = vadd.f32 %v3150_v28, %v2686_v17 }
 0x27e   : > { %v2687_v39 = vmax.f32 %v1900_v43, %v7974_v44  ;;  %v1902_v18 = vpop.f32.mrb[135].mxu0  ;;  %2217 = vmatmul.mubr.f32.gmra.mrb[240].mxu0 %v631_v12  ;;  %v3565_v11 = vmax.f32 %v3389_v27, 0.0  ;;  %v637_v12 = vld [vmem:[%s9760_s1 + $0x7b0] sm:$0xff]  ;;  %v640_v43 = vld [vmem:[%s9760_s1 + $0x7c8] sm:$0xff] }
 0x27f   : > { %v2688_v36 = vmax.f32 %v1902_v18, %v7978_v8  ;;  %5580 = vmatprep.mubr.msk.f32.mxu0 %vm807_vm0, %v634_v61  ;;  %v3566_v8 = vmax.f32 %v3390_v45, 0.0 }
 0x280   : > { %v3391_v19 = vadd.f32 %v3155_v55, %v2687_v39 }
 0x281   : > { %v3392_v22 = vadd.f32 %v3155_v55, %v2688_v36  ;;  %v1906_v24 = vpop.f32.mrb[136].mxu0 }
 0x282   : > { %v3567_v44 = vmax.f32 %v3391_v19, 0.0  ;;  %v2689_v60 = vmax.f32 %v1906_v24, %v7997_v38  ;;  %v1908_v6 = vpop.f32.mrb[137].mxu0  ;;  %2223 = vmatmul.mubr.f32.gmra.mrb[242].mxu0 %v633_v48  ;;  %v3170_v19 = vpop.permute.xlu0 %3169  ;;  %v642_v24 = vld [vmem:[%s9760_s1 + $0x7d8] sm:$0xff] }
 0x283   : > { %v3568_v34 = vmax.f32 %v3392_v22, 0.0  ;;  %v2690_v5 = vmax.f32 %v1908_v6, %v8001_v2  ;;  %5581 = vmatprep.mubr.msk.f32.mxu0 %vm807_vm0, %v636_v35  ;;  %v639_v35 = vld [vmem:[%s9760_s1 + $0x7c0] sm:$0xff] }
 0x284   : > { %v8493_v20 = vpack.c.bf16 %v3567_v44, %v3565_v11  ;;  %v3393_v15 = vadd.f32 %v3160_v10, %v2689_v60  ;;  %v3175_v11 = vpop.permute.xlu1 %3174 }
 0x285   : > { %v1912_v38 = vpop.f32.mrb[138].mxu0  ;;  %v8498_v7 = vpack.c.bf16 %v3568_v34, %v3566_v8  ;;  %v3394_v17 = vadd.f32 %v3160_v10, %v2690_v5  ;;  %v641_v5 = vld [vmem:[%s9760_s1 + $0x7d0] sm:$0xff] }
 0x286   : > { %v2691_v2 = vmax.f32 %v1912_v38, %v8020_v9  ;;  %v1914_v33 = vpop.f32.mrb[139].mxu0  ;;  %2229 = vmatmul.mubr.f32.gmra.mrb[244].mxu0 %v635_v50  ;;  %v3569_v39 = vmax.f32 %v3393_v15, 0.0  ;;  %v644_v50 = vld [vmem:[%s9760_s1 + $0x7e8] sm:$0xff] }
 0x287   : > { %v2692_v28 = vmax.f32 %v1914_v33, %v8024_v25  ;;  %5582 = vmatprep.mubr.msk.f32.mxu0 %vm807_vm0, %v638_v32  ;;  %v3570_v25 = vmax.f32 %v3394_v17, 0.0 }
 0x288   : > { %v3395_v61 = vadd.f32 %v3165_v37, %v2691_v2 }
 0x289   : > { %v3396_v55 = vadd.f32 %v3165_v37, %v2692_v28  ;;  %v1918_v27 = vpop.f32.mrb[140].mxu0  ;;  %v3180_v28 = vpop.permute.xlu0 %3179 }
 0x28a   : > { %v3571_v9 = vmax.f32 %v3395_v61, 0.0  ;;  %v2693_v18 = vmax.f32 %v1918_v27, %v8043_v4  ;;  %v1920_v45 = vpop.f32.mrb[141].mxu0  ;;  %2235 = vmatmul.mubr.f32.gmra.mrb[246].mxu0 %v637_v12  ;;  %v643_v12 = vld [vmem:[%s9760_s1 + $0x7e0] sm:$0xff] }
 0x28b   : > { %v3572_v36 = vmax.f32 %v3396_v55, 0.0  ;;  %v2694_v48 = vmax.f32 %v1920_v45, %v8047_v58  ;;  %5583 = vmatprep.mubr.msk.f32.mxu0 %vm807_vm0, %v640_v43  ;;  %v646_v43 = vld [vmem:[%s9760_s1 + $0x7f8] sm:$0xff]  ;;  %v3185_v55 = vpop.permute.xlu1 %3184 }
 0x28c   : > { %v8515_v22 = vpack.c.bf16 %v3571_v9, %v3569_v39  ;;  %v3397_v60 = vadd.f32 %v3170_v19, %v2693_v18 }
 0x28d   : > { %v1924_v4 = vpop.f32.mrb[142].mxu0  ;;  %v8520_v44 = vpack.c.bf16 %v3572_v36, %v3570_v25  ;;  %v3398_v8 = vadd.f32 %v3170_v19, %v2694_v48  ;;  %v645_v25 = vld [vmem:[%s9760_s1 + $0x7f0] sm:$0xff]  ;;  %v648_v48 = vld [vmem:[%s9760_s1 + $0x808] sm:$0xff] }
 0x28e   : > { %v2695_v58 = vmax.f32 %v1924_v4, %v8066_v0  ;;  %v1926_v6 = vpop.f32.mrb[143].mxu0  ;;  %2241 = vmatmul.mubr.f32.gmra.mrb[248].mxu0 %v639_v35  ;;  %v3573_v37 = vmax.f32 %v3397_v60, 0.0 }
 0x28f   : > { %v2696_v34 = vmax.f32 %v1926_v6, %v8070_v53  ;;  %5584 = vmatprep.mubr.msk.f32.mxu0 %vm807_vm0, %v642_v24  ;;  %v3574_v53 = vmax.f32 %v3398_v8, 0.0  ;;  %v3190_v6 = vpop.permute.xlu0 %3189  ;;  %v647_v8 = vld [vmem:[%s9760_s1 + $0x800] sm:$0xff] }
 0x290   : > { %v3399_v10 = vadd.f32 %v3175_v11, %v2695_v58 }
 0x291   : > { %v3400_v32 = vadd.f32 %v3175_v11, %v2696_v34  ;;  %v1930_v38 = vpop.f32.mrb[144].mxu0 }
 0x292   : > { %v3575_v0 = vmax.f32 %v3399_v10, 0.0  ;;  %v2697_v15 = vmax.f32 %v1930_v38, %v8086_v16  ;;  %v1932_v2 = vpop.f32.mrb[145].mxu0  ;;  %2247 = vmatmul.mubr.f32.gmra.mrb[250].mxu0 %v641_v5  ;;  %v650_v5 = vld [vmem:[%s9760_s1 + $0x818] sm:$0xff]  ;;  %v3195_v10 = vpop.permute.xlu1 %3194 }
 0x293   : > { %v3576_v33 = vmax.f32 %v3400_v32, 0.0  ;;  %v2698_v17 = vmax.f32 %v1932_v2, %v8090_v30  ;;  %5585 = vmatprep.mubr.msk.f32.mxu0 %vm807_vm0, %v644_v50 }
 0x294   : > { %v8537_v61 = vpack.c.bf16 %v3575_v0, %v3573_v37  ;;  %v3401_v39 = vadd.f32 %v3180_v28, %v2697_v15  ;;  %v649_v15 = vld [vmem:[%s9760_s1 + $0x810] sm:$0xff] }
 0x295   : > { %v1936_v16 = vpop.f32.mrb[146].mxu0  ;;  %v8542_v27 = vpack.c.bf16 %v3576_v33, %v3574_v53  ;;  %v3402_v18 = vadd.f32 %v3180_v28, %v2698_v17  ;;  %v652_v53 = vld [vmem:[%s9760_s1 + $0x828] sm:$0xff] }
 0x296   : > { %v2699_v30 = vmax.f32 %v1936_v16, %v8106_v23  ;;  %v1938_v9 = vpop.f32.mrb[147].mxu0  ;;  %2253 = vmatmul.mubr.f32.gmra.mrb[252].mxu0 %v643_v12  ;;  %v3577_v24 = vmax.f32 %v3401_v39, 0.0  ;;  %v3200_v39 = vpop.permute.xlu0 %3199 }
 0x297   : > { %v2700_v45 = vmax.f32 %v1938_v9, %v8110_v14  ;;  %5586 = vmatprep.mubr.msk.f32.mxu0 %vm807_vm0, %v646_v43  ;;  %v3578_v14 = vmax.f32 %v3402_v18, 0.0  ;;  %v654_v18 = vld [vmem:[%s9760_s1 + $0x838] sm:$0xff] }
 0x298   : > { %v3403_v36 = vadd.f32 %v3185_v55, %v2699_v30  ;;  %v651_v30 = vld [vmem:[%s9760_s1 + $0x820] sm:$0xff] }
 0x299   : > { %v3404_v19 = vadd.f32 %v3185_v55, %v2700_v45  ;;  %v1942_v35 = vpop.f32.mrb[148].mxu0  ;;  %v3205_v45 = vpop.permute.xlu1 %3204 }
 0x29a   : > { %v3579_v23 = vmax.f32 %v3403_v36, 0.0  ;;  %v2701_v4 = vmax.f32 %v1942_v35, %v8123_v54  ;;  %v1944_v11 = vpop.f32.mrb[149].mxu0  ;;  %2259 = vmatmul.mubr.f32.gmra.mrb[254].mxu0 %v645_v25 }
 0x29b   : > { %v3580_v60 = vmax.f32 %v3404_v19, 0.0  ;;  %v2702_v58 = vmax.f32 %v1944_v11, %v8127_v13  ;;  %5587 = vmatprep.mubr.msk.f32.mxu0 %vm807_vm0, %v648_v48 }
 0x29c   : > { %v8559_v34 = vpack.c.bf16 %v3579_v23, %v3577_v24  ;;  %v3405_v32 = vadd.f32 %v3190_v6, %v2701_v4  ;;  %v653_v24 = vld [vmem:[%s9760_s1 + $0x830] sm:$0xff]  ;;  %v656_v4 = vld [vmem:[%s9760_s1 + $0x848] sm:$0xff] }
 0x29d   : > { %v1948_v54 = vpop.f32.mrb[150].mxu0  ;;  %v8564_v50 = vpack.c.bf16 %v3580_v60, %v3578_v14  ;;  %v3406_v37 = vadd.f32 %v3190_v6, %v2702_v58 }
 0x29e   : > { %v2703_v13 = vmax.f32 %v1948_v54, %v8140_v41  ;;  %v1950_v38 = vpop.f32.mrb[151].mxu0  ;;  %2265 = vmatmul.mubr.f32.gmra.mrb[0].mxu0 %v647_v8  ;;  %v3581_v28 = vmax.f32 %v3405_v32, 0.0  ;;  %v655_v32 = vld [vmem:[%s9760_s1 + $0x840] sm:$0xff] }
 0x29f   : > { %v2704_v0 = vmax.f32 %v1950_v38, %v8144_v47  ;;  %5588 = vmatprep.mubr.msk.f32.mxu0 %vm807_vm0, %v650_v5  ;;  %v3582_v47 = vmax.f32 %v3406_v37, 0.0  ;;  %v10016_v5 = vld [vmem:[#allocation147_spill] sm:$0xff]  ;;  %v658_v38 = vld [vmem:[%s9760_s1 + $0x858] sm:$0xff]  ;;  %v3215_v37 = vpop.permute.xlu1 %3214 }
 0x2a0   : > { %v3407_v2 = vadd.f32 %v3195_v10, %v2703_v13 }
 0x2a1   : > { %v3408_v33 = vadd.f32 %v3195_v10, %v2704_v0  ;;  %v1954_v17 = vpop.f32.mrb[152].mxu0  ;;  %v3210_v10 = vpop.permute.xlu0 %3209 }
 0x2a2   : > { %v3583_v41 = vmax.f32 %v3407_v2, 0.0  ;;  %v2705_v12 = vmax.f32 %v1954_v17, %v8157_v1  ;;  %v1956_v43 = vpop.f32.mrb[153].mxu0  ;;  %2271 = vmatmul.mubr.f32.gmra.mrb[2].mxu0 %v649_v15  ;;  %v10017_v2 = vld [vmem:[#allocation150_spill] sm:$0xff] }
 0x2a3   : > { %v3584_v16 = vmax.f32 %v3408_v33, 0.0  ;;  %v2706_v55 = vmax.f32 %v1956_v43, %v8161_v63  ;;  %5589 = vmatprep.mubr.msk.f32.mxu0 %vm807_vm0, %v652_v53 }
 0x2a4   : > { %v8581_v9 = vpack.c.bf16 %v3583_v41, %v3581_v28  ;;  %v3409_v36 = vadd.f32 %v3200_v39, %v2705_v12  ;;  %v10018_v28 = vld [vmem:[#allocation152_spill] sm:$0xff]  ;;  %v657_v12 = vld [vmem:[%s9760_s1 + $0x850] sm:$0xff] }
 0x2a5   : > { %v1960_v1 = vpop.f32.mrb[154].mxu0  ;;  %v8586_v25 = vpack.c.bf16 %v3584_v16, %v3582_v47  ;;  %v3410_v19 = vadd.f32 %v3200_v39, %v2706_v55  ;;  %v660_v47 = vld [vmem:[%s9760_s1 + $0x868] sm:$0xff] }
 0x2a6   : > { %v2707_v63 = vmax.f32 %v1960_v1, %v8174_v57  ;;  %v1962_v48 = vpop.f32.mrb[155].mxu0  ;;  %2277 = vmatmul.mubr.f32.gmra.mrb[4].mxu0 %v651_v30  ;;  %v3585_v60 = vmax.f32 %v3409_v36, 0.0 }
 0x2a7   : > { %v2708_v35 = vmax.f32 %v1962_v48, %v8178_v46  ;;  %5590 = vmatprep.mubr.msk.f32.mxu0 %vm807_vm0, %v654_v18  ;;  %v3586_v46 = vmax.f32 %v3410_v19, 0.0  ;;  %v10019_v18 = vld [vmem:[#allocation155_spill] sm:$0xff]  ;;  %v10020_v48 = vld [vmem:[#allocation157_spill] sm:$0xff] }
 0x2a8   : > { %v3411_v23 = vadd.f32 %v3205_v45, %v2707_v63 }
 0x2a9   : > { %v3412_v11 = vadd.f32 %v3205_v45, %v2708_v35  ;;  %v1966_v14 = vpop.f32.mrb[156].mxu0  ;;  %v3220_v35 = vpop.permute.xlu0 %3219 }
 0x2aa   : > { %v3587_v57 = vmax.f32 %v3411_v23, 0.0  ;;  %v2709_v58 = vmax.f32 %v1966_v14, %v8191_v31  ;;  %v1968_v6 = vpop.f32.mrb[157].mxu0  ;;  %2283 = vmatmul.mubr.f32.gmra.mrb[6].mxu0 %v653_v24  ;;  %v659_v24 = vld [vmem:[%s9760_s1 + $0x860] sm:$0xff]  ;;  %v3225_v14 = vpop.permute.xlu1 %3224 }
 0x2ab   : > { %v3588_v8 = vmax.f32 %v3412_v11, 0.0  ;;  %v2710_v54 = vmax.f32 %v1968_v6, %v10016_v5  ;;  %5591 = vmatprep.mubr.msk.f32.mxu0 %vm807_vm0, %v656_v4  ;;  %v662_v4 = vld [vmem:[%s9760_s1 + $0x878] sm:$0xff]  ;;  %v10022_v5 = vld [vmem:[#allocation162_spill] sm:$0xff] }
 0x2ac   : > { %v8603_v13 = vpack.c.bf16 %v3587_v57, %v3585_v60  ;;  %v3413_v15 = vadd.f32 %v3210_v10, %v2709_v58  ;;  %v10021_v58 = vld [vmem:[#allocation160_spill] sm:$0xff] }
 0x2ad   : > { %v1972_v31 = vpop.f32.mrb[158].mxu0  ;;  %v8608_v0 = vpack.c.bf16 %v3588_v8, %v3586_v46  ;;  %v3414_v17 = vadd.f32 %v3210_v10, %v2710_v54  ;;  %v661_v10 = vld [vmem:[%s9760_s1 + $0x870] sm:$0xff] }
 0x2ae   : > { %v2711_v53 = vmax.f32 %v1972_v31, %v10017_v2  ;;  %v1974_v33 = vpop.f32.mrb[159].mxu0  ;;  %2289 = vmatmul.mubr.f32.gmra.mrb[8].mxu0 %v655_v32  ;;  %v3589_v39 = vmax.f32 %v3413_v15, 0.0 }
 0x2af   : > { %v2712_v41 = vmax.f32 %v1974_v33, %v10018_v28  ;;  %5592 = vmatprep.mubr.msk.f32.mxu0 %vm807_vm0, %v658_v38  ;;  %v3590_v36 = vmax.f32 %v3414_v17, 0.0  ;;  %v664_v38 = vld [vmem:[%s9760_s1 + $0x888] sm:$0xff] }
 0x2b0   : > { %v3415_v43 = vadd.f32 %v3215_v37, %v2711_v53  ;;  %v10023_v53 = vld [vmem:[#allocation165_spill] sm:$0xff] }
 0x2b1   : > { %v3416_v16 = vadd.f32 %v3215_v37, %v2712_v41  ;;  %v1978_v55 = vpop.f32.mrb[160].mxu0 }
 0x2b2   : > { %v3591_v30 = vmax.f32 %v3415_v43, 0.0  ;;  %v2713_v1 = vmax.f32 %v1978_v55, %v10019_v18  ;;  %v1980_v45 = vpop.f32.mrb[161].mxu0  ;;  %2295 = vmatmul.mubr.f32.gmra.mrb[10].mxu0 %v657_v12  ;;  %v10024_v12 = vld [vmem:[#allocation167_spill] sm:$0xff]  ;;  %v3235_v18 = vpop.permute.xlu1 %3234 }
 0x2b3   : > { %v3592_v63 = vmax.f32 %v3416_v16, 0.0  ;;  %v2714_v19 = vmax.f32 %v1980_v45, %v10020_v48  ;;  %5593 = vmatprep.mubr.msk.f32.mxu0 %vm807_vm0, %v660_v47  ;;  %v3230_v47 = vpop.permute.xlu0 %3229  ;;  %v663_v16 = vld [vmem:[%s9760_s1 + $0x880] sm:$0xff] }
 0x2b4   : > { %v8625_v23 = vpack.c.bf16 %v3591_v30, %v3589_v39  ;;  %v3417_v57 = vadd.f32 %v3220_v35, %v2713_v1  ;;  %v666_v39 = vld [vmem:[%s9760_s1 + $0x898] sm:$0xff] }
 0x2b5   : > { %v1984_v11 = vpop.f32.mrb[162].mxu0  ;;  %v8630_v60 = vpack.c.bf16 %v3592_v63, %v3590_v36  ;;  %v3418_v8 = vadd.f32 %v3220_v35, %v2714_v19  ;;  %v10025_v36 = vld [vmem:[#allocation170_spill] sm:$0xff]  ;;  %v10026_v35 = vld [vmem:[#allocation172_spill] sm:$0xff] }
 0x2b6   : > { %v2715_v6 = vmax.f32 %v1984_v11, %v10021_v58  ;;  %v1986_v46 = vpop.f32.mrb[163].mxu0  ;;  %2301 = vmatmul.mubr.f32.gmra.mrb[12].mxu0 %v659_v24  ;;  %v3593_v15 = vmax.f32 %v3417_v57, 0.0 }
 0x2b7   : > { %v2716_v54 = vmax.f32 %v1986_v46, %v10022_v5  ;;  %5594 = vmatprep.mubr.msk.f32.mxu0 %vm807_vm0, %v662_v4  ;;  %v3594_v28 = vmax.f32 %v3418_v8, 0.0  ;;  %v665_v4 = vld [vmem:[%s9760_s1 + $0x890] sm:$0xff] }
 0x2b8   : > { %v3419_v32 = vadd.f32 %v3225_v14, %v2715_v6  ;;  %v10027_v8 = vld [vmem:[#allocation175_spill] sm:$0xff] }
 0x2b9   : > { %v3420_v31 = vadd.f32 %v3225_v14, %v2716_v54  ;;  %v1990_v37 = vpop.f32.mrb[164].mxu0  ;;  %v668_v14 = vld [vmem:[%s9760_s1 + $0x8a8] sm:$0xff] }
 0x2ba   : > { %v3595_v2 = vmax.f32 %v3419_v32, 0.0  ;;  %v2717_v33 = vmax.f32 %v1990_v37, %v10023_v53  ;;  %v1992_v17 = vpop.f32.mrb[165].mxu0  ;;  %2307 = vmatmul.mubr.f32.gmra.mrb[14].mxu0 %v661_v10  ;;  %v3240_v37 = vpop.permute.xlu0 %3239  ;;  %v670_v53 = vld [vmem:[%s9760_s1 + $0x8b8] sm:$0xff] }
 0x2bb   : > { %v3596_v41 = vmax.f32 %v3420_v31, 0.0  ;;  %v2718_v43 = vmax.f32 %v1992_v17, %v10024_v12  ;;  %5595 = vmatprep.mubr.msk.f32.mxu0 %vm807_vm0, %v664_v38  ;;  %v10028_v38 = vld [vmem:[#allocation177_spill] sm:$0xff]  ;;  %v3245_v17 = vpop.permute.xlu1 %3244  ;;  %v10029_v12 = vld [vmem:[#allocation180_spill] sm:$0xff] }
 0x2bc   : > { %v8647_v55 = vpack.c.bf16 %v3595_v2, %v3593_v15  ;;  %v3421_v45 = vadd.f32 %v3230_v47, %v2717_v33  ;;  %v667_v15 = vld [vmem:[%s9760_s1 + $0x8a0] sm:$0xff] }
 0x2bd   : > { %v1996_v30 = vpop.f32.mrb[166].mxu0  ;;  %v8652_v1 = vpack.c.bf16 %v3596_v41, %v3594_v28  ;;  %v3422_v19 = vadd.f32 %v3230_v47, %v2718_v43 }
 0x2be   : > { %v2719_v63 = vmax.f32 %v1996_v30, %v10025_v36  ;;  %v1998_v48 = vpop.f32.mrb[167].mxu0  ;;  %2313 = vmatmul.mubr.f32.gmra.mrb[16].mxu0 %v663_v16  ;;  %v3597_v6 = vmax.f32 %v3421_v45, 0.0  ;;  %v672_v36 = vld [vmem:[%s9760_s1 + $0x8c8] sm:$0xff] }
 0x2bf   : > { %v2720_v24 = vmax.f32 %v1998_v48, %v10026_v35  ;;  %5596 = vmatprep.mubr.msk.f32.mxu0 %vm807_vm0, %v666_v39  ;;  %v3598_v10 = vmax.f32 %v3422_v19, 0.0  ;;  %v10030_v39 = vld [vmem:[#allocation182_spill] sm:$0xff] }
 0x2c0   : > { %v3423_v11 = vadd.f32 %v3235_v18, %v2719_v63 }
 0x2c1   : > { %v3424_v57 = vadd.f32 %v3235_v18, %v2720_v24  ;;  %v2002_v58 = vpop.f32.mrb[168].mxu0  ;;  %v669_v18 = vld [vmem:[%s9760_s1 + $0x8b0] sm:$0xff]  ;;  %v10031_v24 = vld [vmem:[#allocation184_spill] sm:$0xff] }
 0x2c2   : > { %v3599_v46 = vmax.f32 %v3423_v11, 0.0  ;;  %v2721_v5 = vmax.f32 %v2002_v58, %v10027_v8  ;;  %v2004_v54 = vpop.f32.mrb[169].mxu0  ;;  %2319 = vmatmul.mubr.f32.gmra.mrb[18].mxu0 %v665_v4  ;;  %v10032_v58 = vld [vmem:[#allocation185_spill] sm:$0xff] }
 0x2c3   : > { %v3600_v32 = vmax.f32 %v3424_v57, 0.0  ;;  %v2722_v31 = vmax.f32 %v2004_v54, %v10028_v38  ;;  %5597 = vmatprep.mubr.msk.f32.mxu0 %vm807_vm0, %v668_v14  ;;  %v671_v8 = vld [vmem:[%s9760_s1 + $0x8c0] sm:$0xff] }
 0x2c4   : > { %v8669_v2 = vpack.c.bf16 %v3599_v46, %v3597_v6  ;;  %v3425_v41 = vadd.f32 %v3240_v37, %v2721_v5  ;;  %v3250_v46 = vpop.permute.xlu0 %3249 }
 0x2c5   : > { %v2008_v33 = vpop.f32.mrb[170].mxu0  ;;  %v8674_v28 = vpack.c.bf16 %v3600_v32, %v3598_v10  ;;  %v3426_v16 = vadd.f32 %v3240_v37, %v2722_v31  ;;  %v3255_v10 = vpop.permute.xlu1 %3254  ;;  %v10033_v31 = vld [vmem:[#allocation186_spill] sm:$0xff] }
 0x2c6   : > { %v2723_v43 = vmax.f32 %v2008_v33, %v10029_v12  ;;  %v2010_v47 = vpop.f32.mrb[171].mxu0  ;;  %2325 = vmatmul.mubr.f32.gmra.mrb[20].mxu0 %v667_v15  ;;  %v3601_v19 = vmax.f32 %v3425_v41, 0.0  ;;  %v10034_v33 = vld [vmem:[#allocation187_spill] sm:$0xff] }
 0x2c7   : > { %v2724_v30 = vmax.f32 %v2010_v47, %v10030_v39  ;;  %5598 = vmatprep.mubr.msk.f32.mxu0 %vm807_vm0, %v670_v53  ;;  %v3602_v14 = vmax.f32 %v3426_v16, 0.0  ;;  %v10035_v39 = vld [vmem:[#allocation5_spill] sm:$0xff] }
 0x2c8   : > { %v3427_v45 = vadd.f32 %v3245_v17, %v2723_v43 }
 0x2c9   : > { %v3428_v63 = vadd.f32 %v3245_v17, %v2724_v30  ;;  %v2014_v48 = vpop.f32.mrb[172].mxu0 }
 0x2ca   : > { %v3603_v35 = vmax.f32 %v3427_v45, 0.0  ;;  %v2725_v4 = vmax.f32 %v2014_v48, %v10031_v24  ;;  %v2016_v11 = vpop.f32.mrb[173].mxu0  ;;  %2331 = vmatmul.mubr.f32.gmra.mrb[22].mxu0 %v669_v18 }
 0x2cb   : > { %v3604_v57 = vmax.f32 %v3428_v63, 0.0  ;;  %v2726_v6 = vmax.f32 %v2016_v11, %v10032_v58  ;;  %5599 = vmatprep.mubr.msk.f32.mxu0 %vm807_vm0, %v672_v36  ;;  %v10036_v63 = vld [vmem:[#allocation6_spill] sm:$0xff] }
 0x2cc   : > { %v8691_v5 = vpack.c.bf16 %v3603_v35, %v3601_v19  ;;  %v3429_v38 = vadd.f32 %v3250_v46, %v2725_v4  ;;  %v10037_v4 = vld [vmem:[#allocation17_spill] sm:$0xff] }
 0x2cd   : > { %v2020_v54 = vpop.f32.mrb[174].mxu0  ;;  %v8693_v32 = vpack.c.bf16 %v3604_v57, %v3602_v14  ;;  %v3430_v53 = vadd.f32 %v3250_v46, %v2726_v6  ;;  %v10038_v14 = vld [vmem:[#allocation7_spill] sm:$0xff]  ;;  %v10039_v46 = vld [vmem:[#allocation8_spill] sm:$0xff] }
 0x2ce   : > { %v2727_v37 = vmax.f32 %v2020_v54, %v10033_v31  ;;  %v2022_v15 = vpop.f32.mrb[175].mxu0  ;;  %2337 = vmatmul.mubr.f32.gmra.mrb[24].mxu0 %v671_v8  ;;  %v3605_v47 = vmax.f32 %v3429_v38, 0.0  ;;  %v10040_v54 = vld [vmem:[#allocation23_spill] sm:$0xff] }
 0x2cf   : > { %v2728_v17 = vmax.f32 %v2022_v15, %v10034_v33  ;;  %v3606_v45 = vmax.f32 %v3430_v53, 0.0  ;;  %v10041_v33 = vld [vmem:[#allocation9_spill] sm:$0xff] }
 0x2d0   : > { %v3431_v41 = vadd.f32 %v3255_v10, %v2727_v37  ;;  %v3610_v37 = vld [vmem:[%s9762_s3 + $0x8] sm:$0xff] }
 0x2d1   : > { %v3432_v12 = vadd.f32 %v3255_v10, %v2728_v17  ;;  %v2026_v43 = vpop.f32.mrb[176].mxu0  ;;  %3962 = vmatprep.mubr.f32.mxu1 %v3610_v37 }
 0x2d2   : > { %v3607_v16 = vmax.f32 %v3431_v41, 0.0  ;;  %v2553_v30 = vmax.f32 %v10035_v39, %v2026_v43  ;;  %v2028_v18 = vpop.f32.mrb[177].mxu0 }
 0x2d3   : > { %v3608_v36 = vmax.f32 %v3432_v12, 0.0  ;;  %v2554_v48 = vmax.f32 %v10036_v63, %v2028_v18  ;;  %v10044_v63 = vld [vmem:[#allocation11_spill] sm:$0xff] }
 0x2d4   : > { %v8699_v19 = vpack.c.bf16 %v3607_v16, %v3605_v47  ;;  %v3257_v11 = vadd.f32 %v10037_v4, %v2553_v30  ;;  %v10042_v47 = vld [vmem:[#allocation10_spill] sm:$0xff] }
 0x2d5   : > { %v2032_v35 = vpop.f32.mrb[178].mxu0  ;;  %v8701_v24 = vpack.c.bf16 %v3608_v36, %v3606_v45  ;;  %v3258_v6 = vadd.f32 %v10037_v4, %v2554_v48  ;;  %v10043_v45 = vld [vmem:[#allocation20_spill] sm:$0xff] }
 0x2d6   : > { %v2555_v57 = vmax.f32 %v10038_v14, %v2032_v35  ;;  %v2034_v58 = vpop.f32.mrb[179].mxu0  ;;  %v3433_v15 = vmax.f32 %v3257_v11, 0.0  ;;  %v10045_v11 = vld [vmem:[#allocation12_spill] sm:$0xff] }
 0x2d7   : > { %v2556_v8 = vmax.f32 %v10039_v46, %v2034_v58  ;;  %v3434_v12 = vmax.f32 %v3258_v6, 0.0 }
 0x2d8   : > { %v3259_v10 = vadd.f32 %v10040_v54, %v2555_v57  ;;  %v10046_v57 = vld [vmem:[#allocation26_spill] sm:$0xff] }
 0x2d9   : > { %v3260_v38 = vadd.f32 %v10040_v54, %v2556_v8  ;;  %v2038_v31 = vpop.f32.mrb[180].mxu0 }
 0x2da   : > { %v3435_v53 = vmax.f32 %v3259_v10, 0.0  ;;  %v2557_v17 = vmax.f32 %v10041_v33, %v2038_v31  ;;  %v2040_v41 = vpop.f32.mrb[181].mxu0  ;;  %v10047_v10 = vld [vmem:[#allocation13_spill] sm:$0xff] }
 0x2db   : > { %v3436_v43 = vmax.f32 %v3260_v38, 0.0  ;;  %v2558_v16 = vmax.f32 %v10042_v47, %v2040_v41 }
 0x2dc   : > { %v5763_v39 = vpack.c.bf16 %v3435_v53, %v3433_v15  ;;  %v3261_v36 = vadd.f32 %v10043_v45, %v2557_v17  ;;  %v10048_v53 = vld [vmem:[#allocation14_spill] sm:$0xff] }
 0x2dd   : > { %v2044_v30 = vpop.f32.mrb[182].mxu0  ;;  %v5761_v18 = vpack.c.bf16 %v3436_v43, %v3434_v12  ;;  %v3262_v4 = vadd.f32 %v10043_v45, %v2558_v16  ;;  %v10049_v43 = vld [vmem:[#allocation27_spill] sm:$0xff]  ;;  %v10051_v45 = vld [vmem:[#allocation16_spill] sm:$0xff] }
 0x2de   : > { %v2559_v48 = vmax.f32 %v10044_v63, %v2044_v30  ;;  %v2046_v35 = vpop.f32.mrb[183].mxu0  ;;  %v3437_v8 = vmax.f32 %v3261_v36, 0.0  ;;  %v10050_v16 = vld [vmem:[#allocation15_spill] sm:$0xff]  ;;  %v10052_v63 = vld [vmem:[#allocation30_spill] sm:$0xff] }
 0x2df   : > { %v2560_v14 = vmax.f32 %v10045_v11, %v2046_v35  ;;  %5762 = vmatprep.subr.bf16.mxu1 %v5761_v18  ;;  %v3438_v37 = vmax.f32 %v3262_v4, 0.0 }
 0x2e0   : > { %v3263_v58 = vadd.f32 %v10046_v57, %v2559_v48  ;;  %5764 = vmatpush1.bf16.msra.mxu1 %v5763_v39 }
 0x2e1   : > { %v3264_v6 = vadd.f32 %v10046_v57, %v2560_v14  ;;  %v2050_v46 = vpop.f32.mrb[184].mxu0  ;;  %v10053_v57 = vld [vmem:[#allocation18_spill] sm:$0xff] }
 0x2e2   : > { %v3439_v54 = vmax.f32 %v3263_v58, 0.0  ;;  %v2561_v38 = vmax.f32 %v10047_v10, %v2050_v46  ;;  %v2052_v31 = vpop.f32.mrb[185].mxu0 }
 0x2e3   : > { %v3440_v15 = vmax.f32 %v3264_v6, 0.0  ;;  %v2562_v33 = vmax.f32 %v10048_v53, %v2052_v31 }
 0x2e4   : > { %v5767_v17 = vpack.c.bf16 %v3439_v54, %v3437_v8  ;;  %v3265_v47 = vadd.f32 %v10049_v43, %v2561_v38  ;;  %v10054_v54 = vld [vmem:[#allocation19_spill] sm:$0xff] }
 0x2e5   : > { %v2056_v41 = vpop.f32.mrb[186].mxu0  ;;  %v5765_v12 = vpack.c.bf16 %v3440_v15, %v3438_v37  ;;  %v3266_v18 = vadd.f32 %v10049_v43, %v2562_v33  ;;  %v10055_v15 = vld [vmem:[#allocation33_spill] sm:$0xff]  ;;  %v10057_v43 = vld [vmem:[#allocation22_spill] sm:$0xff] }
 0x2e6   : > { %v2563_v30 = vmax.f32 %v10050_v16, %v2056_v41  ;;  %v2058_v39 = vpop.f32.mrb[187].mxu0  ;;  %v3441_v11 = vmax.f32 %v3265_v47, 0.0  ;;  %v10056_v33 = vld [vmem:[#allocation21_spill] sm:$0xff]  ;;  %v10058_v16 = vld [vmem:[#allocation36_spill] sm:$0xff] }
 0x2e7   : > { %v2564_v36 = vmax.f32 %v10051_v45, %v2058_v39  ;;  %5766 = vmatprep.subr.bf16.mxu1 %v5765_v12  ;;  %v3442_v46 = vmax.f32 %v3266_v18, 0.0 }
 0x2e8   : > { %v3267_v48 = vadd.f32 %v10052_v63, %v2563_v30  ;;  %5768 = vmatpush1.bf16.msra.mxu1 %v5767_v17 }
 0x2e9   : > { %v3268_v35 = vadd.f32 %v10052_v63, %v2564_v36  ;;  %v2062_v4 = vpop.f32.mrb[188].mxu0  ;;  %v10059_v63 = vld [vmem:[#allocation24_spill] sm:$0xff] }
 0x2ea   : > { %v3443_v14 = vmax.f32 %v3267_v48, 0.0  ;;  %v2565_v58 = vmax.f32 %v10053_v57, %v2062_v4  ;;  %v2064_v6 = vpop.f32.mrb[189].mxu0 }
 0x2eb   : > { %v3444_v8 = vmax.f32 %v3268_v35, 0.0  ;;  %v2566_v10 = vmax.f32 %v10054_v54, %v2064_v6 }
 0x2ec   : > { %v5771_v38 = vpack.c.bf16 %v3443_v14, %v3441_v11  ;;  %v3269_v53 = vadd.f32 %v10055_v15, %v2565_v58  ;;  %v10060_v14 = vld [vmem:[#allocation25_spill] sm:$0xff] }
 0x2ed   : > { %v2068_v31 = vpop.f32.mrb[190].mxu0  ;;  %v5769_v37 = vpack.c.bf16 %v3444_v8, %v3442_v46  ;;  %v3270_v12 = vadd.f32 %v10055_v15, %v2566_v10  ;;  %v10061_v8 = vld [vmem:[#allocation37_spill] sm:$0xff]  ;;  %v10062_v10 = vld [vmem:[#allocation28_spill] sm:$0xff] }
 0x2ee   : > { %v2567_v41 = vmax.f32 %v10056_v33, %v2068_v31  ;;  %v2070_v17 = vpop.f32.mrb[191].mxu0  ;;  %v3445_v45 = vmax.f32 %v3269_v53, 0.0  ;;  %v10063_v15 = vld [vmem:[#allocation29_spill] sm:$0xff]  ;;  %v10064_v33 = vld [vmem:[#allocation40_spill] sm:$0xff] }
 0x2ef   : > { %v2568_v47 = vmax.f32 %v10057_v43, %v2070_v17  ;;  %5770 = vmatprep.subr.bf16.mxu1 %v5769_v37  ;;  %v3446_v4 = vmax.f32 %v3270_v12, 0.0 }
 0x2f0   : > { %v3271_v30 = vadd.f32 %v10058_v16, %v2567_v41  ;;  %5772 = vmatpush1.bf16.msra.mxu1 %v5771_v38 }
 0x2f1   : > { %v3272_v39 = vadd.f32 %v10058_v16, %v2568_v47  ;;  %v2074_v18 = vpop.f32.mrb[192].mxu0  ;;  %v10065_v16 = vld [vmem:[#allocation31_spill] sm:$0xff] }
 0x2f2   : > { %v3447_v36 = vmax.f32 %v3271_v30, 0.0  ;;  %v2569_v48 = vmax.f32 %v10059_v63, %v2074_v18  ;;  %v2076_v35 = vpop.f32.mrb[193].mxu0 }
 0x2f3   : > { %v3448_v11 = vmax.f32 %v3272_v39, 0.0  ;;  %v2570_v57 = vmax.f32 %v10060_v14, %v2076_v35 }
 0x2f4   : > { %v5775_v58 = vpack.c.bf16 %v3447_v36, %v3445_v45  ;;  %v3273_v54 = vadd.f32 %v10061_v8, %v2569_v48  ;;  %v10066_v36 = vld [vmem:[#allocation32_spill] sm:$0xff] }
 0x2f5   : > { %v2080_v6 = vpop.f32.mrb[194].mxu0  ;;  %v5773_v46 = vpack.c.bf16 %v3448_v11, %v3446_v4  ;;  %v3274_v37 = vadd.f32 %v10061_v8, %v2570_v57  ;;  %v10067_v11 = vld [vmem:[#allocation43_spill] sm:$0xff]  ;;  %v10068_v57 = vld [vmem:[#allocation34_spill] sm:$0xff] }
 0x2f6   : > { %v2571_v31 = vmax.f32 %v10062_v10, %v2080_v6  ;;  %v2082_v38 = vpop.f32.mrb[195].mxu0  ;;  %v3449_v43 = vmax.f32 %v3273_v54, 0.0  ;;  %v10069_v8 = vld [vmem:[#allocation35_spill] sm:$0xff]  ;;  %v10070_v10 = vld [vmem:[#allocation46_spill] sm:$0xff] }
 0x2f7   : > { %v2572_v53 = vmax.f32 %v10063_v15, %v2082_v38  ;;  %5774 = vmatprep.subr.bf16.mxu1 %v5773_v46  ;;  %v3450_v18 = vmax.f32 %v3274_v37, 0.0 }
 0x2f8   : > { %v3275_v41 = vadd.f32 %v10064_v33, %v2571_v31  ;;  %5776 = vmatpush1.bf16.msra.mxu1 %v5775_v58 }
 0x2f9   : > { %v3276_v17 = vadd.f32 %v10064_v33, %v2572_v53  ;;  %v2086_v12 = vpop.f32.mrb[196].mxu0  ;;  %v10071_v33 = vld [vmem:[#allocation38_spill] sm:$0xff] }
 0x2fa   : > { %v3451_v47 = vmax.f32 %v3275_v41, 0.0  ;;  %v2573_v30 = vmax.f32 %v10065_v16, %v2086_v12  ;;  %v2088_v39 = vpop.f32.mrb[197].mxu0 }
 0x2fb   : > { %v3452_v45 = vmax.f32 %v3276_v17, 0.0  ;;  %v2574_v63 = vmax.f32 %v10066_v36, %v2088_v39 }
 0x2fc   : > { %v5779_v48 = vpack.c.bf16 %v3451_v47, %v3449_v43  ;;  %v3277_v14 = vadd.f32 %v10067_v11, %v2573_v30  ;;  %v10072_v47 = vld [vmem:[#allocation39_spill] sm:$0xff] }
 0x2fd   : > { %v2092_v35 = vpop.f32.mrb[198].mxu0  ;;  %v5777_v4 = vpack.c.bf16 %v3452_v45, %v3450_v18  ;;  %v3278_v46 = vadd.f32 %v10067_v11, %v2574_v63  ;;  %v10073_v45 = vld [vmem:[#allocation47_spill] sm:$0xff]  ;;  %v10074_v63 = vld [vmem:[#allocation41_spill] sm:$0xff]  ;;  %v10075_v11 = vld [vmem:[#allocation42_spill] sm:$0xff] }
 0x2fe   : > { %v2575_v6 = vmax.f32 %v10068_v57, %v2092_v35  ;;  %v2094_v58 = vpop.f32.mrb[199].mxu0  ;;  %v3453_v15 = vmax.f32 %v3277_v14, 0.0  ;;  %v10076_v57 = vld [vmem:[#allocation50_spill] sm:$0xff] }
 0x2ff   : > { %v2576_v54 = vmax.f32 %v10069_v8, %v2094_v58  ;;  %5778 = vmatprep.subr.bf16.mxu1 %v5777_v4  ;;  %v3454_v12 = vmax.f32 %v3278_v46, 0.0 }
 0x300   : > { %v3279_v31 = vadd.f32 %v10070_v10, %v2575_v6  ;;  %5780 = vmatpush1.bf16.msra.mxu1 %v5779_v48 }
 0x301   : > { %v3280_v38 = vadd.f32 %v10070_v10, %v2576_v54  ;;  %v2098_v37 = vpop.f32.mrb[200].mxu0  ;;  %v10077_v10 = vld [vmem:[#allocation44_spill] sm:$0xff] }
 0x302   : > { %v3455_v53 = vmax.f32 %v3279_v31, 0.0  ;;  %v2577_v41 = vmax.f32 %v10071_v33, %v2098_v37  ;;  %v2100_v17 = vpop.f32.mrb[201].mxu0 }
 0x303   : > { %v3456_v43 = vmax.f32 %v3280_v38, 0.0  ;;  %v2578_v16 = vmax.f32 %v10072_v47, %v2100_v17 }
 0x304   : > { %v5783_v30 = vpack.c.bf16 %v3455_v53, %v3453_v15  ;;  %v3281_v36 = vadd.f32 %v10073_v45, %v2577_v41  ;;  %v10078_v53 = vld [vmem:[#allocation45_spill] sm:$0xff] }
 0x305   : > { %v2104_v39 = vpop.f32.mrb[202].mxu0  ;;  %v5781_v18 = vpack.c.bf16 %v3456_v43, %v3454_v12  ;;  %v3282_v4 = vadd.f32 %v10073_v45, %v2578_v16  ;;  %v10079_v43 = vld [vmem:[#allocation53_spill] sm:$0xff]  ;;  %v10080_v16 = vld [vmem:[#allocation48_spill] sm:$0xff] }
 0x306   : > { %v2579_v35 = vmax.f32 %v10074_v63, %v2104_v39  ;;  %v2106_v48 = vpop.f32.mrb[203].mxu0  ;;  %v3457_v8 = vmax.f32 %v3281_v36, 0.0  ;;  %v10081_v45 = vld [vmem:[#allocation49_spill] sm:$0xff]  ;;  %v10082_v63 = vld [vmem:[#allocation56_spill] sm:$0xff] }
 0x307   : > { %v2580_v14 = vmax.f32 %v10075_v11, %v2106_v48  ;;  %5782 = vmatprep.subr.bf16.mxu1 %v5781_v18  ;;  %v3458_v37 = vmax.f32 %v3282_v4, 0.0 }
 0x308   : > { %v3283_v6 = vadd.f32 %v10076_v57, %v2579_v35  ;;  %5784 = vmatpush1.bf16.msra.mxu1 %v5783_v30 }
 0x309   : > { %v3284_v58 = vadd.f32 %v10076_v57, %v2580_v14  ;;  %v2110_v46 = vpop.f32.mrb[204].mxu0  ;;  %v10083_v57 = vld [vmem:[#allocation51_spill] sm:$0xff] }
 0x30a   : > { %v3459_v54 = vmax.f32 %v3283_v6, 0.0  ;;  %v2581_v31 = vmax.f32 %v10077_v10, %v2110_v46  ;;  %v2112_v38 = vpop.f32.mrb[205].mxu0 }
 0x30b   : > { %v3460_v15 = vmax.f32 %v3284_v58, 0.0  ;;  %v2582_v33 = vmax.f32 %v10078_v53, %v2112_v38 }
 0x30c   : > { %v5787_v41 = vpack.c.bf16 %v3459_v54, %v3457_v8  ;;  %v3285_v47 = vadd.f32 %v10079_v43, %v2581_v31  ;;  %v10084_v54 = vld [vmem:[#allocation52_spill] sm:$0xff] }
 0x30d   : > { %v2116_v17 = vpop.f32.mrb[206].mxu0  ;;  %v5785_v12 = vpack.c.bf16 %v3460_v15, %v3458_v37  ;;  %v3286_v18 = vadd.f32 %v10079_v43, %v2582_v33  ;;  %v10085_v15 = vld [vmem:[#allocation57_spill] sm:$0xff]  ;;  %v10086_v33 = vld [vmem:[#allocation54_spill] sm:$0xff]  ;;  %v10087_v43 = vld [vmem:[#allocation55_spill] sm:$0xff] }
 0x30e   : > { %v2583_v39 = vmax.f32 %v10080_v16, %v2116_v17  ;;  %v2118_v30 = vpop.f32.mrb[207].mxu0  ;;  %v3461_v11 = vmax.f32 %v3285_v47, 0.0  ;;  %v10088_v16 = vld [vmem:[#allocation60_spill] sm:$0xff] }
 0x30f   : > { %v2584_v36 = vmax.f32 %v10081_v45, %v2118_v30  ;;  %5786 = vmatprep.subr.bf16.mxu1 %v5785_v12  ;;  %v3462_v46 = vmax.f32 %v3286_v18, 0.0 }
 0x310   : > { %v3287_v35 = vadd.f32 %v10082_v63, %v2583_v39  ;;  %5788 = vmatpush1.bf16.msra.mxu1 %v5787_v41 }
 0x311   : > { %v3288_v48 = vadd.f32 %v10082_v63, %v2584_v36  ;;  %v2122_v4 = vpop.f32.mrb[208].mxu0  ;;  %v10089_v63 = vld [vmem:[#allocation58_spill] sm:$0xff] }
 0x312   : > { %v3463_v14 = vmax.f32 %v3287_v35, 0.0  ;;  %v2585_v6 = vmax.f32 %v10083_v57, %v2122_v4  ;;  %v2124_v58 = vpop.f32.mrb[209].mxu0 }
 0x313   : > { %v3464_v8 = vmax.f32 %v3288_v48, 0.0  ;;  %v2586_v10 = vmax.f32 %v10084_v54, %v2124_v58 }
 0x314   : > { %v5791_v31 = vpack.c.bf16 %v3463_v14, %v3461_v11  ;;  %v3289_v53 = vadd.f32 %v10085_v15, %v2585_v6  ;;  %v10090_v14 = vld [vmem:[#allocation59_spill] sm:$0xff] }
 0x315   : > { %v2128_v38 = vpop.f32.mrb[210].mxu0  ;;  %v5789_v37 = vpack.c.bf16 %v3464_v8, %v3462_v46  ;;  %v3290_v12 = vadd.f32 %v10085_v15, %v2586_v10  ;;  %v10091_v8 = vld [vmem:[#allocation63_spill] sm:$0xff]  ;;  %v10092_v10 = vld [vmem:[#allocation61_spill] sm:$0xff]  ;;  %v10093_v15 = vld [vmem:[#allocation62_spill] sm:$0xff] }
 0x316   : > { %v2587_v17 = vmax.f32 %v10086_v33, %v2128_v38  ;;  %v2130_v41 = vpop.f32.mrb[211].mxu0  ;;  %v3465_v45 = vmax.f32 %v3289_v53, 0.0  ;;  %v10094_v33 = vld [vmem:[#allocation66_spill] sm:$0xff] }
 0x317   : > { %v2588_v47 = vmax.f32 %v10087_v43, %v2130_v41  ;;  %5790 = vmatprep.subr.bf16.mxu1 %v5789_v37  ;;  %v3466_v4 = vmax.f32 %v3290_v12, 0.0 }
 0x318   : > { %v3291_v39 = vadd.f32 %v10088_v16, %v2587_v17  ;;  %5792 = vmatpush1.bf16.msra.mxu1 %v5791_v31 }
 0x319   : > { %v3292_v30 = vadd.f32 %v10088_v16, %v2588_v47  ;;  %v2134_v18 = vpop.f32.mrb[212].mxu0  ;;  %v10095_v16 = vld [vmem:[#allocation64_spill] sm:$0xff] }
 0x31a   : > { %v3467_v36 = vmax.f32 %v3291_v39, 0.0  ;;  %v2589_v35 = vmax.f32 %v10089_v63, %v2134_v18  ;;  %v2136_v48 = vpop.f32.mrb[213].mxu0 }
 0x31b   : > { %v3468_v11 = vmax.f32 %v3292_v30, 0.0  ;;  %v2590_v57 = vmax.f32 %v10090_v14, %v2136_v48 }
 0x31c   : > { %v5795_v6 = vpack.c.bf16 %v3467_v36, %v3465_v45  ;;  %v3293_v54 = vadd.f32 %v10091_v8, %v2589_v35  ;;  %v10096_v36 = vld [vmem:[#allocation65_spill] sm:$0xff] }
 0x31d   : > { %v2140_v58 = vpop.f32.mrb[214].mxu0  ;;  %v5793_v46 = vpack.c.bf16 %v3468_v11, %v3466_v4  ;;  %v3294_v37 = vadd.f32 %v10091_v8, %v2590_v57  ;;  %v10097_v11 = vld [vmem:[#allocation67_spill] sm:$0xff]  ;;  %v10098_v57 = vld [vmem:[#allocation68_spill] sm:$0xff]  ;;  %v10099_v8 = vld [vmem:[#allocation70_spill] sm:$0xff] }
 0x31e   : > { %v2591_v38 = vmax.f32 %v10092_v10, %v2140_v58  ;;  %v2142_v31 = vpop.f32.mrb[215].mxu0  ;;  %v3469_v43 = vmax.f32 %v3293_v54, 0.0  ;;  %v10100_v10 = vld [vmem:[#allocation72_spill] sm:$0xff] }
 0x31f   : > { %v2592_v53 = vmax.f32 %v10093_v15, %v2142_v31  ;;  %5794 = vmatprep.subr.bf16.mxu1 %v5793_v46  ;;  %v3470_v18 = vmax.f32 %v3294_v37, 0.0 }
 0x320   : > { %v3295_v17 = vadd.f32 %v10094_v33, %v2591_v38  ;;  %5796 = vmatpush1.bf16.msra.mxu1 %v5795_v6 }
 0x321   : > { %v3296_v41 = vadd.f32 %v10094_v33, %v2592_v53  ;;  %v2146_v12 = vpop.f32.mrb[216].mxu0  ;;  %v10101_v33 = vld [vmem:[#allocation73_spill] sm:$0xff] }
 0x322   : > { %v3471_v47 = vmax.f32 %v3295_v17, 0.0  ;;  %v2593_v39 = vmax.f32 %v10095_v16, %v2146_v12  ;;  %v2148_v30 = vpop.f32.mrb[217].mxu0 }
 0x323   : > { %v3472_v45 = vmax.f32 %v3296_v41, 0.0  ;;  %v2594_v63 = vmax.f32 %v10096_v36, %v2148_v30 }
 0x324   : > { %v5799_v35 = vpack.c.bf16 %v3471_v47, %v3469_v43  ;;  %v3297_v14 = vadd.f32 %v10097_v11, %v2593_v39  ;;  %v10102_v47 = vld [vmem:[#allocation74_spill] sm:$0xff] }
 0x325   : > { %v2152_v48 = vpop.f32.mrb[218].mxu0  ;;  %v5797_v4 = vpack.c.bf16 %v3472_v45, %v3470_v18  ;;  %v3298_v46 = vadd.f32 %v10097_v11, %v2594_v63  ;;  %v10103_v45 = vld [vmem:[#allocation75_spill] sm:$0xff]  ;;  %v10104_v63 = vld [vmem:[#allocation76_spill] sm:$0xff]  ;;  %v10105_v11 = vld [vmem:[#allocation77_spill] sm:$0xff] }
 0x326   : > { %v2595_v58 = vmax.f32 %v10098_v57, %v2152_v48  ;;  %v2154_v6 = vpop.f32.mrb[219].mxu0  ;;  %v3473_v15 = vmax.f32 %v3297_v14, 0.0  ;;  %v10106_v57 = vld [vmem:[#allocation78_spill] sm:$0xff] }
 0x327   : > { %v2596_v54 = vmax.f32 %v10099_v8, %v2154_v6  ;;  %5798 = vmatprep.subr.bf16.mxu1 %v5797_v4  ;;  %v3474_v12 = vmax.f32 %v3298_v46, 0.0 }
 0x328   : > { %v3299_v38 = vadd.f32 %v10100_v10, %v2595_v58  ;;  %5800 = vmatpush1.bf16.msra.mxu1 %v5799_v35 }
 0x329   : > { %v3300_v31 = vadd.f32 %v10100_v10, %v2596_v54  ;;  %v2158_v37 = vpop.f32.mrb[220].mxu0  ;;  %v10107_v10 = vld [vmem:[#allocation79_spill] sm:$0xff] }
 0x32a   : > { %v3475_v53 = vmax.f32 %v3299_v38, 0.0  ;;  %v2597_v17 = vmax.f32 %v10101_v33, %v2158_v37  ;;  %v2160_v41 = vpop.f32.mrb[221].mxu0 }
 0x32b   : > { %v3476_v43 = vmax.f32 %v3300_v31, 0.0  ;;  %v2598_v16 = vmax.f32 %v10102_v47, %v2160_v41 }
 0x32c   : > { %v5803_v39 = vpack.c.bf16 %v3475_v53, %v3473_v15  ;;  %v3301_v36 = vadd.f32 %v10103_v45, %v2597_v17  ;;  %v10108_v53 = vld [vmem:[#allocation80_spill] sm:$0xff] }
 0x32d   : > { %v2164_v30 = vpop.f32.mrb[222].mxu0  ;;  %v5801_v18 = vpack.c.bf16 %v3476_v43, %v3474_v12  ;;  %v3302_v4 = vadd.f32 %v10103_v45, %v2598_v16  ;;  %v10109_v43 = vld [vmem:[#allocation81_spill] sm:$0xff]  ;;  %v10110_v16 = vld [vmem:[#allocation82_spill] sm:$0xff]  ;;  %v10111_v45 = vld [vmem:[#allocation83_spill] sm:$0xff] }
 0x32e   : > { %v2599_v48 = vmax.f32 %v10104_v63, %v2164_v30  ;;  %v2166_v35 = vpop.f32.mrb[223].mxu0  ;;  %v3477_v8 = vmax.f32 %v3301_v36, 0.0  ;;  %v10112_v63 = vld [vmem:[#allocation84_spill] sm:$0xff] }
 0x32f   : > { %v2600_v14 = vmax.f32 %v10105_v11, %v2166_v35  ;;  %5802 = vmatprep.subr.bf16.mxu1 %v5801_v18  ;;  %v3478_v37 = vmax.f32 %v3302_v4, 0.0 }
 0x330   : > { %v3303_v58 = vadd.f32 %v10106_v57, %v2599_v48  ;;  %5804 = vmatpush1.bf16.msra.mxu1 %v5803_v39 }
 0x331   : > { %v3304_v6 = vadd.f32 %v10106_v57, %v2600_v14  ;;  %v2170_v46 = vpop.f32.mrb[224].mxu0  ;;  %v10113_v57 = vld [vmem:[#allocation85_spill] sm:$0xff] }
 0x332   : > { %v3479_v54 = vmax.f32 %v3303_v58, 0.0  ;;  %v2601_v38 = vmax.f32 %v10107_v10, %v2170_v46  ;;  %v2172_v31 = vpop.f32.mrb[225].mxu0 }
 0x333   : > { %v3480_v15 = vmax.f32 %v3304_v6, 0.0  ;;  %v2602_v33 = vmax.f32 %v10108_v53, %v2172_v31 }
 0x334   : > { %v5807_v17 = vpack.c.bf16 %v3479_v54, %v3477_v8  ;;  %v3305_v47 = vadd.f32 %v10109_v43, %v2601_v38  ;;  %v10114_v54 = vld [vmem:[#allocation86_spill] sm:$0xff] }
 0x335   : > { %v2176_v41 = vpop.f32.mrb[226].mxu0  ;;  %v5805_v12 = vpack.c.bf16 %v3480_v15, %v3478_v37  ;;  %v3306_v18 = vadd.f32 %v10109_v43, %v2602_v33  ;;  %v10115_v15 = vld [vmem:[#allocation87_spill] sm:$0xff]  ;;  %v10116_v33 = vld [vmem:[#allocation88_spill] sm:$0xff]  ;;  %v10117_v43 = vld [vmem:[#allocation89_spill] sm:$0xff] }
 0x336   : > { %v2603_v30 = vmax.f32 %v10110_v16, %v2176_v41  ;;  %v2178_v39 = vpop.f32.mrb[227].mxu0  ;;  %v3481_v11 = vmax.f32 %v3305_v47, 0.0  ;;  %v10118_v16 = vld [vmem:[#allocation90_spill] sm:$0xff] }
 0x337   : > { %v2604_v36 = vmax.f32 %v10111_v45, %v2178_v39  ;;  %5806 = vmatprep.subr.bf16.mxu1 %v5805_v12  ;;  %v3482_v46 = vmax.f32 %v3306_v18, 0.0 }
 0x338   : > { %v3307_v48 = vadd.f32 %v10112_v63, %v2603_v30  ;;  %5808 = vmatpush1.bf16.msra.mxu1 %v5807_v17 }
 0x339   : > { %v3308_v35 = vadd.f32 %v10112_v63, %v2604_v36  ;;  %v2182_v4 = vpop.f32.mrb[228].mxu0  ;;  %v10119_v63 = vld [vmem:[#allocation91_spill] sm:$0xff] }
 0x33a   : > { %v3483_v14 = vmax.f32 %v3307_v48, 0.0  ;;  %v2605_v58 = vmax.f32 %v10113_v57, %v2182_v4  ;;  %v2184_v6 = vpop.f32.mrb[229].mxu0 }
 0x33b   : > { %v3484_v8 = vmax.f32 %v3308_v35, 0.0  ;;  %v2606_v10 = vmax.f32 %v10114_v54, %v2184_v6 }
 0x33c   : > { %v5811_v38 = vpack.c.bf16 %v3483_v14, %v3481_v11  ;;  %v3309_v53 = vadd.f32 %v10115_v15, %v2605_v58  ;;  %v10120_v14 = vld [vmem:[#allocation92_spill] sm:$0xff] }
 0x33d   : > { %v2188_v31 = vpop.f32.mrb[230].mxu0  ;;  %v5809_v37 = vpack.c.bf16 %v3484_v8, %v3482_v46  ;;  %v3310_v12 = vadd.f32 %v10115_v15, %v2606_v10  ;;  %v10121_v8 = vld [vmem:[#allocation93_spill] sm:$0xff]  ;;  %v10122_v10 = vld [vmem:[#allocation94_spill] sm:$0xff]  ;;  %v10123_v15 = vld [vmem:[#allocation95_spill] sm:$0xff] }
 0x33e   : > { %v2607_v41 = vmax.f32 %v10116_v33, %v2188_v31  ;;  %v2190_v17 = vpop.f32.mrb[231].mxu0  ;;  %v3485_v45 = vmax.f32 %v3309_v53, 0.0  ;;  %v10124_v33 = vld [vmem:[#allocation96_spill] sm:$0xff] }
 0x33f   : > { %v2608_v47 = vmax.f32 %v10117_v43, %v2190_v17  ;;  %5810 = vmatprep.subr.bf16.mxu1 %v5809_v37  ;;  %v3486_v4 = vmax.f32 %v3310_v12, 0.0 }
 0x340   : > { %v3311_v30 = vadd.f32 %v10118_v16, %v2607_v41  ;;  %5812 = vmatpush1.bf16.msra.mxu1 %v5811_v38 }
 0x341   : > { %v3312_v39 = vadd.f32 %v10118_v16, %v2608_v47  ;;  %v2194_v18 = vpop.f32.mrb[232].mxu0  ;;  %v10125_v16 = vld [vmem:[#allocation97_spill] sm:$0xff] }
 0x342   : > { %v3487_v36 = vmax.f32 %v3311_v30, 0.0  ;;  %v2609_v48 = vmax.f32 %v10119_v63, %v2194_v18  ;;  %v2196_v35 = vpop.f32.mrb[233].mxu0 }
 0x343   : > { %v3488_v11 = vmax.f32 %v3312_v39, 0.0  ;;  %v2610_v57 = vmax.f32 %v10120_v14, %v2196_v35 }
 0x344   : > { %v5815_v58 = vpack.c.bf16 %v3487_v36, %v3485_v45  ;;  %v3313_v54 = vadd.f32 %v10121_v8, %v2609_v48  ;;  %v10126_v36 = vld [vmem:[#allocation98_spill] sm:$0xff] }
 0x345   : > { %v2200_v6 = vpop.f32.mrb[234].mxu0  ;;  %v5813_v46 = vpack.c.bf16 %v3488_v11, %v3486_v4  ;;  %v3314_v37 = vadd.f32 %v10121_v8, %v2610_v57  ;;  %v10127_v11 = vld [vmem:[#allocation99_spill] sm:$0xff]  ;;  %v10128_v57 = vld [vmem:[#allocation100_spill] sm:$0xff]  ;;  %v10129_v8 = vld [vmem:[#allocation101_spill] sm:$0xff] }
 0x346   : > { %v2611_v31 = vmax.f32 %v10122_v10, %v2200_v6  ;;  %v2202_v38 = vpop.f32.mrb[235].mxu0  ;;  %v3489_v43 = vmax.f32 %v3313_v54, 0.0  ;;  %v10130_v10 = vld [vmem:[#allocation102_spill] sm:$0xff] }
 0x347   : > { %v2612_v53 = vmax.f32 %v10123_v15, %v2202_v38  ;;  %5814 = vmatprep.subr.bf16.mxu1 %v5813_v46  ;;  %v3490_v18 = vmax.f32 %v3314_v37, 0.0 }
 0x348   : > { %v3315_v41 = vadd.f32 %v10124_v33, %v2611_v31  ;;  %5816 = vmatpush1.bf16.msra.mxu1 %v5815_v58 }
 0x349   : > { %v3316_v17 = vadd.f32 %v10124_v33, %v2612_v53  ;;  %v2206_v12 = vpop.f32.mrb[236].mxu0  ;;  %v10131_v33 = vld [vmem:[#allocation103_spill] sm:$0xff] }
 0x34a   : > { %v3491_v47 = vmax.f32 %v3315_v41, 0.0  ;;  %v2613_v30 = vmax.f32 %v10125_v16, %v2206_v12  ;;  %v2208_v39 = vpop.f32.mrb[237].mxu0 }
 0x34b   : > { %v3492_v45 = vmax.f32 %v3316_v17, 0.0  ;;  %v2614_v63 = vmax.f32 %v10126_v36, %v2208_v39 }
 0x34c   : > { %v5819_v48 = vpack.c.bf16 %v3491_v47, %v3489_v43  ;;  %v3317_v14 = vadd.f32 %v10127_v11, %v2613_v30  ;;  %v10132_v47 = vld [vmem:[#allocation104_spill] sm:$0xff] }
 0x34d   : > { %v2212_v35 = vpop.f32.mrb[238].mxu0  ;;  %v5817_v4 = vpack.c.bf16 %v3492_v45, %v3490_v18  ;;  %v3318_v46 = vadd.f32 %v10127_v11, %v2614_v63  ;;  %v10133_v45 = vld [vmem:[#allocation105_spill] sm:$0xff]  ;;  %v10134_v63 = vld [vmem:[#allocation106_spill] sm:$0xff]  ;;  %v10135_v11 = vld [vmem:[#allocation107_spill] sm:$0xff] }
 0x34e   : > { %v2615_v6 = vmax.f32 %v10128_v57, %v2212_v35  ;;  %v2214_v58 = vpop.f32.mrb[239].mxu0  ;;  %v3493_v15 = vmax.f32 %v3317_v14, 0.0  ;;  %v10136_v57 = vld [vmem:[#allocation108_spill] sm:$0xff] }
 0x34f   : > { %v2616_v54 = vmax.f32 %v10129_v8, %v2214_v58  ;;  %5818 = vmatprep.subr.bf16.mxu1 %v5817_v4  ;;  %v3494_v12 = vmax.f32 %v3318_v46, 0.0  ;;  %v3609_v58 = vld [vmem:[%s9762_s3] sm:$0xff] }
 0x350   : > { %v3319_v31 = vadd.f32 %v10130_v10, %v2615_v6  ;;  %5820 = vmatpush1.bf16.msra.mxu1 %v5819_v48 }
 0x351   : > { %v3320_v38 = vadd.f32 %v10130_v10, %v2616_v54  ;;  %v2218_v37 = vpop.f32.mrb[240].mxu0  ;;  %v3616_v54 = vld [vmem:[%s9762_s3 + $0x38] sm:$0xff] }
 0x352   : > { %v3495_v53 = vmax.f32 %v3319_v31, 0.0  ;;  %v2617_v41 = vmax.f32 %v10131_v33, %v2218_v37  ;;  %v2220_v17 = vpop.f32.mrb[241].mxu0 }
 0x353   : > { %v3496_v43 = vmax.f32 %v3320_v38, 0.0  ;;  %v2618_v16 = vmax.f32 %v10132_v47, %v2220_v17  ;;  %v10137_v38 = vld [vmem:[#allocation109_spill] sm:$0xff] }
 0x354   : > { %v5823_v30 = vpack.c.bf16 %v3495_v53, %v3493_v15  ;;  %v3321_v36 = vadd.f32 %v10133_v45, %v2617_v41  ;;  %v10138_v41 = vld [vmem:[#allocation110_spill] sm:$0xff] }
 0x355   : > { %v2224_v39 = vpop.f32.mrb[242].mxu0  ;;  %v5821_v18 = vpack.c.bf16 %v3496_v43, %v3494_v12  ;;  %v3322_v4 = vadd.f32 %v10133_v45, %v2618_v16  ;;  %v3615_v43 = vld [vmem:[%s9762_s3 + $0x30] sm:$0xff]  ;;  %v10140_v45 = vld [vmem:[#allocation112_spill] sm:$0xff] }
 0x356   : > { %v2619_v35 = vmax.f32 %v10134_v63, %v2224_v39  ;;  %v2226_v48 = vpop.f32.mrb[243].mxu0  ;;  %v3497_v10 = vmax.f32 %v3321_v36, 0.0  ;;  %v10139_v39 = vld [vmem:[#allocation111_spill] sm:$0xff] }
 0x357   : > { %v2620_v14 = vmax.f32 %v10135_v11, %v2226_v48  ;;  %5822 = vmatprep.subr.bf16.mxu1 %v5821_v18  ;;  %v3498_v53 = vmax.f32 %v3322_v4, 0.0  ;;  %v10141_v48 = vld [vmem:[#allocation113_spill] sm:$0xff]  ;;  %v10142_v11 = vld [vmem:[#allocation114_spill] sm:$0xff] }
 0x358   : > { %v3323_v6 = vadd.f32 %v10136_v57, %v2619_v35  ;;  %5824 = vmatpush1.bf16.msra.mxu1 %v5823_v30  ;;  %v3622_v30 = vld [vmem:[%s9762_s3 + $0x68] sm:$0xff] }
 0x359   : > { %v3324_v46 = vadd.f32 %v10136_v57, %v2620_v14  ;;  %v2230_v8 = vpop.f32.mrb[244].mxu0  ;;  %v3621_v57 = vld [vmem:[%s9762_s3 + $0x60] sm:$0xff] }
 0x35a   : > { %v3499_v31 = vmax.f32 %v3323_v6, 0.0  ;;  %v2621_v37 = vmax.f32 %v10137_v38, %v2230_v8  ;;  %v2232_v15 = vpop.f32.mrb[245].mxu0 }
 0x35b   : > { %v3500_v33 = vmax.f32 %v3324_v46, 0.0  ;;  %v2622_v17 = vmax.f32 %v10138_v41, %v2232_v15  ;;  %3963 = vmatmul.mubr.f32.vlgmr.msra.gmra.mrb[70].mxu1 %v3609_v58  ;;  %v3628_v46 = vld [vmem:[%s9762_s3 + $0x98] sm:$0xff] }
 0x35c   : > { %v5827_v12 = vpack.c.bf16 %v3499_v31, %v3497_v10  ;;  %3968 = vmatprep.mubr.f32.mxu1 %v3616_v54  ;;  %v3325_v18 = vadd.f32 %v10139_v39, %v2621_v37  ;;  %v10143_v10 = vld [vmem:[#allocation115_spill] sm:$0xff] }
 0x35d   : > { %v2236_v47 = vpop.f32.mrb[246].mxu0  ;;  %v5825_v16 = vpack.c.bf16 %v3500_v33, %v3498_v53  ;;  %v3326_v35 = vadd.f32 %v10139_v39, %v2622_v17  ;;  %v10144_v53 = vld [vmem:[#allocation116_spill] sm:$0xff]  ;;  %v3627_v17 = vld [vmem:[%s9762_s3 + $0x90] sm:$0xff]  ;;  %v10146_v39 = vld [vmem:[#allocation118_spill] sm:$0xff] }
 0x35e   : > { %v2623_v36 = vmax.f32 %v10140_v45, %v2236_v47  ;;  %v2238_v63 = vpop.f32.mrb[247].mxu0  ;;  %v3501_v8 = vmax.f32 %v3325_v18, 0.0  ;;  %v3634_v47 = vld [vmem:[%s9762_s3 + $0xc8] sm:$0xff] }
 0x35f   : > { %v2624_v4 = vmax.f32 %v10141_v48, %v2238_v63  ;;  %3969 = vmatmul.mubr.f32.gmra.mrb[72].mxu1 %v3615_v43  ;;  %5826 = vmatprep.subr.bf16.mxu1 %v5825_v16  ;;  %v3502_v37 = vmax.f32 %v3326_v35, 0.0  ;;  %v10145_v16 = vld [vmem:[#allocation117_spill] sm:$0xff]  ;;  %v10147_v63 = vld [vmem:[#allocation119_spill] sm:$0xff]  ;;  %v10148_v48 = vld [vmem:[#allocation120_spill] sm:$0xff] }
 0x360   : > { %v3327_v14 = vadd.f32 %v10142_v11, %v2623_v36  ;;  %5828 = vmatpush1.bf16.msra.mxu1 %v5827_v12  ;;  %3974 = vmatprep.mubr.f32.mxu1 %v3622_v30 }
 0x361   : > { %v3328_v6 = vadd.f32 %v10142_v11, %v2624_v4  ;;  %v2242_v58 = vpop.f32.mrb[248].mxu0  ;;  %v3633_v11 = vld [vmem:[%s9762_s3 + $0xc0] sm:$0xff] }
 0x362   : > { %v3503_v54 = vmax.f32 %v3327_v14, 0.0  ;;  %v2625_v31 = vmax.f32 %v10143_v10, %v2242_v58  ;;  %v2244_v38 = vpop.f32.mrb[249].mxu0 }
 0x363   : > { %v3504_v15 = vmax.f32 %v3328_v6, 0.0  ;;  %v2626_v33 = vmax.f32 %v10144_v53, %v2244_v38  ;;  %3975 = vmatmul.mubr.f32.gmra.mrb[74].mxu1 %v3621_v57  ;;  %v3640_v6 = vld [vmem:[%s9762_s3 + $0xf8] sm:$0xff] }
 0x364   : > { %v5831_v41 = vpack.c.bf16 %v3503_v54, %v3501_v8  ;;  %3980 = vmatprep.mubr.f32.mxu1 %v3628_v46  ;;  %v3329_v30 = vadd.f32 %v10145_v16, %v2625_v31  ;;  %v10149_v8 = vld [vmem:[#allocation121_spill] sm:$0xff] }
 0x365   : > { %v2248_v12 = vpop.f32.mrb[250].mxu0  ;;  %v5829_v43 = vpack.c.bf16 %v3504_v15, %v3502_v37  ;;  %v3330_v36 = vadd.f32 %v10145_v16, %v2626_v33  ;;  %v10150_v37 = vld [vmem:[#allocation122_spill] sm:$0xff]  ;;  %v3639_v33 = vld [vmem:[%s9762_s3 + $0xf0] sm:$0xff]  ;;  %v10152_v16 = vld [vmem:[#allocation124_spill] sm:$0xff] }
 0x366   : > { %v2627_v18 = vmax.f32 %v10146_v39, %v2248_v12  ;;  %v2250_v45 = vpop.f32.mrb[251].mxu0  ;;  %v3505_v58 = vmax.f32 %v3329_v30, 0.0  ;;  %v3646_v12 = vld [vmem:[%s9762_s3 + $0x128] sm:$0xff] }
 0x367   : > { %v2628_v35 = vmax.f32 %v10147_v63, %v2250_v45  ;;  %3981 = vmatmul.mubr.f32.gmra.mrb[76].mxu1 %v3627_v17  ;;  %5830 = vmatprep.subr.bf16.mxu1 %v5829_v43  ;;  %v3506_v31 = vmax.f32 %v3330_v36, 0.0  ;;  %v10151_v43 = vld [vmem:[#allocation123_spill] sm:$0xff]  ;;  %v10153_v45 = vld [vmem:[#allocation125_spill] sm:$0xff]  ;;  %v10154_v63 = vld [vmem:[#allocation126_spill] sm:$0xff] }
 0x368   : > { %v3331_v4 = vadd.f32 %v10148_v48, %v2627_v18  ;;  %5832 = vmatpush1.bf16.msra.mxu1 %v5831_v41  ;;  %3986 = vmatprep.mubr.f32.mxu1 %v3634_v47 }
 0x369   : > { %v3332_v14 = vadd.f32 %v10148_v48, %v2628_v35  ;;  %v2254_v57 = vpop.f32.mrb[252].mxu0  ;;  %v3645_v48 = vld [vmem:[%s9762_s3 + $0x120] sm:$0xff] }
 0x36a   : > { %v3507_v46 = vmax.f32 %v3331_v4, 0.0  ;;  %v2629_v54 = vmax.f32 %v10149_v8, %v2254_v57  ;;  %v2256_v10 = vpop.f32.mrb[253].mxu0 }
 0x36b   : > { %v3508_v38 = vmax.f32 %v3332_v14, 0.0  ;;  %v2630_v15 = vmax.f32 %v10150_v37, %v2256_v10  ;;  %3987 = vmatmul.mubr.f32.gmra.mrb[78].mxu1 %v3633_v11  ;;  %v3652_v14 = vld [vmem:[%s9762_s3 + $0x158] sm:$0xff] }
 0x36c   : > { %v5835_v53 = vpack.c.bf16 %v3507_v46, %v3505_v58  ;;  %3992 = vmatprep.mubr.f32.mxu1 %v3640_v6  ;;  %v3333_v47 = vadd.f32 %v10151_v43, %v2629_v54  ;;  %v10155_v58 = vld [vmem:[#allocation127_spill] sm:$0xff] }
 0x36d   : > { %v2260_v41 = vpop.f32.mrb[254].mxu0  ;;  %v5833_v17 = vpack.c.bf16 %v3508_v38, %v3506_v31  ;;  %v3334_v18 = vadd.f32 %v10151_v43, %v2630_v15  ;;  %v10156_v31 = vld [vmem:[#allocation128_spill] sm:$0xff]  ;;  %v3651_v15 = vld [vmem:[%s9762_s3 + $0x150] sm:$0xff]  ;;  %v10158_v43 = vld [vmem:[#allocation130_spill] sm:$0xff] }
 0x36e   : > { %v2631_v30 = vmax.f32 %v10152_v16, %v2260_v41  ;;  %v2262_v39 = vpop.f32.mrb[255].mxu0  ;;  %v3509_v57 = vmax.f32 %v3333_v47, 0.0  ;;  %v3658_v41 = vld [vmem:[%s9762_s3 + $0x188] sm:$0xff] }
 0x36f   : > { %v2632_v36 = vmax.f32 %v10153_v45, %v2262_v39  ;;  %3993 = vmatmul.mubr.f32.gmra.mrb[80].mxu1 %v3639_v33  ;;  %5834 = vmatprep.subr.bf16.mxu1 %v5833_v17  ;;  %v3510_v54 = vmax.f32 %v3334_v18, 0.0  ;;  %v10157_v17 = vld [vmem:[#allocation129_spill] sm:$0xff]  ;;  %v10159_v39 = vld [vmem:[#allocation131_spill] sm:$0xff]  ;;  %v10160_v45 = vld [vmem:[#allocation132_spill] sm:$0xff] }
 0x370   : > { %v3335_v35 = vadd.f32 %v10154_v63, %v2631_v30  ;;  %5836 = vmatpush1.bf16.msra.mxu1 %v5835_v53  ;;  %3998 = vmatprep.mubr.f32.mxu1 %v3646_v12 }
 0x371   : > { %v3336_v4 = vadd.f32 %v10154_v63, %v2632_v36  ;;  %v2266_v11 = vpop.f32.mrb[0].mxu0  ;;  %v3657_v63 = vld [vmem:[%s9762_s3 + $0x180] sm:$0xff] }
 0x372   : > { %v3511_v6 = vmax.f32 %v3335_v35, 0.0  ;;  %v2633_v46 = vmax.f32 %v10155_v58, %v2266_v11  ;;  %v2268_v8 = vpop.f32.mrb[1].mxu0 }
 0x373   : > { %v3512_v10 = vmax.f32 %v3336_v4, 0.0  ;;  %v2634_v38 = vmax.f32 %v10156_v31, %v2268_v8  ;;  %3999 = vmatmul.mubr.f32.gmra.mrb[82].mxu1 %v3645_v48  ;;  %v3664_v4 = vld [vmem:[%s9762_s3 + $0x1b8] sm:$0xff] }
 0x374   : > { %v5839_v37 = vpack.c.bf16 %v3511_v6, %v3509_v57  ;;  %4004 = vmatprep.mubr.f32.mxu1 %v3652_v14  ;;  %v3337_v12 = vadd.f32 %v10157_v17, %v2633_v46  ;;  %v10161_v57 = vld [vmem:[#allocation133_spill] sm:$0xff] }
 0x375   : > { %v2272_v53 = vpop.f32.mrb[2].mxu0  ;;  %v5837_v33 = vpack.c.bf16 %v3512_v10, %v3510_v54  ;;  %v3338_v30 = vadd.f32 %v10157_v17, %v2634_v38  ;;  %v10162_v54 = vld [vmem:[#allocation134_spill] sm:$0xff]  ;;  %v3663_v38 = vld [vmem:[%s9762_s3 + $0x1b0] sm:$0xff]  ;;  %v10164_v17 = vld [vmem:[#allocation136_spill] sm:$0xff] }
 0x376   : > { %v2635_v47 = vmax.f32 %v10158_v43, %v2272_v53  ;;  %v2274_v16 = vpop.f32.mrb[3].mxu0  ;;  %v3513_v11 = vmax.f32 %v3337_v12, 0.0  ;;  %v3670_v53 = vld [vmem:[%s9762_s3 + $0x1e8] sm:$0xff] }
 0x377   : > { %v2636_v18 = vmax.f32 %v10159_v39, %v2274_v16  ;;  %4005 = vmatmul.mubr.f32.gmra.mrb[84].mxu1 %v3651_v15  ;;  %5838 = vmatprep.subr.bf16.mxu1 %v5837_v33  ;;  %v3514_v46 = vmax.f32 %v3338_v30, 0.0  ;;  %v10163_v33 = vld [vmem:[#allocation135_spill] sm:$0xff]  ;;  %v10165_v16 = vld [vmem:[#allocation137_spill] sm:$0xff]  ;;  %v10166_v39 = vld [vmem:[#allocation138_spill] sm:$0xff] }
 0x378   : > { %v3339_v36 = vadd.f32 %v10160_v45, %v2635_v47  ;;  %5840 = vmatpush1.bf16.msra.mxu1 %v5839_v37  ;;  %4010 = vmatprep.mubr.f32.mxu1 %v3658_v41 }
 0x379   : > { %v3340_v35 = vadd.f32 %v10160_v45, %v2636_v18  ;;  %v2278_v48 = vpop.f32.mrb[4].mxu0  ;;  %v3669_v45 = vld [vmem:[%s9762_s3 + $0x1e0] sm:$0xff] }
 0x37a   : > { %v3515_v14 = vmax.f32 %v3339_v36, 0.0  ;;  %v2637_v6 = vmax.f32 %v10161_v57, %v2278_v48  ;;  %v2280_v58 = vpop.f32.mrb[5].mxu0 }
 0x37b   : > { %v3516_v8 = vmax.f32 %v3340_v35, 0.0  ;;  %v2638_v10 = vmax.f32 %v10162_v54, %v2280_v58  ;;  %4011 = vmatmul.mubr.f32.gmra.mrb[86].mxu1 %v3657_v63  ;;  %v3676_v35 = vld [vmem:[%s9762_s3 + $0x218] sm:$0xff] }
 0x37c   : > { %v5843_v31 = vpack.c.bf16 %v3515_v14, %v3513_v11  ;;  %4016 = vmatprep.mubr.f32.mxu1 %v3664_v4  ;;  %v3341_v41 = vadd.f32 %v10163_v33, %v2637_v6  ;;  %v10167_v11 = vld [vmem:[#allocation139_spill] sm:$0xff] }
 0x37d   : > { %v2284_v37 = vpop.f32.mrb[6].mxu0  ;;  %v5841_v15 = vpack.c.bf16 %v3516_v8, %v3514_v46  ;;  %v3342_v47 = vadd.f32 %v10163_v33, %v2638_v10  ;;  %v10168_v46 = vld [vmem:[#allocation140_spill] sm:$0xff]  ;;  %v3675_v10 = vld [vmem:[%s9762_s3 + $0x210] sm:$0xff]  ;;  %v10170_v33 = vld [vmem:[#allocation142_spill] sm:$0xff] }
 0x37e   : > { %v2639_v12 = vmax.f32 %v10164_v17, %v2284_v37  ;;  %v2286_v43 = vpop.f32.mrb[7].mxu0  ;;  %v3517_v48 = vmax.f32 %v3341_v41, 0.0  ;;  %v3682_v37 = vld [vmem:[%s9762_s3 + $0x248] sm:$0xff] }
 0x37f   : > { %v2640_v30 = vmax.f32 %v10165_v16, %v2286_v43  ;;  %4017 = vmatmul.mubr.f32.gmra.mrb[88].mxu1 %v3663_v38  ;;  %5842 = vmatprep.subr.bf16.mxu1 %v5841_v15  ;;  %v3518_v6 = vmax.f32 %v3342_v47, 0.0  ;;  %v10169_v15 = vld [vmem:[#allocation141_spill] sm:$0xff]  ;;  %v10171_v43 = vld [vmem:[#allocation143_spill] sm:$0xff]  ;;  %v10172_v16 = vld [vmem:[#allocation144_spill] sm:$0xff] }
 0x380   : > { %v3343_v18 = vadd.f32 %v10166_v39, %v2639_v12  ;;  %5844 = vmatpush1.bf16.msra.mxu1 %v5843_v31  ;;  %4022 = vmatprep.mubr.f32.mxu1 %v3670_v53 }
 0x381   : > { %v3344_v36 = vadd.f32 %v10166_v39, %v2640_v30  ;;  %v2290_v63 = vpop.f32.mrb[8].mxu0  ;;  %v3681_v39 = vld [vmem:[%s9762_s3 + $0x240] sm:$0xff] }
 0x382   : > { %v3519_v4 = vmax.f32 %v3343_v18, 0.0  ;;  %v2641_v14 = vmax.f32 %v10167_v11, %v2290_v63  ;;  %v2292_v57 = vpop.f32.mrb[9].mxu0 }
 0x383   : > { %v3520_v58 = vmax.f32 %v3344_v36, 0.0  ;;  %v2642_v8 = vmax.f32 %v10168_v46, %v2292_v57  ;;  %4023 = vmatmul.mubr.f32.gmra.mrb[90].mxu1 %v3669_v45  ;;  %v3688_v36 = vld [vmem:[%s9762_s3 + $0x278] sm:$0xff] }
 0x384   : > { %v5847_v54 = vpack.c.bf16 %v3519_v4, %v3517_v48  ;;  %4028 = vmatprep.mubr.f32.mxu1 %v3676_v35  ;;  %v3345_v53 = vadd.f32 %v10169_v15, %v2641_v14  ;;  %v10173_v48 = vld [vmem:[#allocation145_spill] sm:$0xff] }
 0x385   : > { %v2296_v31 = vpop.f32.mrb[10].mxu0  ;;  %v5845_v38 = vpack.c.bf16 %v3520_v58, %v3518_v6  ;;  %v3346_v12 = vadd.f32 %v10169_v15, %v2642_v8  ;;  %v10174_v6 = vld [vmem:[#allocation146_spill] sm:$0xff]  ;;  %v3687_v8 = vld [vmem:[%s9762_s3 + $0x270] sm:$0xff]  ;;  %v10176_v15 = vld [vmem:[#allocation149_spill] sm:$0xff] }
 0x386   : > { %v2643_v41 = vmax.f32 %v10170_v33, %v2296_v31  ;;  %v2298_v17 = vpop.f32.mrb[11].mxu0  ;;  %v3521_v63 = vmax.f32 %v3345_v53, 0.0  ;;  %v3694_v31 = vld [vmem:[%s9762_s3 + $0x2a8] sm:$0xff] }
 0x387   : > { %v2644_v47 = vmax.f32 %v10171_v43, %v2298_v17  ;;  %4029 = vmatmul.mubr.f32.gmra.mrb[92].mxu1 %v3675_v10  ;;  %5846 = vmatprep.subr.bf16.mxu1 %v5845_v38  ;;  %v3522_v14 = vmax.f32 %v3346_v12, 0.0  ;;  %v10175_v38 = vld [vmem:[#allocation148_spill] sm:$0xff]  ;;  %v10177_v17 = vld [vmem:[#allocation151_spill] sm:$0xff]  ;;  %v10178_v43 = vld [vmem:[#allocation153_spill] sm:$0xff] }
 0x388   : > { %v3347_v30 = vadd.f32 %v10172_v16, %v2643_v41  ;;  %5848 = vmatpush1.bf16.msra.mxu1 %v5847_v54  ;;  %4034 = vmatprep.mubr.f32.mxu1 %v3682_v37 }
 0x389   : > { %v3348_v18 = vadd.f32 %v10172_v16, %v2644_v47  ;;  %v2302_v45 = vpop.f32.mrb[12].mxu0  ;;  %v3693_v16 = vld [vmem:[%s9762_s3 + $0x2a0] sm:$0xff] }
 0x38a   : > { %v3523_v35 = vmax.f32 %v3347_v30, 0.0  ;;  %v2645_v4 = vmax.f32 %v10173_v48, %v2302_v45  ;;  %v2304_v11 = vpop.f32.mrb[13].mxu0 }
 0x38b   : > { %v3524_v57 = vmax.f32 %v3348_v18, 0.0  ;;  %v2646_v58 = vmax.f32 %v10174_v6, %v2304_v11  ;;  %4035 = vmatmul.mubr.f32.gmra.mrb[94].mxu1 %v3681_v39  ;;  %v3700_v18 = vld [vmem:[%s9762_s3 + $0x2d8] sm:$0xff] }
 0x38c   : > { %v5851_v46 = vpack.c.bf16 %v3523_v35, %v3521_v63  ;;  %4040 = vmatprep.mubr.f32.mxu1 %v3688_v36  ;;  %v3349_v37 = vadd.f32 %v10175_v38, %v2645_v4  ;;  %v10179_v63 = vld [vmem:[#allocation154_spill] sm:$0xff] }
 0x38d   : > { %v2308_v54 = vpop.f32.mrb[14].mxu0  ;;  %v5849_v10 = vpack.c.bf16 %v3524_v57, %v3522_v14  ;;  %v3350_v41 = vadd.f32 %v10175_v38, %v2646_v58  ;;  %v10180_v14 = vld [vmem:[#allocation156_spill] sm:$0xff]  ;;  %v3699_v58 = vld [vmem:[%s9762_s3 + $0x2d0] sm:$0xff] }
 0x38e   : > { %v2647_v53 = vmax.f32 %v10176_v15, %v2308_v54  ;;  %v2310_v33 = vpop.f32.mrb[15].mxu0  ;;  %v3525_v45 = vmax.f32 %v3349_v37, 0.0  ;;  %v3706_v54 = vld [vmem:[%s9762_s3 + $0x308] sm:$0xff]  ;;  %v10182_v38 = vld [vmem:[#allocation159_spill] sm:$0xff] }
 0x38f   : > { %v2648_v12 = vmax.f32 %v10177_v17, %v2310_v33  ;;  %4041 = vmatmul.mubr.f32.gmra.mrb[96].mxu1 %v3687_v8  ;;  %5850 = vmatprep.subr.bf16.mxu1 %v5849_v10  ;;  %v3526_v4 = vmax.f32 %v3350_v41, 0.0  ;;  %v10181_v10 = vld [vmem:[#allocation158_spill] sm:$0xff]  ;;  %v10183_v33 = vld [vmem:[#allocation161_spill] sm:$0xff]  ;;  %v10184_v17 = vld [vmem:[#allocation163_spill] sm:$0xff] }
 0x390   : > { %v3351_v47 = vadd.f32 %v10178_v43, %v2647_v53  ;;  %5852 = vmatpush1.bf16.msra.mxu1 %v5851_v46  ;;  %4046 = vmatprep.mubr.f32.mxu1 %v3694_v31 }
 0x391   : > { %v3352_v30 = vadd.f32 %v10178_v43, %v2648_v12  ;;  %v2314_v39 = vpop.f32.mrb[16].mxu0  ;;  %v3705_v43 = vld [vmem:[%s9762_s3 + $0x300] sm:$0xff] }
 0x392   : > { %v3527_v36 = vmax.f32 %v3351_v47, 0.0  ;;  %v2649_v35 = vmax.f32 %v10179_v63, %v2314_v39  ;;  %v2316_v48 = vpop.f32.mrb[17].mxu0 }
 0x393   : > { %v3528_v11 = vmax.f32 %v3352_v30, 0.0  ;;  %v2650_v57 = vmax.f32 %v10180_v14, %v2316_v48  ;;  %4047 = vmatmul.mubr.f32.gmra.mrb[98].mxu1 %v3693_v16  ;;  %v3712_v30 = vld [vmem:[%s9762_s3 + $0x338] sm:$0xff] }
 0x394   : > { %v5855_v6 = vpack.c.bf16 %v3527_v36, %v3525_v45  ;;  %4052 = vmatprep.mubr.f32.mxu1 %v3700_v18  ;;  %v3353_v31 = vadd.f32 %v10181_v10, %v2649_v35  ;;  %v10185_v45 = vld [vmem:[#allocation164_spill] sm:$0xff] }
 0x395   : > { %v2320_v46 = vpop.f32.mrb[18].mxu0  ;;  %v5853_v8 = vpack.c.bf16 %v3528_v11, %v3526_v4  ;;  %v3354_v53 = vadd.f32 %v10181_v10, %v2650_v57  ;;  %v10186_v4 = vld [vmem:[#allocation166_spill] sm:$0xff]  ;;  %v3711_v57 = vld [vmem:[%s9762_s3 + $0x330] sm:$0xff]  ;;  %v10188_v10 = vld [vmem:[#allocation169_spill] sm:$0xff] }
 0x396   : > { %v2651_v37 = vmax.f32 %v10182_v38, %v2320_v46  ;;  %v2322_v15 = vpop.f32.mrb[19].mxu0  ;;  %v3529_v39 = vmax.f32 %v3353_v31, 0.0  ;;  %v3718_v46 = vld [vmem:[%s9762_s3 + $0x368] sm:$0xff] }
 0x397   : > { %v2652_v41 = vmax.f32 %v10183_v33, %v2322_v15  ;;  %4053 = vmatmul.mubr.f32.gmra.mrb[100].mxu1 %v3699_v58  ;;  %5854 = vmatprep.subr.bf16.mxu1 %v5853_v8  ;;  %v3530_v35 = vmax.f32 %v3354_v53, 0.0  ;;  %v10187_v8 = vld [vmem:[#allocation168_spill] sm:$0xff]  ;;  %v10189_v15 = vld [vmem:[#allocation171_spill] sm:$0xff]  ;;  %v10190_v33 = vld [vmem:[#allocation173_spill] sm:$0xff] }
 0x398   : > { %v3355_v12 = vadd.f32 %v10184_v17, %v2651_v37  ;;  %5856 = vmatpush1.bf16.msra.mxu1 %v5855_v6  ;;  %4058 = vmatprep.mubr.f32.mxu1 %v3706_v54 }
 0x399   : > { %v3356_v47 = vadd.f32 %v10184_v17, %v2652_v41  ;;  %v2326_v16 = vpop.f32.mrb[20].mxu0  ;;  %v3717_v17 = vld [vmem:[%s9762_s3 + $0x360] sm:$0xff] }
 0x39a   : > { %v3531_v18 = vmax.f32 %v3355_v12, 0.0  ;;  %v2653_v36 = vmax.f32 %v10185_v45, %v2326_v16  ;;  %v2328_v63 = vpop.f32.mrb[21].mxu0  ;;  %v10191_v16 = vld [vmem:[#allocation179_spill] sm:$0xff] }
 0x39b   : > { %v3532_v48 = vmax.f32 %v3356_v47, 0.0  ;;  %v2654_v11 = vmax.f32 %v10186_v4, %v2328_v63  ;;  %4059 = vmatmul.mubr.f32.gmra.mrb[102].mxu1 %v3705_v43  ;;  %v3724_v47 = vld [vmem:[%s9762_s3 + $0x398] sm:$0xff] }
 0x39c   : > { %v5859_v14 = vpack.c.bf16 %v3531_v18, %v3529_v39  ;;  %4064 = vmatprep.mubr.f32.mxu1 %v3712_v30  ;;  %v3357_v54 = vadd.f32 %v10187_v8, %v2653_v36  ;;  %v10192_v30 = vld [vmem:[#allocation69_spill] sm:$0xff]  ;;  %v10194_v18 = vld [vmem:[#allocation183_spill] sm:$0xff] }
 0x39d   : > { %v2332_v6 = vpop.f32.mrb[22].mxu0  ;;  %v5857_v58 = vpack.c.bf16 %v3532_v48, %v3530_v35  ;;  %v3358_v37 = vadd.f32 %v10187_v8, %v2654_v11  ;;  %v10193_v39 = vmax.f32 %v10191_v16, %v10192_v30  ;;  %v10195_v35 = vld [vmem:[#allocation174_spill] sm:$0xff]  ;;  %v10196_v11 = vld [vmem:[#allocation181_spill] sm:$0xff]  ;;  %v10199_v8 = vld [vmem:[#allocation176_spill] sm:$0xff] }
 0x39e   : > { %v2655_v31 = vmax.f32 %v10188_v10, %v2332_v6  ;;  %v2334_v38 = vpop.f32.mrb[23].mxu0  ;;  %v3533_v36 = vmax.f32 %v3357_v54, 0.0  ;;  %v3723_v54 = vld [vmem:[%s9762_s3 + $0x390] sm:$0xff] }
 0x39f   : > { %v2656_v53 = vmax.f32 %v10189_v15, %v2334_v38  ;;  %4065 = vmatmul.mubr.f32.gmra.mrb[104].mxu1 %v3711_v57  ;;  %5858 = vmatprep.subr.bf16.mxu1 %v5857_v58  ;;  %v3363_v45 = vadd.f32 %v10194_v18, %v10193_v39  ;;  %v3534_v58 = vmax.f32 %v3358_v37, 0.0  ;;  %v10200_v38 = vld [vmem:[#allocation178_spill] sm:$0xff]  ;;  %v3736_v39 = vld [vmem:[%s9762_s3 + $0x3f8] sm:$0xff] }
 0x3a0   : > { %v3359_v41 = vadd.f32 %v10190_v33, %v2655_v31  ;;  %5860 = vmatpush1.bf16.msra.mxu1 %v5859_v14  ;;  %4070 = vmatprep.mubr.f32.mxu1 %v3718_v46  ;;  %v10197_v14 = vld [vmem:[#allocation71_spill] sm:$0xff] }
 0x3a1   : > { %v3360_v12 = vadd.f32 %v10190_v33, %v2656_v53  ;;  %v2338_v43 = vpop.f32.mrb[24].mxu0  ;;  %v10198_v57 = vmax.f32 %v10196_v11, %v10197_v14  ;;  %v3539_v37 = vmax.f32 %v3363_v45, 0.0  ;;  %v3742_v45 = vld [vmem:[%s9762_s3 + $0x428] sm:$0xff]  ;;  %v3789_v11 = vld [vmem:[%s9762_s3 + $0x5a0] sm:$0xff]  ;;  %v3796_v14 = vld [vmem:[%s9762_s3 + $0x5d8] sm:$0xff] }
 0x3a2   : > { %v3535_v63 = vmax.f32 %v3359_v41, 0.0  ;;  %v2657_v48 = vmax.f32 %v10195_v35, %v2338_v43  ;;  %v2340_v4 = vpop.f32.mrb[25].mxu0  ;;  %v3730_v41 = vld [vmem:[%s9762_s3 + $0x3c8] sm:$0xff]  ;;  %v3784_v35 = vld [vmem:[%s9762_s3 + $0x578] sm:$0xff] }
 0x3a3   : > { %v3364_v6 = vadd.f32 %v10194_v18, %v10198_v57  ;;  %v3536_v46 = vmax.f32 %v3360_v12, 0.0  ;;  %v2658_v10 = vmax.f32 %v10199_v8, %v2340_v4  ;;  %4071 = vmatmul.mubr.f32.gmra.mrb[106].mxu1 %v3717_v17  ;;  %v3735_v18 = vld [vmem:[%s9762_s3 + $0x3f0] sm:$0xff]  ;;  %v3790_v4 = vld [vmem:[%s9762_s3 + $0x5a8] sm:$0xff]  ;;  %v3617_v8 = vld [vmem:[%s9762_s3 + $0x40] sm:$0xff] }
 0x3a4   : > { %v5863_v31 = vpack.c.bf16 %v3535_v63, %v3533_v36  ;;  %v3361_v15 = vadd.f32 %v10200_v38, %v2657_v48  ;;  %4076 = vmatprep.mubr.f32.mxu1 %v3724_v47  ;;  %v3729_v47 = vld [vmem:[%s9762_s3 + $0x3c0] sm:$0xff]  ;;  %v3748_v63 = vld [vmem:[%s9762_s3 + $0x458] sm:$0xff]  ;;  %v3783_v48 = vld [vmem:[%s9762_s3 + $0x570] sm:$0xff] }
 0x3a5   : > { %v3362_v53 = vadd.f32 %v10200_v38, %v2658_v10  ;;  %v5861_v33 = vpack.c.bf16 %v3536_v46, %v3534_v58  ;;  %v3540_v43 = vmax.f32 %v3364_v6, 0.0  ;;  %v3741_v36 = vld [vmem:[%s9762_s3 + $0x420] sm:$0xff]  ;;  %v3795_v57 = vld [vmem:[%s9762_s3 + $0x5d0] sm:$0xff]  ;;  %v3612_v6 = vld [vmem:[%s9762_s3 + $0x18] sm:$0xff] }
 0x3a6   : > { %v3537_v12 = vmax.f32 %v3361_v15, 0.0  ;;  %v3611_v58 = vld [vmem:[%s9762_s3 + $0x10] sm:$0xff]  ;;  %v3618_v46 = vld [vmem:[%s9762_s3 + $0x48] sm:$0xff]  ;;  %v3624_v10 = vld [vmem:[%s9762_s3 + $0x78] sm:$0xff] }
 0x3a7   : > { %v3538_v16 = vmax.f32 %v3362_v53, 0.0  ;;  %4077 = vmatmul.mubr.f32.gmra.mrb[108].mxu1 %v3723_v54  ;;  %5862 = vmatprep.subr.bf16.mxu1 %v5861_v33  ;;  %v3696_v38 = vld [vmem:[%s9762_s3 + $0x2b8] sm:$0xff]  ;;  %v3702_v15 = vld [vmem:[%s9762_s3 + $0x2e8] sm:$0xff]  ;;  %v3701_v54 = vld [vmem:[%s9762_s3 + $0x2e0] sm:$0xff] }
 0x3a8   : > { %v5867_v17 = vpack.c.bf16 %v3539_v37, %v3537_v12  ;;  %5864 = vmatpush1.bf16.msra.mxu1 %v5863_v31  ;;  %4082 = vmatprep.mubr.f32.mxu1 %v3730_v41  ;;  %v3623_v31 = vld [vmem:[%s9762_s3 + $0x70] sm:$0xff]  ;;  %v3708_v53 = vld [vmem:[%s9762_s3 + $0x318] sm:$0xff]  ;;  %v3714_v41 = vld [vmem:[%s9762_s3 + $0x348] sm:$0xff] }
 0x3a9   : > { %v5865_v30 = vpack.c.bf16 %v3540_v43, %v3538_v16  ;;  %v3707_v33 = vld [vmem:[%s9762_s3 + $0x310] sm:$0xff]  ;;  %v3713_v37 = vld [vmem:[%s9762_s3 + $0x340] sm:$0xff]  ;;  %v3720_v12 = vld [vmem:[%s9762_s3 + $0x378] sm:$0xff] }
 0x3aa   : > { %v3719_v43 = vld [vmem:[%s9762_s3 + $0x370] sm:$0xff]  ;;  %v3726_v16 = vld [vmem:[%s9762_s3 + $0x3a8] sm:$0xff] }
 0x3ab   : > { %4083 = vmatmul.mubr.f32.gmra.mrb[110].mxu1 %v3729_v47  ;;  %5866 = vmatprep.subr.bf16.mxu1 %v5865_v30  ;;  %v3732_v47 = vld [vmem:[%s9762_s3 + $0x3d8] sm:$0xff]  ;;  %v3731_v30 = vld [vmem:[%s9762_s3 + $0x3d0] sm:$0xff] }
 0x3ac   : > { %5868 = vmatpush1.bf16.msra.mxu1 %v5867_v17  ;;  %4088 = vmatprep.mubr.f32.mxu1 %v3736_v39  ;;  %v3725_v17 = vld [vmem:[%s9762_s3 + $0x3a0] sm:$0xff]  ;;  %v3738_v39 = vld [vmem:[%s9762_s3 + $0x408] sm:$0xff] }
 0x3ad   : > { %5870 = vmatprep.subr.bf16.mxu1 %v8366_v3  ;;  %v3747_v3 = vld [vmem:[%s9762_s3 + $0x450] sm:$0xff] }
 0x3af   : > { %4089 = vmatmul.mubr.f32.gmra.mrb[112].mxu1 %v3735_v18  ;;  %v3737_v18 = vld [vmem:[%s9762_s3 + $0x400] sm:$0xff] }
 0x3b0   : > { %5872 = vmatpush1.bf16.msra.mxu1 %v8361_v42  ;;  %4094 = vmatprep.mubr.f32.mxu1 %v3742_v45  ;;  %v3754_v42 = vld [vmem:[%s9762_s3 + $0x488] sm:$0xff]  ;;  %v3744_v45 = vld [vmem:[%s9762_s3 + $0x438] sm:$0xff] }
 0x3b1   : > { %5874 = vmatprep.subr.bf16.mxu1 %v8388_v56  ;;  %v3753_v56 = vld [vmem:[%s9762_s3 + $0x480] sm:$0xff] }
 0x3b3   : > { %4095 = vmatmul.mubr.f32.gmra.mrb[114].mxu1 %v3741_v36  ;;  %v3743_v36 = vld [vmem:[%s9762_s3 + $0x430] sm:$0xff] }
 0x3b4   : > { %5876 = vmatpush1.bf16.msra.mxu1 %v8383_v51  ;;  %4100 = vmatprep.mubr.f32.mxu1 %v3748_v63  ;;  %v3760_v51 = vld [vmem:[%s9762_s3 + $0x4b8] sm:$0xff]  ;;  %v3750_v63 = vld [vmem:[%s9762_s3 + $0x468] sm:$0xff] }
 0x3b5   : > { %5878 = vmatprep.subr.bf16.mxu1 %v8410_v29  ;;  %v3759_v29 = vld [vmem:[%s9762_s3 + $0x4b0] sm:$0xff] }
 0x3b7   : > { %4101 = vmatmul.mubr.f32.gmra.mrb[116].mxu1 %v3747_v3  ;;  %v3749_v3 = vld [vmem:[%s9762_s3 + $0x460] sm:$0xff] }
 0x3b8   : > { %5880 = vmatpush1.bf16.msra.mxu1 %v8405_v26  ;;  %4106 = vmatprep.mubr.f32.mxu1 %v3754_v42  ;;  %v3766_v26 = vld [vmem:[%s9762_s3 + $0x4e8] sm:$0xff]  ;;  %v3756_v42 = vld [vmem:[%s9762_s3 + $0x498] sm:$0xff] }
 0x3b9   : > { %5882 = vmatprep.subr.bf16.mxu1 %v8432_v49  ;;  %v3765_v49 = vld [vmem:[%s9762_s3 + $0x4e0] sm:$0xff] }
 0x3bb   : > { %4107 = vmatmul.mubr.f32.gmra.mrb[118].mxu1 %v3753_v56  ;;  %v3755_v56 = vld [vmem:[%s9762_s3 + $0x490] sm:$0xff] }
 0x3bc   : > { %5884 = vmatpush1.bf16.msra.mxu1 %v8427_v52  ;;  %4112 = vmatprep.mubr.f32.mxu1 %v3760_v51  ;;  %v3772_v52 = vld [vmem:[%s9762_s3 + $0x518] sm:$0xff]  ;;  %v3762_v51 = vld [vmem:[%s9762_s3 + $0x4c8] sm:$0xff] }
 0x3bd   : > { %5886 = vmatprep.subr.bf16.mxu1 %v8454_v21  ;;  %v3771_v21 = vld [vmem:[%s9762_s3 + $0x510] sm:$0xff] }
 0x3bf   : > { %4113 = vmatmul.mubr.f32.gmra.mrb[120].mxu1 %v3759_v29  ;;  %v3761_v29 = vld [vmem:[%s9762_s3 + $0x4c0] sm:$0xff] }
 0x3c0   : > { %5888 = vmatpush1.bf16.msra.mxu1 %v8449_v40  ;;  %4118 = vmatprep.mubr.f32.mxu1 %v3766_v26  ;;  %v3778_v40 = vld [vmem:[%s9762_s3 + $0x548] sm:$0xff]  ;;  %v3768_v26 = vld [vmem:[%s9762_s3 + $0x4f8] sm:$0xff] }
 0x3c1   : > { %5890 = vmatprep.subr.bf16.mxu1 %v8476_v62  ;;  %v3777_v62 = vld [vmem:[%s9762_s3 + $0x540] sm:$0xff] }
 0x3c3   : > { %4119 = vmatmul.mubr.f32.gmra.mrb[122].mxu1 %v3765_v49  ;;  %v3767_v49 = vld [vmem:[%s9762_s3 + $0x4f0] sm:$0xff] }
 0x3c4   : > { %4124 = vmatprep.mubr.f32.mxu1 %v3772_v52  ;;  %v3774_v52 = vld [vmem:[%s9762_s3 + $0x528] sm:$0xff] }
 0x3c7   : > { %4125 = vmatmul.mubr.f32.gmra.mrb[124].mxu1 %v3771_v21  ;;  %v3773_v21 = vld [vmem:[%s9762_s3 + $0x520] sm:$0xff] }
 0x3c8   : > { %4130 = vmatprep.mubr.f32.mxu1 %v3778_v40  ;;  %v3780_v40 = vld [vmem:[%s9762_s3 + $0x558] sm:$0xff] }
 0x3cb   : > { %4131 = vmatmul.mubr.f32.gmra.mrb[126].mxu1 %v3777_v62  ;;  %v3779_v62 = vld [vmem:[%s9762_s3 + $0x550] sm:$0xff] }
 0x3cc   : > { %4136 = vmatprep.mubr.f32.mxu1 %v3784_v35  ;;  %v3786_v35 = vld [vmem:[%s9762_s3 + $0x588] sm:$0xff] }
 0x3cf   : > { %4137 = vmatmul.mubr.f32.gmra.mrb[128].mxu1 %v3783_v48  ;;  %v3785_v48 = vld [vmem:[%s9762_s3 + $0x580] sm:$0xff] }
 0x3d0   : > { %4142 = vmatprep.mubr.f32.mxu1 %v3790_v4  ;;  %v3792_v4 = vld [vmem:[%s9762_s3 + $0x5b8] sm:$0xff] }
 0x3d3   : > { %4143 = vmatmul.mubr.f32.gmra.mrb[130].mxu1 %v3789_v11  ;;  %v3791_v11 = vld [vmem:[%s9762_s3 + $0x5b0] sm:$0xff] }
 0x3d4   : > { %4148 = vmatprep.mubr.f32.mxu1 %v3796_v14  ;;  %v3798_v14 = vld [vmem:[%s9762_s3 + $0x5e8] sm:$0xff] }
 0x3d7   : > { %4149 = vmatmul.mubr.f32.gmra.mrb[132].mxu1 %v3795_v57  ;;  %v3797_v57 = vld [vmem:[%s9762_s3 + $0x5e0] sm:$0xff] }
 0x3d8   : > { %4219 = vmatprep.mubr.f32.mxu1 %v3612_v6  ;;  %v3614_v6 = vld [vmem:[%s9762_s3 + $0x28] sm:$0xff] }
 0x3db   : > { %4220 = vmatmul.mubr.f32.vlgmr.msra.gmra.mrb[70].mxu1 %v3611_v58  ;;  %v3613_v58 = vld [vmem:[%s9762_s3 + $0x20] sm:$0xff] }
 0x3dc   : > { %5892 = vmatpush1.bf16.msra.mxu1 %v8471_v59  ;;  %4225 = vmatprep.mubr.f32.mxu1 %v3618_v46  ;;  %v3630_v59 = vld [vmem:[%s9762_s3 + $0xa8] sm:$0xff]  ;;  %v3620_v46 = vld [vmem:[%s9762_s3 + $0x58] sm:$0xff] }
 0x3dd   : > { %5894 = vmatprep.subr.bf16.mxu1 %v8498_v7  ;;  %v3629_v7 = vld [vmem:[%s9762_s3 + $0xa0] sm:$0xff] }
 0x3df   : > { %4226 = vmatmul.mubr.f32.gmra.mrb[72].mxu1 %v3617_v8  ;;  %v3619_v8 = vld [vmem:[%s9762_s3 + $0x50] sm:$0xff] }
 0x3e0   : > { %5896 = vmatpush1.bf16.msra.mxu1 %v8493_v20  ;;  %4231 = vmatprep.mubr.f32.mxu1 %v3624_v10  ;;  %v3636_v20 = vld [vmem:[%s9762_s3 + $0xd8] sm:$0xff]  ;;  %v3626_v10 = vld [vmem:[%s9762_s3 + $0x88] sm:$0xff] }
 0x3e1   : > { %5898 = vmatprep.subr.bf16.mxu1 %v8520_v44  ;;  %v3635_v44 = vld [vmem:[%s9762_s3 + $0xd0] sm:$0xff] }
 0x3e3   : > { %4232 = vmatmul.mubr.f32.gmra.mrb[74].mxu1 %v3623_v31  ;;  %v3625_v31 = vld [vmem:[%s9762_s3 + $0x80] sm:$0xff] }
 0x3e4   : > { %5900 = vmatpush1.bf16.msra.mxu1 %v8515_v22  ;;  %4237 = vmatprep.mubr.f32.mxu1 %v3630_v59  ;;  %v3642_v22 = vld [vmem:[%s9762_s3 + $0x108] sm:$0xff]  ;;  %v3632_v59 = vld [vmem:[%s9762_s3 + $0xb8] sm:$0xff] }
 0x3e5   : > { %5902 = vmatprep.subr.bf16.mxu1 %v8542_v27  ;;  %v3641_v27 = vld [vmem:[%s9762_s3 + $0x100] sm:$0xff] }
 0x3e7   : > { %4238 = vmatmul.mubr.f32.gmra.mrb[76].mxu1 %v3629_v7  ;;  %v3631_v7 = vld [vmem:[%s9762_s3 + $0xb0] sm:$0xff] }
 0x3e8   : > { %5904 = vmatpush1.bf16.msra.mxu1 %v8537_v61  ;;  %4243 = vmatprep.mubr.f32.mxu1 %v3636_v20  ;;  %v3648_v61 = vld [vmem:[%s9762_s3 + $0x138] sm:$0xff]  ;;  %v3638_v20 = vld [vmem:[%s9762_s3 + $0xe8] sm:$0xff] }
 0x3e9   : > { %5906 = vmatprep.subr.bf16.mxu1 %v8564_v50  ;;  %v3647_v50 = vld [vmem:[%s9762_s3 + $0x130] sm:$0xff] }
 0x3eb   : > { %4244 = vmatmul.mubr.f32.gmra.mrb[78].mxu1 %v3635_v44  ;;  %v3637_v44 = vld [vmem:[%s9762_s3 + $0xe0] sm:$0xff] }
 0x3ec   : > { %5908 = vmatpush1.bf16.msra.mxu1 %v8559_v34  ;;  %4249 = vmatprep.mubr.f32.mxu1 %v3642_v22  ;;  %v3654_v34 = vld [vmem:[%s9762_s3 + $0x168] sm:$0xff]  ;;  %v3644_v22 = vld [vmem:[%s9762_s3 + $0x118] sm:$0xff] }
 0x3ed   : > { %5910 = vmatprep.subr.bf16.mxu1 %v8586_v25  ;;  %v3653_v25 = vld [vmem:[%s9762_s3 + $0x160] sm:$0xff] }
 0x3ef   : > { %4250 = vmatmul.mubr.f32.gmra.mrb[80].mxu1 %v3641_v27  ;;  %v3643_v27 = vld [vmem:[%s9762_s3 + $0x110] sm:$0xff] }
 0x3f0   : > { %5912 = vmatpush1.bf16.msra.mxu1 %v8581_v9  ;;  %4255 = vmatprep.mubr.f32.mxu1 %v3648_v61  ;;  %v3660_v9 = vld [vmem:[%s9762_s3 + $0x198] sm:$0xff]  ;;  %v3650_v61 = vld [vmem:[%s9762_s3 + $0x148] sm:$0xff] }
 0x3f1   : > { %5914 = vmatprep.subr.bf16.mxu1 %v8608_v0  ;;  %v3659_v0 = vld [vmem:[%s9762_s3 + $0x190] sm:$0xff] }
 0x3f3   : > { %4256 = vmatmul.mubr.f32.gmra.mrb[82].mxu1 %v3647_v50  ;;  %v3649_v50 = vld [vmem:[%s9762_s3 + $0x140] sm:$0xff] }
 0x3f4   : > { %5916 = vmatpush1.bf16.msra.mxu1 %v8603_v13  ;;  %4261 = vmatprep.mubr.f32.mxu1 %v3654_v34  ;;  %v3666_v13 = vld [vmem:[%s9762_s3 + $0x1c8] sm:$0xff]  ;;  %v3656_v34 = vld [vmem:[%s9762_s3 + $0x178] sm:$0xff] }
 0x3f5   : > { %5918 = vmatprep.subr.bf16.mxu1 %v8630_v60  ;;  %v3665_v60 = vld [vmem:[%s9762_s3 + $0x1c0] sm:$0xff] }
 0x3f7   : > { %4262 = vmatmul.mubr.f32.gmra.mrb[84].mxu1 %v3653_v25  ;;  %v3655_v25 = vld [vmem:[%s9762_s3 + $0x170] sm:$0xff] }
 0x3f8   : > { %5920 = vmatpush1.bf16.msra.mxu1 %v8625_v23  ;;  %4267 = vmatprep.mubr.f32.mxu1 %v3660_v9  ;;  %v3672_v23 = vld [vmem:[%s9762_s3 + $0x1f8] sm:$0xff]  ;;  %v3662_v9 = vld [vmem:[%s9762_s3 + $0x1a8] sm:$0xff] }
 0x3f9   : > { %5922 = vmatprep.subr.bf16.mxu1 %v8652_v1  ;;  %v3671_v1 = vld [vmem:[%s9762_s3 + $0x1f0] sm:$0xff] }
 0x3fb   : > { %4268 = vmatmul.mubr.f32.gmra.mrb[86].mxu1 %v3659_v0  ;;  %v3661_v0 = vld [vmem:[%s9762_s3 + $0x1a0] sm:$0xff] }
 0x3fc   : > { %5924 = vmatpush1.bf16.msra.mxu1 %v8647_v55  ;;  %4273 = vmatprep.mubr.f32.mxu1 %v3666_v13  ;;  %v3678_v55 = vld [vmem:[%s9762_s3 + $0x228] sm:$0xff]  ;;  %v3668_v13 = vld [vmem:[%s9762_s3 + $0x1d8] sm:$0xff] }
 0x3fd   : > { %5926 = vmatprep.subr.bf16.mxu1 %v8674_v28  ;;  %v3677_v28 = vld [vmem:[%s9762_s3 + $0x220] sm:$0xff] }
 0x3ff   : > { %4274 = vmatmul.mubr.f32.gmra.mrb[88].mxu1 %v3665_v60  ;;  %v3667_v60 = vld [vmem:[%s9762_s3 + $0x1d0] sm:$0xff] }
 0x400   : > { %5928 = vmatpush1.bf16.msra.mxu1 %v8669_v2  ;;  %4279 = vmatprep.mubr.f32.mxu1 %v3672_v23  ;;  %v3684_v2 = vld [vmem:[%s9762_s3 + $0x258] sm:$0xff]  ;;  %v3674_v23 = vld [vmem:[%s9762_s3 + $0x208] sm:$0xff] }
 0x401   : > { %5930 = vmatprep.subr.bf16.mxu1 %v8693_v32  ;;  %v3683_v32 = vld [vmem:[%s9762_s3 + $0x250] sm:$0xff] }
 0x403   : > { %4280 = vmatmul.mubr.f32.gmra.mrb[90].mxu1 %v3671_v1  ;;  %v3673_v1 = vld [vmem:[%s9762_s3 + $0x200] sm:$0xff] }
 0x404   : > { %5932 = vmatpush1.bf16.msra.mxu1 %v8691_v5  ;;  %4285 = vmatprep.mubr.f32.mxu1 %v3678_v55  ;;  %v3690_v5 = vld [vmem:[%s9762_s3 + $0x288] sm:$0xff]  ;;  %v3680_v55 = vld [vmem:[%s9762_s3 + $0x238] sm:$0xff] }
 0x405   : > { %5934 = vmatprep.subr.bf16.mxu1 %v8701_v24  ;;  %v3689_v24 = vld [vmem:[%s9762_s3 + $0x280] sm:$0xff] }
 0x407   : > { %4286 = vmatmul.mubr.f32.gmra.mrb[92].mxu1 %v3677_v28  ;;  %v3679_v28 = vld [vmem:[%s9762_s3 + $0x230] sm:$0xff] }
 0x408   : > { %5936 = vmatpush1.bf16.msra.mxu1 %v8699_v19  ;;  %4291 = vmatprep.mubr.f32.mxu1 %v3684_v2  ;;  %v3695_v19 = vld [vmem:[%s9762_s3 + $0x2b0] sm:$0xff]  ;;  %v3686_v2 = vld [vmem:[%s9762_s3 + $0x268] sm:$0xff] }
 0x40b   : > { %4292 = vmatmul.mubr.f32.gmra.mrb[94].mxu1 %v3683_v32  ;;  %v3685_v32 = vld [vmem:[%s9762_s3 + $0x260] sm:$0xff] }
 0x40c   : > { %4297 = vmatprep.mubr.f32.mxu1 %v3690_v5  ;;  %v3692_v5 = vld [vmem:[%s9762_s3 + $0x298] sm:$0xff] }
 0x40f   : > { %4298 = vmatmul.mubr.f32.gmra.mrb[96].mxu1 %v3689_v24  ;;  %v3691_v24 = vld [vmem:[%s9762_s3 + $0x290] sm:$0xff] }
 0x410   : > { %4303 = vmatprep.mubr.f32.mxu1 %v3696_v38  ;;  %v3698_v38 = vld [vmem:[%s9762_s3 + $0x2c8] sm:$0xff] }
 0x413   : > { %4304 = vmatmul.mubr.f32.gmra.mrb[98].mxu1 %v3695_v19  ;;  %v3697_v19 = vld [vmem:[%s9762_s3 + $0x2c0] sm:$0xff] }
 0x414   : > { %4309 = vmatprep.mubr.f32.mxu1 %v3702_v15  ;;  %v3704_v15 = vld [vmem:[%s9762_s3 + $0x2f8] sm:$0xff] }
 0x417   : > { %4310 = vmatmul.mubr.f32.gmra.mrb[100].mxu1 %v3701_v54  ;;  %v3703_v54 = vld [vmem:[%s9762_s3 + $0x2f0] sm:$0xff] }
 0x418   : > { %4315 = vmatprep.mubr.f32.mxu1 %v3708_v53  ;;  %v3710_v53 = vld [vmem:[%s9762_s3 + $0x328] sm:$0xff] }
 0x41b   : > { %4316 = vmatmul.mubr.f32.gmra.mrb[102].mxu1 %v3707_v33  ;;  %v3709_v33 = vld [vmem:[%s9762_s3 + $0x320] sm:$0xff] }
 0x41c   : > { %4321 = vmatprep.mubr.f32.mxu1 %v3714_v41  ;;  %v3716_v41 = vld [vmem:[%s9762_s3 + $0x358] sm:$0xff] }
 0x41f   : > { %4322 = vmatmul.mubr.f32.gmra.mrb[104].mxu1 %v3713_v37  ;;  %v3715_v37 = vld [vmem:[%s9762_s3 + $0x350] sm:$0xff] }
 0x420   : > { %4327 = vmatprep.mubr.f32.mxu1 %v3720_v12  ;;  %v3722_v12 = vld [vmem:[%s9762_s3 + $0x388] sm:$0xff] }
 0x423   : > { %4328 = vmatmul.mubr.f32.gmra.mrb[106].mxu1 %v3719_v43  ;;  %v3721_v43 = vld [vmem:[%s9762_s3 + $0x380] sm:$0xff] }
 0x424   : > { %4333 = vmatprep.mubr.f32.mxu1 %v3726_v16  ;;  %v3728_v16 = vld [vmem:[%s9762_s3 + $0x3b8] sm:$0xff] }
 0x427   : > { %4334 = vmatmul.mubr.f32.gmra.mrb[108].mxu1 %v3725_v17  ;;  %v3727_v17 = vld [vmem:[%s9762_s3 + $0x3b0] sm:$0xff] }
 0x428   : > { %4339 = vmatprep.mubr.f32.mxu1 %v3732_v47  ;;  %v3734_v47 = vld [vmem:[%s9762_s3 + $0x3e8] sm:$0xff] }
 0x42b   : > { %4340 = vmatmul.mubr.f32.gmra.mrb[110].mxu1 %v3731_v30  ;;  %v3733_v30 = vld [vmem:[%s9762_s3 + $0x3e0] sm:$0xff] }
 0x42c   : > { %4345 = vmatprep.mubr.f32.mxu1 %v3738_v39  ;;  %v3740_v39 = vld [vmem:[%s9762_s3 + $0x418] sm:$0xff] }
 0x42f   : > { %4346 = vmatmul.mubr.f32.gmra.mrb[112].mxu1 %v3737_v18  ;;  %v3739_v18 = vld [vmem:[%s9762_s3 + $0x410] sm:$0xff] }
 0x430   : > { %4351 = vmatprep.mubr.f32.mxu1 %v3744_v45  ;;  %v3746_v45 = vld [vmem:[%s9762_s3 + $0x448] sm:$0xff] }
 0x433   : > { %4352 = vmatmul.mubr.f32.gmra.mrb[114].mxu1 %v3743_v36  ;;  %v3745_v36 = vld [vmem:[%s9762_s3 + $0x440] sm:$0xff] }
 0x434   : > { %4357 = vmatprep.mubr.f32.mxu1 %v3750_v63  ;;  %v3752_v63 = vld [vmem:[%s9762_s3 + $0x478] sm:$0xff] }
 0x437   : > { %4358 = vmatmul.mubr.f32.gmra.mrb[116].mxu1 %v3749_v3  ;;  %v3751_v3 = vld [vmem:[%s9762_s3 + $0x470] sm:$0xff] }
 0x438   : > { %4363 = vmatprep.mubr.f32.mxu1 %v3756_v42  ;;  %v3758_v42 = vld [vmem:[%s9762_s3 + $0x4a8] sm:$0xff] }
 0x43b   : > { %4364 = vmatmul.mubr.f32.gmra.mrb[118].mxu1 %v3755_v56  ;;  %v3757_v56 = vld [vmem:[%s9762_s3 + $0x4a0] sm:$0xff] }
 0x43c   : > { %4369 = vmatprep.mubr.f32.mxu1 %v3762_v51  ;;  %v3764_v51 = vld [vmem:[%s9762_s3 + $0x4d8] sm:$0xff] }
 0x43f   : > { %4370 = vmatmul.mubr.f32.gmra.mrb[120].mxu1 %v3761_v29  ;;  %v3763_v29 = vld [vmem:[%s9762_s3 + $0x4d0] sm:$0xff] }
 0x440   : > { %4375 = vmatprep.mubr.f32.mxu1 %v3768_v26  ;;  %v3770_v26 = vld [vmem:[%s9762_s3 + $0x508] sm:$0xff] }
 0x443   : > { %4376 = vmatmul.mubr.f32.gmra.mrb[122].mxu1 %v3767_v49  ;;  %v3769_v49 = vld [vmem:[%s9762_s3 + $0x500] sm:$0xff] }
 0x444   : > { %4381 = vmatprep.mubr.f32.mxu1 %v3774_v52  ;;  %v3776_v52 = vld [vmem:[%s9762_s3 + $0x538] sm:$0xff] }
 0x447   : > { %4382 = vmatmul.mubr.f32.gmra.mrb[124].mxu1 %v3773_v21  ;;  %v3775_v21 = vld [vmem:[%s9762_s3 + $0x530] sm:$0xff] }
 0x448   : > { %4387 = vmatprep.mubr.f32.mxu1 %v3780_v40  ;;  %v3782_v40 = vld [vmem:[%s9762_s3 + $0x568] sm:$0xff] }
 0x44b   : > { %4388 = vmatmul.mubr.f32.gmra.mrb[126].mxu1 %v3779_v62  ;;  %v3781_v62 = vld [vmem:[%s9762_s3 + $0x560] sm:$0xff] }
 0x44c   : > { %4393 = vmatprep.mubr.f32.mxu1 %v3786_v35  ;;  %v3788_v35 = vld [vmem:[%s9762_s3 + $0x598] sm:$0xff] }
 0x44f   : > { %4394 = vmatmul.mubr.f32.gmra.mrb[128].mxu1 %v3785_v48  ;;  %v3787_v48 = vld [vmem:[%s9762_s3 + $0x590] sm:$0xff] }
 0x450   : > { %4399 = vmatprep.mubr.f32.mxu1 %v3792_v4  ;;  %v3794_v4 = vld [vmem:[%s9762_s3 + $0x5c8] sm:$0xff] }
 0x453   : > { %4400 = vmatmul.mubr.f32.gmra.mrb[130].mxu1 %v3791_v11  ;;  %v3793_v11 = vld [vmem:[%s9762_s3 + $0x5c0] sm:$0xff] }
 0x454   : > { %4405 = vmatprep.mubr.f32.mxu1 %v3798_v14  ;;  %v3800_v14 = vld [vmem:[%s9762_s3 + $0x5f8] sm:$0xff] }
 0x457   : > { %4406 = vmatmul.mubr.f32.gmra.mrb[132].mxu1 %v3797_v57  ;;  %v3799_v57 = vld [vmem:[%s9762_s3 + $0x5f0] sm:$0xff] }
 0x458   : > { %5635 = vmatprep.mubr.msk.f32.mxu1 %vm3801_vm2, %v3614_v6 }
 0x45b   : > { %4477 = vmatmul.mubr.f32.vlgmr.msra.gmra.mrb[70].mxu1 %v3613_v58 }
 0x45c   : > { %5636 = vmatprep.mubr.msk.f32.mxu1 %vm3801_vm2, %v3620_v46 }
 0x45f   : > { %4483 = vmatmul.mubr.f32.gmra.mrb[72].mxu1 %v3619_v8 }
 0x460   : > { %5637 = vmatprep.mubr.msk.f32.mxu1 %vm3801_vm2, %v3626_v10 }
 0x463   : > { %4489 = vmatmul.mubr.f32.gmra.mrb[74].mxu1 %v3625_v31  ;;  %v6272_v31 = vmov 0.0  }
 0x464   : > { %5638 = vmatprep.mubr.msk.f32.mxu1 %vm3801_vm2, %v3632_v59 }
 0x467   : > { %4495 = vmatmul.mubr.f32.gmra.mrb[76].mxu1 %v3631_v7 }
 0x468   : > { %5639 = vmatprep.mubr.msk.f32.mxu1 %vm3801_vm2, %v3638_v20 }
 0x46b   : > { %4501 = vmatmul.mubr.f32.gmra.mrb[78].mxu1 %v3637_v44 }
 0x46c   : > { %5640 = vmatprep.mubr.msk.f32.mxu1 %vm3801_vm2, %v3644_v22 }
 0x46f   : > { %4507 = vmatmul.mubr.f32.gmra.mrb[80].mxu1 %v3643_v27 }
 0x470   : > { %5641 = vmatprep.mubr.msk.f32.mxu1 %vm3801_vm2, %v3650_v61 }
 0x473   : > { %4513 = vmatmul.mubr.f32.gmra.mrb[82].mxu1 %v3649_v50 }
 0x474   : > { %5642 = vmatprep.mubr.msk.f32.mxu1 %vm3801_vm2, %v3656_v34 }
 0x477   : > { %4519 = vmatmul.mubr.f32.gmra.mrb[84].mxu1 %v3655_v25 }
 0x478   : > { %5643 = vmatprep.mubr.msk.f32.mxu1 %vm3801_vm2, %v3662_v9 }
 0x47b   : > { %4525 = vmatmul.mubr.f32.gmra.mrb[86].mxu1 %v3661_v0 }
 0x47c   : > { %5644 = vmatprep.mubr.msk.f32.mxu1 %vm3801_vm2, %v3668_v13 }
 0x47f   : > { %4531 = vmatmul.mubr.f32.gmra.mrb[88].mxu1 %v3667_v60 }
 0x480   : > { %5645 = vmatprep.mubr.msk.f32.mxu1 %vm3801_vm2, %v3674_v23 }
 0x483   : > { %4537 = vmatmul.mubr.f32.gmra.mrb[90].mxu1 %v3673_v1 }
 0x484   : > { %5646 = vmatprep.mubr.msk.f32.mxu1 %vm3801_vm2, %v3680_v55 }
 0x487   : > { %4543 = vmatmul.mubr.f32.gmra.mrb[92].mxu1 %v3679_v28 }
 0x488   : > { %5647 = vmatprep.mubr.msk.f32.mxu1 %vm3801_vm2, %v3686_v2 }
 0x48b   : > { %4549 = vmatmul.mubr.f32.gmra.mrb[94].mxu1 %v3685_v32 }
 0x48c   : > { %5648 = vmatprep.mubr.msk.f32.mxu1 %vm3801_vm2, %v3692_v5 }
 0x48f   : > { %4555 = vmatmul.mubr.f32.gmra.mrb[96].mxu1 %v3691_v24 }
 0x490   : > { %5649 = vmatprep.mubr.msk.f32.mxu1 %vm3801_vm2, %v3698_v38 }
 0x493   : > { %4561 = vmatmul.mubr.f32.gmra.mrb[98].mxu1 %v3697_v19 }
 0x494   : > { %5650 = vmatprep.mubr.msk.f32.mxu1 %vm3801_vm2, %v3704_v15 }
 0x497   : > { %4567 = vmatmul.mubr.f32.gmra.mrb[100].mxu1 %v3703_v54 }
 0x498   : > { %5651 = vmatprep.mubr.msk.f32.mxu1 %vm3801_vm2, %v3710_v53 }
 0x49b   : > { %4573 = vmatmul.mubr.f32.gmra.mrb[102].mxu1 %v3709_v33 }
 0x49c   : > { %5652 = vmatprep.mubr.msk.f32.mxu1 %vm3801_vm2, %v3716_v41 }
 0x49f   : > { %4579 = vmatmul.mubr.f32.gmra.mrb[104].mxu1 %v3715_v37 }
 0x4a0   : > { %5653 = vmatprep.mubr.msk.f32.mxu1 %vm3801_vm2, %v3722_v12 }
 0x4a3   : > { %4585 = vmatmul.mubr.f32.gmra.mrb[106].mxu1 %v3721_v43  ;;  %v4720_v43 = vpop.permute.xlu0 %4719 }
 0x4a4   : > { %5654 = vmatprep.mubr.msk.f32.mxu1 %vm3801_vm2, %v3728_v16 }
 0x4a7   : > { %4591 = vmatmul.mubr.f32.gmra.mrb[108].mxu1 %v3727_v17 }
 0x4a8   : > { %5655 = vmatprep.mubr.msk.f32.mxu1 %vm3801_vm2, %v3734_v47 }
 0x4ab   : > { %4597 = vmatmul.mubr.f32.gmra.mrb[110].mxu1 %v3733_v30 }
 0x4ac   : > { %5656 = vmatprep.mubr.msk.f32.mxu1 %vm3801_vm2, %v3740_v39  ;;  %v4725_v39 = vpop.permute.xlu1 %4724 }
 0x4af   : > { %4603 = vmatmul.mubr.f32.gmra.mrb[112].mxu1 %v3739_v18 }
 0x4b0   : > { %5657 = vmatprep.mubr.msk.f32.mxu1 %vm3801_vm2, %v3746_v45 }
 0x4b3   : > { %4609 = vmatmul.mubr.f32.gmra.mrb[114].mxu1 %v3745_v36 }
 0x4b4   : > { %5658 = vmatprep.mubr.msk.f32.mxu1 %vm3801_vm2, %v3752_v63 }
 0x4b7   : > { %4615 = vmatmul.mubr.f32.gmra.mrb[116].mxu1 %v3751_v3 }
 0x4b8   : > { %5659 = vmatprep.mubr.msk.f32.mxu1 %vm3801_vm2, %v3758_v42 }
 0x4bb   : > { %4621 = vmatmul.mubr.f32.gmra.mrb[118].mxu1 %v3757_v56 }
 0x4bc   : > { %5660 = vmatprep.mubr.msk.f32.mxu1 %vm3801_vm2, %v3764_v51 }
 0x4bf   : > { %4627 = vmatmul.mubr.f32.gmra.mrb[120].mxu1 %v3763_v29 }
 0x4c0   : > { %5661 = vmatprep.mubr.msk.f32.mxu1 %vm3801_vm2, %v3770_v26 }
 0x4c3   : > { %4633 = vmatmul.mubr.f32.gmra.mrb[122].mxu1 %v3769_v49 }
 0x4c4   : > { %5662 = vmatprep.mubr.msk.f32.mxu1 %vm3801_vm2, %v3776_v52 }
 0x4c7   : > { %4639 = vmatmul.mubr.f32.gmra.mrb[124].mxu1 %v3775_v21 }
 0x4c8   : > { %5663 = vmatprep.mubr.msk.f32.mxu1 %vm3801_vm2, %v3782_v40  ;;  %v4730_v40 = vpop.permute.xlu0 %4729 }
 0x4cb   : > { %4645 = vmatmul.mubr.f32.gmra.mrb[126].mxu1 %v3781_v62 }
 0x4cc   : > { %5664 = vmatprep.mubr.msk.f32.mxu1 %vm3801_vm2, %v3788_v35 }
 0x4cf   : > { %4651 = vmatmul.mubr.f32.gmra.mrb[128].mxu1 %v3787_v48 }
 0x4d0   : > { %5665 = vmatprep.mubr.msk.f32.mxu1 %vm3801_vm2, %v3794_v4 }
 0x4d3   : > { %4657 = vmatmul.mubr.f32.gmra.mrb[130].mxu1 %v3793_v11 }
 0x4d4   : > { %5666 = vmatprep.mubr.msk.f32.mxu1 %vm3801_vm2, %v3800_v14  ;;  %v4735_v14 = vpop.permute.xlu1 %4734 }
 0x4d7   : > { %4663 = vmatmul.mubr.f32.gmra.mrb[132].mxu1 %v3799_v57 }
 0x4d8   : > { %4974 = vmatprep.mubr.f32.mxu1 %v6272_v31 }
 0x52e   : > { %v4478_v6 = vpop.f32.mrb[70].mxu1 }
 0x52f   : > { %v4480_v58 = vpop.f32.mrb[71].mxu1 }
 0x532   : > { %v4484_v46 = vpop.f32.mrb[72].mxu1 }
 0x533   : > { %v4486_v8 = vpop.f32.mrb[73].mxu1 }
 0x536   : > { %v4490_v10 = vpop.f32.mrb[74].mxu1 }
 0x537   : > { %v4492_v59 = vpop.f32.mrb[75].mxu1 }
 0x53a   : > { %v4496_v7 = vpop.f32.mrb[76].mxu1 }
 0x53b   : > { %v4498_v20 = vpop.f32.mrb[77].mxu1 }
 0x53e   : > { %v9564_v44 = vpop.f32.mrb[78].mxu1 }
 0x53f   : > { %v9566_v22 = vpop.f32.mrb[79].mxu1 }
 0x542   : > { %v9568_v27 = vpop.f32.mrb[80].mxu1 }
 0x543   : > { %v9570_v61 = vpop.f32.mrb[81].mxu1 }
 0x546   : > { %v9572_v50 = vpop.f32.mrb[82].mxu1 }
 0x547   : > { %v9574_v34 = vpop.f32.mrb[83].mxu1 }
 0x54a   : > { %v9576_v25 = vpop.f32.mrb[84].mxu1 }
 0x54b   : > { %v9578_v9 = vpop.f32.mrb[85].mxu1 }
 0x54e   : > { %v9580_v0 = vpop.f32.mrb[86].mxu1 }
 0x54f   : > { %v9582_v13 = vpop.f32.mrb[87].mxu1 }
 0x552   : > { %v9584_v60 = vpop.f32.mrb[88].mxu1 }
 0x553   : > { %v9586_v23 = vpop.f32.mrb[89].mxu1 }
 0x556   : > { %v9588_v1 = vpop.f32.mrb[90].mxu1 }
 0x557   : > { %v9590_v55 = vpop.f32.mrb[91].mxu1 }
 0x55a   : > { %v9592_v28 = vpop.f32.mrb[92].mxu1 }
 0x55b   : > { %v9594_v2 = vpop.f32.mrb[93].mxu1 }
 0x55e   : > { %v9596_v32 = vpop.f32.mrb[94].mxu1 }
 0x55f   : > { %v9598_v5 = vpop.f32.mrb[95].mxu1 }
 0x562   : > { %v9600_v24 = vpop.f32.mrb[96].mxu1 }
 0x563   : > { %v9602_v38 = vpop.f32.mrb[97].mxu1 }
 0x566   : > { %v9604_v19 = vpop.f32.mrb[98].mxu1 }
 0x567   : > { %v9606_v15 = vpop.f32.mrb[99].mxu1 }
 0x56a   : > { %v9608_v54 = vpop.f32.mrb[100].mxu1 }
 0x56b   : > { %v9610_v53 = vpop.f32.mrb[101].mxu1 }
 0x56e   : > { %v4574_v33 = vpop.f32.mrb[102].mxu1 }
 0x56f   : > { %v4669_v41 = vmax.f32 %v4478_v6, %v4574_v33  ;;  %v4576_v37 = vpop.f32.mrb[103].mxu1 }
 0x570   : > { %v4670_v12 = vmax.f32 %v4480_v58, %v4576_v37 }
 0x571   : > { %v4797_v17 = vadd.f32 %v4720_v43, %v4669_v41 }
 0x572   : > { %v4580_v16 = vpop.f32.mrb[104].mxu1  ;;  %v4798_v18 = vadd.f32 %v4720_v43, %v4670_v12 }
 0x573   : > { %v4671_v47 = vmax.f32 %v4484_v46, %v4580_v16  ;;  %v4582_v30 = vpop.f32.mrb[105].mxu1  ;;  %v4829_v42 = vmax.f32 %v4797_v17, 0.0 }
 0x574   : > { %v4672_v45 = vmax.f32 %v4486_v8, %v4582_v30  ;;  %v4830_v26 = vmax.f32 %v4798_v18, 0.0  ;;  %v4745_v18 = vpop.permute.xlu1 %4744 }
 0x575   : > { %v4799_v36 = vadd.f32 %v4725_v39, %v4671_v47 }
 0x576   : > { %v4800_v63 = vadd.f32 %v4725_v39, %v4672_v45  ;;  %v4586_v3 = vpop.f32.mrb[106].mxu1 }
 0x577   : > { %v4831_v56 = vmax.f32 %v4799_v36, 0.0  ;;  %v4673_v51 = vmax.f32 %v4490_v10, %v4586_v3  ;;  %v4588_v29 = vpop.f32.mrb[107].mxu1 }
 0x578   : > { %v4832_v49 = vmax.f32 %v4800_v63, 0.0  ;;  %v4674_v52 = vmax.f32 %v4492_v59, %v4588_v29 }
 0x579   : > { %v5939_v21 = vpack.c.bf16 %v4831_v56, %v4829_v42  ;;  %v4801_v48 = vadd.f32 %v4730_v40, %v4673_v51 }
 0x57a   : > { %v4592_v62 = vpop.f32.mrb[108].mxu1  ;;  %v5937_v35 = vpack.c.bf16 %v4832_v49, %v4830_v26  ;;  %v4802_v57 = vadd.f32 %v4730_v40, %v4674_v52 }
 0x57b   : > { %v4675_v4 = vmax.f32 %v4496_v7, %v4592_v62  ;;  %v4594_v11 = vpop.f32.mrb[109].mxu1  ;;  %v4833_v10 = vmax.f32 %v4801_v48, 0.0  ;;  %v4740_v7 = vpop.permute.xlu0 %4739 }
 0x57c   : > { %v4676_v6 = vmax.f32 %v4498_v20, %v4594_v11  ;;  %5938 = vmatprep.subr.bf16.mxu1 %v5937_v35  ;;  %v4834_v37 = vmax.f32 %v4802_v57, 0.0  ;;  %v4755_v48 = vpop.permute.xlu1 %4754 }
 0x57d   : > { %v4803_v58 = vadd.f32 %v4735_v14, %v4675_v4  ;;  %5940 = vmatpush1.bf16.msra.mxu1 %v5939_v21 }
 0x57e   : > { %v4804_v46 = vadd.f32 %v4735_v14, %v4676_v6  ;;  %v4598_v8 = vpop.f32.mrb[110].mxu1 }
 0x57f   : > { %v4835_v33 = vmax.f32 %v4803_v58, 0.0  ;;  %v4677_v41 = vmax.f32 %v9564_v44, %v4598_v8  ;;  %v4600_v59 = vpop.f32.mrb[111].mxu1  ;;  %v4750_v52 = vpop.permute.xlu0 %4749 }
 0x580   : > { %v4836_v12 = vmax.f32 %v4804_v46, 0.0  ;;  %v4678_v43 = vmax.f32 %v9566_v22, %v4600_v59 }
 0x581   : > { %v5943_v16 = vpack.c.bf16 %v4835_v33, %v4833_v10  ;;  %v4805_v30 = vadd.f32 %v4740_v7, %v4677_v41 }
 0x582   : > { %v4604_v17 = vpop.f32.mrb[112].mxu1  ;;  %v5941_v47 = vpack.c.bf16 %v4836_v12, %v4834_v37  ;;  %v4806_v45 = vadd.f32 %v4740_v7, %v4678_v43 }
 0x583   : > { %v4679_v20 = vmax.f32 %v9568_v27, %v4604_v17  ;;  %v4606_v39 = vpop.f32.mrb[113].mxu1  ;;  %v4837_v42 = vmax.f32 %v4805_v30, 0.0  ;;  %v4760_v41 = vpop.permute.xlu0 %4759 }
 0x584   : > { %v4680_v36 = vmax.f32 %v9570_v61, %v4606_v39  ;;  %5942 = vmatprep.subr.bf16.mxu1 %v5941_v47  ;;  %v4838_v29 = vmax.f32 %v4806_v45, 0.0 }
 0x585   : > { %v4807_v63 = vadd.f32 %v4745_v18, %v4679_v20  ;;  %5944 = vmatpush1.bf16.msra.mxu1 %v5943_v16  ;;  %v4765_v16 = vpop.permute.xlu1 %4764 }
 0x586   : > { %v4808_v44 = vadd.f32 %v4745_v18, %v4680_v36  ;;  %v4610_v3 = vpop.f32.mrb[114].mxu1 }
 0x587   : > { %v4839_v56 = vmax.f32 %v4807_v63, 0.0  ;;  %v4681_v22 = vmax.f32 %v9572_v50, %v4610_v3  ;;  %v4612_v51 = vpop.f32.mrb[115].mxu1 }
 0x588   : > { %v4840_v26 = vmax.f32 %v4808_v44, 0.0  ;;  %v4682_v49 = vmax.f32 %v9574_v34, %v4612_v51  ;;  %v4770_v44 = vpop.permute.xlu0 %4769 }
 0x589   : > { %v5947_v27 = vpack.c.bf16 %v4839_v56, %v4837_v42  ;;  %v4809_v62 = vadd.f32 %v4750_v52, %v4681_v22  ;;  %v4775_v51 = vpop.permute.xlu1 %4774 }
 0x58a   : > { %v4616_v21 = vpop.f32.mrb[116].mxu1  ;;  %v5945_v40 = vpack.c.bf16 %v4840_v26, %v4838_v29  ;;  %v4810_v4 = vadd.f32 %v4750_v52, %v4682_v49 }
 0x58b   : > { %v4683_v61 = vmax.f32 %v9576_v25, %v4616_v21  ;;  %v4618_v35 = vpop.f32.mrb[117].mxu1  ;;  %v4841_v6 = vmax.f32 %v4809_v62, 0.0 }
 0x58c   : > { %v4684_v11 = vmax.f32 %v9578_v9, %v4618_v35  ;;  %5946 = vmatprep.subr.bf16.mxu1 %v5945_v40  ;;  %v4842_v8 = vmax.f32 %v4810_v4, 0.0 }
 0x58d   : > { %v4811_v14 = vadd.f32 %v4755_v48, %v4683_v61  ;;  %5948 = vmatpush1.bf16.msra.mxu1 %v5947_v27 }
 0x58e   : > { %v4812_v50 = vadd.f32 %v4755_v48, %v4684_v11  ;;  %v4622_v57 = vpop.f32.mrb[118].mxu1  ;;  %v4780_v48 = vpop.permute.xlu0 %4779 }
 0x58f   : > { %v4843_v58 = vmax.f32 %v4811_v14, 0.0  ;;  %v4685_v34 = vmax.f32 %v9580_v0, %v4622_v57  ;;  %v4624_v46 = vpop.f32.mrb[119].mxu1  ;;  %v4785_v57 = vpop.permute.xlu1 %4784 }
 0x590   : > { %v4844_v10 = vmax.f32 %v4812_v50, 0.0  ;;  %v4686_v33 = vmax.f32 %v9582_v13, %v4624_v46 }
 0x591   : > { %v5951_v25 = vpack.c.bf16 %v4843_v58, %v4841_v6  ;;  %v4813_v12 = vadd.f32 %v4760_v41, %v4685_v34 }
 0x592   : > { %v4628_v59 = vpop.f32.mrb[120].mxu1  ;;  %v5949_v37 = vpack.c.bf16 %v4844_v10, %v4842_v8  ;;  %v4814_v7 = vadd.f32 %v4760_v41, %v4686_v33 }
 0x593   : > { %v4687_v9 = vmax.f32 %v9584_v60, %v4628_v59  ;;  %v4630_v43 = vpop.f32.mrb[121].mxu1  ;;  %v4845_v20 = vmax.f32 %v4813_v12, 0.0 }
 0x594   : > { %v4688_v17 = vmax.f32 %v9586_v23, %v4630_v43  ;;  %5950 = vmatprep.subr.bf16.mxu1 %v5949_v37  ;;  %v4846_v45 = vmax.f32 %v4814_v7, 0.0  ;;  %v4790_v37 = vpop.permute.xlu0 %4789  ;;  %v4795_v7 = vpop.permute.xlu1 %4794 }
 0x595   : > { %v4815_v47 = vadd.f32 %v4765_v16, %v4687_v9  ;;  %5952 = vmatpush1.bf16.msra.mxu1 %v5951_v25 }
 0x596   : > { %v4816_v0 = vadd.f32 %v4765_v16, %v4688_v17  ;;  %v4634_v30 = vpop.f32.mrb[122].mxu1 }
 0x597   : > { %v4847_v39 = vmax.f32 %v4815_v47, 0.0  ;;  %v4689_v13 = vmax.f32 %v9588_v1, %v4634_v30  ;;  %v4636_v18 = vpop.f32.mrb[123].mxu1 }
 0x598   : > { %v4848_v36 = vmax.f32 %v4816_v0, 0.0  ;;  %v4690_v63 = vmax.f32 %v9590_v55, %v4636_v18 }
 0x599   : > { %v5955_v60 = vpack.c.bf16 %v4847_v39, %v4845_v20  ;;  %v4817_v56 = vadd.f32 %v4770_v44, %v4689_v13 }
 0x59a   : > { %v4640_v3 = vpop.f32.mrb[124].mxu1  ;;  %v5953_v42 = vpack.c.bf16 %v4848_v36, %v4846_v45  ;;  %v4818_v29 = vadd.f32 %v4770_v44, %v4690_v63  ;;  %v4863_v45 = vld [vmem:[%s9764_s5 + $0x10] sm:$0xff]  ;;  %v4864_v36 = vld [vmem:[%s9764_s5 + $0x18] sm:$0xff]  ;;  %v4865_v63 = vld [vmem:[%s9764_s5 + $0x20] sm:$0xff] }
 0x59b   : > { %v4691_v23 = vmax.f32 %v9592_v28, %v4640_v3  ;;  %v4642_v22 = vpop.f32.mrb[125].mxu1  ;;  %v4849_v52 = vmax.f32 %v4817_v56, 0.0  ;;  %v4867_v44 = vld [vmem:[%s9764_s5 + $0x30] sm:$0x3]  ;;  %v4878_v56 = vpop.permute.xlu0 %4877 }
 0x59c   : > { %v4692_v26 = vmax.f32 %v9594_v2, %v4642_v22  ;;  %5954 = vmatprep.subr.bf16.mxu1 %v5953_v42  ;;  %v4850_v62 = vmax.f32 %v4818_v29, 0.0  ;;  %v4883_v22 = vpop.permute.xlu1 %4882 }
 0x59d   : > { %v4819_v49 = vadd.f32 %v4775_v51, %v4691_v23  ;;  %5956 = vmatpush1.bf16.msra.mxu1 %v5955_v60  ;;  %v4866_v60 = vld [vmem:[%s9764_s5 + $0x28] sm:$0xff] }
 0x59e   : > { %v4820_v1 = vadd.f32 %v4775_v51, %v4692_v26  ;;  %v4646_v27 = vpop.f32.mrb[126].mxu1 }
 0x59f   : > { %v4851_v21 = vmax.f32 %v4819_v49, 0.0  ;;  %v4693_v55 = vmax.f32 %v9596_v32, %v4646_v27  ;;  %v4648_v40 = vpop.f32.mrb[127].mxu1 }
 0x5a0   : > { %v4852_v61 = vmax.f32 %v4820_v1, 0.0  ;;  %v4694_v35 = vmax.f32 %v9598_v5, %v4648_v40 }
 0x5a1   : > { %v5959_v28 = vpack.c.bf16 %v4851_v21, %v4849_v52  ;;  %v4821_v14 = vadd.f32 %v4780_v48, %v4693_v55 }
 0x5a2   : > { %v4652_v4 = vpop.f32.mrb[128].mxu1  ;;  %v5957_v11 = vpack.c.bf16 %v4852_v61, %v4850_v62  ;;  %v4822_v6 = vadd.f32 %v4780_v48, %v4694_v35  ;;  %v4888_v35 = vpop.permute.xlu0 %4887 }
 0x5a3   : > { %v4695_v2 = vmax.f32 %v9600_v24, %v4652_v4  ;;  %v4654_v50 = vpop.f32.mrb[129].mxu1  ;;  %v4853_v8 = vmax.f32 %v4821_v14, 0.0  ;;  %v4893_v4 = vpop.permute.xlu1 %4892 }
 0x5a4   : > { %v4696_v58 = vmax.f32 %v9602_v38, %v4654_v50  ;;  %5958 = vmatprep.subr.bf16.mxu1 %v5957_v11  ;;  %v4854_v25 = vmax.f32 %v4822_v6, 0.0 }
 0x5a5   : > { %v4823_v34 = vadd.f32 %v4785_v57, %v4695_v2  ;;  %5960 = vmatpush1.bf16.msra.mxu1 %v5959_v28 }
 0x5a6   : > { %v4824_v32 = vadd.f32 %v4785_v57, %v4696_v58  ;;  %v4658_v46 = vpop.f32.mrb[130].mxu1 }
 0x5a7   : > { %v4855_v10 = vmax.f32 %v4823_v34, 0.0  ;;  %v4697_v5 = vmax.f32 %v9604_v19, %v4658_v46  ;;  %v4660_v33 = vpop.f32.mrb[131].mxu1 }
 0x5a8   : > { %v4856_v41 = vmax.f32 %v4824_v32, 0.0  ;;  %v4698_v59 = vmax.f32 %v9606_v15, %v4660_v33 }
 0x5a9   : > { %v5963_v24 = vpack.c.bf16 %v4855_v10, %v4853_v8  ;;  %v4825_v43 = vadd.f32 %v4790_v37, %v4697_v5  ;;  %v4898_v5 = vpop.permute.xlu0 %4897 }
 0x5aa   : > { %v4664_v12 = vpop.f32.mrb[132].mxu1  ;;  %v5961_v9 = vpack.c.bf16 %v4856_v41, %v4854_v25  ;;  %v4826_v17 = vadd.f32 %v4790_v37, %v4698_v59  ;;  %v4903_v41 = vpop.permute.xlu1 %4902 }
 0x5ab   : > { %v4699_v38 = vmax.f32 %v9608_v54, %v4664_v12  ;;  %v4666_v16 = vpop.f32.mrb[133].mxu1  ;;  %v4857_v30 = vmax.f32 %v4825_v43, 0.0  ;;  %v4861_v54 = vld [vmem:[%s9764_s5] sm:$0xff] }
 0x5ac   : > { %v4700_v47 = vmax.f32 %v9610_v53, %v4666_v16  ;;  %5962 = vmatprep.subr.bf16.mxu1 %v5961_v9  ;;  %v4858_v39 = vmax.f32 %v4826_v17, 0.0  ;;  %v4862_v53 = vld [vmem:[%s9764_s5 + $0x8] sm:$0xff] }
 0x5ad   : > { %v4827_v0 = vadd.f32 %v4795_v7, %v4699_v38  ;;  %5964 = vmatpush1.bf16.msra.mxu1 %v5963_v24 }
 0x5ae   : > { %v4828_v19 = vadd.f32 %v4795_v7, %v4700_v47  ;;  %v4908_v47 = vpop.permute.xlu0 %4907 }
 0x5af   : > { %v4859_v20 = vmax.f32 %v4827_v0, 0.0 }
 0x5b0   : > { %v4860_v15 = vmax.f32 %v4828_v19, 0.0 }
 0x5b1   : > { %v5967_v13 = vpack.c.bf16 %v4859_v20, %v4857_v30 }
 0x5b2   : > { %v5965_v18 = vpack.c.bf16 %v4860_v15, %v4858_v39 }
 0x5b4   : > { %5966 = vmatprep.subr.bf16.mxu1 %v5965_v18  ;;  %v5031_v18 = vld [vmem:[%s9766_s7] sm:$0xff] }
 0x5b5   : > { %5968 = vmatpush1.bf16.msra.mxu1 %v5967_v13 }
 0x5b8   : > { %4975 = vmatmul.mubr.f32.vlgmr.msra.gmra.mrb[134].mxu1 %v4861_v54  ;;  %v5032_v54 = vld [vmem:[%s9766_s7 + $0x8] sm:$0x3] }
 0x5b9   : > { %4980 = vmatprep.mubr.f32.mxu1 %v6272_v31 }
 0x5bc   : > { %4981 = vmatmul.mubr.f32.gmra.mrb[136].mxu1 %v4862_v53 }
 0x5bd   : > { %4986 = vmatprep.mubr.f32.mxu1 %v6272_v31 }
 0x5c0   : > { %4987 = vmatmul.mubr.f32.gmra.mrb[138].mxu1 %v4863_v45 }
 0x5c1   : > { %4992 = vmatprep.mubr.f32.mxu1 %v6272_v31 }
 0x5c4   : > { %4993 = vmatmul.mubr.f32.gmra.mrb[140].mxu1 %v4864_v36  ;;  %v5038_v36 = vpop.permute.xlu1 %5037 }
 0x5c5   : > { %4998 = vmatprep.mubr.f32.mxu1 %v6272_v31 }
 0x5c8   : > { %4999 = vmatmul.mubr.f32.gmra.mrb[142].mxu1 %v4865_v63 }
 0x5c9   : > { %5004 = vmatprep.mubr.f32.mxu1 %v6272_v31 }
 0x5cc   : > { %5005 = vmatmul.mubr.f32.gmra.mrb[144].mxu1 %v4866_v60  ;;  %v5043_v60 = vpop.permute.xlu0 %5042 }
 0x5cd   : > { %5010 = vmatprep.mubr.f32.mxu1 %v6272_v31 }
 0x5d0   : > { %5011 = vmatmul.mubr.f32.gmra.mrb[146].mxu1 %v4867_v44 }
 0x5d1   : > { %5123 = vmatprep.mubr.f32.mxu1 %v6272_v31 }
 0x68b   : > { %v4976_v3 = vpop.f32.mrb[134].mxu1 }
 0x68c   : > { %v4978_v42 = vpop.f32.mrb[135].mxu1  ;;  %v4977_v23 = vadd.f32 %v4976_v3, %v4878_v56 }
 0x68d   : > { %v4979_v51 = vadd.f32 %v4978_v42, %v4878_v56 }
 0x68e   : > { %v5017_v27 = vmax.f32 %v4977_v23, 0.0 }
 0x68f   : > { %v4982_v29 = vpop.f32.mrb[136].mxu1  ;;  %v5018_v21 = vmax.f32 %v4979_v51, 0.0 }
 0x690   : > { %v4983_v26 = vadd.f32 %v4982_v29, %v4883_v22  ;;  %v4984_v49 = vpop.f32.mrb[137].mxu1 }
 0x691   : > { %v4985_v1 = vadd.f32 %v4984_v49, %v4883_v22 }
 0x692   : > { %v5019_v52 = vmax.f32 %v4983_v26, 0.0 }
 0x693   : > { %v5020_v55 = vmax.f32 %v4985_v1, 0.0  ;;  %v4988_v40 = vpop.f32.mrb[138].mxu1 }
 0x694   : > { %v5971_v62 = vpack.c.bf16 %v5019_v52, %v5017_v27  ;;  %v4990_v61 = vpop.f32.mrb[139].mxu1  ;;  %v4989_v48 = vadd.f32 %v4988_v40, %v4888_v35  ;;  %v5140_v27 = vld [vmem:[%s9768_s9] sm:$0x3]  ;;  %v5145_v52 = vpop.permute.xlu1 %5144 }
 0x695   : > { %v5969_v28 = vpack.c.bf16 %v5020_v55, %v5018_v21  ;;  %v4991_v11 = vadd.f32 %v4990_v61, %v4888_v35 }
 0x696   : > { %v5021_v6 = vmax.f32 %v4989_v48, 0.0 }
 0x697   : > { %v4994_v14 = vpop.f32.mrb[140].mxu1  ;;  %5970 = vmatprep.subr.bf16.mxu1 %v5969_v28  ;;  %v5022_v34 = vmax.f32 %v4991_v11, 0.0 }
 0x698   : > { %v4995_v2 = vadd.f32 %v4994_v14, %v4893_v4  ;;  %v4996_v50 = vpop.f32.mrb[141].mxu1  ;;  %5972 = vmatpush1.bf16.msra.mxu1 %v5971_v62 }
 0x699   : > { %v4997_v57 = vadd.f32 %v4996_v50, %v4893_v4 }
 0x69a   : > { %v5023_v58 = vmax.f32 %v4995_v2, 0.0 }
 0x69b   : > { %v5024_v32 = vmax.f32 %v4997_v57, 0.0  ;;  %v5000_v46 = vpop.f32.mrb[142].mxu1 }
 0x69c   : > { %v5975_v8 = vpack.c.bf16 %v5023_v58, %v5021_v6  ;;  %v5002_v10 = vpop.f32.mrb[143].mxu1  ;;  %v5001_v25 = vadd.f32 %v5000_v46, %v4898_v5 }
 0x69d   : > { %v5973_v33 = vpack.c.bf16 %v5024_v32, %v5022_v34  ;;  %v5003_v59 = vadd.f32 %v5002_v10, %v4898_v5 }
 0x69e   : > { %v5025_v43 = vmax.f32 %v5001_v25, 0.0 }
 0x69f   : > { %v5006_v24 = vpop.f32.mrb[144].mxu1  ;;  %5974 = vmatprep.subr.bf16.mxu1 %v5973_v33  ;;  %v5026_v16 = vmax.f32 %v5003_v59, 0.0 }
 0x6a0   : > { %v5007_v37 = vadd.f32 %v5006_v24, %v4903_v41  ;;  %v5008_v12 = vpop.f32.mrb[145].mxu1  ;;  %5976 = vmatpush1.bf16.msra.mxu1 %v5975_v8 }
 0x6a1   : > { %v5009_v9 = vadd.f32 %v5008_v12, %v4903_v41 }
 0x6a2   : > { %v5027_v38 = vmax.f32 %v5007_v37, 0.0 }
 0x6a3   : > { %v5028_v7 = vmax.f32 %v5009_v9, 0.0  ;;  %v5012_v17 = vpop.f32.mrb[146].mxu1 }
 0x6a4   : > { %v5979_v0 = vpack.c.bf16 %v5027_v38, %v5025_v43  ;;  %v5014_v19 = vpop.f32.mrb[147].mxu1  ;;  %v5013_v39 = vadd.f32 %v5012_v17, %v4908_v47  ;;  %v5286_v38 = vlaneseq }
 0x6a5   : > { %v5977_v30 = vpack.c.bf16 %v5028_v7, %v5026_v16  ;;  %v5015_v20 = vadd.f32 %v5014_v19, %v4908_v47 }
 0x6a6   : > { %v5029_v13 = vmax.f32 %v5013_v39, 0.0  ;;  %v5287_v7 = vshrl.u32 %v5286_v38, 7 }
 0x6a7   : > { %v5030_v15 = vmax.f32 %v5015_v20, 0.0  ;;  %5978 = vmatprep.subr.bf16.mxu1 %v5977_v30 }
 0x6a8   : > { %5980 = vmatpush1.bf16.msra.mxu1 %v5979_v0  ;;  %v5300_v19 = vsub.s32 1, %v5287_v7  ;;  %vm5324_vm10 = vcmp.eq.s32.totalorder %v5287_v7, 4  ;;  %vm5315_vm11 = vcmp.eq.s32.totalorder %v5287_v7, 3  ;;  %vm5288_vm12 = vcmp.eq.s32.totalorder %v5287_v7, 0 }
 0x6a9   : > { %5667 = vmatprep.subr.msk.mxu1 %vm5052_vm3, %v5030_v15  ;;  %vm5306_vm13 = vcmp.eq.s32.totalorder %v5287_v7, 2  ;;  %vm5297_vm14 = vcmp.eq.s32.totalorder %v5287_v7, 1 }
 0x6ac   : > { %5668 = vmatpush1.msk.msra.mxu1 %vm5052_vm3, %v5029_v13 }
 0x6ad   : > { %5669 = vmatmul.mubr.msk.f32.vlgmr.msra.gmra.mrb[148].mxu1 %vm5045_vm4, %v5031_v18 }
 0x6ae   : > { %5129 = vmatprep.mubr.f32.mxu1 %v6272_v31 }
 0x6b1   : > { %5670 = vmatmul.mubr.msk.f32.gmra.mrb[150].mxu1 %vm5045_vm4, %v5032_v54 }
 0x6b2   : > { %5221 = vmatprep.mubr.f32.mxu1 %v6272_v31 }
 0x780   : > { %v5125_v53 = vpop.f32.mrb[148].mxu1 }
 0x781   : > { %v5127_v45 = vpop.f32.mrb[149].mxu1  ;;  %v5126_v63 = vadd.f32 %v5125_v53, %v5038_v36 }
 0x782   : > { %v5128_v44 = vadd.f32 %v5127_v45, %v5038_v36  ;;  %v5291_v36 = vsub.s32 0, %v5287_v7 }
 0x783   : > { %v5136_v22 = vmax.f32 %v5126_v63, 0.0 }
 0x784   : > { %v5131_v3 = vpop.f32.mrb[150].mxu1  ;;  %v5137_v29 = vmax.f32 %v5128_v44, 0.0 }
 0x785   : > { %v5132_v42 = vadd.f32 %v5131_v3, %v5043_v60  ;;  %v5133_v56 = vpop.f32.mrb[151].mxu1 }
 0x786   : > { %v5134_v23 = vadd.f32 %v5133_v56, %v5043_v60 }
 0x787   : > { %v5138_v51 = vmax.f32 %v5132_v42, 0.0 }
 0x788   : > { %v5139_v26 = vmax.f32 %v5134_v23, 0.0 }
 0x789   : > { %v5984_v49 = vpack.c.bf16 %v5138_v51, %v5136_v22 }
 0x78a   : > { %v5981_v1 = vpack.c.bf16 %v5139_v26, %v5137_v29 }
 0x78c   : > { %5983 = vmatprep.subr.msk.bf16.mxu1 %vm5982_vm6, %v5981_v1 }
 0x78d   : > { %5986 = vmatpush1.bf16.msk.msra.mxu1 %vm5982_vm6, %v5984_v49 }
 0x790   : > { %5673 = vmatmul.mubr.msk.f32.vlgmr.msra.gmra.mrb[152].mxu1 %vm5147_vm7, %v5140_v27 }
 0x863   : > { %v5223_v21 = vpop.f32.mrb[152].mxu1 }
 0x864   : > { %v5224_v55 = vadd.f32 %v5223_v21, %v5145_v52  ;;  %v5225_v40 = vpop.f32.mrb[153].mxu1 }
 0x865   : > { %v5226_v62 = vadd.f32 %v5225_v40, %v5145_v52 }
 0x866   : > { %v9678_v61 = vmax.f32 %v5224_v55, 0.0 }
 0x867   : > { %v9680_v35 = vmax.f32 %v5226_v62, 0.0 }
 0x868   : > { %v5232_v28 = vrot.slane %v9678_v61, 1  ;;  %v5278_v43 = vrot.slane %v9678_v61, 7  ;;  %v5301_v3 = vrot.slane %v9678_v61, %v5300_v19  ;;  %v5292_v22 = vrot.slane %v9678_v61, %v5291_v36 }
 0x869   : > { %v5233_v48 = vrot.slane %v9680_v35, 1  ;;  %v5279_v16 = vrot.slane %v9680_v35, 7  ;;  %v5305_v51 = vrot.slane %v9680_v35, %v5300_v19  ;;  %v5296_v49 = vrot.slane %v9680_v35, %v5291_v36 }
 0x86a   : > { %v5236_v4 = vmax.f32 %v9678_v61, %v5232_v28  ;;  %vm5282_vm8 = vcmp.gt.f32.partialorder %v9678_v61, %v5278_v43 }
 0x86b   : > { %v5237_v11 = vmax.f32 %v9680_v35, %v5233_v48  ;;  %vm5283_vm9 = vcmp.gt.f32.partialorder %v9680_v35, %v5279_v16  ;;  %v5284_v17 = vsel %vm5282_vm8, 1.0, %v6272_v31 }
 0x86c   : > { %v5238_v14 = vsub.f32 %v9678_v61, %v5236_v4  ;;  %v5246_v2 = vrot.slane %v5236_v4, 7  ;;  %v5285_v0 = vsel %vm5283_vm9, 1.0, %v6272_v31  ;;  %v5328_v15 = vrot.slane %v5284_v17, %v5300_v19 }
 0x86d   : > { %v5239_v50 = vsub.f32 %v9680_v35, %v5237_v11  ;;  %v5247_v57 = vrot.slane %v5237_v11, 7  ;;  %v5332_v53 = vrot.slane %v5285_v0, %v5300_v19 }
 0x86e   : > { %v5250_v6 = vsub.f32 %v9678_v61, %v5246_v2  ;;  %v5240_v34 = vmul.f32 1.442695, %v5238_v14  ;;  %v5333_v44 = vsel %vm5324_vm10, %v5328_v15, 0.0 }
 0x86f   : > { %v5251_v58 = vsub.f32 %v9680_v35, %v5247_v57  ;;  %v5242_v46 = vmul.f32 1.442695, %v5239_v50  ;;  %v5334_v56 = vsel %vm5324_vm10, %v5332_v53, 0.0 }
 0x870   : > { %v5252_v32 = vmul.f32 1.442695, %v5250_v6 }
 0x871   : > { %v5254_v8 = vmul.f32 1.442695, %v5251_v58 }
 0x872   : > { %6191 = vpow2.f32 %v5252_v32 }
 0x873   : > { %6193 = vpow2.f32 %v5254_v8 }
 0x874   : > { %6195 = vpow2.f32 %v5240_v34 }
 0x875   : > { %6197 = vpow2.f32 %v5242_v46 }
 0x87c   : > { %v6192_v10 = vpop.eup %6191 }
 0x87d   : > { %v6194_v5 = vpop.eup %6193  ;;  %v5258_v33 = vrot.slane %v6192_v10, 1 }
 0x87e   : > { %v6196_v25 = vpop.eup %6195  ;;  %v5259_v41 = vrot.slane %v6194_v5, 1 }
 0x87f   : > { %v6198_v59 = vpop.eup %6197  ;;  %v5262_v24 = vadd.f32 %v6196_v25, %v5258_v33 }
 0x880   : > { %v5263_v37 = vadd.f32 %v6198_v59, %v5259_v41 }
 0x881   : > { %6199 = vrcp.f32 %v5262_v24  ;;  %v5270_v12 = vrot.slane %v5262_v24, 7 }
 0x882   : > { %6201 = vrcp.f32 %v5263_v37  ;;  %v5271_v9 = vrot.slane %v5263_v37, 7 }
 0x883   : > { %6203 = vrcp.f32 %v5270_v12 }
 0x884   : > { %6205 = vrcp.f32 %v5271_v9 }
 0x88b   : > { %v6200_v47 = vpop.eup %6199 }
 0x88c   : > { %v6202_v30 = vpop.eup %6201  ;;  %v5265_v39 = vmul.f32 %v6200_v47, %v6196_v25 }
 0x88d   : > { %v6204_v20 = vpop.eup %6203  ;;  %v5267_v18 = vmul.f32 %v6202_v30, %v6198_v59 }
 0x88e   : > { %v6206_v13 = vpop.eup %6205  ;;  %v5275_v54 = vmul.f32 %v6204_v20, %v6192_v10  ;;  %v5310_v31 = vrot.slane %v5265_v39, %v5291_v36 }
 0x88f   : > { %v5277_v45 = vmul.f32 %v6206_v13, %v6194_v5  ;;  %v5314_v42 = vrot.slane %v5267_v18, %v5291_v36 }
 0x890   : > { %v5319_v63 = vrot.slane %v5275_v54, %v5300_v19 }
 0x891   : > { %v5323_v60 = vrot.slane %v5277_v45, %v5300_v19 }
 0x892   : > { %v5335_v23 = vsel %vm5315_vm11, %v5319_v63, %v5333_v44 }
 0x893   : > { %v5336_v29 = vsel %vm5315_vm11, %v5323_v60, %v5334_v56  ;;  %v5337_v26 = vsel %vm5306_vm13, %v5310_v31, %v5335_v23 }
 0x894   : > { %v5338_v1 = vsel %vm5306_vm13, %v5314_v42, %v5336_v29  ;;  %v5339_v27 = vsel %vm5297_vm14, %v5301_v3, %v5337_v26 }
 0x895   : > { %v5340_v52 = vsel %vm5297_vm14, %v5305_v51, %v5338_v1  ;;  %v5341_v21 = vsel %vm5288_vm12, %v5292_v22, %v5339_v27 }
 0x896   : > { %v5342_v55 = vsel %vm5288_vm12, %v5296_v49, %v5340_v52  ;;  %5343 = vst [vmem:[%s382_s14] sm:$0xff] %v5341_v21 }
 0x897   : > { %5344 = vst [vmem:[%s382_s14 + $0x8] sm:$0xff] %v5342_v55 }
 0x898   : > { %6220 = shalt.err (!%p6217_p3)
}
 0x899   : > { %s6221_s30 = scalar_lea.hbm %s9714_s22, 256  ;;  %s6225_s16 = scalar_lea.hbm %s9770_s11, 512 }
 0x89a   : > { %p6222_p4 = scmp.ne.s32.totalorder %s9714_s22, %s6221_s30  ;;  %p6226_p9 = scmp.lt.u32.totalorder %s9714_s22, %s9770_s11 }
 0x89b   : > { %p6227_p10 = scmp.lt.u32.totalorder %s6225_s16, %s6221_s30  ;;  %p6229_p12 = scmp.lt.u32.totalorder %s6221_s30, %s9714_s22 }
 0x89c   : > { %p6223_p7 = pnand %p6222_p4, %p6373_p5 }
 0x89d   : > { %p6228_p11 = por %p6227_p10, %p6226_p9 }
 0x89e   : > { %p6224_p8 = pneg %p6223_p7 }
 0x89f   : > { %p6230_p13 = por %p6229_p12, %p6228_p11 }
 0x8a1   : > { %p6231_p0 = pnand %p6230_p13, %p6224_p8 }
 0x8a3   : > { %6234 = shalt.err (!%p6231_p0)
}
 0x8a4   : > { %6147 = dma.vmem_to_hbm [thread:$0]  (%p6373_p5), %s9716_s15, 256, %s9714_s22, %s5346_s24  }
 0x8a5 PF: > { %p6153_p1 = scmp.ge.s32.totalorder %s6269_s20, 2  ;;  %s5372_s25 = sand.u32 1, %s6257_s17  }
 0x8a6   : > { %s5373_s13 = scalar_lea.sflag [#allocation3], %s5372_s25 }
 0x8a7   : > { %p6150_p2 = pnand %p6153_p1, %p6377_p6 }
 0x8a9   : > { %6252 = dma.done.wait (!%p6150_p2), %s5373_s13, 256  }
 0x8aa   : > { %6254 = vsyncadd (!%p6150_p2), %s5373_s13, 4294967040  ;;  %p21_p3 = scmp.ge.s32.totalorder %s6360_s23, 4   ;;  %s10201_s17 = smov %s6261_s18 }
 0x8ab   : > { %s10202_s18 = smov %s6265_s19  ;;  %s10203_s19 = smov %s6371_s26 }
 0x8ac   : > { %s10204_s20 = smov %s6360_s23  ;;  %23 = sbr.rel (!%p21_p3) target bundleno = 3 (0x3), region = 99 }
 0x8b3   :  { %5378 = vsyncpa [#allocation3], 1 }
 0x8b4   :  { %5380 = vsyncpa [#allocation3 + $0x1], 1 }

</bundles_post_ra>
